<compile_context>
chip_gen: v6e
topology: v6e:2x2x1
jax: 0.10.0
libtpu: 0.0.40
codegen_flags: <defaults>
</compile_context>

<pallas_src>
import jax
import jax.numpy as jnp
from jax import lax
from jax.experimental import pallas as pl
from jax.experimental.pallas import tpu as pltpu

# ---- model sizes (small, consistent with the module) -----------------------
N_LAYERS = 2
HID = 32
EMB = 32          # encoder.emb_dim == decoder.emb_dim == hid_dim
SRC_VOCAB = 16
TRG_VOCAB = 16
SRC_LEN = 8
TRG_LEN = 8       # max_len
BATCH = 2

# ---- padded on-chip sizes ---------------------------------------------------
HP = 128          # padded hidden/emb width: each LSTM gate = one full 128-lane vreg
BP = 8            # padded batch: full 8-sublane dim
VPAD = 128        # padded vocab width: lane-dense logits / one-hot
NEG = -1e9        # bias on padded vocab lanes (never wins argmax)


# ---- in-kernel helpers ------------------------------------------------------
def _lstm_stack(x, hs, cs, wx_ref, wh_ref, b_ref):
    """One timestep through all LSTM layers (values in, values out; refs only read).

    x: (BP, HP).  wx_ref[l]/wh_ref[l]: (HP, 4*HP) pre-transposed weights (gate order
    i,f,g,o, each gate one full 128-lane block).  b_ref[l]: (1, 4*HP) = b_ih + b_hh.
    Padded lanes have zero weights/bias, so padded h/c lanes stay exactly 0.
    """
    inp = x
    new_h, new_c = [], []
    for l in range(N_LAYERS):
        gates = (jnp.dot(inp, wx_ref[l], preferred_element_type=jnp.float32)
                 + jnp.dot(hs[l], wh_ref[l], preferred_element_type=jnp.float32)
                 + b_ref[l])
        i = jax.nn.sigmoid(gates[:, 0 * HP:1 * HP])     # full-vreg slices
        f = jax.nn.sigmoid(gates[:, 1 * HP:2 * HP])
        g = jnp.tanh(gates[:, 2 * HP:3 * HP])
        o = jax.nn.sigmoid(gates[:, 3 * HP:4 * HP])
        c_new = f * cs[l] + i * g
        h_new = o * jnp.tanh(c_new)
        new_h.append(h_new)
        new_c.append(c_new)
        inp = h_new
    return inp, tuple(new_h), tuple(new_c)


def _encoder_scan(src_ref, emb_ref, wx_ref, wh_ref, b_ref, col):
    """Run the full encoder recurrence in-kernel; returns final (hs, cs) tuples."""
    zeros = jnp.zeros((BP, HP), jnp.float32)

    def body(t, carry):
        hs, cs = carry
        # one-hot via one broadcasted compare (tokens: (BP,1) int32), embedding on MXU
        oh = (col == src_ref[t]).astype(jnp.float32)                     # (BP, VPAD)
        x = jnp.dot(oh, emb_ref[...], preferred_element_type=jnp.float32)  # (BP, HP)
        _, hs, cs = _lstm_stack(x, hs, cs, wx_ref, wh_ref, b_ref)
        return hs, cs

    init = ((zeros,) * N_LAYERS, (zeros,) * N_LAYERS)
    return lax.fori_loop(0, SRC_LEN, body, init, unroll=True)


# ---- encoder-only kernel (the Encoder.forward spec) -------------------------
def _encoder_kernel(src_ref, emb_ref, wx_ref, wh_ref, b_ref, h_out_ref, c_out_ref):
    col = lax.broadcasted_iota(jnp.int32, (BP, VPAD), 1)
    hs, cs = _encoder_scan(src_ref, emb_ref, wx_ref, wh_ref, b_ref, col)
    for l in range(N_LAYERS):
        h_out_ref[l] = hs[l]
        c_out_ref[l] = cs[l]


def encoder_forward(src_p, emb_p, Wx, Wh, B):
    vmem = pl.BlockSpec(memory_space=pltpu.MemorySpace.VMEM)
    return pl.pallas_call(
        _encoder_kernel,
        out_shape=(jax.ShapeDtypeStruct((N_LAYERS, BP, HP), jnp.float32),
                   jax.ShapeDtypeStruct((N_LAYERS, BP, HP), jnp.float32)),
        in_specs=[vmem] * 5,
        out_specs=(vmem, vmem),
    )(src_p, emb_p, Wx, Wh, B)


# ---- fused seq2seq kernel: encoder + whole decode loop in ONE pallas_call ----
def _seq2seq_kernel(src_ref, trg_ref, tf_ref,
                    enc_emb_ref, enc_wx_ref, enc_wh_ref, enc_b_ref,
                    dec_emb_ref, dec_wx_ref, dec_wh_ref, dec_b_ref,
                    fc_w_ref, fc_b_ref,
                    logits_ref):
    col = lax.broadcasted_iota(jnp.int32, (BP, VPAD), 1)

    # ---- encoder: (h, c) stay in vregs, never leave the kernel ----
    hs, cs = _encoder_scan(src_ref, enc_emb_ref, enc_wx_ref, enc_wh_ref, enc_b_ref, col)

    # outputs[0] stays zeros (bentrevett convention); zeroed in-kernel
    logits_ref[0] = jnp.zeros((BP, VPAD), jnp.float32)

    def body(s, carry):
        hs, cs, prev_oh = carry
        # teacher-forcing vs greedy input (tf[0] is forced to 1 wrapper-side)
        teacher_oh = (col == trg_ref[s]).astype(jnp.float32)             # (BP, VPAD)
        tf_full = jnp.broadcast_to(tf_ref[s], (BP, VPAD))                # int32 splat
        inp_oh = jnp.where(tf_full != 0, teacher_oh, prev_oh)
        # embedding, LSTM stack, fc_out
        x = jnp.dot(inp_oh, dec_emb_ref[...], preferred_element_type=jnp.float32)
        top, hs, cs = _lstm_stack(x, hs, cs, dec_wx_ref, dec_wh_ref, dec_b_ref)
        logits = jnp.dot(top, fc_w_ref[...],
                         preferred_element_type=jnp.float32) + fc_b_ref[...]
        logits_ref[s + 1] = logits                                       # lane-dense store
        # greedy next token as a one-hot (first-index argmax tie-break; padded vocab
        # lanes carry the -1e9 bias so they can never win)
        m = jnp.max(logits, axis=-1, keepdims=True)
        idx = jnp.min(jnp.where(logits == m, col, VPAD), axis=-1, keepdims=True)
        return hs, cs, (col == idx).astype(jnp.float32)

    prev_oh0 = jnp.zeros((BP, VPAD), jnp.float32)
    lax.fori_loop(0, TRG_LEN - 1, body, (hs, cs, prev_oh0), unroll=True)


def seq2seq_fused(src_p, trg_p, tf_p, params):
    vmem = pl.BlockSpec(memory_space=pltpu.MemorySpace.VMEM)
    return pl.pallas_call(
        _seq2seq_kernel,
        out_shape=jax.ShapeDtypeStruct((TRG_LEN, BP, VPAD), jnp.float32),
        in_specs=[vmem] * 13,
        out_specs=vmem,
    )(src_p, trg_p, tf_p,
      params["enc_emb_p"], params["enc_Wx"], params["enc_Wh"], params["enc_B"],
      params["dec_emb_p"], params["dec_Wx"], params["dec_Wh"], params["dec_B"],
      params["fc_W"], params["fc_B"])


# ---- wrapper-side layout plumbing (pre-transpose / pad / split) --------------
def _pack_lstm(w_ih, w_hh, b_ih, b_hh):
    """torch layout (L,4H,in),(L,4H,H),(L,4H),(L,4H) -> Wx,(L,HP,4HP) Wh,(L,HP,4HP) B,(L,1,4HP)."""
    L, _, in_dim = w_ih.shape
    Wx = jnp.zeros((L, HP, 4 * HP), jnp.float32)
    Wh = jnp.zeros((L, HP, 4 * HP), jnp.float32)
    B = jnp.zeros((L, 1, 4 * HP), jnp.float32)
    for g in range(4):
        Wx = Wx.at[:, :in_dim, g * HP:g * HP + HID].set(
            jnp.transpose(w_ih[:, g * HID:(g + 1) * HID, :], (0, 2, 1)))
        Wh = Wh.at[:, :HID, g * HP:g * HP + HID].set(
            jnp.transpose(w_hh[:, g * HID:(g + 1) * HID, :], (0, 2, 1)))
        B = B.at[:, 0, g * HP:g * HP + HID].set(
            b_ih[:, g * HID:(g + 1) * HID] + b_hh[:, g * HID:(g + 1) * HID])
    return Wx, Wh, B


def _pack_emb(emb):
    return jnp.zeros((VPAD, HP), jnp.float32).at[:emb.shape[0], :EMB].set(emb)


def _pack_fc(fc_w, fc_b):
    Wfc = jnp.zeros((HP, VPAD), jnp.float32).at[:HID, :TRG_VOCAB].set(fc_w.T)
    Bfc = jnp.full((1, VPAD), NEG, jnp.float32).at[0, :TRG_VOCAB].set(fc_b)
    return Wfc, Bfc


def _pad_tokens(tokens, length):
    # (length, BATCH) int32 -> (length, BP, 1) int32; padded batch rows read token 0,
    # which only drives padded sublanes that are sliced off in the wrapper.
    return jnp.zeros((length, BP, 1), jnp.int32).at[:, :BATCH, 0].set(tokens)


def _pack_tf(tf_mask):
    # (TRG_LEN,) bool -> (TRG_LEN, 1, 1) int32; step 0 always consumes trg[0] (<sos>).
    v = tf_mask.astype(jnp.int32).at[0].set(1)
    return v[:, None, None]


# ---- module-level forwards ---------------------------------------------------
def encoder_apply(params, src):
    """Encoder.forward: embeddings -> n-layer LSTM -> (hidden, cell)."""
    # TODO(synk): nn.Dropout on the embeddings is omitted (eval-mode identity).
    src_p = _pad_tokens(src, SRC_LEN)
    h, c = encoder_forward(src_p, params["enc_emb_p"],
                           params["enc_Wx"], params["enc_Wh"], params["enc_B"])
    return h[:, :BATCH, :HID], c[:, :BATCH, :HID]


def seq2seq_forward(params, src, trg, tf_mask):
    """src/trg: (len, BATCH) int32; tf_mask: (TRG_LEN,) bool teacher-forcing decisions."""
    src_p = _pad_tokens(src, SRC_LEN)
    trg_p = _pad_tokens(trg, TRG_LEN)
    tf_p = _pack_tf(tf_mask)
    logits_p = seq2seq_fused(src_p, trg_p, tf_p, params)
    return logits_p[:, :BATCH, :TRG_VOCAB]          # outputs[0] already zeroed in-kernel


# ---- deterministic parameter init (torch layout) + packing -------------------
def init_params(key):
    ks = jax.random.split(key, 12)
    u = lambda k, shape: jax.random.uniform(k, shape, jnp.float32, -0.1, 0.1)
    raw = {
        "enc_emb": u(ks[0], (SRC_VOCAB, EMB)),
        "enc_w_ih": u(ks[1], (N_LAYERS, 4 * HID, EMB)),
        "enc_w_hh": u(ks[2], (N_LAYERS, 4 * HID, HID)),
        "enc_b_ih": u(ks[3], (N_LAYERS, 4 * HID)),
        "enc_b_hh": u(ks[4], (N_LAYERS, 4 * HID)),
        "dec_emb": u(ks[5], (TRG_VOCAB, EMB)),
        "dec_w_ih": u(ks[6], (N_LAYERS, 4 * HID, EMB)),
        "dec_w_hh": u(ks[7], (N_LAYERS, 4 * HID, HID)),
        "dec_b_ih": u(ks[8], (N_LAYERS, 4 * HID)),
        "dec_b_hh": u(ks[9], (N_LAYERS, 4 * HID)),
        "fc_w": u(ks[10], (TRG_VOCAB, HID)),
        "fc_b": u(ks[11], (TRG_VOCAB,)),
    }
    enc_Wx, enc_Wh, enc_B = _pack_lstm(raw["enc_w_ih"], raw["enc_w_hh"],
                                       raw["enc_b_ih"], raw["enc_b_hh"])
    dec_Wx, dec_Wh, dec_B = _pack_lstm(raw["dec_w_ih"], raw["dec_w_hh"],
                                       raw["dec_b_ih"], raw["dec_b_hh"])
    fc_W, fc_B = _pack_fc(raw["fc_w"], raw["fc_b"])
    packed = {
        "enc_emb_p": _pack_emb(raw["enc_emb"]),
        "enc_Wx": enc_Wx, "enc_Wh": enc_Wh, "enc_B": enc_B,
        "dec_emb_p": _pack_emb(raw["dec_emb"]),
        "dec_Wx": dec_Wx, "dec_Wh": dec_Wh, "dec_B": dec_B,
        "fc_W": fc_W, "fc_B": fc_B,
    }
    return packed, raw


# ---- pure-JAX reference (for numerics checks) --------------------------------
def _ref_lstm_step(x, h, c, w_ih, w_hh, b_ih, b_hh):
    hs, cs, inp = [], [], x
    for l in range(N_LAYERS):
        gates = inp @ w_ih[l].T + h[l] @ w_hh[l].T + b_ih[l] + b_hh[l]
        i = jax.nn.sigmoid(gates[:, 0 * HID:1 * HID])
        f = jax.nn.sigmoid(gates[:, 1 * HID:2 * HID])
        g = jnp.tanh(gates[:, 2 * HID:3 * HID])
        o = jax.nn.sigmoid(gates[:, 3 * HID:4 * HID])
        c_new = f * c[l] + i * g
        h_new = o * jnp.tanh(c_new)
        hs.append(h_new); cs.append(c_new); inp = h_new
    return inp, jnp.stack(hs), jnp.stack(cs)


def _encoder_reference(raw, src):
    h = jnp.zeros((N_LAYERS, BATCH, HID), jnp.float32)
    c = jnp.zeros_like(h)
    for t in range(SRC_LEN):
        _, h, c = _ref_lstm_step(raw["enc_emb"][src[t]], h, c,
                                 raw["enc_w_ih"], raw["enc_w_hh"],
                                 raw["enc_b_ih"], raw["enc_b_hh"])
    return h, c


def _seq2seq_reference(raw, src, trg, tf_mask):
    """Full bentrevett rollout with the same teacher-forcing decisions (tf_mask[t] is the
    draw made at reference step t, selecting the input for step t+1)."""
    h, c = _encoder_reference(raw, src)
    outputs = jnp.zeros((TRG_LEN, BATCH, TRG_VOCAB), jnp.float32)
    inp = trg[0]
    for t in range(1, TRG_LEN):
        top, h, c = _ref_lstm_step(raw["dec_emb"][inp], h, c,
                                   raw["dec_w_ih"], raw["dec_w_hh"],
                                   raw["dec_b_ih"], raw["dec_b_hh"])
        logits = top @ raw["fc_w"].T + raw["fc_b"]
        outputs = outputs.at[t].set(logits)
        top1 = jnp.argmax(logits, axis=-1).astype(jnp.int32)
        inp = jnp.where(tf_mask[t], trg[t], top1)
    return outputs


if __name__ == "__main__":
    key = jax.random.PRNGKey(0)
    k_param, k_src, k_trg, k_tf = jax.random.split(key, 4)

    params, raw = init_params(k_param)
    src = jax.random.randint(k_src, (SRC_LEN, BATCH), 0, SRC_VOCAB, jnp.int32)
    trg = jax.random.randint(k_trg, (TRG_LEN, BATCH), 0, TRG_VOCAB, jnp.int32)

    # teacher_forcing_ratio = 0.5; python random.random() per step is replaced by a
    # deterministic precomputed mask (draw at step t selects the input for step t+1).
    # TODO(synk): per-step python RNG for teacher forcing replaced by a precomputed mask.
    teacher_forcing_ratio = 0.5
    tf_mask = jax.random.uniform(k_tf, (TRG_LEN,)) < teacher_forcing_ratio

    # Encoder.forward (the spec module)
    enc = jax.jit(encoder_apply)
    hidden, cell = jax.block_until_ready(enc(params, src))

    # Full seq2seq forward (single fused pallas_call)
    fwd = jax.jit(seq2seq_forward)
    outputs = jax.block_until_ready(fwd(params, src, trg, tf_mask))

    # numerics checks vs pure-JAX reference (encoder state + FULL decoder rollout with the
    # same mixed teacher-forcing/greedy mask, per the correctness review)
    ref_h, ref_c = _encoder_reference(raw, src)
    ref_out = _seq2seq_reference(raw, src, trg, tf_mask)

    assert hidden.shape == (N_LAYERS, BATCH, HID)
    assert cell.shape == (N_LAYERS, BATCH, HID)
    assert outputs.shape == (TRG_LEN, BATCH, TRG_VOCAB)
    assert bool(jnp.all(outputs[0] == 0.0))
    assert bool(jnp.all(jnp.isfinite(outputs)))
    assert bool(jnp.allclose(hidden, ref_h, atol=1e-4, rtol=1e-4))
    assert bool(jnp.allclose(cell, ref_c, atol=1e-4, rtol=1e-4))
    assert bool(jnp.allclose(outputs, ref_out, atol=1e-4, rtol=1e-4))
    print("KERNEL_OK")
</pallas_src>

<mosaic_0001>
module attributes {stable_mosaic.version = 11 : i64} {
  func.func @_encoder_kernel(%arg0: memref<8x8x1xi32, #tpu.memory_space<vmem>>, %arg1: memref<128x128xf32, #tpu.memory_space<vmem>>, %arg2: memref<2x128x512xf32, #tpu.memory_space<vmem>>, %arg3: memref<2x128x512xf32, #tpu.memory_space<vmem>>, %arg4: memref<2x1x512xf32, #tpu.memory_space<vmem>>, %arg5: memref<2x8x128xf32, #tpu.memory_space<vmem>>, %arg6: memref<2x8x128xf32, #tpu.memory_space<vmem>>) attributes {dimension_semantics = [], scalar_prefetch = 0 : i64, scratch_operands = 0 : i64, tpu.core_type = #tpu.core_type<tc>} {
    %0 = tpu.iota {dimensions = array<i32: 1>} : vector<8x128xi32>
    %cst = arith.constant 0.000000e+00 : f32
    %1 = vector.broadcast %cst : f32 to vector<8x128xf32>
    %c0_i32 = arith.constant 0 : i32
    %2 = arith.index_cast %c0_i32 : i32 to index
    %c0 = arith.constant 0 : index
    %c0_0 = arith.constant 0 : index
    %3 = vector.load %arg0[%2, %c0, %c0_0] : memref<8x8x1xi32, #tpu.memory_space<vmem>>, vector<1x8x1xi32>
    %4 = vector.shape_cast %3 : vector<1x8x1xi32> to vector<8x1xi32>
    %5 = vector.broadcast %4 : vector<8x1xi32> to vector<8x128xi32>
    %6 = arith.cmpi eq, %0, %5 : vector<8x128xi32>
    %7 = arith.extui %6 : vector<8x128xi1> to vector<8x128xi32>
    %8 = arith.sitofp %7 : vector<8x128xi32> to vector<8x128xf32>
    %c0_1 = arith.constant 0 : index
    %c0_2 = arith.constant 0 : index
    %9 = vector.load %arg1[%c0_1, %c0_2] : memref<128x128xf32, #tpu.memory_space<vmem>>, vector<128x128xf32>
    %cst_3 = arith.constant dense<0.000000e+00> : vector<8x128xf32>
    %10 = tpu.matmul %8, %9, %cst_3 {dimension_numbers = #tpu.dot_dimension_numbers<[1], [0], [0], [1], [0, 0, 1, 1], [], []>} : vector<8x128xf32>, vector<128x128xf32>, vector<8x128xf32> -> vector<8x128xf32>
    %c0_4 = arith.constant 0 : index
    %c0_5 = arith.constant 0 : index
    %c0_6 = arith.constant 0 : index
    %11 = vector.load %arg2[%c0_4, %c0_5, %c0_6] : memref<2x128x512xf32, #tpu.memory_space<vmem>>, vector<1x128x512xf32>
    %12 = vector.shape_cast %11 : vector<1x128x512xf32> to vector<128x512xf32>
    %cst_7 = arith.constant dense<0.000000e+00> : vector<8x512xf32>
    %13 = tpu.matmul %10, %12, %cst_7 {dimension_numbers = #tpu.dot_dimension_numbers<[1], [0], [0], [1], [0, 0, 1, 1], [], []>} : vector<8x128xf32>, vector<128x512xf32>, vector<8x512xf32> -> vector<8x512xf32>
    %c0_8 = arith.constant 0 : index
    %c0_9 = arith.constant 0 : index
    %c0_10 = arith.constant 0 : index
    %14 = vector.load %arg3[%c0_8, %c0_9, %c0_10] : memref<2x128x512xf32, #tpu.memory_space<vmem>>, vector<1x128x512xf32>
    %15 = vector.shape_cast %14 : vector<1x128x512xf32> to vector<128x512xf32>
    %cst_11 = arith.constant dense<0.000000e+00> : vector<8x512xf32>
    %16 = tpu.matmul %1, %15, %cst_11 {dimension_numbers = #tpu.dot_dimension_numbers<[1], [0], [0], [1], [0, 0, 1, 1], [], []>} : vector<8x128xf32>, vector<128x512xf32>, vector<8x512xf32> -> vector<8x512xf32>
    %17 = arith.addf %13, %16 : vector<8x512xf32>
    %c0_12 = arith.constant 0 : index
    %c0_13 = arith.constant 0 : index
    %c0_14 = arith.constant 0 : index
    %18 = vector.load %arg4[%c0_12, %c0_13, %c0_14] : memref<2x1x512xf32, #tpu.memory_space<vmem>>, vector<1x1x512xf32>
    %19 = vector.shape_cast %18 : vector<1x1x512xf32> to vector<1x512xf32>
    %20 = vector.broadcast %19 : vector<1x512xf32> to vector<8x512xf32>
    %21 = arith.addf %17, %20 : vector<8x512xf32>
    %22 = vector.extract_strided_slice %21 {offsets = [0, 0], sizes = [8, 128], strides = [1, 1]} : vector<8x512xf32> to vector<8x128xf32>
    %23 = arith.negf %22 : vector<8x128xf32>
    %24 = math.exp %23 : vector<8x128xf32>
    %cst_15 = arith.constant 1.000000e+00 : f32
    %25 = vector.broadcast %cst_15 : f32 to vector<8x128xf32>
    %26 = arith.addf %25, %24 : vector<8x128xf32>
    %27 = arith.divf %25, %26 : vector<8x128xf32>
    %28 = vector.extract_strided_slice %21 {offsets = [0, 128], sizes = [8, 128], strides = [1, 1]} : vector<8x512xf32> to vector<8x128xf32>
    %29 = arith.negf %28 : vector<8x128xf32>
    %30 = math.exp %29 : vector<8x128xf32>
    %cst_16 = arith.constant 1.000000e+00 : f32
    %31 = vector.broadcast %cst_16 : f32 to vector<8x128xf32>
    %32 = arith.addf %31, %30 : vector<8x128xf32>
    %33 = arith.divf %31, %32 : vector<8x128xf32>
    %34 = vector.extract_strided_slice %21 {offsets = [0, 256], sizes = [8, 128], strides = [1, 1]} : vector<8x512xf32> to vector<8x128xf32>
    %35 = math.tanh %34 : vector<8x128xf32>
    %36 = vector.extract_strided_slice %21 {offsets = [0, 384], sizes = [8, 128], strides = [1, 1]} : vector<8x512xf32> to vector<8x128xf32>
    %37 = arith.negf %36 : vector<8x128xf32>
    %38 = math.exp %37 : vector<8x128xf32>
    %cst_17 = arith.constant 1.000000e+00 : f32
    %39 = vector.broadcast %cst_17 : f32 to vector<8x128xf32>
    %40 = arith.addf %39, %38 : vector<8x128xf32>
    %41 = arith.divf %39, %40 : vector<8x128xf32>
    %42 = arith.mulf %33, %1 : vector<8x128xf32>
    %43 = arith.mulf %27, %35 : vector<8x128xf32>
    %44 = arith.addf %42, %43 : vector<8x128xf32>
    %45 = math.tanh %44 : vector<8x128xf32>
    %46 = arith.mulf %41, %45 : vector<8x128xf32>
    %c1 = arith.constant 1 : index
    %c0_18 = arith.constant 0 : index
    %c0_19 = arith.constant 0 : index
    %47 = vector.load %arg2[%c1, %c0_18, %c0_19] : memref<2x128x512xf32, #tpu.memory_space<vmem>>, vector<1x128x512xf32>
    %48 = vector.shape_cast %47 : vector<1x128x512xf32> to vector<128x512xf32>
    %cst_20 = arith.constant dense<0.000000e+00> : vector<8x512xf32>
    %49 = tpu.matmul %46, %48, %cst_20 {dimension_numbers = #tpu.dot_dimension_numbers<[1], [0], [0], [1], [0, 0, 1, 1], [], []>} : vector<8x128xf32>, vector<128x512xf32>, vector<8x512xf32> -> vector<8x512xf32>
    %c1_21 = arith.constant 1 : index
    %c0_22 = arith.constant 0 : index
    %c0_23 = arith.constant 0 : index
    %50 = vector.load %arg3[%c1_21, %c0_22, %c0_23] : memref<2x128x512xf32, #tpu.memory_space<vmem>>, vector<1x128x512xf32>
    %51 = vector.shape_cast %50 : vector<1x128x512xf32> to vector<128x512xf32>
    %cst_24 = arith.constant dense<0.000000e+00> : vector<8x512xf32>
    %52 = tpu.matmul %1, %51, %cst_24 {dimension_numbers = #tpu.dot_dimension_numbers<[1], [0], [0], [1], [0, 0, 1, 1], [], []>} : vector<8x128xf32>, vector<128x512xf32>, vector<8x512xf32> -> vector<8x512xf32>
    %53 = arith.addf %49, %52 : vector<8x512xf32>
    %c1_25 = arith.constant 1 : index
    %c0_26 = arith.constant 0 : index
    %c0_27 = arith.constant 0 : index
    %54 = vector.load %arg4[%c1_25, %c0_26, %c0_27] : memref<2x1x512xf32, #tpu.memory_space<vmem>>, vector<1x1x512xf32>
    %55 = vector.shape_cast %54 : vector<1x1x512xf32> to vector<1x512xf32>
    %56 = vector.broadcast %55 : vector<1x512xf32> to vector<8x512xf32>
    %57 = arith.addf %53, %56 : vector<8x512xf32>
    %58 = vector.extract_strided_slice %57 {offsets = [0, 0], sizes = [8, 128], strides = [1, 1]} : vector<8x512xf32> to vector<8x128xf32>
    %59 = arith.negf %58 : vector<8x128xf32>
    %60 = math.exp %59 : vector<8x128xf32>
    %cst_28 = arith.constant 1.000000e+00 : f32
    %61 = vector.broadcast %cst_28 : f32 to vector<8x128xf32>
    %62 = arith.addf %61, %60 : vector<8x128xf32>
    %63 = arith.divf %61, %62 : vector<8x128xf32>
    %64 = vector.extract_strided_slice %57 {offsets = [0, 128], sizes = [8, 128], strides = [1, 1]} : vector<8x512xf32> to vector<8x128xf32>
    %65 = arith.negf %64 : vector<8x128xf32>
    %66 = math.exp %65 : vector<8x128xf32>
    %cst_29 = arith.constant 1.000000e+00 : f32
    %67 = vector.broadcast %cst_29 : f32 to vector<8x128xf32>
    %68 = arith.addf %67, %66 : vector<8x128xf32>
    %69 = arith.divf %67, %68 : vector<8x128xf32>
    %70 = vector.extract_strided_slice %57 {offsets = [0, 256], sizes = [8, 128], strides = [1, 1]} : vector<8x512xf32> to vector<8x128xf32>
    %71 = math.tanh %70 : vector<8x128xf32>
    %72 = vector.extract_strided_slice %57 {offsets = [0, 384], sizes = [8, 128], strides = [1, 1]} : vector<8x512xf32> to vector<8x128xf32>
    %73 = arith.negf %72 : vector<8x128xf32>
    %74 = math.exp %73 : vector<8x128xf32>
    %cst_30 = arith.constant 1.000000e+00 : f32
    %75 = vector.broadcast %cst_30 : f32 to vector<8x128xf32>
    %76 = arith.addf %75, %74 : vector<8x128xf32>
    %77 = arith.divf %75, %76 : vector<8x128xf32>
    %78 = arith.mulf %69, %1 : vector<8x128xf32>
    %79 = arith.mulf %63, %71 : vector<8x128xf32>
    %80 = arith.addf %78, %79 : vector<8x128xf32>
    %81 = math.tanh %80 : vector<8x128xf32>
    %82 = arith.mulf %77, %81 : vector<8x128xf32>
    %c1_i32 = arith.constant 1 : i32
    %83 = arith.index_cast %c1_i32 : i32 to index
    %c0_31 = arith.constant 0 : index
    %c0_32 = arith.constant 0 : index
    %84 = vector.load %arg0[%83, %c0_31, %c0_32] : memref<8x8x1xi32, #tpu.memory_space<vmem>>, vector<1x8x1xi32>
    %85 = vector.shape_cast %84 : vector<1x8x1xi32> to vector<8x1xi32>
    %86 = vector.broadcast %85 : vector<8x1xi32> to vector<8x128xi32>
    %87 = arith.cmpi eq, %0, %86 : vector<8x128xi32>
    %88 = arith.extui %87 : vector<8x128xi1> to vector<8x128xi32>
    %89 = arith.sitofp %88 : vector<8x128xi32> to vector<8x128xf32>
    %c0_33 = arith.constant 0 : index
    %c0_34 = arith.constant 0 : index
    %90 = vector.load %arg1[%c0_33, %c0_34] : memref<128x128xf32, #tpu.memory_space<vmem>>, vector<128x128xf32>
    %cst_35 = arith.constant dense<0.000000e+00> : vector<8x128xf32>
    %91 = tpu.matmul %89, %90, %cst_35 {dimension_numbers = #tpu.dot_dimension_numbers<[1], [0], [0], [1], [0, 0, 1, 1], [], []>} : vector<8x128xf32>, vector<128x128xf32>, vector<8x128xf32> -> vector<8x128xf32>
    %c0_36 = arith.constant 0 : index
    %c0_37 = arith.constant 0 : index
    %c0_38 = arith.constant 0 : index
    %92 = vector.load %arg2[%c0_36, %c0_37, %c0_38] : memref<2x128x512xf32, #tpu.memory_space<vmem>>, vector<1x128x512xf32>
    %93 = vector.shape_cast %92 : vector<1x128x512xf32> to vector<128x512xf32>
    %cst_39 = arith.constant dense<0.000000e+00> : vector<8x512xf32>
    %94 = tpu.matmul %91, %93, %cst_39 {dimension_numbers = #tpu.dot_dimension_numbers<[1], [0], [0], [1], [0, 0, 1, 1], [], []>} : vector<8x128xf32>, vector<128x512xf32>, vector<8x512xf32> -> vector<8x512xf32>
    %c0_40 = arith.constant 0 : index
    %c0_41 = arith.constant 0 : index
    %c0_42 = arith.constant 0 : index
    %95 = vector.load %arg3[%c0_40, %c0_41, %c0_42] : memref<2x128x512xf32, #tpu.memory_space<vmem>>, vector<1x128x512xf32>
    %96 = vector.shape_cast %95 : vector<1x128x512xf32> to vector<128x512xf32>
    %cst_43 = arith.constant dense<0.000000e+00> : vector<8x512xf32>
    %97 = tpu.matmul %46, %96, %cst_43 {dimension_numbers = #tpu.dot_dimension_numbers<[1], [0], [0], [1], [0, 0, 1, 1], [], []>} : vector<8x128xf32>, vector<128x512xf32>, vector<8x512xf32> -> vector<8x512xf32>
    %98 = arith.addf %94, %97 : vector<8x512xf32>
    %c0_44 = arith.constant 0 : index
    %c0_45 = arith.constant 0 : index
    %c0_46 = arith.constant 0 : index
    %99 = vector.load %arg4[%c0_44, %c0_45, %c0_46] : memref<2x1x512xf32, #tpu.memory_space<vmem>>, vector<1x1x512xf32>
    %100 = vector.shape_cast %99 : vector<1x1x512xf32> to vector<1x512xf32>
    %101 = vector.broadcast %100 : vector<1x512xf32> to vector<8x512xf32>
    %102 = arith.addf %98, %101 : vector<8x512xf32>
    %103 = vector.extract_strided_slice %102 {offsets = [0, 0], sizes = [8, 128], strides = [1, 1]} : vector<8x512xf32> to vector<8x128xf32>
    %104 = arith.negf %103 : vector<8x128xf32>
    %105 = math.exp %104 : vector<8x128xf32>
    %cst_47 = arith.constant 1.000000e+00 : f32
    %106 = vector.broadcast %cst_47 : f32 to vector<8x128xf32>
    %107 = arith.addf %106, %105 : vector<8x128xf32>
    %108 = arith.divf %106, %107 : vector<8x128xf32>
    %109 = vector.extract_strided_slice %102 {offsets = [0, 128], sizes = [8, 128], strides = [1, 1]} : vector<8x512xf32> to vector<8x128xf32>
    %110 = arith.negf %109 : vector<8x128xf32>
    %111 = math.exp %110 : vector<8x128xf32>
    %cst_48 = arith.constant 1.000000e+00 : f32
    %112 = vector.broadcast %cst_48 : f32 to vector<8x128xf32>
    %113 = arith.addf %112, %111 : vector<8x128xf32>
    %114 = arith.divf %112, %113 : vector<8x128xf32>
    %115 = vector.extract_strided_slice %102 {offsets = [0, 256], sizes = [8, 128], strides = [1, 1]} : vector<8x512xf32> to vector<8x128xf32>
    %116 = math.tanh %115 : vector<8x128xf32>
    %117 = vector.extract_strided_slice %102 {offsets = [0, 384], sizes = [8, 128], strides = [1, 1]} : vector<8x512xf32> to vector<8x128xf32>
    %118 = arith.negf %117 : vector<8x128xf32>
    %119 = math.exp %118 : vector<8x128xf32>
    %cst_49 = arith.constant 1.000000e+00 : f32
    %120 = vector.broadcast %cst_49 : f32 to vector<8x128xf32>
    %121 = arith.addf %120, %119 : vector<8x128xf32>
    %122 = arith.divf %120, %121 : vector<8x128xf32>
    %123 = arith.mulf %114, %44 : vector<8x128xf32>
    %124 = arith.mulf %108, %116 : vector<8x128xf32>
    %125 = arith.addf %123, %124 : vector<8x128xf32>
    %126 = math.tanh %125 : vector<8x128xf32>
    %127 = arith.mulf %122, %126 : vector<8x128xf32>
    %c1_50 = arith.constant 1 : index
    %c0_51 = arith.constant 0 : index
    %c0_52 = arith.constant 0 : index
    %128 = vector.load %arg2[%c1_50, %c0_51, %c0_52] : memref<2x128x512xf32, #tpu.memory_space<vmem>>, vector<1x128x512xf32>
    %129 = vector.shape_cast %128 : vector<1x128x512xf32> to vector<128x512xf32>
    %cst_53 = arith.constant dense<0.000000e+00> : vector<8x512xf32>
    %130 = tpu.matmul %127, %129, %cst_53 {dimension_numbers = #tpu.dot_dimension_numbers<[1], [0], [0], [1], [0, 0, 1, 1], [], []>} : vector<8x128xf32>, vector<128x512xf32>, vector<8x512xf32> -> vector<8x512xf32>
    %c1_54 = arith.constant 1 : index
    %c0_55 = arith.constant 0 : index
    %c0_56 = arith.constant 0 : index
    %131 = vector.load %arg3[%c1_54, %c0_55, %c0_56] : memref<2x128x512xf32, #tpu.memory_space<vmem>>, vector<1x128x512xf32>
    %132 = vector.shape_cast %131 : vector<1x128x512xf32> to vector<128x512xf32>
    %cst_57 = arith.constant dense<0.000000e+00> : vector<8x512xf32>
    %133 = tpu.matmul %82, %132, %cst_57 {dimension_numbers = #tpu.dot_dimension_numbers<[1], [0], [0], [1], [0, 0, 1, 1], [], []>} : vector<8x128xf32>, vector<128x512xf32>, vector<8x512xf32> -> vector<8x512xf32>
    %134 = arith.addf %130, %133 : vector<8x512xf32>
    %c1_58 = arith.constant 1 : index
    %c0_59 = arith.constant 0 : index
    %c0_60 = arith.constant 0 : index
    %135 = vector.load %arg4[%c1_58, %c0_59, %c0_60] : memref<2x1x512xf32, #tpu.memory_space<vmem>>, vector<1x1x512xf32>
    %136 = vector.shape_cast %135 : vector<1x1x512xf32> to vector<1x512xf32>
    %137 = vector.broadcast %136 : vector<1x512xf32> to vector<8x512xf32>
    %138 = arith.addf %134, %137 : vector<8x512xf32>
    %139 = vector.extract_strided_slice %138 {offsets = [0, 0], sizes = [8, 128], strides = [1, 1]} : vector<8x512xf32> to vector<8x128xf32>
    %140 = arith.negf %139 : vector<8x128xf32>
    %141 = math.exp %140 : vector<8x128xf32>
    %cst_61 = arith.constant 1.000000e+00 : f32
    %142 = vector.broadcast %cst_61 : f32 to vector<8x128xf32>
    %143 = arith.addf %142, %141 : vector<8x128xf32>
    %144 = arith.divf %142, %143 : vector<8x128xf32>
    %145 = vector.extract_strided_slice %138 {offsets = [0, 128], sizes = [8, 128], strides = [1, 1]} : vector<8x512xf32> to vector<8x128xf32>
    %146 = arith.negf %145 : vector<8x128xf32>
    %147 = math.exp %146 : vector<8x128xf32>
    %cst_62 = arith.constant 1.000000e+00 : f32
    %148 = vector.broadcast %cst_62 : f32 to vector<8x128xf32>
    %149 = arith.addf %148, %147 : vector<8x128xf32>
    %150 = arith.divf %148, %149 : vector<8x128xf32>
    %151 = vector.extract_strided_slice %138 {offsets = [0, 256], sizes = [8, 128], strides = [1, 1]} : vector<8x512xf32> to vector<8x128xf32>
    %152 = math.tanh %151 : vector<8x128xf32>
    %153 = vector.extract_strided_slice %138 {offsets = [0, 384], sizes = [8, 128], strides = [1, 1]} : vector<8x512xf32> to vector<8x128xf32>
    %154 = arith.negf %153 : vector<8x128xf32>
    %155 = math.exp %154 : vector<8x128xf32>
    %cst_63 = arith.constant 1.000000e+00 : f32
    %156 = vector.broadcast %cst_63 : f32 to vector<8x128xf32>
    %157 = arith.addf %156, %155 : vector<8x128xf32>
    %158 = arith.divf %156, %157 : vector<8x128xf32>
    %159 = arith.mulf %150, %80 : vector<8x128xf32>
    %160 = arith.mulf %144, %152 : vector<8x128xf32>
    %161 = arith.addf %159, %160 : vector<8x128xf32>
    %162 = math.tanh %161 : vector<8x128xf32>
    %163 = arith.mulf %158, %162 : vector<8x128xf32>
    %c2_i32 = arith.constant 2 : i32
    %164 = arith.index_cast %c2_i32 : i32 to index
    %c0_64 = arith.constant 0 : index
    %c0_65 = arith.constant 0 : index
    %165 = vector.load %arg0[%164, %c0_64, %c0_65] : memref<8x8x1xi32, #tpu.memory_space<vmem>>, vector<1x8x1xi32>
    %166 = vector.shape_cast %165 : vector<1x8x1xi32> to vector<8x1xi32>
    %167 = vector.broadcast %166 : vector<8x1xi32> to vector<8x128xi32>
    %168 = arith.cmpi eq, %0, %167 : vector<8x128xi32>
    %169 = arith.extui %168 : vector<8x128xi1> to vector<8x128xi32>
    %170 = arith.sitofp %169 : vector<8x128xi32> to vector<8x128xf32>
    %c0_66 = arith.constant 0 : index
    %c0_67 = arith.constant 0 : index
    %171 = vector.load %arg1[%c0_66, %c0_67] : memref<128x128xf32, #tpu.memory_space<vmem>>, vector<128x128xf32>
    %cst_68 = arith.constant dense<0.000000e+00> : vector<8x128xf32>
    %172 = tpu.matmul %170, %171, %cst_68 {dimension_numbers = #tpu.dot_dimension_numbers<[1], [0], [0], [1], [0, 0, 1, 1], [], []>} : vector<8x128xf32>, vector<128x128xf32>, vector<8x128xf32> -> vector<8x128xf32>
    %c0_69 = arith.constant 0 : index
    %c0_70 = arith.constant 0 : index
    %c0_71 = arith.constant 0 : index
    %173 = vector.load %arg2[%c0_69, %c0_70, %c0_71] : memref<2x128x512xf32, #tpu.memory_space<vmem>>, vector<1x128x512xf32>
    %174 = vector.shape_cast %173 : vector<1x128x512xf32> to vector<128x512xf32>
    %cst_72 = arith.constant dense<0.000000e+00> : vector<8x512xf32>
    %175 = tpu.matmul %172, %174, %cst_72 {dimension_numbers = #tpu.dot_dimension_numbers<[1], [0], [0], [1], [0, 0, 1, 1], [], []>} : vector<8x128xf32>, vector<128x512xf32>, vector<8x512xf32> -> vector<8x512xf32>
    %c0_73 = arith.constant 0 : index
    %c0_74 = arith.constant 0 : index
    %c0_75 = arith.constant 0 : index
    %176 = vector.load %arg3[%c0_73, %c0_74, %c0_75] : memref<2x128x512xf32, #tpu.memory_space<vmem>>, vector<1x128x512xf32>
    %177 = vector.shape_cast %176 : vector<1x128x512xf32> to vector<128x512xf32>
    %cst_76 = arith.constant dense<0.000000e+00> : vector<8x512xf32>
    %178 = tpu.matmul %127, %177, %cst_76 {dimension_numbers = #tpu.dot_dimension_numbers<[1], [0], [0], [1], [0, 0, 1, 1], [], []>} : vector<8x128xf32>, vector<128x512xf32>, vector<8x512xf32> -> vector<8x512xf32>
    %179 = arith.addf %175, %178 : vector<8x512xf32>
    %c0_77 = arith.constant 0 : index
    %c0_78 = arith.constant 0 : index
    %c0_79 = arith.constant 0 : index
    %180 = vector.load %arg4[%c0_77, %c0_78, %c0_79] : memref<2x1x512xf32, #tpu.memory_space<vmem>>, vector<1x1x512xf32>
    %181 = vector.shape_cast %180 : vector<1x1x512xf32> to vector<1x512xf32>
    %182 = vector.broadcast %181 : vector<1x512xf32> to vector<8x512xf32>
    %183 = arith.addf %179, %182 : vector<8x512xf32>
    %184 = vector.extract_strided_slice %183 {offsets = [0, 0], sizes = [8, 128], strides = [1, 1]} : vector<8x512xf32> to vector<8x128xf32>
    %185 = arith.negf %184 : vector<8x128xf32>
    %186 = math.exp %185 : vector<8x128xf32>
    %cst_80 = arith.constant 1.000000e+00 : f32
    %187 = vector.broadcast %cst_80 : f32 to vector<8x128xf32>
    %188 = arith.addf %187, %186 : vector<8x128xf32>
    %189 = arith.divf %187, %188 : vector<8x128xf32>
    %190 = vector.extract_strided_slice %183 {offsets = [0, 128], sizes = [8, 128], strides = [1, 1]} : vector<8x512xf32> to vector<8x128xf32>
    %191 = arith.negf %190 : vector<8x128xf32>
    %192 = math.exp %191 : vector<8x128xf32>
    %cst_81 = arith.constant 1.000000e+00 : f32
    %193 = vector.broadcast %cst_81 : f32 to vector<8x128xf32>
    %194 = arith.addf %193, %192 : vector<8x128xf32>
    %195 = arith.divf %193, %194 : vector<8x128xf32>
    %196 = vector.extract_strided_slice %183 {offsets = [0, 256], sizes = [8, 128], strides = [1, 1]} : vector<8x512xf32> to vector<8x128xf32>
    %197 = math.tanh %196 : vector<8x128xf32>
    %198 = vector.extract_strided_slice %183 {offsets = [0, 384], sizes = [8, 128], strides = [1, 1]} : vector<8x512xf32> to vector<8x128xf32>
    %199 = arith.negf %198 : vector<8x128xf32>
    %200 = math.exp %199 : vector<8x128xf32>
    %cst_82 = arith.constant 1.000000e+00 : f32
    %201 = vector.broadcast %cst_82 : f32 to vector<8x128xf32>
    %202 = arith.addf %201, %200 : vector<8x128xf32>
    %203 = arith.divf %201, %202 : vector<8x128xf32>
    %204 = arith.mulf %195, %125 : vector<8x128xf32>
    %205 = arith.mulf %189, %197 : vector<8x128xf32>
    %206 = arith.addf %204, %205 : vector<8x128xf32>
    %207 = math.tanh %206 : vector<8x128xf32>
    %208 = arith.mulf %203, %207 : vector<8x128xf32>
    %c1_83 = arith.constant 1 : index
    %c0_84 = arith.constant 0 : index
    %c0_85 = arith.constant 0 : index
    %209 = vector.load %arg2[%c1_83, %c0_84, %c0_85] : memref<2x128x512xf32, #tpu.memory_space<vmem>>, vector<1x128x512xf32>
    %210 = vector.shape_cast %209 : vector<1x128x512xf32> to vector<128x512xf32>
    %cst_86 = arith.constant dense<0.000000e+00> : vector<8x512xf32>
    %211 = tpu.matmul %208, %210, %cst_86 {dimension_numbers = #tpu.dot_dimension_numbers<[1], [0], [0], [1], [0, 0, 1, 1], [], []>} : vector<8x128xf32>, vector<128x512xf32>, vector<8x512xf32> -> vector<8x512xf32>
    %c1_87 = arith.constant 1 : index
    %c0_88 = arith.constant 0 : index
    %c0_89 = arith.constant 0 : index
    %212 = vector.load %arg3[%c1_87, %c0_88, %c0_89] : memref<2x128x512xf32, #tpu.memory_space<vmem>>, vector<1x128x512xf32>
    %213 = vector.shape_cast %212 : vector<1x128x512xf32> to vector<128x512xf32>
    %cst_90 = arith.constant dense<0.000000e+00> : vector<8x512xf32>
    %214 = tpu.matmul %163, %213, %cst_90 {dimension_numbers = #tpu.dot_dimension_numbers<[1], [0], [0], [1], [0, 0, 1, 1], [], []>} : vector<8x128xf32>, vector<128x512xf32>, vector<8x512xf32> -> vector<8x512xf32>
    %215 = arith.addf %211, %214 : vector<8x512xf32>
    %c1_91 = arith.constant 1 : index
    %c0_92 = arith.constant 0 : index
    %c0_93 = arith.constant 0 : index
    %216 = vector.load %arg4[%c1_91, %c0_92, %c0_93] : memref<2x1x512xf32, #tpu.memory_space<vmem>>, vector<1x1x512xf32>
    %217 = vector.shape_cast %216 : vector<1x1x512xf32> to vector<1x512xf32>
    %218 = vector.broadcast %217 : vector<1x512xf32> to vector<8x512xf32>
    %219 = arith.addf %215, %218 : vector<8x512xf32>
    %220 = vector.extract_strided_slice %219 {offsets = [0, 0], sizes = [8, 128], strides = [1, 1]} : vector<8x512xf32> to vector<8x128xf32>
    %221 = arith.negf %220 : vector<8x128xf32>
    %222 = math.exp %221 : vector<8x128xf32>
    %cst_94 = arith.constant 1.000000e+00 : f32
    %223 = vector.broadcast %cst_94 : f32 to vector<8x128xf32>
    %224 = arith.addf %223, %222 : vector<8x128xf32>
    %225 = arith.divf %223, %224 : vector<8x128xf32>
    %226 = vector.extract_strided_slice %219 {offsets = [0, 128], sizes = [8, 128], strides = [1, 1]} : vector<8x512xf32> to vector<8x128xf32>
    %227 = arith.negf %226 : vector<8x128xf32>
    %228 = math.exp %227 : vector<8x128xf32>
    %cst_95 = arith.constant 1.000000e+00 : f32
    %229 = vector.broadcast %cst_95 : f32 to vector<8x128xf32>
    %230 = arith.addf %229, %228 : vector<8x128xf32>
    %231 = arith.divf %229, %230 : vector<8x128xf32>
    %232 = vector.extract_strided_slice %219 {offsets = [0, 256], sizes = [8, 128], strides = [1, 1]} : vector<8x512xf32> to vector<8x128xf32>
    %233 = math.tanh %232 : vector<8x128xf32>
    %234 = vector.extract_strided_slice %219 {offsets = [0, 384], sizes = [8, 128], strides = [1, 1]} : vector<8x512xf32> to vector<8x128xf32>
    %235 = arith.negf %234 : vector<8x128xf32>
    %236 = math.exp %235 : vector<8x128xf32>
    %cst_96 = arith.constant 1.000000e+00 : f32
    %237 = vector.broadcast %cst_96 : f32 to vector<8x128xf32>
    %238 = arith.addf %237, %236 : vector<8x128xf32>
    %239 = arith.divf %237, %238 : vector<8x128xf32>
    %240 = arith.mulf %231, %161 : vector<8x128xf32>
    %241 = arith.mulf %225, %233 : vector<8x128xf32>
    %242 = arith.addf %240, %241 : vector<8x128xf32>
    %243 = math.tanh %242 : vector<8x128xf32>
    %244 = arith.mulf %239, %243 : vector<8x128xf32>
    %c3_i32 = arith.constant 3 : i32
    %245 = arith.index_cast %c3_i32 : i32 to index
    %c0_97 = arith.constant 0 : index
    %c0_98 = arith.constant 0 : index
    %246 = vector.load %arg0[%245, %c0_97, %c0_98] : memref<8x8x1xi32, #tpu.memory_space<vmem>>, vector<1x8x1xi32>
    %247 = vector.shape_cast %246 : vector<1x8x1xi32> to vector<8x1xi32>
    %248 = vector.broadcast %247 : vector<8x1xi32> to vector<8x128xi32>
    %249 = arith.cmpi eq, %0, %248 : vector<8x128xi32>
    %250 = arith.extui %249 : vector<8x128xi1> to vector<8x128xi32>
    %251 = arith.sitofp %250 : vector<8x128xi32> to vector<8x128xf32>
    %c0_99 = arith.constant 0 : index
    %c0_100 = arith.constant 0 : index
    %252 = vector.load %arg1[%c0_99, %c0_100] : memref<128x128xf32, #tpu.memory_space<vmem>>, vector<128x128xf32>
    %cst_101 = arith.constant dense<0.000000e+00> : vector<8x128xf32>
    %253 = tpu.matmul %251, %252, %cst_101 {dimension_numbers = #tpu.dot_dimension_numbers<[1], [0], [0], [1], [0, 0, 1, 1], [], []>} : vector<8x128xf32>, vector<128x128xf32>, vector<8x128xf32> -> vector<8x128xf32>
    %c0_102 = arith.constant 0 : index
    %c0_103 = arith.constant 0 : index
    %c0_104 = arith.constant 0 : index
    %254 = vector.load %arg2[%c0_102, %c0_103, %c0_104] : memref<2x128x512xf32, #tpu.memory_space<vmem>>, vector<1x128x512xf32>
    %255 = vector.shape_cast %254 : vector<1x128x512xf32> to vector<128x512xf32>
    %cst_105 = arith.constant dense<0.000000e+00> : vector<8x512xf32>
    %256 = tpu.matmul %253, %255, %cst_105 {dimension_numbers = #tpu.dot_dimension_numbers<[1], [0], [0], [1], [0, 0, 1, 1], [], []>} : vector<8x128xf32>, vector<128x512xf32>, vector<8x512xf32> -> vector<8x512xf32>
    %c0_106 = arith.constant 0 : index
    %c0_107 = arith.constant 0 : index
    %c0_108 = arith.constant 0 : index
    %257 = vector.load %arg3[%c0_106, %c0_107, %c0_108] : memref<2x128x512xf32, #tpu.memory_space<vmem>>, vector<1x128x512xf32>
    %258 = vector.shape_cast %257 : vector<1x128x512xf32> to vector<128x512xf32>
    %cst_109 = arith.constant dense<0.000000e+00> : vector<8x512xf32>
    %259 = tpu.matmul %208, %258, %cst_109 {dimension_numbers = #tpu.dot_dimension_numbers<[1], [0], [0], [1], [0, 0, 1, 1], [], []>} : vector<8x128xf32>, vector<128x512xf32>, vector<8x512xf32> -> vector<8x512xf32>
    %260 = arith.addf %256, %259 : vector<8x512xf32>
    %c0_110 = arith.constant 0 : index
    %c0_111 = arith.constant 0 : index
    %c0_112 = arith.constant 0 : index
    %261 = vector.load %arg4[%c0_110, %c0_111, %c0_112] : memref<2x1x512xf32, #tpu.memory_space<vmem>>, vector<1x1x512xf32>
    %262 = vector.shape_cast %261 : vector<1x1x512xf32> to vector<1x512xf32>
    %263 = vector.broadcast %262 : vector<1x512xf32> to vector<8x512xf32>
    %264 = arith.addf %260, %263 : vector<8x512xf32>
    %265 = vector.extract_strided_slice %264 {offsets = [0, 0], sizes = [8, 128], strides = [1, 1]} : vector<8x512xf32> to vector<8x128xf32>
    %266 = arith.negf %265 : vector<8x128xf32>
    %267 = math.exp %266 : vector<8x128xf32>
    %cst_113 = arith.constant 1.000000e+00 : f32
    %268 = vector.broadcast %cst_113 : f32 to vector<8x128xf32>
    %269 = arith.addf %268, %267 : vector<8x128xf32>
    %270 = arith.divf %268, %269 : vector<8x128xf32>
    %271 = vector.extract_strided_slice %264 {offsets = [0, 128], sizes = [8, 128], strides = [1, 1]} : vector<8x512xf32> to vector<8x128xf32>
    %272 = arith.negf %271 : vector<8x128xf32>
    %273 = math.exp %272 : vector<8x128xf32>
    %cst_114 = arith.constant 1.000000e+00 : f32
    %274 = vector.broadcast %cst_114 : f32 to vector<8x128xf32>
    %275 = arith.addf %274, %273 : vector<8x128xf32>
    %276 = arith.divf %274, %275 : vector<8x128xf32>
    %277 = vector.extract_strided_slice %264 {offsets = [0, 256], sizes = [8, 128], strides = [1, 1]} : vector<8x512xf32> to vector<8x128xf32>
    %278 = math.tanh %277 : vector<8x128xf32>
    %279 = vector.extract_strided_slice %264 {offsets = [0, 384], sizes = [8, 128], strides = [1, 1]} : vector<8x512xf32> to vector<8x128xf32>
    %280 = arith.negf %279 : vector<8x128xf32>
    %281 = math.exp %280 : vector<8x128xf32>
    %cst_115 = arith.constant 1.000000e+00 : f32
    %282 = vector.broadcast %cst_115 : f32 to vector<8x128xf32>
    %283 = arith.addf %282, %281 : vector<8x128xf32>
    %284 = arith.divf %282, %283 : vector<8x128xf32>
    %285 = arith.mulf %276, %206 : vector<8x128xf32>
    %286 = arith.mulf %270, %278 : vector<8x128xf32>
    %287 = arith.addf %285, %286 : vector<8x128xf32>
    %288 = math.tanh %287 : vector<8x128xf32>
    %289 = arith.mulf %284, %288 : vector<8x128xf32>
    %c1_116 = arith.constant 1 : index
    %c0_117 = arith.constant 0 : index
    %c0_118 = arith.constant 0 : index
    %290 = vector.load %arg2[%c1_116, %c0_117, %c0_118] : memref<2x128x512xf32, #tpu.memory_space<vmem>>, vector<1x128x512xf32>
    %291 = vector.shape_cast %290 : vector<1x128x512xf32> to vector<128x512xf32>
    %cst_119 = arith.constant dense<0.000000e+00> : vector<8x512xf32>
    %292 = tpu.matmul %289, %291, %cst_119 {dimension_numbers = #tpu.dot_dimension_numbers<[1], [0], [0], [1], [0, 0, 1, 1], [], []>} : vector<8x128xf32>, vector<128x512xf32>, vector<8x512xf32> -> vector<8x512xf32>
    %c1_120 = arith.constant 1 : index
    %c0_121 = arith.constant 0 : index
    %c0_122 = arith.constant 0 : index
    %293 = vector.load %arg3[%c1_120, %c0_121, %c0_122] : memref<2x128x512xf32, #tpu.memory_space<vmem>>, vector<1x128x512xf32>
    %294 = vector.shape_cast %293 : vector<1x128x512xf32> to vector<128x512xf32>
    %cst_123 = arith.constant dense<0.000000e+00> : vector<8x512xf32>
    %295 = tpu.matmul %244, %294, %cst_123 {dimension_numbers = #tpu.dot_dimension_numbers<[1], [0], [0], [1], [0, 0, 1, 1], [], []>} : vector<8x128xf32>, vector<128x512xf32>, vector<8x512xf32> -> vector<8x512xf32>
    %296 = arith.addf %292, %295 : vector<8x512xf32>
    %c1_124 = arith.constant 1 : index
    %c0_125 = arith.constant 0 : index
    %c0_126 = arith.constant 0 : index
    %297 = vector.load %arg4[%c1_124, %c0_125, %c0_126] : memref<2x1x512xf32, #tpu.memory_space<vmem>>, vector<1x1x512xf32>
    %298 = vector.shape_cast %297 : vector<1x1x512xf32> to vector<1x512xf32>
    %299 = vector.broadcast %298 : vector<1x512xf32> to vector<8x512xf32>
    %300 = arith.addf %296, %299 : vector<8x512xf32>
    %301 = vector.extract_strided_slice %300 {offsets = [0, 0], sizes = [8, 128], strides = [1, 1]} : vector<8x512xf32> to vector<8x128xf32>
    %302 = arith.negf %301 : vector<8x128xf32>
    %303 = math.exp %302 : vector<8x128xf32>
    %cst_127 = arith.constant 1.000000e+00 : f32
    %304 = vector.broadcast %cst_127 : f32 to vector<8x128xf32>
    %305 = arith.addf %304, %303 : vector<8x128xf32>
    %306 = arith.divf %304, %305 : vector<8x128xf32>
    %307 = vector.extract_strided_slice %300 {offsets = [0, 128], sizes = [8, 128], strides = [1, 1]} : vector<8x512xf32> to vector<8x128xf32>
    %308 = arith.negf %307 : vector<8x128xf32>
    %309 = math.exp %308 : vector<8x128xf32>
    %cst_128 = arith.constant 1.000000e+00 : f32
    %310 = vector.broadcast %cst_128 : f32 to vector<8x128xf32>
    %311 = arith.addf %310, %309 : vector<8x128xf32>
    %312 = arith.divf %310, %311 : vector<8x128xf32>
    %313 = vector.extract_strided_slice %300 {offsets = [0, 256], sizes = [8, 128], strides = [1, 1]} : vector<8x512xf32> to vector<8x128xf32>
    %314 = math.tanh %313 : vector<8x128xf32>
    %315 = vector.extract_strided_slice %300 {offsets = [0, 384], sizes = [8, 128], strides = [1, 1]} : vector<8x512xf32> to vector<8x128xf32>
    %316 = arith.negf %315 : vector<8x128xf32>
    %317 = math.exp %316 : vector<8x128xf32>
    %cst_129 = arith.constant 1.000000e+00 : f32
    %318 = vector.broadcast %cst_129 : f32 to vector<8x128xf32>
    %319 = arith.addf %318, %317 : vector<8x128xf32>
    %320 = arith.divf %318, %319 : vector<8x128xf32>
    %321 = arith.mulf %312, %242 : vector<8x128xf32>
    %322 = arith.mulf %306, %314 : vector<8x128xf32>
    %323 = arith.addf %321, %322 : vector<8x128xf32>
    %324 = math.tanh %323 : vector<8x128xf32>
    %325 = arith.mulf %320, %324 : vector<8x128xf32>
    %c4_i32 = arith.constant 4 : i32
    %326 = arith.index_cast %c4_i32 : i32 to index
    %c0_130 = arith.constant 0 : index
    %c0_131 = arith.constant 0 : index
    %327 = vector.load %arg0[%326, %c0_130, %c0_131] : memref<8x8x1xi32, #tpu.memory_space<vmem>>, vector<1x8x1xi32>
    %328 = vector.shape_cast %327 : vector<1x8x1xi32> to vector<8x1xi32>
    %329 = vector.broadcast %328 : vector<8x1xi32> to vector<8x128xi32>
    %330 = arith.cmpi eq, %0, %329 : vector<8x128xi32>
    %331 = arith.extui %330 : vector<8x128xi1> to vector<8x128xi32>
    %332 = arith.sitofp %331 : vector<8x128xi32> to vector<8x128xf32>
    %c0_132 = arith.constant 0 : index
    %c0_133 = arith.constant 0 : index
    %333 = vector.load %arg1[%c0_132, %c0_133] : memref<128x128xf32, #tpu.memory_space<vmem>>, vector<128x128xf32>
    %cst_134 = arith.constant dense<0.000000e+00> : vector<8x128xf32>
    %334 = tpu.matmul %332, %333, %cst_134 {dimension_numbers = #tpu.dot_dimension_numbers<[1], [0], [0], [1], [0, 0, 1, 1], [], []>} : vector<8x128xf32>, vector<128x128xf32>, vector<8x128xf32> -> vector<8x128xf32>
    %c0_135 = arith.constant 0 : index
    %c0_136 = arith.constant 0 : index
    %c0_137 = arith.constant 0 : index
    %335 = vector.load %arg2[%c0_135, %c0_136, %c0_137] : memref<2x128x512xf32, #tpu.memory_space<vmem>>, vector<1x128x512xf32>
    %336 = vector.shape_cast %335 : vector<1x128x512xf32> to vector<128x512xf32>
    %cst_138 = arith.constant dense<0.000000e+00> : vector<8x512xf32>
    %337 = tpu.matmul %334, %336, %cst_138 {dimension_numbers = #tpu.dot_dimension_numbers<[1], [0], [0], [1], [0, 0, 1, 1], [], []>} : vector<8x128xf32>, vector<128x512xf32>, vector<8x512xf32> -> vector<8x512xf32>
    %c0_139 = arith.constant 0 : index
    %c0_140 = arith.constant 0 : index
    %c0_141 = arith.constant 0 : index
    %338 = vector.load %arg3[%c0_139, %c0_140, %c0_141] : memref<2x128x512xf32, #tpu.memory_space<vmem>>, vector<1x128x512xf32>
    %339 = vector.shape_cast %338 : vector<1x128x512xf32> to vector<128x512xf32>
    %cst_142 = arith.constant dense<0.000000e+00> : vector<8x512xf32>
    %340 = tpu.matmul %289, %339, %cst_142 {dimension_numbers = #tpu.dot_dimension_numbers<[1], [0], [0], [1], [0, 0, 1, 1], [], []>} : vector<8x128xf32>, vector<128x512xf32>, vector<8x512xf32> -> vector<8x512xf32>
    %341 = arith.addf %337, %340 : vector<8x512xf32>
    %c0_143 = arith.constant 0 : index
    %c0_144 = arith.constant 0 : index
    %c0_145 = arith.constant 0 : index
    %342 = vector.load %arg4[%c0_143, %c0_144, %c0_145] : memref<2x1x512xf32, #tpu.memory_space<vmem>>, vector<1x1x512xf32>
    %343 = vector.shape_cast %342 : vector<1x1x512xf32> to vector<1x512xf32>
    %344 = vector.broadcast %343 : vector<1x512xf32> to vector<8x512xf32>
    %345 = arith.addf %341, %344 : vector<8x512xf32>
    %346 = vector.extract_strided_slice %345 {offsets = [0, 0], sizes = [8, 128], strides = [1, 1]} : vector<8x512xf32> to vector<8x128xf32>
    %347 = arith.negf %346 : vector<8x128xf32>
    %348 = math.exp %347 : vector<8x128xf32>
    %cst_146 = arith.constant 1.000000e+00 : f32
    %349 = vector.broadcast %cst_146 : f32 to vector<8x128xf32>
    %350 = arith.addf %349, %348 : vector<8x128xf32>
    %351 = arith.divf %349, %350 : vector<8x128xf32>
    %352 = vector.extract_strided_slice %345 {offsets = [0, 128], sizes = [8, 128], strides = [1, 1]} : vector<8x512xf32> to vector<8x128xf32>
    %353 = arith.negf %352 : vector<8x128xf32>
    %354 = math.exp %353 : vector<8x128xf32>
    %cst_147 = arith.constant 1.000000e+00 : f32
    %355 = vector.broadcast %cst_147 : f32 to vector<8x128xf32>
    %356 = arith.addf %355, %354 : vector<8x128xf32>
    %357 = arith.divf %355, %356 : vector<8x128xf32>
    %358 = vector.extract_strided_slice %345 {offsets = [0, 256], sizes = [8, 128], strides = [1, 1]} : vector<8x512xf32> to vector<8x128xf32>
    %359 = math.tanh %358 : vector<8x128xf32>
    %360 = vector.extract_strided_slice %345 {offsets = [0, 384], sizes = [8, 128], strides = [1, 1]} : vector<8x512xf32> to vector<8x128xf32>
    %361 = arith.negf %360 : vector<8x128xf32>
    %362 = math.exp %361 : vector<8x128xf32>
    %cst_148 = arith.constant 1.000000e+00 : f32
    %363 = vector.broadcast %cst_148 : f32 to vector<8x128xf32>
    %364 = arith.addf %363, %362 : vector<8x128xf32>
    %365 = arith.divf %363, %364 : vector<8x128xf32>
    %366 = arith.mulf %357, %287 : vector<8x128xf32>
    %367 = arith.mulf %351, %359 : vector<8x128xf32>
    %368 = arith.addf %366, %367 : vector<8x128xf32>
    %369 = math.tanh %368 : vector<8x128xf32>
    %370 = arith.mulf %365, %369 : vector<8x128xf32>
    %c1_149 = arith.constant 1 : index
    %c0_150 = arith.constant 0 : index
    %c0_151 = arith.constant 0 : index
    %371 = vector.load %arg2[%c1_149, %c0_150, %c0_151] : memref<2x128x512xf32, #tpu.memory_space<vmem>>, vector<1x128x512xf32>
    %372 = vector.shape_cast %371 : vector<1x128x512xf32> to vector<128x512xf32>
    %cst_152 = arith.constant dense<0.000000e+00> : vector<8x512xf32>
    %373 = tpu.matmul %370, %372, %cst_152 {dimension_numbers = #tpu.dot_dimension_numbers<[1], [0], [0], [1], [0, 0, 1, 1], [], []>} : vector<8x128xf32>, vector<128x512xf32>, vector<8x512xf32> -> vector<8x512xf32>
    %c1_153 = arith.constant 1 : index
    %c0_154 = arith.constant 0 : index
    %c0_155 = arith.constant 0 : index
    %374 = vector.load %arg3[%c1_153, %c0_154, %c0_155] : memref<2x128x512xf32, #tpu.memory_space<vmem>>, vector<1x128x512xf32>
    %375 = vector.shape_cast %374 : vector<1x128x512xf32> to vector<128x512xf32>
    %cst_156 = arith.constant dense<0.000000e+00> : vector<8x512xf32>
    %376 = tpu.matmul %325, %375, %cst_156 {dimension_numbers = #tpu.dot_dimension_numbers<[1], [0], [0], [1], [0, 0, 1, 1], [], []>} : vector<8x128xf32>, vector<128x512xf32>, vector<8x512xf32> -> vector<8x512xf32>
    %377 = arith.addf %373, %376 : vector<8x512xf32>
    %c1_157 = arith.constant 1 : index
    %c0_158 = arith.constant 0 : index
    %c0_159 = arith.constant 0 : index
    %378 = vector.load %arg4[%c1_157, %c0_158, %c0_159] : memref<2x1x512xf32, #tpu.memory_space<vmem>>, vector<1x1x512xf32>
    %379 = vector.shape_cast %378 : vector<1x1x512xf32> to vector<1x512xf32>
    %380 = vector.broadcast %379 : vector<1x512xf32> to vector<8x512xf32>
    %381 = arith.addf %377, %380 : vector<8x512xf32>
    %382 = vector.extract_strided_slice %381 {offsets = [0, 0], sizes = [8, 128], strides = [1, 1]} : vector<8x512xf32> to vector<8x128xf32>
    %383 = arith.negf %382 : vector<8x128xf32>
    %384 = math.exp %383 : vector<8x128xf32>
    %cst_160 = arith.constant 1.000000e+00 : f32
    %385 = vector.broadcast %cst_160 : f32 to vector<8x128xf32>
    %386 = arith.addf %385, %384 : vector<8x128xf32>
    %387 = arith.divf %385, %386 : vector<8x128xf32>
    %388 = vector.extract_strided_slice %381 {offsets = [0, 128], sizes = [8, 128], strides = [1, 1]} : vector<8x512xf32> to vector<8x128xf32>
    %389 = arith.negf %388 : vector<8x128xf32>
    %390 = math.exp %389 : vector<8x128xf32>
    %cst_161 = arith.constant 1.000000e+00 : f32
    %391 = vector.broadcast %cst_161 : f32 to vector<8x128xf32>
    %392 = arith.addf %391, %390 : vector<8x128xf32>
    %393 = arith.divf %391, %392 : vector<8x128xf32>
    %394 = vector.extract_strided_slice %381 {offsets = [0, 256], sizes = [8, 128], strides = [1, 1]} : vector<8x512xf32> to vector<8x128xf32>
    %395 = math.tanh %394 : vector<8x128xf32>
    %396 = vector.extract_strided_slice %381 {offsets = [0, 384], sizes = [8, 128], strides = [1, 1]} : vector<8x512xf32> to vector<8x128xf32>
    %397 = arith.negf %396 : vector<8x128xf32>
    %398 = math.exp %397 : vector<8x128xf32>
    %cst_162 = arith.constant 1.000000e+00 : f32
    %399 = vector.broadcast %cst_162 : f32 to vector<8x128xf32>
    %400 = arith.addf %399, %398 : vector<8x128xf32>
    %401 = arith.divf %399, %400 : vector<8x128xf32>
    %402 = arith.mulf %393, %323 : vector<8x128xf32>
    %403 = arith.mulf %387, %395 : vector<8x128xf32>
    %404 = arith.addf %402, %403 : vector<8x128xf32>
    %405 = math.tanh %404 : vector<8x128xf32>
    %406 = arith.mulf %401, %405 : vector<8x128xf32>
    %c5_i32 = arith.constant 5 : i32
    %407 = arith.index_cast %c5_i32 : i32 to index
    %c0_163 = arith.constant 0 : index
    %c0_164 = arith.constant 0 : index
    %408 = vector.load %arg0[%407, %c0_163, %c0_164] : memref<8x8x1xi32, #tpu.memory_space<vmem>>, vector<1x8x1xi32>
    %409 = vector.shape_cast %408 : vector<1x8x1xi32> to vector<8x1xi32>
    %410 = vector.broadcast %409 : vector<8x1xi32> to vector<8x128xi32>
    %411 = arith.cmpi eq, %0, %410 : vector<8x128xi32>
    %412 = arith.extui %411 : vector<8x128xi1> to vector<8x128xi32>
    %413 = arith.sitofp %412 : vector<8x128xi32> to vector<8x128xf32>
    %c0_165 = arith.constant 0 : index
    %c0_166 = arith.constant 0 : index
    %414 = vector.load %arg1[%c0_165, %c0_166] : memref<128x128xf32, #tpu.memory_space<vmem>>, vector<128x128xf32>
    %cst_167 = arith.constant dense<0.000000e+00> : vector<8x128xf32>
    %415 = tpu.matmul %413, %414, %cst_167 {dimension_numbers = #tpu.dot_dimension_numbers<[1], [0], [0], [1], [0, 0, 1, 1], [], []>} : vector<8x128xf32>, vector<128x128xf32>, vector<8x128xf32> -> vector<8x128xf32>
    %c0_168 = arith.constant 0 : index
    %c0_169 = arith.constant 0 : index
    %c0_170 = arith.constant 0 : index
    %416 = vector.load %arg2[%c0_168, %c0_169, %c0_170] : memref<2x128x512xf32, #tpu.memory_space<vmem>>, vector<1x128x512xf32>
    %417 = vector.shape_cast %416 : vector<1x128x512xf32> to vector<128x512xf32>
    %cst_171 = arith.constant dense<0.000000e+00> : vector<8x512xf32>
    %418 = tpu.matmul %415, %417, %cst_171 {dimension_numbers = #tpu.dot_dimension_numbers<[1], [0], [0], [1], [0, 0, 1, 1], [], []>} : vector<8x128xf32>, vector<128x512xf32>, vector<8x512xf32> -> vector<8x512xf32>
    %c0_172 = arith.constant 0 : index
    %c0_173 = arith.constant 0 : index
    %c0_174 = arith.constant 0 : index
    %419 = vector.load %arg3[%c0_172, %c0_173, %c0_174] : memref<2x128x512xf32, #tpu.memory_space<vmem>>, vector<1x128x512xf32>
    %420 = vector.shape_cast %419 : vector<1x128x512xf32> to vector<128x512xf32>
    %cst_175 = arith.constant dense<0.000000e+00> : vector<8x512xf32>
    %421 = tpu.matmul %370, %420, %cst_175 {dimension_numbers = #tpu.dot_dimension_numbers<[1], [0], [0], [1], [0, 0, 1, 1], [], []>} : vector<8x128xf32>, vector<128x512xf32>, vector<8x512xf32> -> vector<8x512xf32>
    %422 = arith.addf %418, %421 : vector<8x512xf32>
    %c0_176 = arith.constant 0 : index
    %c0_177 = arith.constant 0 : index
    %c0_178 = arith.constant 0 : index
    %423 = vector.load %arg4[%c0_176, %c0_177, %c0_178] : memref<2x1x512xf32, #tpu.memory_space<vmem>>, vector<1x1x512xf32>
    %424 = vector.shape_cast %423 : vector<1x1x512xf32> to vector<1x512xf32>
    %425 = vector.broadcast %424 : vector<1x512xf32> to vector<8x512xf32>
    %426 = arith.addf %422, %425 : vector<8x512xf32>
    %427 = vector.extract_strided_slice %426 {offsets = [0, 0], sizes = [8, 128], strides = [1, 1]} : vector<8x512xf32> to vector<8x128xf32>
    %428 = arith.negf %427 : vector<8x128xf32>
    %429 = math.exp %428 : vector<8x128xf32>
    %cst_179 = arith.constant 1.000000e+00 : f32
    %430 = vector.broadcast %cst_179 : f32 to vector<8x128xf32>
    %431 = arith.addf %430, %429 : vector<8x128xf32>
    %432 = arith.divf %430, %431 : vector<8x128xf32>
    %433 = vector.extract_strided_slice %426 {offsets = [0, 128], sizes = [8, 128], strides = [1, 1]} : vector<8x512xf32> to vector<8x128xf32>
    %434 = arith.negf %433 : vector<8x128xf32>
    %435 = math.exp %434 : vector<8x128xf32>
    %cst_180 = arith.constant 1.000000e+00 : f32
    %436 = vector.broadcast %cst_180 : f32 to vector<8x128xf32>
    %437 = arith.addf %436, %435 : vector<8x128xf32>
    %438 = arith.divf %436, %437 : vector<8x128xf32>
    %439 = vector.extract_strided_slice %426 {offsets = [0, 256], sizes = [8, 128], strides = [1, 1]} : vector<8x512xf32> to vector<8x128xf32>
    %440 = math.tanh %439 : vector<8x128xf32>
    %441 = vector.extract_strided_slice %426 {offsets = [0, 384], sizes = [8, 128], strides = [1, 1]} : vector<8x512xf32> to vector<8x128xf32>
    %442 = arith.negf %441 : vector<8x128xf32>
    %443 = math.exp %442 : vector<8x128xf32>
    %cst_181 = arith.constant 1.000000e+00 : f32
    %444 = vector.broadcast %cst_181 : f32 to vector<8x128xf32>
    %445 = arith.addf %444, %443 : vector<8x128xf32>
    %446 = arith.divf %444, %445 : vector<8x128xf32>
    %447 = arith.mulf %438, %368 : vector<8x128xf32>
    %448 = arith.mulf %432, %440 : vector<8x128xf32>
    %449 = arith.addf %447, %448 : vector<8x128xf32>
    %450 = math.tanh %449 : vector<8x128xf32>
    %451 = arith.mulf %446, %450 : vector<8x128xf32>
    %c1_182 = arith.constant 1 : index
    %c0_183 = arith.constant 0 : index
    %c0_184 = arith.constant 0 : index
    %452 = vector.load %arg2[%c1_182, %c0_183, %c0_184] : memref<2x128x512xf32, #tpu.memory_space<vmem>>, vector<1x128x512xf32>
    %453 = vector.shape_cast %452 : vector<1x128x512xf32> to vector<128x512xf32>
    %cst_185 = arith.constant dense<0.000000e+00> : vector<8x512xf32>
    %454 = tpu.matmul %451, %453, %cst_185 {dimension_numbers = #tpu.dot_dimension_numbers<[1], [0], [0], [1], [0, 0, 1, 1], [], []>} : vector<8x128xf32>, vector<128x512xf32>, vector<8x512xf32> -> vector<8x512xf32>
    %c1_186 = arith.constant 1 : index
    %c0_187 = arith.constant 0 : index
    %c0_188 = arith.constant 0 : index
    %455 = vector.load %arg3[%c1_186, %c0_187, %c0_188] : memref<2x128x512xf32, #tpu.memory_space<vmem>>, vector<1x128x512xf32>
    %456 = vector.shape_cast %455 : vector<1x128x512xf32> to vector<128x512xf32>
    %cst_189 = arith.constant dense<0.000000e+00> : vector<8x512xf32>
    %457 = tpu.matmul %406, %456, %cst_189 {dimension_numbers = #tpu.dot_dimension_numbers<[1], [0], [0], [1], [0, 0, 1, 1], [], []>} : vector<8x128xf32>, vector<128x512xf32>, vector<8x512xf32> -> vector<8x512xf32>
    %458 = arith.addf %454, %457 : vector<8x512xf32>
    %c1_190 = arith.constant 1 : index
    %c0_191 = arith.constant 0 : index
    %c0_192 = arith.constant 0 : index
    %459 = vector.load %arg4[%c1_190, %c0_191, %c0_192] : memref<2x1x512xf32, #tpu.memory_space<vmem>>, vector<1x1x512xf32>
    %460 = vector.shape_cast %459 : vector<1x1x512xf32> to vector<1x512xf32>
    %461 = vector.broadcast %460 : vector<1x512xf32> to vector<8x512xf32>
    %462 = arith.addf %458, %461 : vector<8x512xf32>
    %463 = vector.extract_strided_slice %462 {offsets = [0, 0], sizes = [8, 128], strides = [1, 1]} : vector<8x512xf32> to vector<8x128xf32>
    %464 = arith.negf %463 : vector<8x128xf32>
    %465 = math.exp %464 : vector<8x128xf32>
    %cst_193 = arith.constant 1.000000e+00 : f32
    %466 = vector.broadcast %cst_193 : f32 to vector<8x128xf32>
    %467 = arith.addf %466, %465 : vector<8x128xf32>
    %468 = arith.divf %466, %467 : vector<8x128xf32>
    %469 = vector.extract_strided_slice %462 {offsets = [0, 128], sizes = [8, 128], strides = [1, 1]} : vector<8x512xf32> to vector<8x128xf32>
    %470 = arith.negf %469 : vector<8x128xf32>
    %471 = math.exp %470 : vector<8x128xf32>
    %cst_194 = arith.constant 1.000000e+00 : f32
    %472 = vector.broadcast %cst_194 : f32 to vector<8x128xf32>
    %473 = arith.addf %472, %471 : vector<8x128xf32>
    %474 = arith.divf %472, %473 : vector<8x128xf32>
    %475 = vector.extract_strided_slice %462 {offsets = [0, 256], sizes = [8, 128], strides = [1, 1]} : vector<8x512xf32> to vector<8x128xf32>
    %476 = math.tanh %475 : vector<8x128xf32>
    %477 = vector.extract_strided_slice %462 {offsets = [0, 384], sizes = [8, 128], strides = [1, 1]} : vector<8x512xf32> to vector<8x128xf32>
    %478 = arith.negf %477 : vector<8x128xf32>
    %479 = math.exp %478 : vector<8x128xf32>
    %cst_195 = arith.constant 1.000000e+00 : f32
    %480 = vector.broadcast %cst_195 : f32 to vector<8x128xf32>
    %481 = arith.addf %480, %479 : vector<8x128xf32>
    %482 = arith.divf %480, %481 : vector<8x128xf32>
    %483 = arith.mulf %474, %404 : vector<8x128xf32>
    %484 = arith.mulf %468, %476 : vector<8x128xf32>
    %485 = arith.addf %483, %484 : vector<8x128xf32>
    %486 = math.tanh %485 : vector<8x128xf32>
    %487 = arith.mulf %482, %486 : vector<8x128xf32>
    %c6_i32 = arith.constant 6 : i32
    %488 = arith.index_cast %c6_i32 : i32 to index
    %c0_196 = arith.constant 0 : index
    %c0_197 = arith.constant 0 : index
    %489 = vector.load %arg0[%488, %c0_196, %c0_197] : memref<8x8x1xi32, #tpu.memory_space<vmem>>, vector<1x8x1xi32>
    %490 = vector.shape_cast %489 : vector<1x8x1xi32> to vector<8x1xi32>
    %491 = vector.broadcast %490 : vector<8x1xi32> to vector<8x128xi32>
    %492 = arith.cmpi eq, %0, %491 : vector<8x128xi32>
    %493 = arith.extui %492 : vector<8x128xi1> to vector<8x128xi32>
    %494 = arith.sitofp %493 : vector<8x128xi32> to vector<8x128xf32>
    %c0_198 = arith.constant 0 : index
    %c0_199 = arith.constant 0 : index
    %495 = vector.load %arg1[%c0_198, %c0_199] : memref<128x128xf32, #tpu.memory_space<vmem>>, vector<128x128xf32>
    %cst_200 = arith.constant dense<0.000000e+00> : vector<8x128xf32>
    %496 = tpu.matmul %494, %495, %cst_200 {dimension_numbers = #tpu.dot_dimension_numbers<[1], [0], [0], [1], [0, 0, 1, 1], [], []>} : vector<8x128xf32>, vector<128x128xf32>, vector<8x128xf32> -> vector<8x128xf32>
    %c0_201 = arith.constant 0 : index
    %c0_202 = arith.constant 0 : index
    %c0_203 = arith.constant 0 : index
    %497 = vector.load %arg2[%c0_201, %c0_202, %c0_203] : memref<2x128x512xf32, #tpu.memory_space<vmem>>, vector<1x128x512xf32>
    %498 = vector.shape_cast %497 : vector<1x128x512xf32> to vector<128x512xf32>
    %cst_204 = arith.constant dense<0.000000e+00> : vector<8x512xf32>
    %499 = tpu.matmul %496, %498, %cst_204 {dimension_numbers = #tpu.dot_dimension_numbers<[1], [0], [0], [1], [0, 0, 1, 1], [], []>} : vector<8x128xf32>, vector<128x512xf32>, vector<8x512xf32> -> vector<8x512xf32>
    %c0_205 = arith.constant 0 : index
    %c0_206 = arith.constant 0 : index
    %c0_207 = arith.constant 0 : index
    %500 = vector.load %arg3[%c0_205, %c0_206, %c0_207] : memref<2x128x512xf32, #tpu.memory_space<vmem>>, vector<1x128x512xf32>
    %501 = vector.shape_cast %500 : vector<1x128x512xf32> to vector<128x512xf32>
    %cst_208 = arith.constant dense<0.000000e+00> : vector<8x512xf32>
    %502 = tpu.matmul %451, %501, %cst_208 {dimension_numbers = #tpu.dot_dimension_numbers<[1], [0], [0], [1], [0, 0, 1, 1], [], []>} : vector<8x128xf32>, vector<128x512xf32>, vector<8x512xf32> -> vector<8x512xf32>
    %503 = arith.addf %499, %502 : vector<8x512xf32>
    %c0_209 = arith.constant 0 : index
    %c0_210 = arith.constant 0 : index
    %c0_211 = arith.constant 0 : index
    %504 = vector.load %arg4[%c0_209, %c0_210, %c0_211] : memref<2x1x512xf32, #tpu.memory_space<vmem>>, vector<1x1x512xf32>
    %505 = vector.shape_cast %504 : vector<1x1x512xf32> to vector<1x512xf32>
    %506 = vector.broadcast %505 : vector<1x512xf32> to vector<8x512xf32>
    %507 = arith.addf %503, %506 : vector<8x512xf32>
    %508 = vector.extract_strided_slice %507 {offsets = [0, 0], sizes = [8, 128], strides = [1, 1]} : vector<8x512xf32> to vector<8x128xf32>
    %509 = arith.negf %508 : vector<8x128xf32>
    %510 = math.exp %509 : vector<8x128xf32>
    %cst_212 = arith.constant 1.000000e+00 : f32
    %511 = vector.broadcast %cst_212 : f32 to vector<8x128xf32>
    %512 = arith.addf %511, %510 : vector<8x128xf32>
    %513 = arith.divf %511, %512 : vector<8x128xf32>
    %514 = vector.extract_strided_slice %507 {offsets = [0, 128], sizes = [8, 128], strides = [1, 1]} : vector<8x512xf32> to vector<8x128xf32>
    %515 = arith.negf %514 : vector<8x128xf32>
    %516 = math.exp %515 : vector<8x128xf32>
    %cst_213 = arith.constant 1.000000e+00 : f32
    %517 = vector.broadcast %cst_213 : f32 to vector<8x128xf32>
    %518 = arith.addf %517, %516 : vector<8x128xf32>
    %519 = arith.divf %517, %518 : vector<8x128xf32>
    %520 = vector.extract_strided_slice %507 {offsets = [0, 256], sizes = [8, 128], strides = [1, 1]} : vector<8x512xf32> to vector<8x128xf32>
    %521 = math.tanh %520 : vector<8x128xf32>
    %522 = vector.extract_strided_slice %507 {offsets = [0, 384], sizes = [8, 128], strides = [1, 1]} : vector<8x512xf32> to vector<8x128xf32>
    %523 = arith.negf %522 : vector<8x128xf32>
    %524 = math.exp %523 : vector<8x128xf32>
    %cst_214 = arith.constant 1.000000e+00 : f32
    %525 = vector.broadcast %cst_214 : f32 to vector<8x128xf32>
    %526 = arith.addf %525, %524 : vector<8x128xf32>
    %527 = arith.divf %525, %526 : vector<8x128xf32>
    %528 = arith.mulf %519, %449 : vector<8x128xf32>
    %529 = arith.mulf %513, %521 : vector<8x128xf32>
    %530 = arith.addf %528, %529 : vector<8x128xf32>
    %531 = math.tanh %530 : vector<8x128xf32>
    %532 = arith.mulf %527, %531 : vector<8x128xf32>
    %c1_215 = arith.constant 1 : index
    %c0_216 = arith.constant 0 : index
    %c0_217 = arith.constant 0 : index
    %533 = vector.load %arg2[%c1_215, %c0_216, %c0_217] : memref<2x128x512xf32, #tpu.memory_space<vmem>>, vector<1x128x512xf32>
    %534 = vector.shape_cast %533 : vector<1x128x512xf32> to vector<128x512xf32>
    %cst_218 = arith.constant dense<0.000000e+00> : vector<8x512xf32>
    %535 = tpu.matmul %532, %534, %cst_218 {dimension_numbers = #tpu.dot_dimension_numbers<[1], [0], [0], [1], [0, 0, 1, 1], [], []>} : vector<8x128xf32>, vector<128x512xf32>, vector<8x512xf32> -> vector<8x512xf32>
    %c1_219 = arith.constant 1 : index
    %c0_220 = arith.constant 0 : index
    %c0_221 = arith.constant 0 : index
    %536 = vector.load %arg3[%c1_219, %c0_220, %c0_221] : memref<2x128x512xf32, #tpu.memory_space<vmem>>, vector<1x128x512xf32>
    %537 = vector.shape_cast %536 : vector<1x128x512xf32> to vector<128x512xf32>
    %cst_222 = arith.constant dense<0.000000e+00> : vector<8x512xf32>
    %538 = tpu.matmul %487, %537, %cst_222 {dimension_numbers = #tpu.dot_dimension_numbers<[1], [0], [0], [1], [0, 0, 1, 1], [], []>} : vector<8x128xf32>, vector<128x512xf32>, vector<8x512xf32> -> vector<8x512xf32>
    %539 = arith.addf %535, %538 : vector<8x512xf32>
    %c1_223 = arith.constant 1 : index
    %c0_224 = arith.constant 0 : index
    %c0_225 = arith.constant 0 : index
    %540 = vector.load %arg4[%c1_223, %c0_224, %c0_225] : memref<2x1x512xf32, #tpu.memory_space<vmem>>, vector<1x1x512xf32>
    %541 = vector.shape_cast %540 : vector<1x1x512xf32> to vector<1x512xf32>
    %542 = vector.broadcast %541 : vector<1x512xf32> to vector<8x512xf32>
    %543 = arith.addf %539, %542 : vector<8x512xf32>
    %544 = vector.extract_strided_slice %543 {offsets = [0, 0], sizes = [8, 128], strides = [1, 1]} : vector<8x512xf32> to vector<8x128xf32>
    %545 = arith.negf %544 : vector<8x128xf32>
    %546 = math.exp %545 : vector<8x128xf32>
    %cst_226 = arith.constant 1.000000e+00 : f32
    %547 = vector.broadcast %cst_226 : f32 to vector<8x128xf32>
    %548 = arith.addf %547, %546 : vector<8x128xf32>
    %549 = arith.divf %547, %548 : vector<8x128xf32>
    %550 = vector.extract_strided_slice %543 {offsets = [0, 128], sizes = [8, 128], strides = [1, 1]} : vector<8x512xf32> to vector<8x128xf32>
    %551 = arith.negf %550 : vector<8x128xf32>
    %552 = math.exp %551 : vector<8x128xf32>
    %cst_227 = arith.constant 1.000000e+00 : f32
    %553 = vector.broadcast %cst_227 : f32 to vector<8x128xf32>
    %554 = arith.addf %553, %552 : vector<8x128xf32>
    %555 = arith.divf %553, %554 : vector<8x128xf32>
    %556 = vector.extract_strided_slice %543 {offsets = [0, 256], sizes = [8, 128], strides = [1, 1]} : vector<8x512xf32> to vector<8x128xf32>
    %557 = math.tanh %556 : vector<8x128xf32>
    %558 = vector.extract_strided_slice %543 {offsets = [0, 384], sizes = [8, 128], strides = [1, 1]} : vector<8x512xf32> to vector<8x128xf32>
    %559 = arith.negf %558 : vector<8x128xf32>
    %560 = math.exp %559 : vector<8x128xf32>
    %cst_228 = arith.constant 1.000000e+00 : f32
    %561 = vector.broadcast %cst_228 : f32 to vector<8x128xf32>
    %562 = arith.addf %561, %560 : vector<8x128xf32>
    %563 = arith.divf %561, %562 : vector<8x128xf32>
    %564 = arith.mulf %555, %485 : vector<8x128xf32>
    %565 = arith.mulf %549, %557 : vector<8x128xf32>
    %566 = arith.addf %564, %565 : vector<8x128xf32>
    %567 = math.tanh %566 : vector<8x128xf32>
    %568 = arith.mulf %563, %567 : vector<8x128xf32>
    %c7_i32 = arith.constant 7 : i32
    %569 = arith.index_cast %c7_i32 : i32 to index
    %c0_229 = arith.constant 0 : index
    %c0_230 = arith.constant 0 : index
    %570 = vector.load %arg0[%569, %c0_229, %c0_230] : memref<8x8x1xi32, #tpu.memory_space<vmem>>, vector<1x8x1xi32>
    %571 = vector.shape_cast %570 : vector<1x8x1xi32> to vector<8x1xi32>
    %572 = vector.broadcast %571 : vector<8x1xi32> to vector<8x128xi32>
    %573 = arith.cmpi eq, %0, %572 : vector<8x128xi32>
    %574 = arith.extui %573 : vector<8x128xi1> to vector<8x128xi32>
    %575 = arith.sitofp %574 : vector<8x128xi32> to vector<8x128xf32>
    %c0_231 = arith.constant 0 : index
    %c0_232 = arith.constant 0 : index
    %576 = vector.load %arg1[%c0_231, %c0_232] : memref<128x128xf32, #tpu.memory_space<vmem>>, vector<128x128xf32>
    %cst_233 = arith.constant dense<0.000000e+00> : vector<8x128xf32>
    %577 = tpu.matmul %575, %576, %cst_233 {dimension_numbers = #tpu.dot_dimension_numbers<[1], [0], [0], [1], [0, 0, 1, 1], [], []>} : vector<8x128xf32>, vector<128x128xf32>, vector<8x128xf32> -> vector<8x128xf32>
    %c0_234 = arith.constant 0 : index
    %c0_235 = arith.constant 0 : index
    %c0_236 = arith.constant 0 : index
    %578 = vector.load %arg2[%c0_234, %c0_235, %c0_236] : memref<2x128x512xf32, #tpu.memory_space<vmem>>, vector<1x128x512xf32>
    %579 = vector.shape_cast %578 : vector<1x128x512xf32> to vector<128x512xf32>
    %cst_237 = arith.constant dense<0.000000e+00> : vector<8x512xf32>
    %580 = tpu.matmul %577, %579, %cst_237 {dimension_numbers = #tpu.dot_dimension_numbers<[1], [0], [0], [1], [0, 0, 1, 1], [], []>} : vector<8x128xf32>, vector<128x512xf32>, vector<8x512xf32> -> vector<8x512xf32>
    %c0_238 = arith.constant 0 : index
    %c0_239 = arith.constant 0 : index
    %c0_240 = arith.constant 0 : index
    %581 = vector.load %arg3[%c0_238, %c0_239, %c0_240] : memref<2x128x512xf32, #tpu.memory_space<vmem>>, vector<1x128x512xf32>
    %582 = vector.shape_cast %581 : vector<1x128x512xf32> to vector<128x512xf32>
    %cst_241 = arith.constant dense<0.000000e+00> : vector<8x512xf32>
    %583 = tpu.matmul %532, %582, %cst_241 {dimension_numbers = #tpu.dot_dimension_numbers<[1], [0], [0], [1], [0, 0, 1, 1], [], []>} : vector<8x128xf32>, vector<128x512xf32>, vector<8x512xf32> -> vector<8x512xf32>
    %584 = arith.addf %580, %583 : vector<8x512xf32>
    %c0_242 = arith.constant 0 : index
    %c0_243 = arith.constant 0 : index
    %c0_244 = arith.constant 0 : index
    %585 = vector.load %arg4[%c0_242, %c0_243, %c0_244] : memref<2x1x512xf32, #tpu.memory_space<vmem>>, vector<1x1x512xf32>
    %586 = vector.shape_cast %585 : vector<1x1x512xf32> to vector<1x512xf32>
    %587 = vector.broadcast %586 : vector<1x512xf32> to vector<8x512xf32>
    %588 = arith.addf %584, %587 : vector<8x512xf32>
    %589 = vector.extract_strided_slice %588 {offsets = [0, 0], sizes = [8, 128], strides = [1, 1]} : vector<8x512xf32> to vector<8x128xf32>
    %590 = arith.negf %589 : vector<8x128xf32>
    %591 = math.exp %590 : vector<8x128xf32>
    %cst_245 = arith.constant 1.000000e+00 : f32
    %592 = vector.broadcast %cst_245 : f32 to vector<8x128xf32>
    %593 = arith.addf %592, %591 : vector<8x128xf32>
    %594 = arith.divf %592, %593 : vector<8x128xf32>
    %595 = vector.extract_strided_slice %588 {offsets = [0, 128], sizes = [8, 128], strides = [1, 1]} : vector<8x512xf32> to vector<8x128xf32>
    %596 = arith.negf %595 : vector<8x128xf32>
    %597 = math.exp %596 : vector<8x128xf32>
    %cst_246 = arith.constant 1.000000e+00 : f32
    %598 = vector.broadcast %cst_246 : f32 to vector<8x128xf32>
    %599 = arith.addf %598, %597 : vector<8x128xf32>
    %600 = arith.divf %598, %599 : vector<8x128xf32>
    %601 = vector.extract_strided_slice %588 {offsets = [0, 256], sizes = [8, 128], strides = [1, 1]} : vector<8x512xf32> to vector<8x128xf32>
    %602 = math.tanh %601 : vector<8x128xf32>
    %603 = vector.extract_strided_slice %588 {offsets = [0, 384], sizes = [8, 128], strides = [1, 1]} : vector<8x512xf32> to vector<8x128xf32>
    %604 = arith.negf %603 : vector<8x128xf32>
    %605 = math.exp %604 : vector<8x128xf32>
    %cst_247 = arith.constant 1.000000e+00 : f32
    %606 = vector.broadcast %cst_247 : f32 to vector<8x128xf32>
    %607 = arith.addf %606, %605 : vector<8x128xf32>
    %608 = arith.divf %606, %607 : vector<8x128xf32>
    %609 = arith.mulf %600, %530 : vector<8x128xf32>
    %610 = arith.mulf %594, %602 : vector<8x128xf32>
    %611 = arith.addf %609, %610 : vector<8x128xf32>
    %612 = math.tanh %611 : vector<8x128xf32>
    %613 = arith.mulf %608, %612 : vector<8x128xf32>
    %c1_248 = arith.constant 1 : index
    %c0_249 = arith.constant 0 : index
    %c0_250 = arith.constant 0 : index
    %614 = vector.load %arg2[%c1_248, %c0_249, %c0_250] : memref<2x128x512xf32, #tpu.memory_space<vmem>>, vector<1x128x512xf32>
    %615 = vector.shape_cast %614 : vector<1x128x512xf32> to vector<128x512xf32>
    %cst_251 = arith.constant dense<0.000000e+00> : vector<8x512xf32>
    %616 = tpu.matmul %613, %615, %cst_251 {dimension_numbers = #tpu.dot_dimension_numbers<[1], [0], [0], [1], [0, 0, 1, 1], [], []>} : vector<8x128xf32>, vector<128x512xf32>, vector<8x512xf32> -> vector<8x512xf32>
    %c1_252 = arith.constant 1 : index
    %c0_253 = arith.constant 0 : index
    %c0_254 = arith.constant 0 : index
    %617 = vector.load %arg3[%c1_252, %c0_253, %c0_254] : memref<2x128x512xf32, #tpu.memory_space<vmem>>, vector<1x128x512xf32>
    %618 = vector.shape_cast %617 : vector<1x128x512xf32> to vector<128x512xf32>
    %cst_255 = arith.constant dense<0.000000e+00> : vector<8x512xf32>
    %619 = tpu.matmul %568, %618, %cst_255 {dimension_numbers = #tpu.dot_dimension_numbers<[1], [0], [0], [1], [0, 0, 1, 1], [], []>} : vector<8x128xf32>, vector<128x512xf32>, vector<8x512xf32> -> vector<8x512xf32>
    %620 = arith.addf %616, %619 : vector<8x512xf32>
    %c1_256 = arith.constant 1 : index
    %c0_257 = arith.constant 0 : index
    %c0_258 = arith.constant 0 : index
    %621 = vector.load %arg4[%c1_256, %c0_257, %c0_258] : memref<2x1x512xf32, #tpu.memory_space<vmem>>, vector<1x1x512xf32>
    %622 = vector.shape_cast %621 : vector<1x1x512xf32> to vector<1x512xf32>
    %623 = vector.broadcast %622 : vector<1x512xf32> to vector<8x512xf32>
    %624 = arith.addf %620, %623 : vector<8x512xf32>
    %625 = vector.extract_strided_slice %624 {offsets = [0, 0], sizes = [8, 128], strides = [1, 1]} : vector<8x512xf32> to vector<8x128xf32>
    %626 = arith.negf %625 : vector<8x128xf32>
    %627 = math.exp %626 : vector<8x128xf32>
    %cst_259 = arith.constant 1.000000e+00 : f32
    %628 = vector.broadcast %cst_259 : f32 to vector<8x128xf32>
    %629 = arith.addf %628, %627 : vector<8x128xf32>
    %630 = arith.divf %628, %629 : vector<8x128xf32>
    %631 = vector.extract_strided_slice %624 {offsets = [0, 128], sizes = [8, 128], strides = [1, 1]} : vector<8x512xf32> to vector<8x128xf32>
    %632 = arith.negf %631 : vector<8x128xf32>
    %633 = math.exp %632 : vector<8x128xf32>
    %cst_260 = arith.constant 1.000000e+00 : f32
    %634 = vector.broadcast %cst_260 : f32 to vector<8x128xf32>
    %635 = arith.addf %634, %633 : vector<8x128xf32>
    %636 = arith.divf %634, %635 : vector<8x128xf32>
    %637 = vector.extract_strided_slice %624 {offsets = [0, 256], sizes = [8, 128], strides = [1, 1]} : vector<8x512xf32> to vector<8x128xf32>
    %638 = math.tanh %637 : vector<8x128xf32>
    %639 = vector.extract_strided_slice %624 {offsets = [0, 384], sizes = [8, 128], strides = [1, 1]} : vector<8x512xf32> to vector<8x128xf32>
    %640 = arith.negf %639 : vector<8x128xf32>
    %641 = math.exp %640 : vector<8x128xf32>
    %cst_261 = arith.constant 1.000000e+00 : f32
    %642 = vector.broadcast %cst_261 : f32 to vector<8x128xf32>
    %643 = arith.addf %642, %641 : vector<8x128xf32>
    %644 = arith.divf %642, %643 : vector<8x128xf32>
    %645 = arith.mulf %636, %566 : vector<8x128xf32>
    %646 = arith.mulf %630, %638 : vector<8x128xf32>
    %647 = arith.addf %645, %646 : vector<8x128xf32>
    %648 = math.tanh %647 : vector<8x128xf32>
    %649 = arith.mulf %644, %648 : vector<8x128xf32>
    %c8_i32 = arith.constant 8 : i32
    %c0_262 = arith.constant 0 : index
    %c0_263 = arith.constant 0 : index
    %c0_264 = arith.constant 0 : index
    %650 = vector.load %arg5[%c0_262, %c0_263, %c0_264] : memref<2x8x128xf32, #tpu.memory_space<vmem>>, vector<1x8x128xf32>
    %651 = vector.shape_cast %650 : vector<1x8x128xf32> to vector<8x128xf32>
    %652 = vector.shape_cast %613 : vector<8x128xf32> to vector<1x8x128xf32>
    tpu.vector_store %arg5[%c0_262, %c0_263, %c0_264], %652 {strides = array<i32>} : memref<2x8x128xf32, #tpu.memory_space<vmem>>, vector<1x8x128xf32>,
    %c0_265 = arith.constant 0 : index
    %c0_266 = arith.constant 0 : index
    %c0_267 = arith.constant 0 : index
    %653 = vector.load %arg6[%c0_265, %c0_266, %c0_267] : memref<2x8x128xf32, #tpu.memory_space<vmem>>, vector<1x8x128xf32>
    %654 = vector.shape_cast %653 : vector<1x8x128xf32> to vector<8x128xf32>
    %655 = vector.shape_cast %611 : vector<8x128xf32> to vector<1x8x128xf32>
    tpu.vector_store %arg6[%c0_265, %c0_266, %c0_267], %655 {strides = array<i32>} : memref<2x8x128xf32, #tpu.memory_space<vmem>>, vector<1x8x128xf32>,
    %c1_268 = arith.constant 1 : index
    %c0_269 = arith.constant 0 : index
    %c0_270 = arith.constant 0 : index
    %656 = vector.load %arg5[%c1_268, %c0_269, %c0_270] : memref<2x8x128xf32, #tpu.memory_space<vmem>>, vector<1x8x128xf32>
    %657 = vector.shape_cast %656 : vector<1x8x128xf32> to vector<8x128xf32>
    %658 = vector.shape_cast %649 : vector<8x128xf32> to vector<1x8x128xf32>
    tpu.vector_store %arg5[%c1_268, %c0_269, %c0_270], %658 {strides = array<i32>} : memref<2x8x128xf32, #tpu.memory_space<vmem>>, vector<1x8x128xf32>,
    %c1_271 = arith.constant 1 : index
    %c0_272 = arith.constant 0 : index
    %c0_273 = arith.constant 0 : index
    %659 = vector.load %arg6[%c1_271, %c0_272, %c0_273] : memref<2x8x128xf32, #tpu.memory_space<vmem>>, vector<1x8x128xf32>
    %660 = vector.shape_cast %659 : vector<1x8x128xf32> to vector<8x128xf32>
    %661 = vector.shape_cast %647 : vector<8x128xf32> to vector<1x8x128xf32>
    tpu.vector_store %arg6[%c1_271, %c0_272, %c0_273], %661 {strides = array<i32>} : memref<2x8x128xf32, #tpu.memory_space<vmem>>, vector<1x8x128xf32>,
    return
  }
}

</mosaic_0001>

<bundles_post_ra>
// kernel: encoder_apply.1
= control target key start
LH: loop header
LB: loop body
LE: loop exit
PB: predicated region body
PF: predicated region fallthrough
CT: control target
= control target key end

     0   :  { %12 = vsyncpa [#allocation3], 0  ;;  %s12079_s0 = inlined_call_operand.vmem [shape: s32[8,8,1], index: 0, kind: input, shape index: {}]   ;;  %s12080_s1 = inlined_call_operand.hbm [shape: f32[128,128], index: 1, kind: input, shape index: {}]   ;;  %s12081_s2 = inlined_call_operand.hbm [shape: f32[2,128,512], index: 2, kind: input, shape index: {}]   ;;  %s12082_s3 = inlined_call_operand.hbm [shape: f32[2,128,512], index: 3, kind: input, shape index: {}]   ;;  %s12083_s4 = inlined_call_operand.vmem [shape: f32[2,1,512], index: 4, kind: input, shape index: {}]   ;;  %s12084_s5 = inlined_call_operand.vmem [shape: f32[2,8,128], index: 5, kind: output, shape index: {0}]   ;;  %s12085_s6 = inlined_call_operand.vmem [shape: f32[2,8,128], index: 6, kind: output, shape index: {1}]  }
   0x1   :  { %13 = vsyncpa [#allocation5], 0  ;;  %s7806_s21 = smov [#allocation4]  }
   0x2   :  { %s33_s22 = sshll.u32 %s7806_s21, 4  ;;  %s34_s22 = int_to_ptr.vmem [resolvable:$true] %s33_s22 }
   0x3   :  { %s7750_s23 = scalar_lea.vmem %s34_s22, 16384  ;;  %p7755_p1 = scmp.lt.s32.totalorder %s34_s22, %s34_s22 }
   0x4   :  { %p7751_p0 = scmp.ne.s32.totalorder %s34_s22, %s7750_s23  ;;  %p7756_p2 = scmp.lt.s32.totalorder %s7750_s23, %s7750_s23 }
   0x6   :  { %p7757_p3 = por %p7756_p2, %p7755_p1 }
   0x8   :  { %p7758_p4 = pnand %p7757_p3, %p7751_p0 }
   0xa   :  { %7761 = shalt.err (!%p7758_p4)
}
   0xb   :  { %s7807_s24 = smov 512   ;;  %s7808_s25 = smov 32  }
   0xc   :  { %39 = dma.hbm_to_vmem [thread:$0]  %s12081_s2, 16384, %s34_s22, [#allocation5], %s7807_s24, %s7807_s24, %s7808_s25  }
   0xd   :  { %s7809_s28 = smov [#allocation2]  }
   0xe   :  { %s21_s29 = sshll.u32 %s7809_s28, 4  ;;  %s22_s29 = int_to_ptr.vmem [resolvable:$true] %s21_s29 }
   0xf   :  { %s7770_s30 = scalar_lea.vmem %s22_s29, 2048  ;;  %p7775_p6 = scmp.lt.s32.totalorder %s22_s29, %s22_s29 }
  0x10   :  { %p7771_p5 = scmp.ne.s32.totalorder %s22_s29, %s7770_s30  ;;  %p7776_p7 = scmp.lt.s32.totalorder %s7770_s30, %s7770_s30 }
  0x12   :  { %p7777_p8 = por %p7776_p7, %p7775_p6 }
  0x14   :  { %p7778_p9 = pnand %p7777_p8, %p7771_p5 }
  0x16   :  { %7781 = shalt.err (!%p7778_p9)
}
  0x17   :  { %s7810_s7 = smov 128   ;;  %s7811_s8 = smov 8  }
  0x18   :  { %27 = dma.hbm_to_vmem [thread:$0]  %s12080_s1, 2048, %s22_s29, [#allocation3], %s7810_s7, %s7810_s7, %s7811_s8  }
  0x19   :  { %s7812_s11 = smov [#allocation6]  }
  0x1a   :  { %s45_s12 = sshll.u32 %s7812_s11, 4  ;;  %s46_s12 = int_to_ptr.vmem [resolvable:$true] %s45_s12 }
  0x1b   :  { %s7790_s2 = scalar_lea.vmem %s46_s12, 16384  ;;  %p7795_p11 = scmp.lt.s32.totalorder %s46_s12, %s46_s12 }
  0x1c   :  { %p7791_p10 = scmp.ne.s32.totalorder %s46_s12, %s7790_s2  ;;  %p7796_p12 = scmp.lt.s32.totalorder %s7790_s2, %s7790_s2 }
  0x1e   :  { %p7797_p13 = por %p7796_p12, %p7795_p11 }
  0x20   :  { %p7798_p0 = pnand %p7797_p13, %p7791_p10 }
  0x22   :  { %7801 = shalt.err (!%p7798_p0)
}
  0x23   :  { %51 = dma.hbm_to_vmem [thread:$0]  %s12082_s3, 16384, %s46_s12, [#allocation5], %s7807_s24, %s7807_s24, %s7808_s25  }
  0x24   :  { %7802 = dma.done.wait [#allocation3], 2048  }
  0x25   :  { %7803 = vsyncadd [#allocation3], 4294965248 }
  0x26   :  { %7804 = dma.done.wait [#allocation5], 32768  }
  0x27   :  { %7805 = vsyncadd [#allocation5], 4294934528  ;;  %v7813_v0 = vmov 0   ;;  %v12092_v1 = vmov 0.0   ;;  %vm7815_vm0 = vmmov 0   ;;  %v65_v2 = vld [vmem:[%s12079_s0] sm:$0xff] }
  0x28   :  { %6516 = vset.pattern.permute.xlu0 %v7813_v0  ;;  %6225 = vmatprep.subr.mxu0 %v12092_v1  ;;  %v87_v3 = vld [vmem:[#allocation2 + $0x78] sm:$0xff]  ;;  %v86_v4 = vld [vmem:[#allocation2 + $0x70] sm:$0xff]  ;;  %v6024_v5 = vld [vmem:[%s12079_s0 + $0x8] sm:$0xff] }
  0x29   :  { %350 = vmatprep.mubr.f32.mxu1 %v12092_v1  ;;  %6517 = vset.pattern.permute.xlu1 %v7813_v0  ;;  %v85_v6 = vld [vmem:[#allocation2 + $0x68] sm:$0xff]  ;;  %v84_v7 = vld [vmem:[#allocation2 + $0x60] sm:$0xff]  ;;  %v83_v9 = vld [vmem:[#allocation2 + $0x58] sm:$0xff] }
  0x2a   :  { %6257 = vmatprep.mubr.msk.f32.mxu0 %vm7815_vm0, %v12092_v1  ;;  %67 = vperm.xlu0 %6516, %v65_v2   ;;  %v6051_v8 = vld [vmem:[%s12079_s0 + $0x20] sm:$0xff]  ;;  %v82_v10 = vld [vmem:[#allocation2 + $0x50] sm:$0xff]  ;;  %v283_v11 = vld [vmem:[#allocation6 + $0x1e8] sm:$0xff] }
  0x2b   :  { %6226 = vmatpush3.msra.mxu0 %v87_v3  ;;  %v282_v12 = vld [vmem:[#allocation6 + $0x1e0] sm:$0xff]  ;;  %v6069_v13 = vld [vmem:[%s12079_s0 + $0x30] sm:$0xff]  ;;  %286 = vmatprep.subr.mxu1 %v283_v11  ;;  %v279_v14 = vld [vmem:[#allocation6 + $0x1c8] sm:$0xff] }
  0x2c   :  { %6227 = vmatprep.subr.mxu0 %v12092_v1  ;;  %v81_v15 = vld [vmem:[#allocation2 + $0x48] sm:$0xff]  ;;  %287 = vmatpush1.msra.mxu1 %v282_v12  ;;  %v278_v16 = vld [vmem:[#allocation6 + $0x1c0] sm:$0xff]  ;;  %v79_v21 = vld [vmem:[#allocation2 + $0x38] sm:$0xff] }
  0x2d   :  { %6228 = vmatpush3.msra.mxu0 %v86_v4  ;;  %288 = vmatprep.subr.mxu1 %v279_v14  ;;  %v275_v17 = vld [vmem:[#allocation6 + $0x1a8] sm:$0xff]  ;;  %v80_v18 = vld [vmem:[#allocation2 + $0x40] sm:$0xff]  ;;  %v78_v24 = vld [vmem:[#allocation2 + $0x30] sm:$0xff] }
  0x2e   :  { %1088 = vperm.xlu0 %6516, %v6024_v5   ;;  %6229 = vmatprep.subr.mxu0 %v12092_v1  ;;  %v274_v19 = vld [vmem:[#allocation6 + $0x1a0] sm:$0xff]  ;;  %v271_v20 = vld [vmem:[#allocation6 + $0x188] sm:$0xff]  ;;  %v75_v33 = vld [vmem:[#allocation2 + $0x18] sm:$0xff] }
  0x2f   :  { %6230 = vmatpush3.msra.mxu0 %v85_v6  ;;  %289 = vmatpush1.msra.mxu1 %v278_v16  ;;  %v270_v22 = vld [vmem:[#allocation6 + $0x180] sm:$0xff]  ;;  %v267_v23 = vld [vmem:[#allocation6 + $0x168] sm:$0xff]  ;;  %v74_v36 = vld [vmem:[#allocation2 + $0x10] sm:$0xff] }
  0x30   :  { %6231 = vmatprep.subr.mxu0 %v12092_v1  ;;  %290 = vmatprep.subr.mxu1 %v275_v17  ;;  %v266_v25 = vld [vmem:[#allocation6 + $0x160] sm:$0xff]  ;;  %v263_v26 = vld [vmem:[#allocation6 + $0x148] sm:$0xff]  ;;  %v285_v44 = vld [vmem:[#allocation6 + $0x1f8] sm:$0xff] }
  0x31   :  { %6232 = vmatpush3.msra.mxu0 %v84_v7  ;;  %291 = vmatpush1.msra.mxu1 %v274_v19  ;;  %v77_v27 = vld [vmem:[#allocation2 + $0x28] sm:$0xff]  ;;  %v262_v28 = vld [vmem:[#allocation6 + $0x140] sm:$0xff] }
  0x32   :  { %3194 = vperm.xlu0 %6516, %v6051_v8   ;;  %6233 = vmatprep.subr.mxu0 %v12092_v1  ;;  %v259_v29 = vld [vmem:[#allocation6 + $0x128] sm:$0xff]  ;;  %v76_v30 = vld [vmem:[#allocation2 + $0x20] sm:$0xff] }
  0x33   :  { %6234 = vmatpush3.msra.mxu0 %v83_v9  ;;  %292 = vmatprep.subr.mxu1 %v271_v20  ;;  %v258_v31 = vld [vmem:[#allocation6 + $0x120] sm:$0xff]  ;;  %v255_v32 = vld [vmem:[#allocation6 + $0x108] sm:$0xff] }
  0x34   :  { %6235 = vmatprep.subr.mxu0 %v12092_v1  ;;  %293 = vmatpush1.msra.mxu1 %v270_v22  ;;  %v254_v34 = vld [vmem:[#allocation6 + $0x100] sm:$0xff]  ;;  %v251_v35 = vld [vmem:[#allocation6 + $0xe8] sm:$0xff] }
  0x35   :  { %6236 = vmatpush3.msra.mxu0 %v82_v10  ;;  %294 = vmatprep.subr.mxu1 %v267_v23  ;;  %v250_v37 = vld [vmem:[#allocation6 + $0xe0] sm:$0xff]  ;;  %v247_v38 = vld [vmem:[#allocation6 + $0xc8] sm:$0xff]  ;;  %v12088_v23 = vlaneseq }
  0x36   :  { %4598 = vperm.xlu0 %6516, %v6069_v13   ;;  %6237 = vmatprep.subr.mxu0 %v12092_v1  ;;  %v73_v39 = vld [vmem:[#allocation2 + $0x8] sm:$0xff]  ;;  %v246_v40 = vld [vmem:[#allocation6 + $0xc0] sm:$0xff] }
  0x37   :  { %6238 = vmatpush3.msra.mxu0 %v81_v15  ;;  %295 = vmatpush1.msra.mxu1 %v266_v25  ;;  %v243_v41 = vld [vmem:[#allocation6 + $0xa8] sm:$0xff]  ;;  %v72_v42 = vld [vmem:[#allocation2] sm:$0xff] }
  0x38   :  { %6239 = vmatprep.subr.mxu0 %v12092_v1  ;;  %296 = vmatprep.subr.mxu1 %v263_v26  ;;  %v242_v43 = vld [vmem:[#allocation6 + $0xa0] sm:$0xff]  ;;  %v239_v45 = vld [vmem:[#allocation6 + $0x88] sm:$0xff]  ;;  %v284_v26 = vld [vmem:[#allocation6 + $0x1f0] sm:$0xff] }
  0x39   :  { %6240 = vmatpush3.msra.mxu0 %v80_v18  ;;  %297 = vmatpush1.msra.mxu1 %v262_v28  ;;  %v238_v46 = vld [vmem:[#allocation6 + $0x80] sm:$0xff]  ;;  %v235_v47 = vld [vmem:[#allocation6 + $0x68] sm:$0xff]  ;;  %v12086_v28 = vmov 1.0  }
  0x3a   :  { %6241 = vmatprep.subr.mxu0 %v12092_v1  ;;  %298 = vmatprep.subr.mxu1 %v259_v29  ;;  %v234_v48 = vld [vmem:[#allocation6 + $0x60] sm:$0xff]  ;;  %v231_v49 = vld [vmem:[#allocation6 + $0x48] sm:$0xff]  ;;  %v280_v29 = vld [vmem:[#allocation6 + $0x1d0] sm:$0xff] }
  0x3b   :  { %6242 = vmatpush3.msra.mxu0 %v79_v21  ;;  %299 = vmatpush1.msra.mxu1 %v258_v31  ;;  %v230_v50 = vld [vmem:[#allocation6 + $0x40] sm:$0xff]  ;;  %v227_v51 = vld [vmem:[#allocation6 + $0x28] sm:$0xff]  ;;  %v276_v31 = vld [vmem:[#allocation6 + $0x1b0] sm:$0xff] }
  0x3c   :  { %6243 = vmatprep.subr.mxu0 %v12092_v1  ;;  %300 = vmatprep.subr.mxu1 %v255_v32  ;;  %v226_v52 = vld [vmem:[#allocation6 + $0x20] sm:$0xff]  ;;  %v223_v53 = vld [vmem:[#allocation6 + $0x8] sm:$0xff]  ;;  %v273_v32 = vld [vmem:[#allocation6 + $0x198] sm:$0xff] }
  0x3d   :  { %6244 = vmatpush3.msra.mxu0 %v78_v24  ;;  %301 = vmatpush1.msra.mxu1 %v254_v34  ;;  %v222_v54 = vld [vmem:[#allocation6] sm:$0xff]  ;;  %v219_v55 = vld [vmem:[#allocation4 + $0x1e8] sm:$0xff]  ;;  %v7895_v24 = vand.u32 127, %v12088_v23  ;;  %v269_v34 = vld [vmem:[#allocation6 + $0x178] sm:$0xff] }
  0x3e   :  { %6245 = vmatprep.subr.mxu0 %v12092_v1  ;;  %302 = vmatprep.subr.mxu1 %v251_v35  ;;  %v218_v56 = vld [vmem:[#allocation4 + $0x1e0] sm:$0xff]  ;;  %v215_v57 = vld [vmem:[#allocation4 + $0x1c8] sm:$0xff]  ;;  %v268_v35 = vld [vmem:[#allocation6 + $0x170] sm:$0xff] }
  0x3f   :  { %6246 = vmatpush3.msra.mxu0 %v77_v27  ;;  %303 = vmatpush1.msra.mxu1 %v250_v37  ;;  %v214_v58 = vld [vmem:[#allocation4 + $0x1c0] sm:$0xff]  ;;  %v211_v59 = vld [vmem:[#allocation4 + $0x1a8] sm:$0xff]  ;;  %12810 = vst [vmem:[#allocation9_spill] sm:$0xff] %v7895_v24  ;;  %v281_v27 = vld [vmem:[#allocation6 + $0x1d8] sm:$0xff] }
  0x40   :  { %6247 = vmatprep.subr.mxu0 %v12092_v1  ;;  %304 = vmatprep.subr.mxu1 %v247_v38  ;;  %v210_v60 = vld [vmem:[#allocation4 + $0x1a0] sm:$0xff]  ;;  %v207_v61 = vld [vmem:[#allocation4 + $0x188] sm:$0xff]  ;;  %v264_v37 = vld [vmem:[#allocation6 + $0x150] sm:$0xff] }
  0x41   :  { %6248 = vmatpush3.msra.mxu0 %v76_v30  ;;  %305 = vmatpush1.msra.mxu1 %v246_v40  ;;  %v206_v62 = vld [vmem:[#allocation4 + $0x180] sm:$0xff]  ;;  %v203_v63 = vld [vmem:[#allocation4 + $0x168] sm:$0xff]  ;;  %v277_v30 = vld [vmem:[#allocation6 + $0x1b8] sm:$0xff] }
  0x42   :  { %6249 = vmatprep.subr.mxu0 %v12092_v1  ;;  %306 = vmatprep.subr.mxu1 %v243_v41  ;;  %v202_v0 = vld [vmem:[#allocation4 + $0x160] sm:$0xff]  ;;  %v199_v2 = vld [vmem:[#allocation4 + $0x148] sm:$0xff]  ;;  %v261_v38 = vld [vmem:[#allocation6 + $0x138] sm:$0xff] }
  0x43   :  { %6250 = vmatpush3.msra.mxu0 %v75_v33  ;;  %307 = vmatpush1.msra.mxu1 %v242_v43  ;;  %v198_v3 = vld [vmem:[#allocation4 + $0x140] sm:$0xff]  ;;  %v195_v4 = vld [vmem:[#allocation4 + $0x128] sm:$0xff]  ;;  %v272_v33 = vld [vmem:[#allocation6 + $0x190] sm:$0xff] }
  0x44   :  { %6251 = vmatprep.subr.mxu0 %v12092_v1  ;;  %308 = vmatprep.subr.mxu1 %v239_v45  ;;  %v194_v5 = vld [vmem:[#allocation4 + $0x120] sm:$0xff]  ;;  %v191_v6 = vld [vmem:[#allocation4 + $0x108] sm:$0xff]  ;;  %v257_v40 = vld [vmem:[#allocation6 + $0x118] sm:$0xff] }
  0x45   :  { %6252 = vmatpush3.msra.mxu0 %v74_v36  ;;  %309 = vmatpush1.msra.mxu1 %v238_v46  ;;  %v190_v7 = vld [vmem:[#allocation4 + $0x100] sm:$0xff]  ;;  %v187_v8 = vld [vmem:[#allocation4 + $0xe8] sm:$0xff]  ;;  %v265_v36 = vld [vmem:[#allocation6 + $0x158] sm:$0xff] }
  0x46   :  { %6253 = vmatprep.subr.mxu0 %v12092_v1  ;;  %310 = vmatprep.subr.mxu1 %v235_v47  ;;  %v186_v9 = vld [vmem:[#allocation4 + $0xe0] sm:$0xff]  ;;  %v183_v10 = vld [vmem:[#allocation4 + $0xc8] sm:$0xff]  ;;  %v256_v41 = vld [vmem:[#allocation6 + $0x110] sm:$0xff] }
  0x47   :  { %6254 = vmatpush3.msra.mxu0 %v73_v39  ;;  %311 = vmatpush1.msra.mxu1 %v234_v48  ;;  %v182_v11 = vld [vmem:[#allocation4 + $0xc0] sm:$0xff]  ;;  %v179_v12 = vld [vmem:[#allocation4 + $0xa8] sm:$0xff]  ;;  %v260_v39 = vld [vmem:[#allocation6 + $0x130] sm:$0xff] }
  0x48   :  { %6255 = vmatprep.subr.mxu0 %v12092_v1  ;;  %312 = vmatprep.subr.mxu1 %v231_v49  ;;  %v178_v13 = vld [vmem:[#allocation4 + $0xa0] sm:$0xff]  ;;  %v175_v14 = vld [vmem:[#allocation4 + $0x88] sm:$0xff]  ;;  %v252_v43 = vld [vmem:[#allocation6 + $0xf0] sm:$0xff] }
  0x49   :  { %6256 = vmatpush3.msra.mxu0 %v72_v42  ;;  %313 = vmatpush1.msra.mxu1 %v230_v50  ;;  %v174_v15 = vld [vmem:[#allocation4 + $0x80] sm:$0xff]  ;;  %v171_v16 = vld [vmem:[#allocation4 + $0x68] sm:$0xff]  ;;  %v253_v42 = vld [vmem:[#allocation6 + $0xf8] sm:$0xff] }
  0x4a   :  { %357 = vmatprep.subr.mxu0 %v285_v44  ;;  %314 = vmatprep.subr.mxu1 %v227_v51  ;;  %v170_v17 = vld [vmem:[#allocation4 + $0x60] sm:$0xff]  ;;  %v167_v18 = vld [vmem:[#allocation4 + $0x48] sm:$0xff]  ;;  %v249_v44 = vld [vmem:[#allocation6 + $0xd8] sm:$0xff] }
  0x4b   :  { %315 = vmatpush1.msra.mxu1 %v226_v52  ;;  %v166_v19 = vld [vmem:[#allocation4 + $0x40] sm:$0xff]  ;;  %v163_v20 = vld [vmem:[#allocation4 + $0x28] sm:$0xff]  ;;  %v248_v45 = vld [vmem:[#allocation6 + $0xd0] sm:$0xff] }
  0x4c   :  { %316 = vmatprep.subr.mxu1 %v223_v53  ;;  %v162_v21 = vld [vmem:[#allocation4 + $0x20] sm:$0xff]  ;;  %v159_v22 = vld [vmem:[#allocation4 + $0x8] sm:$0xff]  ;;  %v245_v46 = vld [vmem:[#allocation6 + $0xb8] sm:$0xff] }
  0x4d   :  { %317 = vmatpush1.msra.mxu1 %v222_v54  ;;  %v244_v47 = vld [vmem:[#allocation6 + $0xb0] sm:$0xff]  ;;  %v241_v48 = vld [vmem:[#allocation6 + $0x98] sm:$0xff] }
  0x4e   :  { %351 = vmatmul.mubr.f32.vlgmr.msra.gmra.mxu1 %v12092_v1  ;;  %428 = vmatprep.subr.mxu1 %v219_v55  ;;  %v240_v49 = vld [vmem:[#allocation6 + $0x90] sm:$0xff]  ;;  %v237_v50 = vld [vmem:[#allocation6 + $0x78] sm:$0xff] }
  0x4f   :  { %429 = vmatpush1.msra.mxu1 %v218_v56  ;;  %492 = vmatprep.mubr.f32.mxu1 %v12092_v1  ;;  %v236_v51 = vld [vmem:[#allocation6 + $0x70] sm:$0xff]  ;;  %v233_v52 = vld [vmem:[#allocation6 + $0x58] sm:$0xff] }
  0x50   :  { %430 = vmatprep.subr.mxu1 %v215_v57  ;;  %v232_v53 = vld [vmem:[#allocation6 + $0x50] sm:$0xff]  ;;  %v229_v54 = vld [vmem:[#allocation6 + $0x38] sm:$0xff] }
  0x51   :  { %431 = vmatpush1.msra.mxu1 %v214_v58  ;;  %v228_v55 = vld [vmem:[#allocation6 + $0x30] sm:$0xff]  ;;  %v225_v56 = vld [vmem:[#allocation6 + $0x18] sm:$0xff] }
  0x52   :  { %432 = vmatprep.subr.mxu1 %v211_v59  ;;  %v224_v57 = vld [vmem:[#allocation6 + $0x10] sm:$0xff]  ;;  %v221_v58 = vld [vmem:[#allocation4 + $0x1f8] sm:$0xff] }
  0x53   :  { %433 = vmatpush1.msra.mxu1 %v210_v60  ;;  %v220_v59 = vld [vmem:[#allocation4 + $0x1f0] sm:$0xff]  ;;  %v217_v60 = vld [vmem:[#allocation4 + $0x1d8] sm:$0xff] }
  0x54   :  { %434 = vmatprep.subr.mxu1 %v207_v61  ;;  %v216_v61 = vld [vmem:[#allocation4 + $0x1d0] sm:$0xff]  ;;  %v8087_v23 = vld [vmem:[#allocation4 + $0x3d8] sm:$0xff] }
  0x55   :  { %435 = vmatpush1.msra.mxu1 %v206_v62  ;;  %v213_v62 = vld [vmem:[#allocation4 + $0x1b8] sm:$0xff]  ;;  %12831 = vst [vmem:[#allocation30_spill] sm:$0xff] %v8087_v23 }
  0x56   :  { %436 = vmatprep.subr.mxu1 %v203_v63  ;;  %v212_v63 = vld [vmem:[#allocation4 + $0x1b0] sm:$0xff] }
  0x57   :  { %437 = vmatpush1.msra.mxu1 %v202_v0  ;;  %v209_v0 = vld [vmem:[#allocation4 + $0x198] sm:$0xff] }
  0x58   :  { %438 = vmatprep.subr.mxu1 %v199_v2  ;;  %v208_v2 = vld [vmem:[#allocation4 + $0x190] sm:$0xff] }
  0x59   :  { %439 = vmatpush1.msra.mxu1 %v198_v3  ;;  %v205_v3 = vld [vmem:[#allocation4 + $0x178] sm:$0xff] }
  0x5a   :  { %440 = vmatprep.subr.mxu1 %v195_v4  ;;  %v204_v4 = vld [vmem:[#allocation4 + $0x170] sm:$0xff] }
  0x5b   :  { %441 = vmatpush1.msra.mxu1 %v194_v5  ;;  %v201_v5 = vld [vmem:[#allocation4 + $0x158] sm:$0xff] }
  0x5c   :  { %442 = vmatprep.subr.mxu1 %v191_v6  ;;  %v200_v6 = vld [vmem:[#allocation4 + $0x150] sm:$0xff] }
  0x5d   :  { %443 = vmatpush1.msra.mxu1 %v190_v7  ;;  %v197_v7 = vld [vmem:[#allocation4 + $0x138] sm:$0xff] }
  0x5e   :  { %444 = vmatprep.subr.mxu1 %v187_v8  ;;  %v196_v8 = vld [vmem:[#allocation4 + $0x130] sm:$0xff] }
  0x5f   :  { %445 = vmatpush1.msra.mxu1 %v186_v9  ;;  %v193_v9 = vld [vmem:[#allocation4 + $0x118] sm:$0xff] }
  0x60   :  { %446 = vmatprep.subr.mxu1 %v183_v10  ;;  %v192_v10 = vld [vmem:[#allocation4 + $0x110] sm:$0xff] }
  0x61   :  { %447 = vmatpush1.msra.mxu1 %v182_v11  ;;  %v7902_v11 = vld [vmem:[#allocation4 + $0xf8] sm:$0xff] }
  0x62   :  { %448 = vmatprep.subr.mxu1 %v179_v12  ;;  %v7904_v12 = vld [vmem:[#allocation4 + $0xf0] sm:$0xff] }
  0x63   :  { %449 = vmatpush1.msra.mxu1 %v178_v13  ;;  %v7906_v13 = vld [vmem:[#allocation4 + $0xd8] sm:$0xff] }
  0x64   :  { %450 = vmatprep.subr.mxu1 %v175_v14  ;;  %v7909_v14 = vld [vmem:[#allocation4 + $0xd0] sm:$0xff] }
  0x65   :  { %451 = vmatpush1.msra.mxu1 %v174_v15  ;;  %v7912_v15 = vld [vmem:[#allocation4 + $0xb8] sm:$0xff] }
  0x66   :  { %452 = vmatprep.subr.mxu1 %v171_v16  ;;  %v7915_v16 = vld [vmem:[#allocation4 + $0xb0] sm:$0xff] }
  0x67   :  { %453 = vmatpush1.msra.mxu1 %v170_v17  ;;  %v7918_v17 = vld [vmem:[#allocation4 + $0x98] sm:$0xff] }
  0x68   :  { %454 = vmatprep.subr.mxu1 %v167_v18  ;;  %v7921_v18 = vld [vmem:[#allocation4 + $0x90] sm:$0xff] }
  0x69   :  { %455 = vmatpush1.msra.mxu1 %v166_v19  ;;  %v7924_v19 = vld [vmem:[#allocation4 + $0x78] sm:$0xff] }
  0x6a   :  { %456 = vmatprep.subr.mxu1 %v163_v20  ;;  %v7927_v20 = vld [vmem:[#allocation4 + $0x70] sm:$0xff] }
  0x6b   :  { %457 = vmatpush1.msra.mxu1 %v162_v21  ;;  %v7930_v21 = vld [vmem:[#allocation4 + $0x58] sm:$0xff] }
  0x6c   :  { %458 = vmatprep.subr.mxu1 %v159_v22  ;;  %v7933_v22 = vld [vmem:[#allocation4 + $0x50] sm:$0xff] }
  0xa5   :  { %v68_v25 = vpop.permute.xlu0 %67 }
  0xa6   :  { %vm69_vm1 = vcmp.eq.s32.totalorder %v7895_v24, %v68_v25  ;;  %v7936_v25 = vld [vmem:[#allocation4 + $0x38] sm:$0xff] }
  0xa7   :  { %6258 = vmatmul.mubr.msk.f32.vlgmr.msra.gmra.mxu0 %vm69_vm1, %v12086_v28  ;;  %v8085_v28 = vld [vmem:[#allocation4 + $0x3c8] sm:$0xff] }
  0xa8   :  { %358 = vmatpush1.msra.mxu0 %v284_v26  ;;  %421 = vmatprep.mubr.f32.mxu0 %v12092_v1  ;;  %v7939_v26 = vld [vmem:[#allocation4 + $0x30] sm:$0xff]  ;;  %12830 = vst [vmem:[#allocation29_spill] sm:$0xff] %v8085_v28 }
  0xa9   :  { %359 = vmatprep.subr.mxu0 %v281_v27  ;;  %v7942_v27 = vld [vmem:[#allocation4 + $0x18] sm:$0xff] }
  0xaa   :  { %360 = vmatpush1.msra.mxu0 %v280_v29  ;;  %v7947_v29 = vld [vmem:[#allocation4] sm:$0xff] }
  0xab   :  { %361 = vmatprep.subr.mxu0 %v277_v30  ;;  %v7949_v30 = vld [vmem:[#allocation4 + $0x10] sm:$0xff]  ;;  %459 = vmatpush1.msra.mxu1 %v7947_v29 }
  0xac   :  { %362 = vmatpush1.msra.mxu0 %v276_v31  ;;  %v7953_v31 = vld [vmem:[#allocation6 + $0x3e8] sm:$0xff] }
  0xad   :  { %363 = vmatprep.subr.mxu0 %v273_v32  ;;  %v7955_v32 = vld [vmem:[#allocation6 + $0x3f8] sm:$0xff]  ;;  %750 = vmatprep.subr.mxu1 %v7953_v31 }
  0xae   :  { %364 = vmatpush1.msra.mxu0 %v272_v33  ;;  %v746_v33 = vld [vmem:[#allocation6 + $0x3e0] sm:$0xff] }
  0xaf   :  { %365 = vmatprep.subr.mxu0 %v269_v34  ;;  %v748_v34 = vld [vmem:[#allocation6 + $0x3f0] sm:$0xff] }
  0xb0   :  { %366 = vmatpush1.msra.mxu0 %v268_v35 }
  0xb1   :  { %367 = vmatprep.subr.mxu0 %v265_v36  ;;  %v743_v36 = vld [vmem:[#allocation6 + $0x3c8] sm:$0xff] }
  0xb2   :  { %368 = vmatpush1.msra.mxu0 %v264_v37  ;;  %v745_v37 = vld [vmem:[#allocation6 + $0x3d8] sm:$0xff] }
  0xb3   :  { %369 = vmatprep.subr.mxu0 %v261_v38  ;;  %v742_v38 = vld [vmem:[#allocation6 + $0x3c0] sm:$0xff] }
  0xb4   :  { %370 = vmatpush1.msra.mxu0 %v260_v39  ;;  %v744_v39 = vld [vmem:[#allocation6 + $0x3d0] sm:$0xff] }
  0xb5   :  { %371 = vmatprep.subr.mxu0 %v257_v40 }
  0xb6   :  { %372 = vmatpush1.msra.mxu0 %v256_v41  ;;  %v739_v41 = vld [vmem:[#allocation6 + $0x3a8] sm:$0xff] }
  0xb7   :  { %373 = vmatprep.subr.mxu0 %v253_v42  ;;  %v741_v42 = vld [vmem:[#allocation6 + $0x3b8] sm:$0xff] }
  0xb8   :  { %374 = vmatpush1.msra.mxu0 %v252_v43  ;;  %v738_v43 = vld [vmem:[#allocation6 + $0x3a0] sm:$0xff] }
  0xb9   :  { %375 = vmatprep.subr.mxu0 %v249_v44  ;;  %v740_v44 = vld [vmem:[#allocation6 + $0x3b0] sm:$0xff] }
  0xba   :  { %376 = vmatpush1.msra.mxu0 %v248_v45  ;;  %v735_v45 = vld [vmem:[#allocation6 + $0x388] sm:$0xff] }
  0xbb   :  { %377 = vmatprep.subr.mxu0 %v245_v46  ;;  %v734_v46 = vld [vmem:[#allocation6 + $0x380] sm:$0xff] }
  0xbc   :  { %378 = vmatpush1.msra.mxu0 %v244_v47  ;;  %v737_v47 = vld [vmem:[#allocation6 + $0x398] sm:$0xff] }
  0xbd   :  { %379 = vmatprep.subr.mxu0 %v241_v48  ;;  %v731_v48 = vld [vmem:[#allocation6 + $0x368] sm:$0xff] }
  0xbe   :  { %380 = vmatpush1.msra.mxu0 %v240_v49  ;;  %v736_v49 = vld [vmem:[#allocation6 + $0x390] sm:$0xff] }
  0xbf   :  { %381 = vmatprep.subr.mxu0 %v237_v50  ;;  %v730_v50 = vld [vmem:[#allocation6 + $0x360] sm:$0xff] }
  0xc0   :  { %382 = vmatpush1.msra.mxu0 %v236_v51  ;;  %v733_v51 = vld [vmem:[#allocation6 + $0x378] sm:$0xff] }
  0xc1   :  { %383 = vmatprep.subr.mxu0 %v233_v52  ;;  %v727_v52 = vld [vmem:[#allocation6 + $0x348] sm:$0xff] }
  0xc2   :  { %384 = vmatpush1.msra.mxu0 %v232_v53  ;;  %v732_v53 = vld [vmem:[#allocation6 + $0x370] sm:$0xff] }
  0xc3   :  { %385 = vmatprep.subr.mxu0 %v229_v54  ;;  %v726_v54 = vld [vmem:[#allocation6 + $0x340] sm:$0xff] }
  0xc4   :  { %386 = vmatpush1.msra.mxu0 %v228_v55  ;;  %v729_v55 = vld [vmem:[#allocation6 + $0x358] sm:$0xff] }
  0xc5   :  { %387 = vmatprep.subr.mxu0 %v225_v56  ;;  %v723_v56 = vld [vmem:[#allocation6 + $0x328] sm:$0xff] }
  0xc6   :  { %388 = vmatpush1.msra.mxu0 %v224_v57  ;;  %v728_v57 = vld [vmem:[#allocation6 + $0x350] sm:$0xff] }
  0xc7   :  { %499 = vmatprep.subr.mxu0 %v221_v58  ;;  %422 = vmatmul.mubr.f32.vlgmr.msra.gmra.mxu0 %v12092_v1  ;;  %v722_v58 = vld [vmem:[#allocation6 + $0x320] sm:$0xff] }
  0xc8   :  { %500 = vmatpush1.msra.mxu0 %v220_v59  ;;  %563 = vmatprep.mubr.f32.mxu0 %v12092_v1  ;;  %v7961_v59 = vld [vmem:[#allocation6 + $0x338] sm:$0xff] }
  0xc9   :  { %501 = vmatprep.subr.mxu0 %v217_v60  ;;  %v719_v60 = vld [vmem:[#allocation6 + $0x308] sm:$0xff] }
  0xca   :  { %502 = vmatpush1.msra.mxu0 %v216_v61  ;;  %v7964_v61 = vld [vmem:[#allocation6 + $0x330] sm:$0xff] }
  0xcb   :  { %503 = vmatprep.subr.mxu0 %v213_v62  ;;  %v7967_v62 = vld [vmem:[#allocation6 + $0x300] sm:$0xff] }
  0xcc   :  { %504 = vmatpush1.msra.mxu0 %v212_v63  ;;  %v7969_v63 = vld [vmem:[#allocation6 + $0x318] sm:$0xff] }
  0xcd   :  { %505 = vmatprep.subr.mxu0 %v209_v0  ;;  %v7973_v0 = vld [vmem:[#allocation6 + $0x2e8] sm:$0xff] }
  0xce   :  { %506 = vmatpush1.msra.mxu0 %v208_v2  ;;  %v7975_v2 = vld [vmem:[#allocation6 + $0x310] sm:$0xff] }
  0xcf   :  { %507 = vmatprep.subr.mxu0 %v205_v3  ;;  %v7979_v3 = vld [vmem:[#allocation6 + $0x2e0] sm:$0xff] }
  0xd0   :  { %508 = vmatpush1.msra.mxu0 %v204_v4  ;;  %v7981_v4 = vld [vmem:[#allocation6 + $0x2f8] sm:$0xff] }
  0xd1   :  { %509 = vmatprep.subr.mxu0 %v201_v5  ;;  %v7985_v5 = vld [vmem:[#allocation6 + $0x2c8] sm:$0xff] }
  0xd2   :  { %510 = vmatpush1.msra.mxu0 %v200_v6  ;;  %v7987_v6 = vld [vmem:[#allocation6 + $0x2f0] sm:$0xff] }
  0xd3   :  { %511 = vmatprep.subr.mxu0 %v197_v7  ;;  %v7991_v7 = vld [vmem:[#allocation6 + $0x2c0] sm:$0xff] }
  0xd4   :  { %512 = vmatpush1.msra.mxu0 %v196_v8  ;;  %v7993_v8 = vld [vmem:[#allocation6 + $0x2d8] sm:$0xff] }
  0xd5   :  { %513 = vmatprep.subr.mxu0 %v193_v9  ;;  %v7997_v9 = vld [vmem:[#allocation6 + $0x2a8] sm:$0xff] }
  0xd6   :  { %514 = vmatpush1.msra.mxu0 %v192_v10  ;;  %v7999_v10 = vld [vmem:[#allocation6 + $0x2d0] sm:$0xff] }
  0xd7   :  { %515 = vmatprep.subr.mxu0 %v7902_v11 }
  0xd8   :  { %516 = vmatpush1.msra.mxu0 %v7904_v12 }
  0xd9   :  { %517 = vmatprep.subr.mxu0 %v7906_v13 }
  0xda   :  { %518 = vmatpush1.msra.mxu0 %v7909_v14 }
  0xdb   :  { %519 = vmatprep.subr.mxu0 %v7912_v15 }
  0xdc   :  { %520 = vmatpush1.msra.mxu0 %v7915_v16 }
  0xdd   :  { %521 = vmatprep.subr.mxu0 %v7918_v17 }
  0xde   :  { %522 = vmatpush1.msra.mxu0 %v7921_v18 }
  0xdf   :  { %523 = vmatprep.subr.mxu0 %v7924_v19 }
  0xe0   :  { %524 = vmatpush1.msra.mxu0 %v7927_v20 }
  0xe1   :  { %525 = vmatprep.subr.mxu0 %v7930_v21 }
  0xe2   :  { %526 = vmatpush1.msra.mxu0 %v7933_v22 }
  0xe3   :  { %527 = vmatprep.subr.mxu0 %v7936_v25 }
  0xe4   :  { %528 = vmatpush1.msra.mxu0 %v7939_v26 }
  0xe5   :  { %529 = vmatprep.subr.mxu0 %v7942_v27 }
  0xe6   :  { %530 = vmatpush1.msra.mxu0 %v7949_v30 }
  0xe7   :  { %821 = vmatprep.subr.mxu0 %v7955_v32 }
 0x167   :  { %v154_v35 = vpop.f32.mrf.mxu0 }
 0x168   :  { %493 = vmatmul.mubr.f32.vlgmr.msra.gmra.mxu1 %v154_v35  ;;  %564 = vmatmul.mubr.f32.vlgmr.msra.gmra.mxu0 %v154_v35  ;;  %v8009_v35 = vld [vmem:[#allocation6 + $0x288] sm:$0xff] }
 0x169   :  { %v6259_v40 = vpop.f32.mrf.mxu0  ;;  %751 = vmatpush1.msra.mxu1 %v746_v33  ;;  %822 = vmatpush1.msra.mxu0 %v748_v34  ;;  %v8003_v33 = vld [vmem:[#allocation6 + $0x2a0] sm:$0xff]  ;;  %v8005_v34 = vld [vmem:[#allocation6 + $0x2b8] sm:$0xff] }
 0x16a   :  { %752 = vmatprep.subr.mxu1 %v743_v36  ;;  %823 = vmatprep.subr.mxu0 %v745_v37  ;;  %v8011_v36 = vld [vmem:[#allocation6 + $0x2b0] sm:$0xff]  ;;  %v8015_v37 = vld [vmem:[#allocation6 + $0x280] sm:$0xff] }
 0x16b   :  { %753 = vmatpush1.msra.mxu1 %v742_v38  ;;  %824 = vmatpush1.msra.mxu0 %v744_v39  ;;  %v8017_v38 = vld [vmem:[#allocation6 + $0x298] sm:$0xff]  ;;  %v8021_v39 = vld [vmem:[#allocation6 + $0x268] sm:$0xff]  ;;  %v8023_v40 = vld [vmem:[#allocation6 + $0x290] sm:$0xff] }
 0x16c   :  { %754 = vmatprep.subr.mxu1 %v739_v41  ;;  %825 = vmatprep.subr.mxu0 %v741_v42  ;;  %v8027_v41 = vld [vmem:[#allocation6 + $0x260] sm:$0xff]  ;;  %v8029_v42 = vld [vmem:[#allocation6 + $0x278] sm:$0xff] }
 0x16d   :  { %755 = vmatpush1.msra.mxu1 %v738_v43  ;;  %826 = vmatpush1.msra.mxu0 %v740_v44  ;;  %12811 = vst [vmem:[#allocation10_spill] sm:$0xff] %v8027_v41  ;;  %12812 = vst [vmem:[#allocation11_spill] sm:$0xff] %v8029_v42  ;;  %v8033_v43 = vld [vmem:[#allocation6 + $0x248] sm:$0xff]  ;;  %v8035_v44 = vld [vmem:[#allocation6 + $0x270] sm:$0xff] }
 0x16e   :  { %756 = vmatprep.subr.mxu1 %v735_v45  ;;  %814 = vmatprep.mubr.f32.mxu1 %v12092_v1  ;;  %12813 = vst [vmem:[#allocation12_spill] sm:$0xff] %v8033_v43  ;;  %12814 = vst [vmem:[#allocation13_spill] sm:$0xff] %v8035_v44  ;;  %v8039_v45 = vld [vmem:[#allocation6 + $0x240] sm:$0xff] }
 0x16f   :  { %885 = vmatprep.mubr.f32.mxu0 %v12092_v1  ;;  %757 = vmatpush1.msra.mxu1 %v734_v46  ;;  %12815 = vst [vmem:[#allocation14_spill] sm:$0xff] %v8039_v45  ;;  %v8041_v46 = vld [vmem:[#allocation6 + $0x258] sm:$0xff] }
 0x170   :  { %827 = vmatprep.subr.mxu0 %v737_v47  ;;  %758 = vmatprep.subr.mxu1 %v731_v48  ;;  %12816 = vst [vmem:[#allocation15_spill] sm:$0xff] %v8041_v46  ;;  %v8045_v47 = vld [vmem:[#allocation6 + $0x228] sm:$0xff]  ;;  %v8047_v48 = vld [vmem:[#allocation6 + $0x250] sm:$0xff] }
 0x171   :  { %828 = vmatpush1.msra.mxu0 %v736_v49  ;;  %759 = vmatpush1.msra.mxu1 %v730_v50  ;;  %12817 = vst [vmem:[#allocation16_spill] sm:$0xff] %v8045_v47  ;;  %12818 = vst [vmem:[#allocation17_spill] sm:$0xff] %v8047_v48  ;;  %v8051_v49 = vld [vmem:[#allocation6 + $0x220] sm:$0xff]  ;;  %v8053_v50 = vld [vmem:[#allocation6 + $0x238] sm:$0xff] }
 0x172   :  { %829 = vmatprep.subr.mxu0 %v733_v51  ;;  %760 = vmatprep.subr.mxu1 %v727_v52  ;;  %12819 = vst [vmem:[#allocation18_spill] sm:$0xff] %v8051_v49  ;;  %12820 = vst [vmem:[#allocation19_spill] sm:$0xff] %v8053_v50  ;;  %v8057_v51 = vld [vmem:[#allocation6 + $0x208] sm:$0xff]  ;;  %v8059_v52 = vld [vmem:[#allocation6 + $0x230] sm:$0xff] }
 0x173   :  { %830 = vmatpush1.msra.mxu0 %v732_v53  ;;  %761 = vmatpush1.msra.mxu1 %v726_v54  ;;  %12821 = vst [vmem:[#allocation20_spill] sm:$0xff] %v8057_v51  ;;  %12822 = vst [vmem:[#allocation21_spill] sm:$0xff] %v8059_v52  ;;  %v8063_v53 = vld [vmem:[#allocation6 + $0x200] sm:$0xff]  ;;  %v8065_v54 = vld [vmem:[#allocation6 + $0x218] sm:$0xff] }
 0x174   :  { %831 = vmatprep.subr.mxu0 %v729_v55  ;;  %762 = vmatprep.subr.mxu1 %v723_v56  ;;  %12823 = vst [vmem:[#allocation22_spill] sm:$0xff] %v8063_v53  ;;  %12824 = vst [vmem:[#allocation23_spill] sm:$0xff] %v8065_v54  ;;  %v8069_v55 = vld [vmem:[#allocation6 + $0x210] sm:$0xff]  ;;  %v8073_v56 = vld [vmem:[#allocation4 + $0x3e8] sm:$0xff] }
 0x175   :  { %832 = vmatpush1.msra.mxu0 %v728_v57  ;;  %763 = vmatpush1.msra.mxu1 %v722_v58  ;;  %12825 = vst [vmem:[#allocation24_spill] sm:$0xff] %v8069_v55  ;;  %12826 = vst [vmem:[#allocation25_spill] sm:$0xff] %v8073_v56  ;;  %v8075_v57 = vld [vmem:[#allocation4 + $0x3f8] sm:$0xff]  ;;  %v8079_v58 = vld [vmem:[#allocation4 + $0x3e0] sm:$0xff] }
 0x176   :  { %833 = vmatprep.subr.mxu0 %v7961_v59  ;;  %764 = vmatprep.subr.mxu1 %v719_v60  ;;  %12827 = vst [vmem:[#allocation26_spill] sm:$0xff] %v8075_v57  ;;  %12828 = vst [vmem:[#allocation27_spill] sm:$0xff] %v8079_v58  ;;  %v8081_v60 = vld [vmem:[#allocation4 + $0x3f0] sm:$0xff] }
 0x177   :  { %834 = vmatpush1.msra.mxu0 %v7964_v61  ;;  %765 = vmatpush1.msra.mxu1 %v7967_v62  ;;  %12829 = vst [vmem:[#allocation28_spill] sm:$0xff] %v8081_v60 }
 0x178   :  { %835 = vmatprep.subr.mxu0 %v7969_v63  ;;  %766 = vmatprep.subr.mxu1 %v7973_v0 }
 0x179   :  { %836 = vmatpush1.msra.mxu0 %v7975_v2  ;;  %767 = vmatpush1.msra.mxu1 %v7979_v3 }
 0x17a   :  { %837 = vmatprep.subr.mxu0 %v7981_v4  ;;  %768 = vmatprep.subr.mxu1 %v7985_v5 }
 0x17b   :  { %838 = vmatpush1.msra.mxu0 %v7987_v6  ;;  %769 = vmatpush1.msra.mxu1 %v7991_v7 }
 0x17c   :  { %839 = vmatprep.subr.mxu0 %v7993_v8  ;;  %770 = vmatprep.subr.mxu1 %v7997_v9 }
 0x17d   :  { %840 = vmatpush1.msra.mxu0 %v7999_v10  ;;  %771 = vmatpush1.msra.mxu1 %v8003_v33 }
 0x17e   :  { %841 = vmatprep.subr.mxu0 %v8005_v34  ;;  %772 = vmatprep.subr.mxu1 %v8009_v35 }
 0x17f   :  { %842 = vmatpush1.msra.mxu0 %v8011_v36  ;;  %773 = vmatpush1.msra.mxu1 %v8015_v37 }
 0x180   :  { %843 = vmatprep.subr.mxu0 %v8017_v38  ;;  %774 = vmatprep.subr.mxu1 %v8021_v39 }
 0x181   :  { %844 = vmatpush1.msra.mxu0 %v8023_v40  ;;  %775 = vmatpush1.msra.mxu1 %v8027_v41 }
 0x182   :  { %845 = vmatprep.subr.mxu0 %v8029_v42  ;;  %776 = vmatprep.subr.mxu1 %v8033_v43 }
 0x183   :  { %846 = vmatpush1.msra.mxu0 %v8035_v44  ;;  %777 = vmatpush1.msra.mxu1 %v8039_v45 }
 0x184   :  { %847 = vmatprep.subr.mxu0 %v8041_v46  ;;  %778 = vmatprep.subr.mxu1 %v8045_v47 }
 0x185   :  { %848 = vmatpush1.msra.mxu0 %v8047_v48  ;;  %779 = vmatpush1.msra.mxu1 %v8051_v49 }
 0x186   :  { %849 = vmatprep.subr.mxu0 %v8053_v50  ;;  %780 = vmatprep.subr.mxu1 %v8057_v51  ;;  %v8211_v51 = vld [vmem:[#allocation4 + $0x290] sm:$0xff] }
 0x187   :  { %850 = vmatpush1.msra.mxu0 %v8059_v52  ;;  %781 = vmatpush1.msra.mxu1 %v8063_v53  ;;  %v8187_v53 = vld [vmem:[#allocation4 + $0x2d0] sm:$0xff]  ;;  %12873 = vst [vmem:[#allocation72_spill] sm:$0xff] %v8211_v51 }
 0x188   :  { %851 = vmatprep.subr.mxu0 %v8065_v54  ;;  %815 = vmatmul.mubr.f32.vlgmr.msra.gmra.mxu1 %v12092_v1  ;;  %12865 = vst [vmem:[#allocation64_spill] sm:$0xff] %v8187_v53  ;;  %v8195_v54 = vld [vmem:[#allocation4 + $0x2a0] sm:$0xff] }
 0x189   :  { %852 = vmatpush1.msra.mxu0 %v8069_v55  ;;  %892 = vmatprep.subr.mxu1 %v8073_v56  ;;  %v8091_v55 = vld [vmem:[#allocation4 + $0x3c0] sm:$0xff]  ;;  %v8093_v56 = vld [vmem:[#allocation4 + $0x3d0] sm:$0xff]  ;;  %12868 = vst [vmem:[#allocation67_spill] sm:$0xff] %v8195_v54 }
 0x18a   :  { %963 = vmatprep.subr.mxu0 %v8075_v57  ;;  %886 = vmatmul.mubr.f32.vlgmr.msra.gmra.mxu0 %v12092_v1  ;;  %12832 = vst [vmem:[#allocation31_spill] sm:$0xff] %v8091_v55  ;;  %12833 = vst [vmem:[#allocation32_spill] sm:$0xff] %v8093_v56  ;;  %v8097_v57 = vld [vmem:[#allocation4 + $0x3a8] sm:$0xff]  ;;  %v8099_v1 = vld [vmem:[#allocation4 + $0x3b8] sm:$0xff] }
 0x18b   :  { %893 = vmatpush1.msra.mxu1 %v8079_v58  ;;  %964 = vmatpush1.msra.mxu0 %v8081_v60  ;;  %12834 = vst [vmem:[#allocation33_spill] sm:$0xff] %v8097_v57  ;;  %12835 = vst [vmem:[#allocation34_spill] sm:$0xff] %v8099_v1  ;;  %v8103_v58 = vld [vmem:[#allocation4 + $0x3a0] sm:$0xff]  ;;  %v8105_v60 = vld [vmem:[#allocation4 + $0x3b0] sm:$0xff] }
 0x18c   :  { %894 = vmatprep.subr.mxu1 %v8085_v28  ;;  %965 = vmatprep.subr.mxu0 %v8087_v23  ;;  %12836 = vst [vmem:[#allocation35_spill] sm:$0xff] %v8103_v58  ;;  %12837 = vst [vmem:[#allocation36_spill] sm:$0xff] %v8105_v60  ;;  %v8109_v28 = vld [vmem:[#allocation4 + $0x388] sm:$0xff]  ;;  %v8111_v23 = vld [vmem:[#allocation4 + $0x398] sm:$0xff] }
 0x18d   :  { %895 = vmatpush1.msra.mxu1 %v8091_v55  ;;  %966 = vmatpush1.msra.mxu0 %v8093_v56  ;;  %12838 = vst [vmem:[#allocation37_spill] sm:$0xff] %v8109_v28  ;;  %12839 = vst [vmem:[#allocation38_spill] sm:$0xff] %v8111_v23  ;;  %v8115_v55 = vld [vmem:[#allocation4 + $0x380] sm:$0xff]  ;;  %v8117_v56 = vld [vmem:[#allocation4 + $0x390] sm:$0xff] }
 0x18e   :  { %896 = vmatprep.subr.mxu1 %v8097_v57  ;;  %967 = vmatprep.subr.mxu0 %v8099_v1  ;;  %12840 = vst [vmem:[#allocation39_spill] sm:$0xff] %v8115_v55  ;;  %12841 = vst [vmem:[#allocation40_spill] sm:$0xff] %v8117_v56  ;;  %v8121_v57 = vld [vmem:[#allocation4 + $0x368] sm:$0xff]  ;;  %v8123_v1 = vld [vmem:[#allocation4 + $0x378] sm:$0xff] }
 0x18f   :  { %897 = vmatpush1.msra.mxu1 %v8103_v58  ;;  %968 = vmatpush1.msra.mxu0 %v8105_v60  ;;  %12842 = vst [vmem:[#allocation41_spill] sm:$0xff] %v8121_v57  ;;  %12843 = vst [vmem:[#allocation42_spill] sm:$0xff] %v8123_v1  ;;  %v8127_v58 = vld [vmem:[#allocation4 + $0x360] sm:$0xff]  ;;  %v8129_v60 = vld [vmem:[#allocation4 + $0x370] sm:$0xff] }
 0x190   :  { %898 = vmatprep.subr.mxu1 %v8109_v28  ;;  %969 = vmatprep.subr.mxu0 %v8111_v23  ;;  %12844 = vst [vmem:[#allocation43_spill] sm:$0xff] %v8127_v58  ;;  %12845 = vst [vmem:[#allocation44_spill] sm:$0xff] %v8129_v60  ;;  %v8133_v28 = vld [vmem:[#allocation4 + $0x348] sm:$0xff]  ;;  %v8135_v23 = vld [vmem:[#allocation4 + $0x358] sm:$0xff] }
 0x191   :  { %899 = vmatpush1.msra.mxu1 %v8115_v55  ;;  %970 = vmatpush1.msra.mxu0 %v8117_v56  ;;  %12846 = vst [vmem:[#allocation45_spill] sm:$0xff] %v8133_v28  ;;  %12847 = vst [vmem:[#allocation46_spill] sm:$0xff] %v8135_v23  ;;  %v8139_v55 = vld [vmem:[#allocation4 + $0x340] sm:$0xff]  ;;  %v8141_v56 = vld [vmem:[#allocation4 + $0x350] sm:$0xff] }
 0x192   :  { %900 = vmatprep.subr.mxu1 %v8121_v57  ;;  %971 = vmatprep.subr.mxu0 %v8123_v1  ;;  %12848 = vst [vmem:[#allocation47_spill] sm:$0xff] %v8139_v55  ;;  %12849 = vst [vmem:[#allocation48_spill] sm:$0xff] %v8141_v56  ;;  %v8145_v57 = vld [vmem:[#allocation4 + $0x328] sm:$0xff]  ;;  %v8147_v1 = vld [vmem:[#allocation4 + $0x338] sm:$0xff] }
 0x193   :  { %901 = vmatpush1.msra.mxu1 %v8127_v58  ;;  %972 = vmatpush1.msra.mxu0 %v8129_v60  ;;  %12850 = vst [vmem:[#allocation49_spill] sm:$0xff] %v8145_v57  ;;  %12851 = vst [vmem:[#allocation50_spill] sm:$0xff] %v8147_v1  ;;  %v8151_v58 = vld [vmem:[#allocation4 + $0x320] sm:$0xff]  ;;  %v8153_v60 = vld [vmem:[#allocation4 + $0x330] sm:$0xff] }
 0x194   :  { %902 = vmatprep.subr.mxu1 %v8133_v28  ;;  %973 = vmatprep.subr.mxu0 %v8135_v23  ;;  %12852 = vst [vmem:[#allocation51_spill] sm:$0xff] %v8151_v58  ;;  %12853 = vst [vmem:[#allocation52_spill] sm:$0xff] %v8153_v60  ;;  %v8157_v28 = vld [vmem:[#allocation4 + $0x308] sm:$0xff]  ;;  %v8159_v23 = vld [vmem:[#allocation4 + $0x318] sm:$0xff] }
 0x195   :  { %903 = vmatpush1.msra.mxu1 %v8139_v55  ;;  %974 = vmatpush1.msra.mxu0 %v8141_v56  ;;  %12854 = vst [vmem:[#allocation53_spill] sm:$0xff] %v8157_v28  ;;  %12855 = vst [vmem:[#allocation54_spill] sm:$0xff] %v8159_v23  ;;  %v8163_v55 = vld [vmem:[#allocation4 + $0x300] sm:$0xff]  ;;  %v8165_v56 = vld [vmem:[#allocation4 + $0x310] sm:$0xff] }
 0x196   :  { %904 = vmatprep.subr.mxu1 %v8145_v57  ;;  %975 = vmatprep.subr.mxu0 %v8147_v1  ;;  %12856 = vst [vmem:[#allocation55_spill] sm:$0xff] %v8163_v55  ;;  %12857 = vst [vmem:[#allocation56_spill] sm:$0xff] %v8165_v56  ;;  %v8169_v57 = vld [vmem:[#allocation4 + $0x2e8] sm:$0xff]  ;;  %v8171_v1 = vld [vmem:[#allocation4 + $0x2f8] sm:$0xff] }
 0x197   :  { %905 = vmatpush1.msra.mxu1 %v8151_v58  ;;  %976 = vmatpush1.msra.mxu0 %v8153_v60  ;;  %12858 = vst [vmem:[#allocation57_spill] sm:$0xff] %v8169_v57  ;;  %12859 = vst [vmem:[#allocation58_spill] sm:$0xff] %v8171_v1  ;;  %v8175_v58 = vld [vmem:[#allocation4 + $0x2e0] sm:$0xff]  ;;  %v8177_v60 = vld [vmem:[#allocation4 + $0x2f0] sm:$0xff] }
 0x198   :  { %906 = vmatprep.subr.mxu1 %v8157_v28  ;;  %977 = vmatprep.subr.mxu0 %v8159_v23  ;;  %12860 = vst [vmem:[#allocation59_spill] sm:$0xff] %v8175_v58  ;;  %12861 = vst [vmem:[#allocation60_spill] sm:$0xff] %v8177_v60  ;;  %v8179_v28 = vld [vmem:[#allocation4 + $0x2c8] sm:$0xff]  ;;  %v8183_v23 = vld [vmem:[#allocation4 + $0x2d8] sm:$0xff] }
 0x199   :  { %907 = vmatpush1.msra.mxu1 %v8163_v55  ;;  %978 = vmatpush1.msra.mxu0 %v8165_v56  ;;  %12862 = vst [vmem:[#allocation61_spill] sm:$0xff] %v8179_v28  ;;  %12863 = vst [vmem:[#allocation62_spill] sm:$0xff] %v8183_v23  ;;  %v8185_v55 = vld [vmem:[#allocation4 + $0x2c0] sm:$0xff]  ;;  %v8193_v56 = vld [vmem:[#allocation4 + $0x2b8] sm:$0xff] }
 0x19a   :  { %908 = vmatprep.subr.mxu1 %v8169_v57  ;;  %979 = vmatprep.subr.mxu0 %v8171_v1  ;;  %12864 = vst [vmem:[#allocation63_spill] sm:$0xff] %v8185_v55  ;;  %v8191_v57 = vld [vmem:[#allocation4 + $0x2a8] sm:$0xff]  ;;  %12867 = vst [vmem:[#allocation66_spill] sm:$0xff] %v8193_v56 }
 0x19b   :  { %909 = vmatpush1.msra.mxu1 %v8175_v58  ;;  %980 = vmatpush1.msra.mxu0 %v8177_v60  ;;  %12866 = vst [vmem:[#allocation65_spill] sm:$0xff] %v8191_v57  ;;  %v8199_v58 = vld [vmem:[#allocation4 + $0x2b0] sm:$0xff]  ;;  %v8201_v1 = vld [vmem:[#allocation4 + $0x288] sm:$0xff]  ;;  %v8205_v60 = vld [vmem:[#allocation4 + $0x298] sm:$0xff] }
 0x19c   :  { %910 = vmatprep.subr.mxu1 %v8179_v28  ;;  %981 = vmatprep.subr.mxu0 %v8183_v23  ;;  %12869 = vst [vmem:[#allocation68_spill] sm:$0xff] %v8199_v58  ;;  %12870 = vst [vmem:[#allocation69_spill] sm:$0xff] %v8201_v1  ;;  %v8207_v28 = vld [vmem:[#allocation4 + $0x280] sm:$0xff]  ;;  %v8213_v23 = vld [vmem:[#allocation4 + $0x268] sm:$0xff] }
 0x19d   :  { %911 = vmatpush1.msra.mxu1 %v8185_v55  ;;  %982 = vmatpush1.msra.mxu0 %v8187_v53  ;;  %12871 = vst [vmem:[#allocation70_spill] sm:$0xff] %v8205_v60  ;;  %12872 = vst [vmem:[#allocation71_spill] sm:$0xff] %v8207_v28  ;;  %v8217_v55 = vld [vmem:[#allocation4 + $0x278] sm:$0xff]  ;;  %v8219_v53 = vld [vmem:[#allocation4 + $0x260] sm:$0xff] }
 0x19e   :  { %912 = vmatprep.subr.mxu1 %v8191_v57  ;;  %983 = vmatprep.subr.mxu0 %v8193_v56  ;;  %12874 = vst [vmem:[#allocation73_spill] sm:$0xff] %v8213_v23  ;;  %12875 = vst [vmem:[#allocation74_spill] sm:$0xff] %v8217_v55  ;;  %v8223_v57 = vld [vmem:[#allocation4 + $0x270] sm:$0xff]  ;;  %v8225_v56 = vld [vmem:[#allocation4 + $0x248] sm:$0xff] }
 0x19f   :  { %913 = vmatpush1.msra.mxu1 %v8195_v54  ;;  %984 = vmatpush1.msra.mxu0 %v8199_v58  ;;  %12876 = vst [vmem:[#allocation75_spill] sm:$0xff] %v8219_v53  ;;  %12877 = vst [vmem:[#allocation76_spill] sm:$0xff] %v8223_v57  ;;  %v8229_v54 = vld [vmem:[#allocation4 + $0x258] sm:$0xff]  ;;  %v8231_v58 = vld [vmem:[#allocation4 + $0x240] sm:$0xff] }
 0x1a0   :  { %914 = vmatprep.subr.mxu1 %v8201_v1  ;;  %985 = vmatprep.subr.mxu0 %v8205_v60  ;;  %12878 = vst [vmem:[#allocation77_spill] sm:$0xff] %v8225_v56  ;;  %12879 = vst [vmem:[#allocation78_spill] sm:$0xff] %v8229_v54  ;;  %v8235_v1 = vld [vmem:[#allocation4 + $0x250] sm:$0xff]  ;;  %v8237_v60 = vld [vmem:[#allocation4 + $0x228] sm:$0xff] }
 0x1a1   :  { %915 = vmatpush1.msra.mxu1 %v8207_v28  ;;  %986 = vmatpush1.msra.mxu0 %v8211_v51  ;;  %12880 = vst [vmem:[#allocation79_spill] sm:$0xff] %v8231_v58  ;;  %12881 = vst [vmem:[#allocation80_spill] sm:$0xff] %v8235_v1  ;;  %v8241_v28 = vld [vmem:[#allocation4 + $0x238] sm:$0xff]  ;;  %v8243_v51 = vld [vmem:[#allocation4 + $0x220] sm:$0xff] }
 0x1a2   :  { %916 = vmatprep.subr.mxu1 %v8213_v23  ;;  %987 = vmatprep.subr.mxu0 %v8217_v55  ;;  %12882 = vst [vmem:[#allocation81_spill] sm:$0xff] %v8237_v60  ;;  %12883 = vst [vmem:[#allocation82_spill] sm:$0xff] %v8241_v28  ;;  %v8247_v23 = vld [vmem:[#allocation4 + $0x230] sm:$0xff]  ;;  %v8249_v55 = vld [vmem:[#allocation4 + $0x208] sm:$0xff] }
 0x1a3   :  { %917 = vmatpush1.msra.mxu1 %v8219_v53  ;;  %988 = vmatpush1.msra.mxu0 %v8223_v57  ;;  %12884 = vst [vmem:[#allocation83_spill] sm:$0xff] %v8243_v51  ;;  %12885 = vst [vmem:[#allocation84_spill] sm:$0xff] %v8247_v23  ;;  %v8253_v53 = vld [vmem:[#allocation4 + $0x218] sm:$0xff]  ;;  %v8255_v57 = vld [vmem:[#allocation4 + $0x200] sm:$0xff] }
 0x1a4   :  { %918 = vmatprep.subr.mxu1 %v8225_v56  ;;  %989 = vmatprep.subr.mxu0 %v8229_v54  ;;  %12886 = vst [vmem:[#allocation85_spill] sm:$0xff] %v8249_v55  ;;  %12887 = vst [vmem:[#allocation86_spill] sm:$0xff] %v8253_v53  ;;  %v8259_v56 = vld [vmem:[#allocation4 + $0x210] sm:$0xff] }
 0x1a5   :  { %919 = vmatpush1.msra.mxu1 %v8231_v58  ;;  %990 = vmatpush1.msra.mxu0 %v8235_v1  ;;  %12888 = vst [vmem:[#allocation87_spill] sm:$0xff] %v8255_v57  ;;  %12889 = vst [vmem:[#allocation88_spill] sm:$0xff] %v8259_v56 }
 0x1a6   :  { %920 = vmatprep.subr.mxu1 %v8237_v60  ;;  %991 = vmatprep.subr.mxu0 %v8241_v28  ;;  %v12890_v60 = vmov 0.0   ;;  %v8269_v28 = vld [vmem:[#allocation6 + $0x1e8] sm:$0xff] }
 0x1a7   :  { %921 = vmatpush1.msra.mxu1 %v8243_v51  ;;  %992 = vmatpush1.msra.mxu0 %v8247_v23  ;;  %12891 = vst [vmem:[#allocation89_spill] sm:$0xff] %v8269_v28  ;;  %v12892_v51 = vlaneseq }
 0x1a8   :  { %922 = vmatprep.subr.mxu1 %v8249_v55  ;;  %993 = vmatprep.subr.mxu0 %v8253_v53  ;;  %v352_v55 = vpop.f32.mrf.mxu1 }
 0x1a9   :  { %923 = vmatpush1.msra.mxu1 %v8255_v57  ;;  %994 = vmatpush1.msra.mxu0 %v8259_v56  ;;  %v8273_v23 = vshrl.u32 %v12892_v51, 7  ;;  %v570_v56 = vld [vmem:[%s12083_s4] sm:$0xf]  ;;  %v423_v57 = vpop.f32.mrf.mxu0 }
 0x1aa   :  { %956 = vmatprep.mubr.f32.mxu1 %v12890_v60  ;;  %1027 = vmatprep.mubr.f32.mxu0 %v12890_v60  ;;  %v354_v58 = vpop.f32.mrf.mxu1 }
 0x1ab   :  { %6260 = vmatprep.subr.mxu1 %v12890_v60  ;;  %1163 = vmatprep.subr.mxu0 %v8269_v28  ;;  %v12169_v53 = vsub.s32 0, %v8273_v23  ;;  %v12172_v1 = vsub.s32 1, %v8273_v23  ;;  %v425_v28 = vpop.f32.mrf.mxu0  ;;  %v12173_v44 = vsub.s32 3, %v8273_v23 }
 0x1ad   :  { %v8282_v54 = vrot.slane %v570_v56, %v12169_v53  ;;  %v8286_v51 = vrot.slane %v570_v56, %v12172_v1 }
 0x228   :  { %v494_v52 = vpop.f32.mrf.mxu1  ;;  %v565_v48 = vpop.f32.mrf.mxu0 }
 0x229   :  { %v495_v49 = vadd.f32 %v494_v52, %v352_v55  ;;  %v8293_v52 = vrot.slane %v570_v56, %v12173_v44  ;;  %v12176_v55 = vsub.s32 2, %v8273_v23  ;;  %v566_v1 = vadd.f32 %v565_v48, %v423_v57 }
 0x22a   :  { %v496_v50 = vpop.f32.mrf.mxu1  ;;  %v567_v41 = vpop.f32.mrf.mxu0 }
 0x22b   :  { %v592_v47 = vadd.f32 %v8282_v54, %v495_v49  ;;  %v497_v45 = vadd.f32 %v496_v50, %v354_v58  ;;  %v568_v42 = vadd.f32 %v567_v41, %v425_v28  ;;  %12893 = vst [vmem:[#allocation90_spill] sm:$0xff] %v8293_v52 }
 0x22d   :  { %v6017_v46 = vmul.f32 -1.442695, %v592_v47  ;;  %v593_v43 = vadd.f32 %v8286_v51, %v497_v45  ;;  %v595_v49 = vadd.f32 %v8293_v52, %v568_v42  ;;  %v8299_v47 = vrot.slane %v570_v56, %v12176_v55  ;;  %v8356_v55 = vld [vmem:[#allocation6 + $0x148] sm:$0xff] }
 0x22e   :  { %12899 = vst [vmem:[#allocation96_spill] sm:$0xff] %v8356_v55 }
 0x22f   :  { %6518 = vpow2.f32 %v6017_v46  ;;  %v6018_v53 = vmul.f32 -1.442695, %v593_v43  ;;  %v6019_v45 = vmul.f32 -1.442695, %v595_v49  ;;  %v594_v43 = vadd.f32 %v8299_v47, %v566_v1 }
 0x231   :  { %6520 = vpow2.f32 %v6018_v53 }
 0x232   :  { %6522 = vpow2.f32 %v6019_v45  ;;  %v8309_v45 = vld [vmem:[#allocation2 + $0x78] sm:$0xff] }
 0x23c   :  { %v6519_v50 = vpop.eup %6518 }
 0x23d   :  { %v599_v46 = vadd.f32 1.0, %v6519_v50 }
 0x23e   :  { %v6521_v53 = vpop.eup %6520 }
 0x23f   :  { %6524 = vrcp.f32 %v599_v46  ;;  %v605_v28 = vadd.f32 1.0, %v6521_v53  ;;  %v6523_v41 = vpop.eup %6522  ;;  %v8322_v46 = vld [vmem:[#allocation6 + $0x1c0] sm:$0xff]  ;;  %v8326_v53 = vld [vmem:[#allocation6 + $0x1a8] sm:$0xff] }
 0x240   :  { %6526 = vtanh.f32 %v594_v43  ;;  %v612_v48 = vadd.f32 1.0, %v6523_v41  ;;  %v8312_v43 = vld [vmem:[#allocation6 + $0x1e0] sm:$0xff] }
 0x241   :  { %6528 = vrcp.f32 %v605_v28  ;;  %v8329_v28 = vld [vmem:[#allocation2 + $0x68] sm:$0xff]  ;;  %v8332_v41 = vld [vmem:[#allocation6 + $0x1a0] sm:$0xff] }
 0x242   :  { %6530 = vrcp.f32 %v612_v48  ;;  %v8342_v48 = vld [vmem:[#allocation6 + $0x180] sm:$0xff] }
 0x243   :  { %12895 = vst [vmem:[#allocation92_spill] sm:$0xff] %v8342_v48 }
 0x24c   :  { %v6525_v58 = vpop.eup %6524 }
 0x24d   :  { %v6527_v44 = vpop.eup %6526 }
 0x24e   :  { %v6529_v42 = vpop.eup %6528  ;;  %v616_v52 = vmul.f32 %v6527_v44, %v6525_v58  ;;  %v8316_v44 = vld [vmem:[#allocation6 + $0x1c8] sm:$0xff] }
 0x24f   :  { %v615_v57 = vmul.f32 0.0, %v6529_v42  ;;  %v6531_v1 = vpop.eup %6530  ;;  %v8336_v58 = vld [vmem:[#allocation6 + $0x188] sm:$0xff]  ;;  %v8339_v42 = vld [vmem:[#allocation2 + $0x60] sm:$0xff] }
 0x250   :  { %12894 = vst [vmem:[#allocation91_spill] sm:$0xff] %v8339_v42 }
 0x251   :  { %v8302_v56 = vadd.f32 %v616_v52, %v615_v57  ;;  %v8319_v52 = vld [vmem:[#allocation2 + $0x70] sm:$0xff]  ;;  %v8346_v57 = vld [vmem:[#allocation6 + $0x168] sm:$0xff] }
 0x252   :  { %12896 = vst [vmem:[#allocation93_spill] sm:$0xff] %v8346_v57 }
 0x253   :  { %6532 = vtanh.f32 %v8302_v56 }
 0x260   :  { %v6533_v49 = vpop.eup %6532 }
 0x261   :  { %v8305_v50 = vmul.f32 %v6533_v49, %v6531_v1  ;;  %v8349_v1 = vld [vmem:[#allocation2 + $0x58] sm:$0xff]  ;;  %v8352_v49 = vld [vmem:[#allocation6 + $0x160] sm:$0xff] }
 0x262   :  { %12897 = vst [vmem:[#allocation94_spill] sm:$0xff] %v8349_v1  ;;  %12898 = vst [vmem:[#allocation95_spill] sm:$0xff] %v8352_v49 }
 0x263   :  { %957 = vmatmul.mubr.f32.vlgmr.msra.gmra.mxu1 %v8305_v50  ;;  %1028 = vmatmul.mubr.f32.vlgmr.msra.gmra.mxu0 %v8305_v50 }
 0x264   :  { %6261 = vmatpush3.msra.mxu1 %v8309_v45  ;;  %1164 = vmatpush1.msra.mxu0 %v8312_v43 }
 0x265   :  { %6262 = vmatprep.subr.mxu1 %v12890_v60  ;;  %1165 = vmatprep.subr.mxu0 %v8316_v44 }
 0x266   :  { %6263 = vmatpush3.msra.mxu1 %v8319_v52  ;;  %1166 = vmatpush1.msra.mxu0 %v8322_v46 }
 0x267   :  { %6264 = vmatprep.subr.mxu1 %v12890_v60  ;;  %1167 = vmatprep.subr.mxu0 %v8326_v53 }
 0x268   :  { %6265 = vmatpush3.msra.mxu1 %v8329_v28  ;;  %1168 = vmatpush1.msra.mxu0 %v8332_v41 }
 0x269   :  { %6266 = vmatprep.subr.mxu1 %v12890_v60  ;;  %1169 = vmatprep.subr.mxu0 %v8336_v58 }
 0x26a   :  { %6267 = vmatpush3.msra.mxu1 %v8339_v42  ;;  %1170 = vmatpush1.msra.mxu0 %v8342_v48  ;;  %v8359_v48 = vld [vmem:[#allocation2 + $0x50] sm:$0xff]  ;;  %v8362_v42 = vld [vmem:[#allocation6 + $0x140] sm:$0xff] }
 0x26b   :  { %6268 = vmatprep.subr.mxu1 %v12890_v60  ;;  %1171 = vmatprep.subr.mxu0 %v8346_v57  ;;  %12900 = vst [vmem:[#allocation97_spill] sm:$0xff] %v8359_v48  ;;  %12901 = vst [vmem:[#allocation98_spill] sm:$0xff] %v8362_v42  ;;  %v8372_v57 = vld [vmem:[#allocation6 + $0x120] sm:$0xff] }
 0x26c   :  { %6269 = vmatpush3.msra.mxu1 %v8349_v1  ;;  %1172 = vmatpush1.msra.mxu0 %v8352_v49  ;;  %v8366_v1 = vld [vmem:[#allocation6 + $0x128] sm:$0xff]  ;;  %12904 = vst [vmem:[#allocation101_spill] sm:$0xff] %v8372_v57 }
 0x26d   :  { %6270 = vmatprep.subr.mxu1 %v12890_v60  ;;  %1173 = vmatprep.subr.mxu0 %v8356_v55  ;;  %12902 = vst [vmem:[#allocation99_spill] sm:$0xff] %v8366_v1  ;;  %v8369_v49 = vld [vmem:[#allocation2 + $0x48] sm:$0xff]  ;;  %v8382_v55 = vld [vmem:[#allocation6 + $0x100] sm:$0xff] }
 0x26e   :  { %6271 = vmatpush3.msra.mxu1 %v8359_v48  ;;  %1174 = vmatpush1.msra.mxu0 %v8362_v42  ;;  %12903 = vst [vmem:[#allocation100_spill] sm:$0xff] %v8369_v49  ;;  %v8376_v48 = vld [vmem:[#allocation6 + $0x108] sm:$0xff]  ;;  %v8379_v42 = vld [vmem:[#allocation2 + $0x40] sm:$0xff]  ;;  %12907 = vst [vmem:[#allocation104_spill] sm:$0xff] %v8382_v55 }
 0x26f   :  { %6272 = vmatprep.subr.mxu1 %v12890_v60  ;;  %1175 = vmatprep.subr.mxu0 %v8366_v1  ;;  %12905 = vst [vmem:[#allocation102_spill] sm:$0xff] %v8376_v48  ;;  %12906 = vst [vmem:[#allocation103_spill] sm:$0xff] %v8379_v42  ;;  %v8392_v1 = vld [vmem:[#allocation6 + $0xe0] sm:$0xff] }
 0x270   :  { %6273 = vmatpush3.msra.mxu1 %v8369_v49  ;;  %1176 = vmatpush1.msra.mxu0 %v8372_v57  ;;  %v8386_v49 = vld [vmem:[#allocation6 + $0xe8] sm:$0xff]  ;;  %v8389_v57 = vld [vmem:[#allocation2 + $0x38] sm:$0xff]  ;;  %12910 = vst [vmem:[#allocation107_spill] sm:$0xff] %v8392_v1 }
 0x271   :  { %6274 = vmatprep.subr.mxu1 %v12890_v60  ;;  %1177 = vmatprep.subr.mxu0 %v8376_v48  ;;  %12908 = vst [vmem:[#allocation105_spill] sm:$0xff] %v8386_v49  ;;  %12909 = vst [vmem:[#allocation106_spill] sm:$0xff] %v8389_v57  ;;  %v8402_v48 = vld [vmem:[#allocation6 + $0xc0] sm:$0xff] }
 0x272   :  { %6275 = vmatpush3.msra.mxu1 %v8379_v42  ;;  %1178 = vmatpush1.msra.mxu0 %v8382_v55  ;;  %v8396_v42 = vld [vmem:[#allocation6 + $0xc8] sm:$0xff]  ;;  %v8399_v55 = vld [vmem:[#allocation2 + $0x30] sm:$0xff]  ;;  %12913 = vst [vmem:[#allocation110_spill] sm:$0xff] %v8402_v48 }
 0x273   :  { %6276 = vmatprep.subr.mxu1 %v12890_v60  ;;  %1179 = vmatprep.subr.mxu0 %v8386_v49  ;;  %12911 = vst [vmem:[#allocation108_spill] sm:$0xff] %v8396_v42  ;;  %12912 = vst [vmem:[#allocation109_spill] sm:$0xff] %v8399_v55  ;;  %v8412_v49 = vld [vmem:[#allocation6 + $0xa0] sm:$0xff] }
 0x274   :  { %6277 = vmatpush3.msra.mxu1 %v8389_v57  ;;  %1180 = vmatpush1.msra.mxu0 %v8392_v1  ;;  %v8406_v57 = vld [vmem:[#allocation6 + $0xa8] sm:$0xff]  ;;  %12916 = vst [vmem:[#allocation113_spill] sm:$0xff] %v8412_v49 }
 0x275   :  { %6278 = vmatprep.subr.mxu1 %v12890_v60  ;;  %1181 = vmatprep.subr.mxu0 %v8396_v42  ;;  %12914 = vst [vmem:[#allocation111_spill] sm:$0xff] %v8406_v57  ;;  %v8409_v1 = vld [vmem:[#allocation2 + $0x28] sm:$0xff]  ;;  %v8422_v42 = vld [vmem:[#allocation6 + $0x80] sm:$0xff] }
 0x276   :  { %6279 = vmatpush3.msra.mxu1 %v8399_v55  ;;  %1182 = vmatpush1.msra.mxu0 %v8402_v48  ;;  %12915 = vst [vmem:[#allocation112_spill] sm:$0xff] %v8409_v1  ;;  %v8416_v55 = vld [vmem:[#allocation6 + $0x88] sm:$0xff]  ;;  %v8419_v48 = vld [vmem:[#allocation2 + $0x20] sm:$0xff]  ;;  %12919 = vst [vmem:[#allocation116_spill] sm:$0xff] %v8422_v42 }
 0x277   :  { %6280 = vmatprep.subr.mxu1 %v12890_v60  ;;  %1183 = vmatprep.subr.mxu0 %v8406_v57  ;;  %12917 = vst [vmem:[#allocation114_spill] sm:$0xff] %v8416_v55  ;;  %12918 = vst [vmem:[#allocation115_spill] sm:$0xff] %v8419_v48  ;;  %v8432_v57 = vld [vmem:[#allocation6 + $0x60] sm:$0xff] }
 0x278   :  { %6281 = vmatpush3.msra.mxu1 %v8409_v1  ;;  %1184 = vmatpush1.msra.mxu0 %v8412_v49  ;;  %v8426_v1 = vld [vmem:[#allocation6 + $0x68] sm:$0xff]  ;;  %v8429_v49 = vld [vmem:[#allocation2 + $0x18] sm:$0xff]  ;;  %12922 = vst [vmem:[#allocation119_spill] sm:$0xff] %v8432_v57 }
 0x279   :  { %6282 = vmatprep.subr.mxu1 %v12890_v60  ;;  %1185 = vmatprep.subr.mxu0 %v8416_v55  ;;  %12920 = vst [vmem:[#allocation117_spill] sm:$0xff] %v8426_v1  ;;  %12921 = vst [vmem:[#allocation118_spill] sm:$0xff] %v8429_v49  ;;  %v8442_v55 = vld [vmem:[#allocation6 + $0x40] sm:$0xff] }
 0x27a   :  { %6283 = vmatpush3.msra.mxu1 %v8419_v48  ;;  %1186 = vmatpush1.msra.mxu0 %v8422_v42  ;;  %v8436_v48 = vld [vmem:[#allocation6 + $0x48] sm:$0xff]  ;;  %v8439_v42 = vld [vmem:[#allocation2 + $0x10] sm:$0xff]  ;;  %12925 = vst [vmem:[#allocation122_spill] sm:$0xff] %v8442_v55 }
 0x27b   :  { %6284 = vmatprep.subr.mxu1 %v12890_v60  ;;  %1187 = vmatprep.subr.mxu0 %v8426_v1  ;;  %12923 = vst [vmem:[#allocation120_spill] sm:$0xff] %v8436_v48  ;;  %12924 = vst [vmem:[#allocation121_spill] sm:$0xff] %v8439_v42  ;;  %v8449_v1 = vld [vmem:[#allocation2 + $0x8] sm:$0xff] }
 0x27c   :  { %6285 = vmatpush3.msra.mxu1 %v8429_v49  ;;  %1188 = vmatpush1.msra.mxu0 %v8432_v57  ;;  %v8446_v49 = vld [vmem:[#allocation6 + $0x28] sm:$0xff]  ;;  %v1089_v57 = vpop.permute.xlu0 %1088  ;;  %12926 = vst [vmem:[#allocation123_spill] sm:$0xff] %v8449_v1 }
 0x27d   :  { %6286 = vmatprep.subr.mxu1 %v12890_v60  ;;  %1189 = vmatprep.subr.mxu0 %v8436_v48  ;;  %v8452_v48 = vld [vmem:[#allocation6 + $0x20] sm:$0xff]  ;;  %vm1090_vm2 = vcmp.eq.s32.totalorder %v7895_v24, %v1089_v57  ;;  %v8478_v57 = vld [vmem:[#allocation4 + $0x1e8] sm:$0xff]  ;;  %v8487_v24 = vld [vmem:[#allocation6 + $0x1d0] sm:$0xff] }
 0x27e   :  { %6287 = vmatpush3.msra.mxu1 %v8439_v42  ;;  %1190 = vmatpush1.msra.mxu0 %v8442_v55  ;;  %12927 = vst [vmem:[#allocation124_spill] sm:$0xff] %v8452_v48  ;;  %v8456_v42 = vld [vmem:[#allocation6 + $0x8] sm:$0xff]  ;;  %v8459_v55 = vld [vmem:[#allocation2] sm:$0xff]  ;;  %12934 = vst [vmem:[#allocation130_spill] sm:$0xff] %v8478_v57 }
 0x27f   :  { %6288 = vmatprep.subr.mxu1 %v12890_v60  ;;  %1191 = vmatprep.subr.mxu0 %v8446_v49  ;;  %12928 = vst [vmem:[#allocation125_spill] sm:$0xff] %v8456_v42  ;;  %12929 = vst [vmem:[#allocation126_spill] sm:$0xff] %v8459_v55 }
 0x280   :  { %6289 = vmatpush3.msra.mxu1 %v8449_v1  ;;  %1192 = vmatpush1.msra.mxu0 %v8452_v48  ;;  %v8465_v1 = vld [vmem:[#allocation6] sm:$0xff]  ;;  %v12931_v48 = vmov 1.0   ;;  %12937 = vst [vmem:[#allocation133_spill] sm:$0xff] %v8487_v24 }
 0x281   :  { %6290 = vmatprep.subr.mxu1 %v12890_v60  ;;  %1193 = vmatprep.subr.mxu0 %v8456_v42  ;;  %12930 = vst [vmem:[#allocation127_spill] sm:$0xff] %v8465_v1  ;;  %v8471_v42 = vld [vmem:[#allocation6 + $0x1f8] sm:$0xff] }
 0x282   :  { %6291 = vmatpush3.msra.mxu1 %v8459_v55  ;;  %6292 = vmatprep.mubr.msk.f32.mxu1 %vm7815_vm0, %v12890_v60  ;;  %12932 = vst [vmem:[#allocation128_spill] sm:$0xff] %v8471_v42  ;;  %v8475_v55 = vld [vmem:[#allocation6 + $0x1f0] sm:$0xff] }
 0x283   :  { %1194 = vmatpush1.msra.mxu0 %v8465_v1  ;;  %1227 = vmatprep.mubr.f32.mxu0 %v12890_v60  ;;  %12933 = vst [vmem:[#allocation129_spill] sm:$0xff] %v8475_v55  ;;  %v8481_v1 = vld [vmem:[#allocation6 + $0x1d8] sm:$0xff] }
 0x284   :  { %6293 = vmatmul.mubr.msk.f32.vlgmr.msra.gmra.mxu1 %vm1090_vm2, %v12931_v48  ;;  %1228 = vmatmul.mubr.f32.vlgmr.msra.gmra.mxu0 %v8305_v50  ;;  %12935 = vst [vmem:[#allocation131_spill] sm:$0xff] %v8481_v1  ;;  %v8484_v48 = vld [vmem:[#allocation4 + $0x1e0] sm:$0xff] }
 0x285   :  { %1234 = vmatprep.subr.mxu1 %v8471_v42  ;;  %1298 = vmatprep.mubr.f32.mxu1 %v12890_v60  ;;  %12936 = vst [vmem:[#allocation132_spill] sm:$0xff] %v8484_v48  ;;  %v8490_v42 = vld [vmem:[#allocation4 + $0x1c8] sm:$0xff] }
 0x286   :  { %1235 = vmatpush1.msra.mxu1 %v8475_v55  ;;  %1305 = vmatprep.subr.mxu0 %v8478_v57  ;;  %12938 = vst [vmem:[#allocation134_spill] sm:$0xff] %v8490_v42  ;;  %v8493_v55 = vld [vmem:[#allocation6 + $0x1b8] sm:$0xff]  ;;  %v8496_v57 = vld [vmem:[#allocation4 + $0x1c0] sm:$0xff] }
 0x287   :  { %1236 = vmatprep.subr.mxu1 %v8481_v1  ;;  %1306 = vmatpush1.msra.mxu0 %v8484_v48  ;;  %12939 = vst [vmem:[#allocation135_spill] sm:$0xff] %v8493_v55  ;;  %12940 = vst [vmem:[#allocation136_spill] sm:$0xff] %v8496_v57  ;;  %v8499_v1 = vld [vmem:[#allocation6 + $0x1b0] sm:$0xff]  ;;  %v8502_v48 = vld [vmem:[#allocation4 + $0x1a8] sm:$0xff] }
 0x288   :  { %1237 = vmatpush1.msra.mxu1 %v8487_v24  ;;  %1307 = vmatprep.subr.mxu0 %v8490_v42  ;;  %12941 = vst [vmem:[#allocation137_spill] sm:$0xff] %v8499_v1  ;;  %12942 = vst [vmem:[#allocation138_spill] sm:$0xff] %v8502_v48  ;;  %v8505_v24 = vld [vmem:[#allocation6 + $0x198] sm:$0xff]  ;;  %v8508_v42 = vld [vmem:[#allocation4 + $0x1a0] sm:$0xff] }
 0x289   :  { %1238 = vmatprep.subr.mxu1 %v8493_v55  ;;  %1308 = vmatpush1.msra.mxu0 %v8496_v57  ;;  %12943 = vst [vmem:[#allocation139_spill] sm:$0xff] %v8505_v24  ;;  %12944 = vst [vmem:[#allocation140_spill] sm:$0xff] %v8508_v42  ;;  %v8511_v55 = vld [vmem:[#allocation6 + $0x190] sm:$0xff]  ;;  %v8514_v57 = vld [vmem:[#allocation4 + $0x188] sm:$0xff] }
 0x28a   :  { %1239 = vmatpush1.msra.mxu1 %v8499_v1  ;;  %1309 = vmatprep.subr.mxu0 %v8502_v48  ;;  %12945 = vst [vmem:[#allocation141_spill] sm:$0xff] %v8511_v55  ;;  %12946 = vst [vmem:[#allocation142_spill] sm:$0xff] %v8514_v57  ;;  %v8517_v1 = vld [vmem:[#allocation6 + $0x178] sm:$0xff]  ;;  %v8520_v48 = vld [vmem:[#allocation4 + $0x180] sm:$0xff] }
 0x28b   :  { %1240 = vmatprep.subr.mxu1 %v8505_v24  ;;  %1310 = vmatpush1.msra.mxu0 %v8508_v42  ;;  %12947 = vst [vmem:[#allocation143_spill] sm:$0xff] %v8517_v1  ;;  %12948 = vst [vmem:[#allocation144_spill] sm:$0xff] %v8520_v48  ;;  %v8523_v24 = vld [vmem:[#allocation6 + $0x170] sm:$0xff]  ;;  %v8526_v42 = vld [vmem:[#allocation4 + $0x168] sm:$0xff] }
 0x28c   :  { %1241 = vmatpush1.msra.mxu1 %v8511_v55  ;;  %1311 = vmatprep.subr.mxu0 %v8514_v57  ;;  %12949 = vst [vmem:[#allocation145_spill] sm:$0xff] %v8523_v24  ;;  %12950 = vst [vmem:[#allocation146_spill] sm:$0xff] %v8526_v42  ;;  %v8529_v55 = vld [vmem:[#allocation6 + $0x158] sm:$0xff]  ;;  %v8532_v57 = vld [vmem:[#allocation4 + $0x160] sm:$0xff] }
 0x28d   :  { %1242 = vmatprep.subr.mxu1 %v8517_v1  ;;  %1312 = vmatpush1.msra.mxu0 %v8520_v48  ;;  %12951 = vst [vmem:[#allocation147_spill] sm:$0xff] %v8529_v55  ;;  %12952 = vst [vmem:[#allocation148_spill] sm:$0xff] %v8532_v57  ;;  %v8535_v1 = vld [vmem:[#allocation6 + $0x150] sm:$0xff]  ;;  %v8538_v48 = vld [vmem:[#allocation4 + $0x148] sm:$0xff] }
 0x28e   :  { %1243 = vmatpush1.msra.mxu1 %v8523_v24  ;;  %1313 = vmatprep.subr.mxu0 %v8526_v42  ;;  %12953 = vst [vmem:[#allocation149_spill] sm:$0xff] %v8535_v1  ;;  %12954 = vst [vmem:[#allocation150_spill] sm:$0xff] %v8538_v48  ;;  %v8541_v24 = vld [vmem:[#allocation6 + $0x138] sm:$0xff]  ;;  %v8544_v42 = vld [vmem:[#allocation4 + $0x140] sm:$0xff] }
 0x28f   :  { %1244 = vmatprep.subr.mxu1 %v8529_v55  ;;  %1314 = vmatpush1.msra.mxu0 %v8532_v57  ;;  %12955 = vst [vmem:[#allocation151_spill] sm:$0xff] %v8541_v24  ;;  %12956 = vst [vmem:[#allocation152_spill] sm:$0xff] %v8544_v42  ;;  %v8547_v55 = vld [vmem:[#allocation6 + $0x130] sm:$0xff]  ;;  %v8550_v57 = vld [vmem:[#allocation4 + $0x128] sm:$0xff] }
 0x290   :  { %1245 = vmatpush1.msra.mxu1 %v8535_v1  ;;  %1315 = vmatprep.subr.mxu0 %v8538_v48  ;;  %12957 = vst [vmem:[#allocation153_spill] sm:$0xff] %v8547_v55  ;;  %12958 = vst [vmem:[#allocation154_spill] sm:$0xff] %v8550_v57  ;;  %v8553_v1 = vld [vmem:[#allocation6 + $0x118] sm:$0xff]  ;;  %v8556_v48 = vld [vmem:[#allocation4 + $0x120] sm:$0xff] }
 0x291   :  { %1246 = vmatprep.subr.mxu1 %v8541_v24  ;;  %1316 = vmatpush1.msra.mxu0 %v8544_v42  ;;  %12959 = vst [vmem:[#allocation155_spill] sm:$0xff] %v8553_v1  ;;  %12960 = vst [vmem:[#allocation156_spill] sm:$0xff] %v8556_v48  ;;  %v8559_v24 = vld [vmem:[#allocation6 + $0x110] sm:$0xff]  ;;  %v8562_v42 = vld [vmem:[#allocation4 + $0x108] sm:$0xff] }
 0x292   :  { %1247 = vmatpush1.msra.mxu1 %v8547_v55  ;;  %1317 = vmatprep.subr.mxu0 %v8550_v57  ;;  %12961 = vst [vmem:[#allocation157_spill] sm:$0xff] %v8559_v24  ;;  %12962 = vst [vmem:[#allocation158_spill] sm:$0xff] %v8562_v42  ;;  %v8565_v55 = vld [vmem:[#allocation6 + $0xf8] sm:$0xff]  ;;  %v8568_v57 = vld [vmem:[#allocation4 + $0x100] sm:$0xff] }
 0x293   :  { %1248 = vmatprep.subr.mxu1 %v8553_v1  ;;  %1318 = vmatpush1.msra.mxu0 %v8556_v48  ;;  %12963 = vst [vmem:[#allocation159_spill] sm:$0xff] %v8565_v55  ;;  %12964 = vst [vmem:[#allocation160_spill] sm:$0xff] %v8568_v57  ;;  %v8571_v1 = vld [vmem:[#allocation6 + $0xf0] sm:$0xff]  ;;  %v8574_v48 = vld [vmem:[#allocation4 + $0xe8] sm:$0xff] }
 0x294   :  { %1249 = vmatpush1.msra.mxu1 %v8559_v24  ;;  %1319 = vmatprep.subr.mxu0 %v8562_v42  ;;  %12965 = vst [vmem:[#allocation161_spill] sm:$0xff] %v8571_v1  ;;  %12966 = vst [vmem:[#allocation162_spill] sm:$0xff] %v8574_v48  ;;  %v8577_v24 = vld [vmem:[#allocation6 + $0xd8] sm:$0xff]  ;;  %v8580_v42 = vld [vmem:[#allocation4 + $0xe0] sm:$0xff] }
 0x295   :  { %1250 = vmatprep.subr.mxu1 %v8565_v55  ;;  %1320 = vmatpush1.msra.mxu0 %v8568_v57  ;;  %12967 = vst [vmem:[#allocation163_spill] sm:$0xff] %v8577_v24  ;;  %12968 = vst [vmem:[#allocation164_spill] sm:$0xff] %v8580_v42  ;;  %v8583_v55 = vld [vmem:[#allocation6 + $0xd0] sm:$0xff]  ;;  %v8586_v57 = vld [vmem:[#allocation4 + $0xc8] sm:$0xff] }
 0x296   :  { %1251 = vmatpush1.msra.mxu1 %v8571_v1  ;;  %1321 = vmatprep.subr.mxu0 %v8574_v48  ;;  %12969 = vst [vmem:[#allocation165_spill] sm:$0xff] %v8583_v55  ;;  %12970 = vst [vmem:[#allocation166_spill] sm:$0xff] %v8586_v57  ;;  %v8589_v1 = vld [vmem:[#allocation6 + $0xb8] sm:$0xff]  ;;  %v8592_v48 = vld [vmem:[#allocation4 + $0xc0] sm:$0xff] }
 0x297   :  { %1252 = vmatprep.subr.mxu1 %v8577_v24  ;;  %1322 = vmatpush1.msra.mxu0 %v8580_v42  ;;  %12971 = vst [vmem:[#allocation167_spill] sm:$0xff] %v8589_v1  ;;  %12972 = vst [vmem:[#allocation168_spill] sm:$0xff] %v8592_v48  ;;  %v8595_v24 = vld [vmem:[#allocation6 + $0xb0] sm:$0xff]  ;;  %v8598_v42 = vld [vmem:[#allocation4 + $0xa8] sm:$0xff] }
 0x298   :  { %1253 = vmatpush1.msra.mxu1 %v8583_v55  ;;  %1323 = vmatprep.subr.mxu0 %v8586_v57  ;;  %12973 = vst [vmem:[#allocation169_spill] sm:$0xff] %v8595_v24  ;;  %12974 = vst [vmem:[#allocation170_spill] sm:$0xff] %v8598_v42  ;;  %v8601_v55 = vld [vmem:[#allocation6 + $0x98] sm:$0xff]  ;;  %v8604_v57 = vld [vmem:[#allocation4 + $0xa0] sm:$0xff] }
 0x299   :  { %1254 = vmatprep.subr.mxu1 %v8589_v1  ;;  %1324 = vmatpush1.msra.mxu0 %v8592_v48  ;;  %12975 = vst [vmem:[#allocation171_spill] sm:$0xff] %v8601_v55  ;;  %12976 = vst [vmem:[#allocation172_spill] sm:$0xff] %v8604_v57  ;;  %v8607_v1 = vld [vmem:[#allocation6 + $0x90] sm:$0xff]  ;;  %v8610_v48 = vld [vmem:[#allocation4 + $0x88] sm:$0xff] }
 0x29a   :  { %1255 = vmatpush1.msra.mxu1 %v8595_v24  ;;  %1325 = vmatprep.subr.mxu0 %v8598_v42  ;;  %12977 = vst [vmem:[#allocation173_spill] sm:$0xff] %v8607_v1  ;;  %12978 = vst [vmem:[#allocation174_spill] sm:$0xff] %v8610_v48  ;;  %v8613_v24 = vld [vmem:[#allocation6 + $0x78] sm:$0xff]  ;;  %v8616_v42 = vld [vmem:[#allocation4 + $0x80] sm:$0xff] }
 0x29b   :  { %1256 = vmatprep.subr.mxu1 %v8601_v55  ;;  %1326 = vmatpush1.msra.mxu0 %v8604_v57  ;;  %12979 = vst [vmem:[#allocation175_spill] sm:$0xff] %v8613_v24  ;;  %12980 = vst [vmem:[#allocation176_spill] sm:$0xff] %v8616_v42  ;;  %v8619_v55 = vld [vmem:[#allocation6 + $0x70] sm:$0xff]  ;;  %v8622_v57 = vld [vmem:[#allocation4 + $0x68] sm:$0xff] }
 0x29c   :  { %1257 = vmatpush1.msra.mxu1 %v8607_v1  ;;  %1327 = vmatprep.subr.mxu0 %v8610_v48  ;;  %12981 = vst [vmem:[#allocation177_spill] sm:$0xff] %v8619_v55  ;;  %12982 = vst [vmem:[#allocation178_spill] sm:$0xff] %v8622_v57  ;;  %v8625_v1 = vld [vmem:[#allocation6 + $0x58] sm:$0xff]  ;;  %v8628_v48 = vld [vmem:[#allocation4 + $0x60] sm:$0xff] }
 0x29d   :  { %1258 = vmatprep.subr.mxu1 %v8613_v24  ;;  %1328 = vmatpush1.msra.mxu0 %v8616_v42  ;;  %12983 = vst [vmem:[#allocation179_spill] sm:$0xff] %v8625_v1  ;;  %12984 = vst [vmem:[#allocation180_spill] sm:$0xff] %v8628_v48  ;;  %v8631_v24 = vld [vmem:[#allocation6 + $0x50] sm:$0xff]  ;;  %v8634_v42 = vld [vmem:[#allocation4 + $0x48] sm:$0xff] }
 0x29e   :  { %1259 = vmatpush1.msra.mxu1 %v8619_v55  ;;  %1329 = vmatprep.subr.mxu0 %v8622_v57  ;;  %12985 = vst [vmem:[#allocation181_spill] sm:$0xff] %v8631_v24  ;;  %12986 = vst [vmem:[#allocation182_spill] sm:$0xff] %v8634_v42  ;;  %v8637_v55 = vld [vmem:[#allocation6 + $0x38] sm:$0xff]  ;;  %v8640_v57 = vld [vmem:[#allocation4 + $0x40] sm:$0xff] }
 0x29f   :  { %1260 = vmatprep.subr.mxu1 %v8625_v1  ;;  %1330 = vmatpush1.msra.mxu0 %v8628_v48  ;;  %12987 = vst [vmem:[#allocation183_spill] sm:$0xff] %v8637_v55  ;;  %12988 = vst [vmem:[#allocation184_spill] sm:$0xff] %v8640_v57  ;;  %v8643_v1 = vld [vmem:[#allocation6 + $0x30] sm:$0xff]  ;;  %v8646_v48 = vld [vmem:[#allocation4 + $0x28] sm:$0xff] }
 0x2a0   :  { %1261 = vmatpush1.msra.mxu1 %v8631_v24  ;;  %1331 = vmatprep.subr.mxu0 %v8634_v42  ;;  %12989 = vst [vmem:[#allocation185_spill] sm:$0xff] %v8643_v1  ;;  %12990 = vst [vmem:[#allocation186_spill] sm:$0xff] %v8646_v48  ;;  %v8649_v24 = vld [vmem:[#allocation6 + $0x18] sm:$0xff]  ;;  %v8652_v42 = vld [vmem:[#allocation4 + $0x20] sm:$0xff] }
 0x2a1   :  { %1262 = vmatprep.subr.mxu1 %v8637_v55  ;;  %1332 = vmatpush1.msra.mxu0 %v8640_v57  ;;  %12991 = vst [vmem:[#allocation187_spill] sm:$0xff] %v8652_v42  ;;  %v8655_v55 = vld [vmem:[#allocation6 + $0x10] sm:$0xff]  ;;  %v8658_v57 = vld [vmem:[#allocation4 + $0x8] sm:$0xff] }
 0x2a2   :  { %1263 = vmatpush1.msra.mxu1 %v8643_v1  ;;  %1333 = vmatprep.subr.mxu0 %v8646_v48  ;;  %12992 = vst [vmem:[#allocation188_spill] sm:$0xff] %v8655_v55  ;;  %v8662_v1 = vld [vmem:[#allocation4 + $0x1f8] sm:$0xff]  ;;  %v8665_v48 = vld [vmem:[#allocation4 + $0x1f0] sm:$0xff] }
 0x2a3   :  { %1264 = vmatprep.subr.mxu1 %v8649_v24  ;;  %1334 = vmatpush1.msra.mxu0 %v8652_v42  ;;  %12993 = vst [vmem:[#allocation189_spill] sm:$0xff] %v8662_v1  ;;  %12994 = vst [vmem:[#allocation190_spill] sm:$0xff] %v8665_v48  ;;  %v8669_v42 = vld [vmem:[#allocation4 + $0x1d8] sm:$0xff] }
 0x2a4   :  { %1265 = vmatpush1.msra.mxu1 %v8655_v55  ;;  %1335 = vmatprep.subr.mxu0 %v8658_v57  ;;  %12995 = vst [vmem:[#allocation191_spill] sm:$0xff] %v8669_v42  ;;  %v8673_v55 = vld [vmem:[#allocation4 + $0x1d0] sm:$0xff] }
 0x2a5   :  { %1299 = vmatmul.mubr.f32.vlgmr.msra.gmra.mxu1 %v8305_v50  ;;  %1376 = vmatprep.subr.mxu1 %v8662_v1  ;;  %12996 = vst [vmem:[#allocation192_spill] sm:$0xff] %v8673_v55  ;;  %v8677_v50 = vld [vmem:[#allocation4 + $0x1b8] sm:$0xff]  ;;  %v8693_v1 = vld [vmem:[#allocation4 + $0x170] sm:$0xff] }
 0x2a6   :  { %1377 = vmatpush1.msra.mxu1 %v8665_v48  ;;  %1336 = vmatpush1.msra.mxu0 %v7947_v29  ;;  %v8681_v48 = vld [vmem:[#allocation4 + $0x1b0] sm:$0xff]  ;;  %v8684_v29 = vld [vmem:[#allocation4 + $0x198] sm:$0xff]  ;;  %13001 = vst [vmem:[#allocation197_spill] sm:$0xff] %v8693_v1 }
 0x2a7   :  { %1378 = vmatprep.subr.mxu1 %v8669_v42  ;;  %1369 = vmatprep.mubr.f32.mxu0 %v12890_v60  ;;  %12997 = vst [vmem:[#allocation193_spill] sm:$0xff] %v8681_v48  ;;  %12998 = vst [vmem:[#allocation194_spill] sm:$0xff] %v8684_v29  ;;  %v8687_v42 = vld [vmem:[#allocation4 + $0x190] sm:$0xff] }
 0x2a8   :  { %1379 = vmatpush1.msra.mxu1 %v8673_v55  ;;  %1440 = vmatprep.mubr.f32.mxu1 %v12890_v60  ;;  %12999 = vst [vmem:[#allocation195_spill] sm:$0xff] %v8687_v42  ;;  %v8690_v55 = vld [vmem:[#allocation4 + $0x178] sm:$0xff] }
 0x2a9   :  { %1380 = vmatprep.subr.mxu1 %v8677_v50  ;;  %1475 = vmatprep.subr.mxu0 %v7953_v31  ;;  %13000 = vst [vmem:[#allocation196_spill] sm:$0xff] %v8690_v55  ;;  %v8696_v31 = vld [vmem:[#allocation4 + $0x158] sm:$0xff] }
 0x2aa   :  { %1381 = vmatpush1.msra.mxu1 %v8681_v48  ;;  %v8699_v48 = vld [vmem:[#allocation4 + $0x150] sm:$0xff] }
 0x2ab   :  { %1382 = vmatprep.subr.mxu1 %v8684_v29  ;;  %v8702_v29 = vld [vmem:[#allocation4 + $0x138] sm:$0xff] }
 0x2ac   :  { %1383 = vmatpush1.msra.mxu1 %v8687_v42  ;;  %v8705_v42 = vld [vmem:[#allocation4 + $0x130] sm:$0xff] }
 0x2ad   :  { %1384 = vmatprep.subr.mxu1 %v8690_v55  ;;  %13002 = vst [vmem:[#allocation198_spill] sm:$0xff] %v8705_v42  ;;  %v8708_v55 = vld [vmem:[#allocation4 + $0x118] sm:$0xff] }
 0x2ae   :  { %1385 = vmatpush1.msra.mxu1 %v8693_v1  ;;  %13003 = vst [vmem:[#allocation199_spill] sm:$0xff] %v8708_v55  ;;  %v8711_v1 = vld [vmem:[#allocation4 + $0x110] sm:$0xff] }
 0x2af   :  { %1386 = vmatprep.subr.mxu1 %v8696_v31  ;;  %13004 = vst [vmem:[#allocation200_spill] sm:$0xff] %v8711_v1 }
 0x2b0   :  { %1387 = vmatpush1.msra.mxu1 %v8699_v48 }
 0x2b1   :  { %1388 = vmatprep.subr.mxu1 %v8702_v29 }
 0x2b2   :  { %1389 = vmatpush1.msra.mxu1 %v8705_v42 }
 0x2b3   :  { %1390 = vmatprep.subr.mxu1 %v8708_v55 }
 0x2b4   :  { %1391 = vmatpush1.msra.mxu1 %v8711_v1 }
 0x2b5   :  { %1392 = vmatprep.subr.mxu1 %v7902_v11  ;;  %v6033_v11 = vld [vmem:[%s12079_s0 + $0x10] sm:$0xff] }
 0x2b6   :  { %1393 = vmatpush1.msra.mxu1 %v7904_v12  ;;  %1790 = vperm.xlu1 %6517, %v6033_v11   ;;  %v6042_v12 = vld [vmem:[%s12079_s0 + $0x18] sm:$0xff] }
 0x2b7   :  { %1394 = vmatprep.subr.mxu1 %v7906_v13  ;;  %v6060_v13 = vld [vmem:[%s12079_s0 + $0x28] sm:$0xff] }
 0x2b8   :  { %1395 = vmatpush1.msra.mxu1 %v7909_v14  ;;  %v6078_v14 = vld [vmem:[%s12079_s0 + $0x38] sm:$0xff] }
 0x2b9   :  { %1396 = vmatprep.subr.mxu1 %v7912_v15  ;;  %v816_v15 = vpop.f32.mrf.mxu1 }
 0x2ba   :  { %1397 = vmatpush1.msra.mxu1 %v7915_v16  ;;  %2492 = vperm.xlu1 %6517, %v6042_v12   ;;  %v6020_v16 = vld [vmem:[%s12083_s4 + $0x4] sm:$0xf] }
 0x2bb   :  { %1398 = vmatprep.subr.mxu1 %v7918_v17  ;;  %v818_v17 = vpop.f32.mrf.mxu1 }
 0x2bc   :  { %1399 = vmatpush1.msra.mxu1 %v7921_v18  ;;  %v13005_v18 = vsub.s32 0, %v8273_v23 }
 0x2bd   :  { %1400 = vmatprep.subr.mxu1 %v7924_v19 }
 0x2be   :  { %1401 = vmatpush1.msra.mxu1 %v7927_v20  ;;  %3896 = vperm.xlu1 %6517, %v6060_v13   ;;  %v8748_v19 = vrot.slane %v6020_v16, %v13005_v18 }
 0x2bf   :  { %1402 = vmatprep.subr.mxu1 %v7930_v21 }
 0x2c0   :  { %1403 = vmatpush1.msra.mxu1 %v7933_v22  ;;  %v13006_v22 = vsub.s32 1, %v8273_v23 }
 0x2c1   :  { %1404 = vmatprep.subr.mxu1 %v7936_v25 }
 0x2c2   :  { %1405 = vmatpush1.msra.mxu1 %v7939_v26  ;;  %5300 = vperm.xlu1 %6517, %v6078_v14   ;;  %v8752_v25 = vrot.slane %v6020_v16, %v13006_v22 }
 0x2c3   :  { %1406 = vmatprep.subr.mxu1 %v7942_v27 }
 0x2c4   :  { %1407 = vmatpush1.msra.mxu1 %v7949_v30 }
 0x2c5   :  { %1546 = vmatprep.subr.mxu1 %v7955_v32  ;;  %v887_v32 = vpop.f32.mrf.mxu0 }
 0x2c7   :  { %v889_v14 = vpop.f32.mrf.mxu0 }
 0x323   :  { %v958_v20 = vpop.f32.mrf.mxu1  ;;  %v1029_v18 = vpop.f32.mrf.mxu0 }
 0x324   :  { %v959_v21 = vadd.f32 %v958_v20, %v816_v15  ;;  %v13007_v15 = vsub.s32 3, %v8273_v23  ;;  %v1030_v42 = vadd.f32 %v1029_v18, %v887_v32  ;;  %v8766_v32 = vld [vmem:[#allocation6 + $0x3e0] sm:$0xff]  ;;  %v8781_v18 = vld [vmem:[#allocation6 + $0x3d0] sm:$0xff] }
 0x325   :  { %v960_v26 = vpop.f32.mrf.mxu1  ;;  %v1031_v1 = vpop.f32.mrf.mxu0 }
 0x326   :  { %v1057_v27 = vadd.f32 %v8748_v19, %v959_v21  ;;  %v961_v30 = vadd.f32 %v960_v26, %v818_v17  ;;  %v1032_v55 = vadd.f32 %v1031_v1, %v889_v14  ;;  %v8758_v20 = vrot.slane %v6020_v16, %v13007_v15  ;;  %v8778_v14 = vld [vmem:[#allocation6 + $0x3c0] sm:$0xff] }
 0x327   :  { %v13008_v21 = vsub.s32 2, %v8273_v23  ;;  %v8769_v23 = vld [vmem:[#allocation6 + $0x3f0] sm:$0xff] }
 0x328   :  { %v6021_v11 = vmul.f32 -1.442695, %v1057_v27  ;;  %v1058_v12 = vadd.f32 %v8752_v25, %v961_v30 }
 0x329   :  { %v8762_v17 = vrot.slane %v6020_v16, %v13008_v21  ;;  %v8787_v21 = vld [vmem:[#allocation6 + $0x3b8] sm:$0xff] }
 0x32a   :  { %6534 = vpow2.f32 %v6021_v11  ;;  %v6022_v13 = vmul.f32 -1.442695, %v1058_v12  ;;  %v1060_v11 = vadd.f32 %v8758_v20, %v1032_v55  ;;  %v8772_v55 = vld [vmem:[#allocation6 + $0x3c8] sm:$0xff]  ;;  %13010 = vst [vmem:[#allocation202_spill] sm:$0xff] %v8787_v21 }
 0x32b   :  { %v1059_v12 = vadd.f32 %v8762_v17, %v1030_v42  ;;  %v8775_v42 = vld [vmem:[#allocation6 + $0x3d8] sm:$0xff] }
 0x32c   :  { %6536 = vpow2.f32 %v6022_v13  ;;  %v6023_v1 = vmul.f32 -1.442695, %v1060_v11  ;;  %v8796_v11 = vld [vmem:[#allocation6 + $0x388] sm:$0xff] }
 0x32d   :  { %13013 = vst [vmem:[#allocation205_spill] sm:$0xff] %v8796_v11 }
 0x337   :  { %v6535_v22 = vpop.eup %6534 }
 0x338   :  { %v1064_v27 = vadd.f32 1.0, %v6535_v22  ;;  %v8784_v22 = vld [vmem:[#allocation6 + $0x3a8] sm:$0xff] }
 0x339   :  { %v6537_v26 = vpop.eup %6536  ;;  %13009 = vst [vmem:[#allocation201_spill] sm:$0xff] %v8784_v22 }
 0x33a   :  { %v1070_v30 = vadd.f32 1.0, %v6537_v26  ;;  %v8790_v26 = vld [vmem:[#allocation6 + $0x3a0] sm:$0xff] }
 0x33b   :  { %13011 = vst [vmem:[#allocation203_spill] sm:$0xff] %v8790_v26 }
 0x33c   :  { %6538 = vrcp.f32 %v1070_v30 }
 0x33d   :  { %6540 = vrcp.f32 %v1064_v27  ;;  %v8793_v27 = vld [vmem:[#allocation6 + $0x3b0] sm:$0xff] }
 0x33e   :  { %6542 = vtanh.f32 %v1059_v12  ;;  %13012 = vst [vmem:[#allocation204_spill] sm:$0xff] %v8793_v27  ;;  %v8799_v12 = vld [vmem:[#allocation6 + $0x398] sm:$0xff] }
 0x33f   :  { %6544 = vpow2.f32 %v6023_v1  ;;  %13014 = vst [vmem:[#allocation206_spill] sm:$0xff] %v8799_v12 }
 0x344   :  { %v1159_v13 = vpop.f32.mrf.mxu1 }
 0x345   :  { %1370 = vmatmul.mubr.f32.vlgmr.msra.gmra.mxu0 %v1159_v13  ;;  %1441 = vmatmul.mubr.f32.vlgmr.msra.gmra.mxu1 %v1159_v13  ;;  %v8802_v13 = vld [vmem:[#allocation6 + $0x380] sm:$0xff] }
 0x346   :  { %1476 = vmatpush1.msra.mxu0 %v8766_v32  ;;  %1547 = vmatpush1.msra.mxu1 %v8769_v23  ;;  %v6294_v16 = vpop.f32.mrf.mxu1  ;;  %13015 = vst [vmem:[#allocation207_spill] sm:$0xff] %v8802_v13 }
 0x347   :  { %1477 = vmatprep.subr.mxu0 %v8772_v55  ;;  %1548 = vmatprep.subr.mxu1 %v8775_v42  ;;  %v8805_v16 = vld [vmem:[#allocation6 + $0x390] sm:$0xff] }
 0x348   :  { %1478 = vmatpush1.msra.mxu0 %v8778_v14  ;;  %1549 = vmatpush1.msra.mxu1 %v8781_v18  ;;  %13016 = vst [vmem:[#allocation208_spill] sm:$0xff] %v8805_v16 }
 0x349   :  { %v6539_v15 = vpop.eup %6538  ;;  %1479 = vmatprep.subr.mxu0 %v8784_v22  ;;  %1550 = vmatprep.subr.mxu1 %v8787_v21  ;;  %v8811_v21 = vld [vmem:[#allocation6 + $0x378] sm:$0xff] }
 0x34a   :  { %1480 = vmatpush1.msra.mxu0 %v8790_v26  ;;  %1551 = vmatpush1.msra.mxu1 %v8793_v27  ;;  %v6541_v30 = vpop.eup %6540  ;;  %v1080_v1 = vmul.f32 0.0, %v6539_v15  ;;  %v8808_v27 = vld [vmem:[#allocation6 + $0x368] sm:$0xff]  ;;  %v8817_v15 = vld [vmem:[#allocation6 + $0x370] sm:$0xff]  ;;  %v8823_v22 = vld [vmem:[#allocation6 + $0x358] sm:$0xff] }
 0x34b   :  { %1481 = vmatprep.subr.mxu0 %v8796_v11  ;;  %1552 = vmatprep.subr.mxu1 %v8799_v12  ;;  %v6543_v26 = vpop.eup %6542  ;;  %13017 = vst [vmem:[#allocation209_spill] sm:$0xff] %v8808_v27  ;;  %v8814_v12 = vld [vmem:[#allocation6 + $0x360] sm:$0xff]  ;;  %13019 = vst [vmem:[#allocation211_spill] sm:$0xff] %v8817_v15 }
 0x34c   :  { %1482 = vmatpush1.msra.mxu0 %v8802_v13  ;;  %1553 = vmatpush1.msra.mxu1 %v8805_v16  ;;  %v1081_v11 = vmul.f32 %v6543_v26, %v6541_v30  ;;  %13018 = vst [vmem:[#allocation210_spill] sm:$0xff] %v8814_v12  ;;  %v6545_v13 = vpop.eup %6544  ;;  %v8820_v16 = vld [vmem:[#allocation6 + $0x348] sm:$0xff]  ;;  %v8828_v26 = vld [vmem:[#allocation6 + $0x340] sm:$0xff]  ;;  %v8831_v30 = vld [vmem:[#allocation6 + $0x350] sm:$0xff] }
 0x34d   :  { %1483 = vmatprep.subr.mxu0 %v8808_v27  ;;  %1554 = vmatprep.subr.mxu1 %v8811_v21  ;;  %13020 = vst [vmem:[#allocation212_spill] sm:$0xff] %v8820_v16 }
 0x34e   :  { %1484 = vmatpush1.msra.mxu0 %v8814_v12  ;;  %1555 = vmatpush1.msra.mxu1 %v8817_v15  ;;  %v8826_v27 = vadd.f32 %v1081_v11, %v1080_v1  ;;  %v8834_v15 = vld [vmem:[#allocation6 + $0x328] sm:$0xff]  ;;  %v8838_v12 = vld [vmem:[#allocation6 + $0x320] sm:$0xff] }
 0x34f   :  { %1485 = vmatprep.subr.mxu0 %v8820_v16  ;;  %1556 = vmatprep.subr.mxu1 %v8823_v22  ;;  %v1077_v16 = vadd.f32 1.0, %v6545_v13  ;;  %v8842_v11 = vld [vmem:[#allocation6 + $0x308] sm:$0xff]  ;;  %v13040_v1 = vld [vmem:[#allocation29_spill] sm:$0xff] }
 0x350   :  { %1486 = vmatpush1.msra.mxu0 %v8828_v26  ;;  %1557 = vmatpush1.msra.mxu1 %v8831_v30  ;;  %6546 = vtanh.f32 %v8826_v27  ;;  %v13041_v13 = vld [vmem:[#allocation30_spill] sm:$0xff] }
 0x351   :  { %1487 = vmatprep.subr.mxu0 %v8834_v15  ;;  %1558 = vmatprep.subr.mxu1 %v7961_v59  ;;  %6548 = vrcp.f32 %v1077_v16  ;;  %v13021_v59 = vld [vmem:[#allocation11_spill] sm:$0xff] }
 0x352   :  { %1488 = vmatpush1.msra.mxu0 %v8838_v12  ;;  %1559 = vmatpush1.msra.mxu1 %v7964_v61  ;;  %v13022_v61 = vld [vmem:[#allocation10_spill] sm:$0xff]  ;;  %v13042_v16 = vld [vmem:[#allocation31_spill] sm:$0xff] }
 0x353   :  { %1489 = vmatprep.subr.mxu0 %v8842_v11  ;;  %1560 = vmatprep.subr.mxu1 %v7969_v63  ;;  %v13024_v63 = vld [vmem:[#allocation12_spill] sm:$0xff] }
 0x354   :  { %1490 = vmatpush1.msra.mxu0 %v7967_v62  ;;  %1561 = vmatpush1.msra.mxu1 %v7975_v2  ;;  %v13023_v62 = vld [vmem:[#allocation13_spill] sm:$0xff]  ;;  %v13026_v2 = vld [vmem:[#allocation14_spill] sm:$0xff] }
 0x355   :  { %1491 = vmatprep.subr.mxu0 %v7973_v0  ;;  %1562 = vmatprep.subr.mxu1 %v7981_v4  ;;  %v13025_v0 = vld [vmem:[#allocation15_spill] sm:$0xff] }
 0x356   :  { %1492 = vmatpush1.msra.mxu0 %v7979_v3  ;;  %1563 = vmatpush1.msra.mxu1 %v7987_v6  ;;  %v13027_v3 = vld [vmem:[#allocation17_spill] sm:$0xff]  ;;  %v13029_v6 = vld [vmem:[#allocation19_spill] sm:$0xff] }
 0x357   :  { %1493 = vmatprep.subr.mxu0 %v7985_v5  ;;  %1564 = vmatprep.subr.mxu1 %v7993_v8  ;;  %v13028_v5 = vld [vmem:[#allocation16_spill] sm:$0xff]  ;;  %v13031_v8 = vld [vmem:[#allocation21_spill] sm:$0xff] }
 0x358   :  { %1494 = vmatpush1.msra.mxu0 %v7991_v7  ;;  %1565 = vmatpush1.msra.mxu1 %v7999_v10  ;;  %v13030_v7 = vld [vmem:[#allocation18_spill] sm:$0xff]  ;;  %v13032_v10 = vld [vmem:[#allocation20_spill] sm:$0xff] }
 0x359   :  { %1495 = vmatprep.subr.mxu0 %v7997_v9  ;;  %1566 = vmatprep.subr.mxu1 %v8005_v34  ;;  %v13034_v34 = vld [vmem:[#allocation22_spill] sm:$0xff] }
 0x35a   :  { %1496 = vmatpush1.msra.mxu0 %v8003_v33  ;;  %1567 = vmatpush1.msra.mxu1 %v8011_v36  ;;  %v13033_v33 = vld [vmem:[#allocation23_spill] sm:$0xff]  ;;  %v13035_v36 = vld [vmem:[#allocation24_spill] sm:$0xff] }
 0x35b   :  { %1497 = vmatprep.subr.mxu0 %v8009_v35  ;;  %1568 = vmatprep.subr.mxu1 %v8017_v38  ;;  %v13037_v38 = vld [vmem:[#allocation26_spill] sm:$0xff] }
 0x35c   :  { %1498 = vmatpush1.msra.mxu0 %v8015_v37  ;;  %1569 = vmatpush1.msra.mxu1 %v8023_v40  ;;  %v13036_v37 = vld [vmem:[#allocation25_spill] sm:$0xff]  ;;  %v13039_v40 = vld [vmem:[#allocation28_spill] sm:$0xff] }
 0x35d   :  { %1499 = vmatprep.subr.mxu0 %v8021_v39  ;;  %1570 = vmatprep.subr.mxu1 %v13021_v59  ;;  %v6547_v4 = vpop.eup %6546  ;;  %v13038_v39 = vld [vmem:[#allocation27_spill] sm:$0xff]  ;;  %v13043_v59 = vld [vmem:[#allocation32_spill] sm:$0xff] }
 0x35e   :  { %1500 = vmatpush1.msra.mxu0 %v13022_v61  ;;  %1571 = vmatpush1.msra.mxu1 %v13023_v62  ;;  %v6549_v9 = vpop.eup %6548  ;;  %v13044_v61 = vld [vmem:[#allocation33_spill] sm:$0xff]  ;;  %v13045_v62 = vld [vmem:[#allocation34_spill] sm:$0xff] }
 0x35f   :  { %1501 = vmatprep.subr.mxu0 %v13024_v63  ;;  %1572 = vmatprep.subr.mxu1 %v13025_v0  ;;  %v1084_v35 = vmul.f32 %v6549_v9, %v6547_v4  ;;  %v13046_v63 = vld [vmem:[#allocation35_spill] sm:$0xff]  ;;  %v13047_v0 = vld [vmem:[#allocation36_spill] sm:$0xff] }
 0x360   :  { %1502 = vmatpush1.msra.mxu0 %v13026_v2  ;;  %1573 = vmatpush1.msra.mxu1 %v13027_v3  ;;  %v13048_v2 = vld [vmem:[#allocation37_spill] sm:$0xff]  ;;  %v13049_v3 = vld [vmem:[#allocation38_spill] sm:$0xff]  ;;  %v13050_v4 = vld [vmem:[#allocation39_spill] sm:$0xff] }
 0x361   :  { %1503 = vmatprep.subr.mxu0 %v13028_v5  ;;  %1574 = vmatprep.subr.mxu1 %v13029_v6  ;;  %v13051_v5 = vld [vmem:[#allocation40_spill] sm:$0xff]  ;;  %v13052_v6 = vld [vmem:[#allocation41_spill] sm:$0xff] }
 0x362   :  { %1504 = vmatpush1.msra.mxu0 %v13030_v7  ;;  %1575 = vmatpush1.msra.mxu1 %v13031_v8  ;;  %v13053_v7 = vld [vmem:[#allocation42_spill] sm:$0xff]  ;;  %v13054_v8 = vld [vmem:[#allocation43_spill] sm:$0xff]  ;;  %v13055_v9 = vld [vmem:[#allocation44_spill] sm:$0xff] }
 0x363   :  { %1505 = vmatprep.subr.mxu0 %v13032_v10  ;;  %1576 = vmatprep.subr.mxu1 %v13033_v33  ;;  %v13056_v10 = vld [vmem:[#allocation45_spill] sm:$0xff]  ;;  %v13057_v33 = vld [vmem:[#allocation46_spill] sm:$0xff] }
 0x364   :  { %1506 = vmatpush1.msra.mxu0 %v13034_v34  ;;  %1539 = vmatprep.mubr.f32.mxu0 %v12890_v60  ;;  %v13058_v34 = vld [vmem:[#allocation47_spill] sm:$0xff] }
 0x365   :  { %1577 = vmatpush1.msra.mxu1 %v13035_v36  ;;  %1610 = vmatprep.mubr.f32.mxu1 %v12890_v60  ;;  %v13060_v36 = vld [vmem:[#allocation49_spill] sm:$0xff] }
 0x366   :  { %1540 = vmatmul.mubr.f32.vlgmr.msra.gmra.mxu0 %v1084_v35  ;;  %1611 = vmatmul.mubr.f32.vlgmr.msra.gmra.mxu1 %v1084_v35  ;;  %v13059_v35 = vld [vmem:[#allocation48_spill] sm:$0xff] }
 0x367   :  { %1617 = vmatprep.subr.mxu0 %v13036_v37  ;;  %1688 = vmatprep.subr.mxu1 %v13037_v38  ;;  %v13061_v37 = vld [vmem:[#allocation50_spill] sm:$0xff]  ;;  %v13062_v38 = vld [vmem:[#allocation51_spill] sm:$0xff] }
 0x368   :  { %1618 = vmatpush1.msra.mxu0 %v13038_v39  ;;  %1689 = vmatpush1.msra.mxu1 %v13039_v40  ;;  %v13063_v39 = vld [vmem:[#allocation52_spill] sm:$0xff]  ;;  %v13064_v40 = vld [vmem:[#allocation53_spill] sm:$0xff] }
 0x369   :  { %1619 = vmatprep.subr.mxu0 %v13040_v1  ;;  %1690 = vmatprep.subr.mxu1 %v13041_v13  ;;  %v13065_v1 = vld [vmem:[#allocation54_spill] sm:$0xff]  ;;  %v13066_v13 = vld [vmem:[#allocation55_spill] sm:$0xff] }
 0x36a   :  { %1620 = vmatpush1.msra.mxu0 %v13042_v16  ;;  %1691 = vmatpush1.msra.mxu1 %v13043_v59  ;;  %v13067_v16 = vld [vmem:[#allocation56_spill] sm:$0xff]  ;;  %v13068_v59 = vld [vmem:[#allocation57_spill] sm:$0xff] }
 0x36b   :  { %1621 = vmatprep.subr.mxu0 %v13044_v61  ;;  %1692 = vmatprep.subr.mxu1 %v13045_v62  ;;  %v13069_v61 = vld [vmem:[#allocation58_spill] sm:$0xff]  ;;  %v13070_v62 = vld [vmem:[#allocation59_spill] sm:$0xff] }
 0x36c   :  { %1622 = vmatpush1.msra.mxu0 %v13046_v63  ;;  %1693 = vmatpush1.msra.mxu1 %v13047_v0  ;;  %v13071_v63 = vld [vmem:[#allocation60_spill] sm:$0xff]  ;;  %v13072_v0 = vld [vmem:[#allocation61_spill] sm:$0xff] }
 0x36d   :  { %1623 = vmatprep.subr.mxu0 %v13048_v2  ;;  %1694 = vmatprep.subr.mxu1 %v13049_v3  ;;  %v13073_v2 = vld [vmem:[#allocation62_spill] sm:$0xff]  ;;  %v13074_v3 = vld [vmem:[#allocation63_spill] sm:$0xff] }
 0x36e   :  { %1624 = vmatpush1.msra.mxu0 %v13050_v4  ;;  %1695 = vmatpush1.msra.mxu1 %v13051_v5  ;;  %v13075_v4 = vld [vmem:[#allocation64_spill] sm:$0xff]  ;;  %v13076_v5 = vld [vmem:[#allocation65_spill] sm:$0xff] }
 0x36f   :  { %1625 = vmatprep.subr.mxu0 %v13052_v6  ;;  %1696 = vmatprep.subr.mxu1 %v13053_v7  ;;  %v13077_v6 = vld [vmem:[#allocation66_spill] sm:$0xff]  ;;  %v13078_v7 = vld [vmem:[#allocation67_spill] sm:$0xff] }
 0x370   :  { %1626 = vmatpush1.msra.mxu0 %v13054_v8  ;;  %1697 = vmatpush1.msra.mxu1 %v13055_v9  ;;  %v13079_v8 = vld [vmem:[#allocation68_spill] sm:$0xff]  ;;  %v13080_v9 = vld [vmem:[#allocation69_spill] sm:$0xff] }
 0x371   :  { %1627 = vmatprep.subr.mxu0 %v13056_v10  ;;  %1698 = vmatprep.subr.mxu1 %v13057_v33  ;;  %v13081_v10 = vld [vmem:[#allocation70_spill] sm:$0xff]  ;;  %v13082_v33 = vld [vmem:[#allocation71_spill] sm:$0xff] }
 0x372   :  { %1628 = vmatpush1.msra.mxu0 %v13058_v34  ;;  %1699 = vmatpush1.msra.mxu1 %v13059_v35  ;;  %v13083_v34 = vld [vmem:[#allocation72_spill] sm:$0xff]  ;;  %v13084_v35 = vld [vmem:[#allocation73_spill] sm:$0xff] }
 0x373   :  { %1629 = vmatprep.subr.mxu0 %v13060_v36  ;;  %1700 = vmatprep.subr.mxu1 %v13061_v37  ;;  %v13085_v36 = vld [vmem:[#allocation74_spill] sm:$0xff]  ;;  %v13086_v37 = vld [vmem:[#allocation75_spill] sm:$0xff] }
 0x374   :  { %1630 = vmatpush1.msra.mxu0 %v13062_v38  ;;  %1701 = vmatpush1.msra.mxu1 %v13063_v39  ;;  %v13087_v38 = vld [vmem:[#allocation76_spill] sm:$0xff]  ;;  %v13088_v39 = vld [vmem:[#allocation77_spill] sm:$0xff] }
 0x375   :  { %1631 = vmatprep.subr.mxu0 %v13064_v40  ;;  %1702 = vmatprep.subr.mxu1 %v13065_v1  ;;  %v13089_v40 = vld [vmem:[#allocation78_spill] sm:$0xff]  ;;  %v13090_v1 = vld [vmem:[#allocation79_spill] sm:$0xff] }
 0x376   :  { %1632 = vmatpush1.msra.mxu0 %v13066_v13  ;;  %1703 = vmatpush1.msra.mxu1 %v13067_v16  ;;  %v13091_v13 = vld [vmem:[#allocation80_spill] sm:$0xff]  ;;  %v13092_v16 = vld [vmem:[#allocation81_spill] sm:$0xff] }
 0x377   :  { %1633 = vmatprep.subr.mxu0 %v13068_v59  ;;  %1704 = vmatprep.subr.mxu1 %v13069_v61  ;;  %v13093_v59 = vld [vmem:[#allocation82_spill] sm:$0xff]  ;;  %v13094_v61 = vld [vmem:[#allocation83_spill] sm:$0xff] }
 0x378   :  { %1634 = vmatpush1.msra.mxu0 %v13070_v62  ;;  %1705 = vmatpush1.msra.mxu1 %v13071_v63  ;;  %v13095_v62 = vld [vmem:[#allocation84_spill] sm:$0xff]  ;;  %v13096_v63 = vld [vmem:[#allocation85_spill] sm:$0xff] }
 0x379   :  { %1635 = vmatprep.subr.mxu0 %v13072_v0  ;;  %1706 = vmatprep.subr.mxu1 %v13073_v2  ;;  %v13097_v0 = vld [vmem:[#allocation86_spill] sm:$0xff]  ;;  %v13098_v2 = vld [vmem:[#allocation87_spill] sm:$0xff] }
 0x37a   :  { %1636 = vmatpush1.msra.mxu0 %v13074_v3  ;;  %1707 = vmatpush1.msra.mxu1 %v13075_v4  ;;  %v13099_v3 = vld [vmem:[#allocation88_spill] sm:$0xff]  ;;  %v13100_v4 = vld [vmem:[#allocation89_spill] sm:$0xff] }
 0x37b   :  { %1637 = vmatprep.subr.mxu0 %v13076_v5  ;;  %1708 = vmatprep.subr.mxu1 %v13077_v6  ;;  %v1229_v5 = vpop.f32.mrf.mxu0  ;;  %v1300_v6 = vpop.f32.mrf.mxu1 }
 0x37c   :  { %1638 = vmatpush1.msra.mxu0 %v13078_v7  ;;  %1709 = vmatpush1.msra.mxu1 %v13079_v8 }
 0x37d   :  { %1639 = vmatprep.subr.mxu0 %v13080_v9  ;;  %1710 = vmatprep.subr.mxu1 %v13081_v10  ;;  %v1231_v7 = vpop.f32.mrf.mxu0  ;;  %v1302_v9 = vpop.f32.mrf.mxu1 }
 0x37e   :  { %1640 = vmatpush1.msra.mxu0 %v13082_v33  ;;  %1711 = vmatpush1.msra.mxu1 %v13083_v34 }
 0x37f   :  { %1641 = vmatprep.subr.mxu0 %v13084_v35  ;;  %1712 = vmatprep.subr.mxu1 %v13085_v36 }
 0x380   :  { %1642 = vmatpush1.msra.mxu0 %v13086_v37  ;;  %1713 = vmatpush1.msra.mxu1 %v13087_v38 }
 0x381   :  { %1643 = vmatprep.subr.mxu0 %v13088_v39  ;;  %1714 = vmatprep.subr.mxu1 %v13089_v40 }
 0x382   :  { %1644 = vmatpush1.msra.mxu0 %v13090_v1  ;;  %1715 = vmatpush1.msra.mxu1 %v13091_v13  ;;  %v13101_v13 = vld [vmem:[#allocation90_spill] sm:$0xff] }
 0x383   :  { %1645 = vmatprep.subr.mxu0 %v13092_v16  ;;  %1716 = vmatprep.subr.mxu1 %v13093_v59 }
 0x384   :  { %1646 = vmatpush1.msra.mxu0 %v13094_v61  ;;  %1717 = vmatpush1.msra.mxu1 %v13095_v62 }
 0x385   :  { %1647 = vmatprep.subr.mxu0 %v13096_v63  ;;  %1718 = vmatprep.subr.mxu1 %v13097_v0 }
 0x386   :  { %1648 = vmatpush1.msra.mxu0 %v13098_v2  ;;  %1719 = vmatpush1.msra.mxu1 %v13099_v3 }
 0x387   :  { %1681 = vmatprep.mubr.f32.mxu0 %v12890_v60  ;;  %1752 = vmatprep.mubr.f32.mxu1 %v12890_v60 }
 0x388   :  { %6295 = vmatprep.subr.mxu0 %v12890_v60  ;;  %1865 = vmatprep.subr.mxu1 %v13100_v4 }
 0x405   :  { %v1371_v8 = vpop.f32.mrf.mxu0  ;;  %v1442_v35 = vpop.f32.mrf.mxu1 }
 0x406   :  { %v1372_v10 = vadd.f32 %v1371_v8, %v1229_v5  ;;  %v1443_v59 = vadd.f32 %v1442_v35, %v1300_v6 }
 0x407   :  { %v1373_v33 = vpop.f32.mrf.mxu0  ;;  %v1444_v40 = vpop.f32.mrf.mxu1 }
 0x408   :  { %v1447_v34 = vadd.f32 %v1372_v10, %v8282_v54  ;;  %v1374_v36 = vadd.f32 %v1373_v33, %v1231_v7  ;;  %v1445_v1 = vadd.f32 %v1444_v40, %v1302_v9  ;;  %v1449_v63 = vadd.f32 %v1443_v59, %v8299_v47  ;;  %v13115_v40 = vld [vmem:[#allocation104_spill] sm:$0xff]  ;;  %v13118_v59 = vld [vmem:[#allocation107_spill] sm:$0xff] }
 0x40a   :  { %v6027_v37 = vmul.f32 -1.442695, %v1447_v34  ;;  %v1448_v38 = vadd.f32 %v1374_v36, %v8286_v51  ;;  %v1450_v16 = vadd.f32 %v1445_v1, %v13101_v13  ;;  %v13116_v1 = vld [vmem:[#allocation105_spill] sm:$0xff] }
 0x40c   :  { %6550 = vpow2.f32 %v6027_v37  ;;  %v6028_v39 = vmul.f32 -1.442695, %v1448_v38  ;;  %v6029_v61 = vmul.f32 -1.442695, %v1450_v16  ;;  %v13112_v37 = vld [vmem:[#allocation101_spill] sm:$0xff]  ;;  %v13113_v38 = vld [vmem:[#allocation102_spill] sm:$0xff] }
 0x40d   :  { %v13117_v16 = vld [vmem:[#allocation106_spill] sm:$0xff] }
 0x40e   :  { %6552 = vpow2.f32 %v6028_v39  ;;  %v13114_v39 = vld [vmem:[#allocation103_spill] sm:$0xff] }
 0x40f   :  { %6554 = vpow2.f32 %v6029_v61  ;;  %v13119_v61 = vld [vmem:[#allocation108_spill] sm:$0xff] }
 0x419   :  { %v6551_v62 = vpop.eup %6550 }
 0x41a   :  { %v1454_v0 = vadd.f32 1.0, %v6551_v62  ;;  %v13120_v62 = vld [vmem:[#allocation109_spill] sm:$0xff] }
 0x41b   :  { %v6553_v2 = vpop.eup %6552 }
 0x41c   :  { %6556 = vrcp.f32 %v1454_v0  ;;  %v1460_v3 = vadd.f32 1.0, %v6553_v2  ;;  %v6555_v4 = vpop.eup %6554  ;;  %v13122_v0 = vld [vmem:[#allocation111_spill] sm:$0xff]  ;;  %v13123_v2 = vld [vmem:[#allocation112_spill] sm:$0xff] }
 0x41d   :  { %6558 = vtanh.f32 %v1449_v63  ;;  %v1467_v10 = vadd.f32 1.0, %v6555_v4  ;;  %v13121_v63 = vld [vmem:[#allocation110_spill] sm:$0xff] }
 0x41e   :  { %6560 = vrcp.f32 %v1460_v3  ;;  %v13124_v3 = vld [vmem:[#allocation113_spill] sm:$0xff]  ;;  %v13125_v4 = vld [vmem:[#allocation114_spill] sm:$0xff] }
 0x41f   :  { %6562 = vrcp.f32 %v1467_v10  ;;  %v13129_v10 = vld [vmem:[#allocation118_spill] sm:$0xff] }
 0x429   :  { %v6557_v5 = vpop.eup %6556 }
 0x42a   :  { %v6559_v7 = vpop.eup %6558 }
 0x42b   :  { %v6561_v8 = vpop.eup %6560  ;;  %v1471_v9 = vmul.f32 %v6559_v7, %v6557_v5  ;;  %v13126_v5 = vld [vmem:[#allocation115_spill] sm:$0xff]  ;;  %v13127_v7 = vld [vmem:[#allocation116_spill] sm:$0xff] }
 0x42c   :  { %v1470_v33 = vmul.f32 %v6561_v8, %v8302_v56  ;;  %v6563_v34 = vpop.eup %6562  ;;  %v13102_v56 = vld [vmem:[#allocation91_spill] sm:$0xff]  ;;  %v13128_v8 = vld [vmem:[#allocation117_spill] sm:$0xff] }
 0x42e   :  { %v8956_v6 = vadd.f32 %v1471_v9, %v1470_v33  ;;  %v13130_v9 = vld [vmem:[#allocation119_spill] sm:$0xff]  ;;  %v13131_v33 = vld [vmem:[#allocation120_spill] sm:$0xff] }
 0x430   :  { %6564 = vtanh.f32 %v8956_v6 }
 0x43d   :  { %v6565_v35 = vpop.eup %6564 }
 0x43e   :  { %v8959_v36 = vmul.f32 %v6565_v35, %v6563_v34  ;;  %v13132_v34 = vld [vmem:[#allocation121_spill] sm:$0xff]  ;;  %v13133_v35 = vld [vmem:[#allocation122_spill] sm:$0xff] }
 0x440   :  { %1682 = vmatmul.mubr.f32.vlgmr.msra.gmra.mxu0 %v8959_v36  ;;  %1753 = vmatmul.mubr.f32.vlgmr.msra.gmra.mxu1 %v8959_v36 }
 0x441   :  { %6296 = vmatpush3.msra.mxu0 %v8309_v45  ;;  %1866 = vmatpush1.msra.mxu1 %v8312_v43  ;;  %v13103_v45 = vld [vmem:[#allocation92_spill] sm:$0xff]  ;;  %v13104_v43 = vld [vmem:[#allocation93_spill] sm:$0xff] }
 0x442   :  { %6297 = vmatprep.subr.mxu0 %v12890_v60  ;;  %1867 = vmatprep.subr.mxu1 %v8316_v44  ;;  %v13105_v44 = vld [vmem:[#allocation94_spill] sm:$0xff] }
 0x443   :  { %6298 = vmatpush3.msra.mxu0 %v8319_v52  ;;  %1868 = vmatpush1.msra.mxu1 %v8322_v46  ;;  %v13106_v52 = vld [vmem:[#allocation95_spill] sm:$0xff]  ;;  %v13107_v46 = vld [vmem:[#allocation96_spill] sm:$0xff] }
 0x444   :  { %6299 = vmatprep.subr.mxu0 %v12890_v60  ;;  %1869 = vmatprep.subr.mxu1 %v8326_v53  ;;  %v13108_v53 = vld [vmem:[#allocation97_spill] sm:$0xff] }
 0x445   :  { %6300 = vmatpush3.msra.mxu0 %v8329_v28  ;;  %1870 = vmatpush1.msra.mxu1 %v8332_v41  ;;  %v13109_v28 = vld [vmem:[#allocation98_spill] sm:$0xff]  ;;  %v13110_v41 = vld [vmem:[#allocation99_spill] sm:$0xff] }
 0x446   :  { %6301 = vmatprep.subr.mxu0 %v12890_v60  ;;  %1871 = vmatprep.subr.mxu1 %v8336_v58  ;;  %v13111_v58 = vld [vmem:[#allocation100_spill] sm:$0xff] }
 0x447   :  { %6302 = vmatpush3.msra.mxu0 %v13102_v56  ;;  %1872 = vmatpush1.msra.mxu1 %v13103_v45  ;;  %v1791_v56 = vpop.permute.xlu1 %1790  ;;  %v13134_v45 = vld [vmem:[#allocation123_spill] sm:$0xff] }
 0x448   :  { %6303 = vmatprep.subr.mxu0 %v12890_v60  ;;  %1873 = vmatprep.subr.mxu1 %v13104_v43  ;;  %v13135_v43 = vld [vmem:[#allocation124_spill] sm:$0xff] }
 0x449   :  { %6304 = vmatpush3.msra.mxu0 %v13105_v44  ;;  %1874 = vmatpush1.msra.mxu1 %v13106_v52  ;;  %v13136_v44 = vld [vmem:[#allocation9_spill] sm:$0xff] }
 0x44a   :  { %6305 = vmatprep.subr.mxu0 %v12890_v60  ;;  %1875 = vmatprep.subr.mxu1 %v13107_v46  ;;  %vm1792_vm3 = vcmp.eq.s32.totalorder %v13136_v44, %v1791_v56  ;;  %v13137_v52 = vld [vmem:[#allocation125_spill] sm:$0xff]  ;;  %v13138_v46 = vld [vmem:[#allocation126_spill] sm:$0xff] }
 0x44b   :  { %6306 = vmatpush3.msra.mxu0 %v13108_v53  ;;  %1876 = vmatpush1.msra.mxu1 %v13109_v28  ;;  %v13139_v53 = vld [vmem:[#allocation127_spill] sm:$0xff]  ;;  %v13141_v28 = vld [vmem:[#allocation128_spill] sm:$0xff]  ;;  %v13166_v56 = vld [vmem:[#allocation153_spill] sm:$0xff] }
 0x44c   :  { %6307 = vmatprep.subr.mxu0 %v12890_v60  ;;  %1877 = vmatprep.subr.mxu1 %v13110_v41  ;;  %v13142_v41 = vld [vmem:[#allocation129_spill] sm:$0xff] }
 0x44d   :  { %6308 = vmatpush3.msra.mxu0 %v13111_v58  ;;  %1878 = vmatpush1.msra.mxu1 %v13112_v37  ;;  %v13143_v58 = vld [vmem:[#allocation130_spill] sm:$0xff]  ;;  %v13144_v37 = vld [vmem:[#allocation131_spill] sm:$0xff] }
 0x44e   :  { %6309 = vmatprep.subr.mxu0 %v12890_v60  ;;  %1879 = vmatprep.subr.mxu1 %v13113_v38  ;;  %v13145_v38 = vld [vmem:[#allocation132_spill] sm:$0xff] }
 0x44f   :  { %6310 = vmatpush3.msra.mxu0 %v13114_v39  ;;  %1880 = vmatpush1.msra.mxu1 %v13115_v40  ;;  %v13146_v39 = vld [vmem:[#allocation133_spill] sm:$0xff]  ;;  %v13147_v40 = vld [vmem:[#allocation134_spill] sm:$0xff] }
 0x450   :  { %6311 = vmatprep.subr.mxu0 %v12890_v60  ;;  %1881 = vmatprep.subr.mxu1 %v13116_v1  ;;  %v13148_v1 = vld [vmem:[#allocation135_spill] sm:$0xff] }
 0x451   :  { %6312 = vmatpush3.msra.mxu0 %v13117_v16  ;;  %1882 = vmatpush1.msra.mxu1 %v13118_v59  ;;  %v13149_v16 = vld [vmem:[#allocation136_spill] sm:$0xff]  ;;  %v13150_v59 = vld [vmem:[#allocation137_spill] sm:$0xff] }
 0x452   :  { %6313 = vmatprep.subr.mxu0 %v12890_v60  ;;  %1883 = vmatprep.subr.mxu1 %v13119_v61  ;;  %v13151_v61 = vld [vmem:[#allocation138_spill] sm:$0xff] }
 0x453   :  { %6314 = vmatpush3.msra.mxu0 %v13120_v62  ;;  %1884 = vmatpush1.msra.mxu1 %v13121_v63  ;;  %v13152_v62 = vld [vmem:[#allocation139_spill] sm:$0xff]  ;;  %v13153_v63 = vld [vmem:[#allocation140_spill] sm:$0xff] }
 0x454   :  { %6315 = vmatprep.subr.mxu0 %v12890_v60  ;;  %1885 = vmatprep.subr.mxu1 %v13122_v0  ;;  %v13154_v0 = vld [vmem:[#allocation141_spill] sm:$0xff] }
 0x455   :  { %6316 = vmatpush3.msra.mxu0 %v13123_v2  ;;  %1886 = vmatpush1.msra.mxu1 %v13124_v3  ;;  %v13155_v2 = vld [vmem:[#allocation142_spill] sm:$0xff]  ;;  %v13156_v3 = vld [vmem:[#allocation143_spill] sm:$0xff] }
 0x456   :  { %6317 = vmatprep.subr.mxu0 %v12890_v60  ;;  %1887 = vmatprep.subr.mxu1 %v13125_v4  ;;  %v13157_v4 = vld [vmem:[#allocation144_spill] sm:$0xff] }
 0x457   :  { %6318 = vmatpush3.msra.mxu0 %v13126_v5  ;;  %1888 = vmatpush1.msra.mxu1 %v13127_v7  ;;  %v13158_v5 = vld [vmem:[#allocation145_spill] sm:$0xff]  ;;  %v13159_v7 = vld [vmem:[#allocation146_spill] sm:$0xff] }
 0x458   :  { %6319 = vmatprep.subr.mxu0 %v12890_v60  ;;  %1889 = vmatprep.subr.mxu1 %v13128_v8  ;;  %v13160_v8 = vld [vmem:[#allocation147_spill] sm:$0xff] }
 0x459   :  { %6320 = vmatpush3.msra.mxu0 %v13129_v10  ;;  %1890 = vmatpush1.msra.mxu1 %v13130_v9  ;;  %v13161_v10 = vld [vmem:[#allocation148_spill] sm:$0xff]  ;;  %v13162_v9 = vld [vmem:[#allocation149_spill] sm:$0xff] }
 0x45a   :  { %6321 = vmatprep.subr.mxu0 %v12890_v60  ;;  %1891 = vmatprep.subr.mxu1 %v13131_v33  ;;  %v13163_v33 = vld [vmem:[#allocation150_spill] sm:$0xff] }
 0x45b   :  { %6322 = vmatpush3.msra.mxu0 %v13132_v34  ;;  %1892 = vmatpush1.msra.mxu1 %v13133_v35  ;;  %v13164_v34 = vld [vmem:[#allocation151_spill] sm:$0xff]  ;;  %v13165_v35 = vld [vmem:[#allocation152_spill] sm:$0xff] }
 0x45c   :  { %6323 = vmatprep.subr.mxu0 %v12890_v60  ;;  %1893 = vmatprep.subr.mxu1 %v8446_v49  ;;  %v13140_v49 = vmov 1.0  }
 0x45d   :  { %6324 = vmatpush3.msra.mxu0 %v13134_v45  ;;  %1894 = vmatpush1.msra.mxu1 %v13135_v43  ;;  %v13167_v45 = vld [vmem:[#allocation154_spill] sm:$0xff]  ;;  %v13168_v43 = vld [vmem:[#allocation155_spill] sm:$0xff] }
 0x45e   :  { %6325 = vmatprep.subr.mxu0 %v12890_v60  ;;  %1895 = vmatprep.subr.mxu1 %v13137_v52  ;;  %v13169_v52 = vld [vmem:[#allocation156_spill] sm:$0xff] }
 0x45f   :  { %6326 = vmatpush3.msra.mxu0 %v13138_v46  ;;  %6327 = vmatprep.mubr.msk.f32.mxu0 %vm7815_vm0, %v12890_v60  ;;  %v13170_v46 = vld [vmem:[#allocation157_spill] sm:$0xff] }
 0x460   :  { %1896 = vmatpush1.msra.mxu1 %v13139_v53  ;;  %1929 = vmatprep.mubr.f32.mxu1 %v12890_v60  ;;  %v13171_v53 = vld [vmem:[#allocation158_spill] sm:$0xff] }
 0x461   :  { %6328 = vmatmul.mubr.msk.f32.vlgmr.msra.gmra.mxu0 %vm1792_vm3, %v13140_v49  ;;  %1930 = vmatmul.mubr.f32.vlgmr.msra.gmra.mxu1 %v8959_v36 }
 0x462   :  { %1936 = vmatprep.subr.mxu0 %v13141_v28  ;;  %2000 = vmatprep.mubr.f32.mxu0 %v12890_v60  ;;  %v13172_v28 = vld [vmem:[#allocation159_spill] sm:$0xff] }
 0x463   :  { %1937 = vmatpush1.msra.mxu0 %v13142_v41  ;;  %2007 = vmatprep.subr.mxu1 %v13143_v58  ;;  %v13173_v41 = vld [vmem:[#allocation160_spill] sm:$0xff]  ;;  %v13174_v58 = vld [vmem:[#allocation161_spill] sm:$0xff] }
 0x464   :  { %1938 = vmatprep.subr.mxu0 %v13144_v37  ;;  %2008 = vmatpush1.msra.mxu1 %v13145_v38  ;;  %v13175_v37 = vld [vmem:[#allocation162_spill] sm:$0xff]  ;;  %v13176_v38 = vld [vmem:[#allocation163_spill] sm:$0xff] }
 0x465   :  { %1939 = vmatpush1.msra.mxu0 %v13146_v39  ;;  %2009 = vmatprep.subr.mxu1 %v13147_v40  ;;  %v13177_v39 = vld [vmem:[#allocation164_spill] sm:$0xff]  ;;  %v13178_v40 = vld [vmem:[#allocation165_spill] sm:$0xff] }
 0x466   :  { %1940 = vmatprep.subr.mxu0 %v13148_v1  ;;  %2010 = vmatpush1.msra.mxu1 %v13149_v16  ;;  %v13179_v1 = vld [vmem:[#allocation166_spill] sm:$0xff]  ;;  %v13180_v16 = vld [vmem:[#allocation167_spill] sm:$0xff] }
 0x467   :  { %1941 = vmatpush1.msra.mxu0 %v13150_v59  ;;  %2011 = vmatprep.subr.mxu1 %v13151_v61  ;;  %v13181_v59 = vld [vmem:[#allocation168_spill] sm:$0xff]  ;;  %v13182_v61 = vld [vmem:[#allocation169_spill] sm:$0xff] }
 0x468   :  { %1942 = vmatprep.subr.mxu0 %v13152_v62  ;;  %2012 = vmatpush1.msra.mxu1 %v13153_v63  ;;  %v13183_v62 = vld [vmem:[#allocation170_spill] sm:$0xff]  ;;  %v13184_v63 = vld [vmem:[#allocation171_spill] sm:$0xff] }
 0x469   :  { %1943 = vmatpush1.msra.mxu0 %v13154_v0  ;;  %2013 = vmatprep.subr.mxu1 %v13155_v2  ;;  %v13185_v0 = vld [vmem:[#allocation172_spill] sm:$0xff]  ;;  %v13186_v2 = vld [vmem:[#allocation173_spill] sm:$0xff] }
 0x46a   :  { %1944 = vmatprep.subr.mxu0 %v13156_v3  ;;  %2014 = vmatpush1.msra.mxu1 %v13157_v4  ;;  %v13187_v3 = vld [vmem:[#allocation174_spill] sm:$0xff]  ;;  %v13188_v4 = vld [vmem:[#allocation175_spill] sm:$0xff] }
 0x46b   :  { %1945 = vmatpush1.msra.mxu0 %v13158_v5  ;;  %2015 = vmatprep.subr.mxu1 %v13159_v7  ;;  %v13189_v5 = vld [vmem:[#allocation176_spill] sm:$0xff]  ;;  %v13190_v7 = vld [vmem:[#allocation177_spill] sm:$0xff] }
 0x46c   :  { %1946 = vmatprep.subr.mxu0 %v13160_v8  ;;  %2016 = vmatpush1.msra.mxu1 %v13161_v10  ;;  %v13191_v8 = vld [vmem:[#allocation178_spill] sm:$0xff]  ;;  %v13192_v10 = vld [vmem:[#allocation179_spill] sm:$0xff] }
 0x46d   :  { %1947 = vmatpush1.msra.mxu0 %v13162_v9  ;;  %2017 = vmatprep.subr.mxu1 %v13163_v33  ;;  %v13193_v9 = vld [vmem:[#allocation180_spill] sm:$0xff]  ;;  %v13194_v33 = vld [vmem:[#allocation181_spill] sm:$0xff] }
 0x46e   :  { %1948 = vmatprep.subr.mxu0 %v13164_v34  ;;  %2018 = vmatpush1.msra.mxu1 %v13165_v35  ;;  %v13195_v34 = vld [vmem:[#allocation182_spill] sm:$0xff]  ;;  %v13196_v35 = vld [vmem:[#allocation183_spill] sm:$0xff] }
 0x46f   :  { %1949 = vmatpush1.msra.mxu0 %v13166_v56  ;;  %2019 = vmatprep.subr.mxu1 %v13167_v45  ;;  %v13197_v56 = vld [vmem:[#allocation184_spill] sm:$0xff]  ;;  %v13198_v45 = vld [vmem:[#allocation185_spill] sm:$0xff] }
 0x470   :  { %1950 = vmatprep.subr.mxu0 %v13168_v43  ;;  %2020 = vmatpush1.msra.mxu1 %v13169_v52  ;;  %v13199_v43 = vld [vmem:[#allocation186_spill] sm:$0xff]  ;;  %v13200_v52 = vld [vmem:[#allocation187_spill] sm:$0xff] }
 0x471   :  { %1951 = vmatpush1.msra.mxu0 %v13170_v46  ;;  %2021 = vmatprep.subr.mxu1 %v13171_v53  ;;  %v13201_v46 = vld [vmem:[#allocation188_spill] sm:$0xff]  ;;  %v13202_v53 = vld [vmem:[#allocation189_spill] sm:$0xff] }
 0x472   :  { %1952 = vmatprep.subr.mxu0 %v13172_v28  ;;  %2022 = vmatpush1.msra.mxu1 %v13173_v41  ;;  %v13203_v28 = vld [vmem:[#allocation190_spill] sm:$0xff]  ;;  %v9098_v41 = vld [vmem:[#allocation4] sm:$0xff] }
 0x473   :  { %1953 = vmatpush1.msra.mxu0 %v13174_v58  ;;  %2023 = vmatprep.subr.mxu1 %v13175_v37  ;;  %v13204_v58 = vld [vmem:[#allocation191_spill] sm:$0xff]  ;;  %v13207_v37 = vld [vmem:[#allocation194_spill] sm:$0xff] }
 0x474   :  { %1954 = vmatprep.subr.mxu0 %v13176_v38  ;;  %2024 = vmatpush1.msra.mxu1 %v13177_v39  ;;  %v13208_v38 = vld [vmem:[#allocation195_spill] sm:$0xff]  ;;  %v13209_v39 = vld [vmem:[#allocation196_spill] sm:$0xff] }
 0x475   :  { %1955 = vmatpush1.msra.mxu0 %v13178_v40  ;;  %2025 = vmatprep.subr.mxu1 %v13179_v1  ;;  %v13210_v40 = vld [vmem:[#allocation197_spill] sm:$0xff]  ;;  %v13212_v1 = vld [vmem:[#allocation199_spill] sm:$0xff] }
 0x476   :  { %1956 = vmatprep.subr.mxu0 %v13180_v16  ;;  %2026 = vmatpush1.msra.mxu1 %v13181_v59  ;;  %v13213_v16 = vld [vmem:[#allocation200_spill] sm:$0xff] }
 0x477   :  { %1957 = vmatpush1.msra.mxu0 %v13182_v61  ;;  %2027 = vmatprep.subr.mxu1 %v13183_v62  ;;  %v9120_v59 = vld [vmem:[#allocation4 + $0xf8] sm:$0xff]  ;;  %v9123_v61 = vld [vmem:[#allocation4 + $0xf0] sm:$0xff] }
 0x478   :  { %1958 = vmatprep.subr.mxu0 %v13184_v63  ;;  %2028 = vmatpush1.msra.mxu1 %v13185_v0  ;;  %v9126_v62 = vld [vmem:[#allocation4 + $0xd8] sm:$0xff]  ;;  %v9141_v0 = vld [vmem:[#allocation4 + $0x90] sm:$0xff] }
 0x479   :  { %1959 = vmatpush1.msra.mxu0 %v13186_v2  ;;  %2029 = vmatprep.subr.mxu1 %v13187_v3  ;;  %v9138_v63 = vld [vmem:[#allocation4 + $0x98] sm:$0xff]  ;;  %v9147_v3 = vld [vmem:[#allocation4 + $0x70] sm:$0xff] }
 0x47a   :  { %1960 = vmatprep.subr.mxu0 %v13188_v4  ;;  %2030 = vmatpush1.msra.mxu1 %v13189_v5  ;;  %v9144_v2 = vld [vmem:[#allocation4 + $0x78] sm:$0xff]  ;;  %v9153_v5 = vld [vmem:[#allocation4 + $0x50] sm:$0xff] }
 0x47b   :  { %1961 = vmatpush1.msra.mxu0 %v13190_v7  ;;  %2031 = vmatprep.subr.mxu1 %v13191_v8  ;;  %v9150_v4 = vld [vmem:[#allocation4 + $0x58] sm:$0xff]  ;;  %v9159_v8 = vld [vmem:[#allocation4 + $0x30] sm:$0xff] }
 0x47c   :  { %1962 = vmatprep.subr.mxu0 %v13192_v10  ;;  %2032 = vmatpush1.msra.mxu1 %v13193_v9  ;;  %v9156_v7 = vld [vmem:[#allocation4 + $0x38] sm:$0xff]  ;;  %v9165_v9 = vld [vmem:[#allocation4 + $0x10] sm:$0xff] }
 0x47d   :  { %1963 = vmatpush1.msra.mxu0 %v13194_v33  ;;  %2033 = vmatprep.subr.mxu1 %v13195_v34  ;;  %v9162_v10 = vld [vmem:[#allocation4 + $0x18] sm:$0xff]  ;;  %v1541_v34 = vpop.f32.mrf.mxu0 }
 0x47e   :  { %1964 = vmatprep.subr.mxu0 %v13196_v35  ;;  %2034 = vmatpush1.msra.mxu1 %v13197_v56  ;;  %v9168_v33 = vld [vmem:[#allocation6 + $0x3f8] sm:$0xff] }
 0x47f   :  { %1965 = vmatpush1.msra.mxu0 %v13198_v45  ;;  %2035 = vmatprep.subr.mxu1 %v13199_v43  ;;  %v1543_v35 = vpop.f32.mrf.mxu0 }
 0x480   :  { %1966 = vmatprep.subr.mxu0 %v8649_v24  ;;  %2036 = vmatpush1.msra.mxu1 %v13200_v52  ;;  %v13205_v24 = vld [vmem:[#allocation192_spill] sm:$0xff] }
 0x481   :  { %1967 = vmatpush1.msra.mxu0 %v13201_v46  ;;  %2037 = vmatprep.subr.mxu1 %v8658_v57  ;;  %v9106_v57 = vld [vmem:[#allocation6 + $0x3e8] sm:$0xff] }
 0x482   :  { %2001 = vmatmul.mubr.f32.vlgmr.msra.gmra.mxu0 %v8959_v36  ;;  %2078 = vmatprep.subr.mxu0 %v13202_v53  ;;  %v13206_v36 = vld [vmem:[#allocation193_spill] sm:$0xff] }
 0x483   :  { %2079 = vmatpush1.msra.mxu0 %v13203_v28  ;;  %2038 = vmatpush1.msra.mxu1 %v9098_v41 }
 0x484   :  { %2080 = vmatprep.subr.mxu0 %v13204_v58  ;;  %2071 = vmatprep.mubr.f32.mxu1 %v12890_v60  ;;  %v1612_v58 = vpop.f32.mrf.mxu1 }
 0x485   :  { %2081 = vmatpush1.msra.mxu0 %v13205_v24  ;;  %2142 = vmatprep.mubr.f32.mxu0 %v12890_v60 }
 0x486   :  { %2082 = vmatprep.subr.mxu0 %v8677_v50  ;;  %2177 = vmatprep.subr.mxu1 %v9106_v57  ;;  %v13211_v50 = vld [vmem:[#allocation198_spill] sm:$0xff] }
 0x487   :  { %2083 = vmatpush1.msra.mxu0 %v13206_v36  ;;  %v1614_v36 = vpop.f32.mrf.mxu1 }
 0x488   :  { %2084 = vmatprep.subr.mxu0 %v13207_v37 }
 0x489   :  { %2085 = vmatpush1.msra.mxu0 %v13208_v38 }
 0x48a   :  { %2086 = vmatprep.subr.mxu0 %v13209_v39 }
 0x48b   :  { %2087 = vmatpush1.msra.mxu0 %v13210_v40 }
 0x48c   :  { %2088 = vmatprep.subr.mxu0 %v8696_v31  ;;  %v9135_v31 = vld [vmem:[#allocation4 + $0xb0] sm:$0xff] }
 0x48d   :  { %2089 = vmatpush1.msra.mxu0 %v8699_v48  ;;  %v9129_v48 = vld [vmem:[#allocation4 + $0xd0] sm:$0xff] }
 0x48e   :  { %2090 = vmatprep.subr.mxu0 %v8702_v29  ;;  %v9132_v29 = vld [vmem:[#allocation4 + $0xb8] sm:$0xff] }
 0x48f   :  { %2091 = vmatpush1.msra.mxu0 %v13211_v50 }
 0x490   :  { %2092 = vmatprep.subr.mxu0 %v13212_v1 }
 0x491   :  { %2093 = vmatpush1.msra.mxu0 %v13213_v16 }
 0x492   :  { %2094 = vmatprep.subr.mxu0 %v9120_v59 }
 0x493   :  { %2095 = vmatpush1.msra.mxu0 %v9123_v61 }
 0x494   :  { %2096 = vmatprep.subr.mxu0 %v9126_v62 }
 0x495   :  { %2097 = vmatpush1.msra.mxu0 %v9129_v48 }
 0x496   :  { %2098 = vmatprep.subr.mxu0 %v9132_v29 }
 0x497   :  { %2099 = vmatpush1.msra.mxu0 %v9135_v31 }
 0x498   :  { %2100 = vmatprep.subr.mxu0 %v9138_v63 }
 0x499   :  { %2101 = vmatpush1.msra.mxu0 %v9141_v0 }
 0x49a   :  { %2102 = vmatprep.subr.mxu0 %v9144_v2 }
 0x49b   :  { %2103 = vmatpush1.msra.mxu0 %v9147_v3 }
 0x49c   :  { %2104 = vmatprep.subr.mxu0 %v9150_v4 }
 0x49d   :  { %2105 = vmatpush1.msra.mxu0 %v9153_v5 }
 0x49e   :  { %2106 = vmatprep.subr.mxu0 %v9156_v7 }
 0x49f   :  { %2107 = vmatpush1.msra.mxu0 %v9159_v8 }
 0x4a0   :  { %2108 = vmatprep.subr.mxu0 %v9162_v10 }
 0x4a1   :  { %2109 = vmatpush1.msra.mxu0 %v9165_v9 }
 0x4a2   :  { %2248 = vmatprep.subr.mxu0 %v9168_v33 }
 0x500   :  { %v1683_v56 = vpop.f32.mrf.mxu0  ;;  %v1754_v37 = vpop.f32.mrf.mxu1 }
 0x501   :  { %v1684_v45 = vadd.f32 %v1683_v56, %v1541_v34  ;;  %v1755_v50 = vadd.f32 %v1754_v37, %v1612_v58  ;;  %v13216_v58 = vld [vmem:[#allocation203_spill] sm:$0xff]  ;;  %v13222_v37 = vld [vmem:[#allocation209_spill] sm:$0xff] }
 0x502   :  { %v1685_v43 = vpop.f32.mrf.mxu0  ;;  %v1756_v38 = vpop.f32.mrf.mxu1 }
 0x503   :  { %v1759_v52 = vadd.f32 %v1684_v45, %v8748_v19  ;;  %v1686_v46 = vadd.f32 %v1685_v43, %v1543_v35  ;;  %v1757_v39 = vadd.f32 %v1756_v38, %v1614_v36  ;;  %v1761_v35 = vadd.f32 %v1755_v50, %v8762_v17  ;;  %v13219_v36 = vld [vmem:[#allocation206_spill] sm:$0xff] }
 0x505   :  { %v6030_v53 = vmul.f32 -1.442695, %v1759_v52  ;;  %v1760_v28 = vadd.f32 %v1686_v46, %v8752_v25  ;;  %v1762_v56 = vadd.f32 %v1757_v39, %v8758_v20  ;;  %v13223_v39 = vld [vmem:[#allocation210_spill] sm:$0xff] }
 0x507   :  { %6566 = vpow2.f32 %v6030_v53  ;;  %v6031_v24 = vmul.f32 -1.442695, %v1760_v28  ;;  %v6032_v45 = vmul.f32 -1.442695, %v1762_v56  ;;  %v13214_v53 = vld [vmem:[#allocation201_spill] sm:$0xff]  ;;  %v13215_v28 = vld [vmem:[#allocation202_spill] sm:$0xff] }
 0x508   :  { %v9228_v56 = vld [vmem:[#allocation6 + $0x2f0] sm:$0xff] }
 0x509   :  { %6568 = vpow2.f32 %v6031_v24  ;;  %v13217_v24 = vld [vmem:[#allocation204_spill] sm:$0xff] }
 0x514   :  { %v6567_v40 = vpop.eup %6566 }
 0x515   :  { %v1766_v16 = vadd.f32 1.0, %v6567_v40  ;;  %v13224_v40 = vld [vmem:[#allocation211_spill] sm:$0xff] }
 0x516   :  { %v6569_v1 = vpop.eup %6568 }
 0x517   :  { %v1772_v34 = vadd.f32 1.0, %v6569_v1  ;;  %v13225_v1 = vld [vmem:[#allocation212_spill] sm:$0xff] }
 0x519   :  { %6570 = vrcp.f32 %v1772_v34  ;;  %v9205_v34 = vld [vmem:[#allocation6 + $0x330] sm:$0xff] }
 0x51a   :  { %6572 = vrcp.f32 %v1766_v16  ;;  %v9201_v16 = vld [vmem:[#allocation6 + $0x338] sm:$0xff] }
 0x51b   :  { %6574 = vtanh.f32 %v1761_v35  ;;  %v9231_v35 = vld [vmem:[#allocation6 + $0x2c8] sm:$0xff] }
 0x51c   :  { %6576 = vpow2.f32 %v6032_v45  ;;  %v9234_v45 = vld [vmem:[#allocation6 + $0x2d8] sm:$0xff] }
 0x521   :  { %v1861_v43 = vpop.f32.mrf.mxu0 }
 0x522   :  { %2072 = vmatmul.mubr.f32.vlgmr.msra.gmra.mxu1 %v1861_v43  ;;  %2143 = vmatmul.mubr.f32.vlgmr.msra.gmra.mxu0 %v1861_v43  ;;  %v9237_v43 = vld [vmem:[#allocation6 + $0x2c0] sm:$0xff] }
 0x523   :  { %2178 = vmatpush1.msra.mxu1 %v8766_v32  ;;  %2249 = vmatpush1.msra.mxu0 %v8769_v23  ;;  %v6329_v52 = vpop.f32.mrf.mxu0  ;;  %v13218_v23 = vld [vmem:[#allocation205_spill] sm:$0xff] }
 0x524   :  { %2179 = vmatprep.subr.mxu1 %v8772_v55  ;;  %2250 = vmatprep.subr.mxu0 %v8775_v42  ;;  %v13220_v42 = vld [vmem:[#allocation207_spill] sm:$0xff] }
 0x525   :  { %2180 = vmatpush1.msra.mxu1 %v8778_v14  ;;  %2251 = vmatpush1.msra.mxu0 %v8781_v18  ;;  %v13221_v14 = vld [vmem:[#allocation208_spill] sm:$0xff]  ;;  %v9240_v52 = vld [vmem:[#allocation6 + $0x2d0] sm:$0xff] }
 0x526   :  { %v6571_v46 = vpop.eup %6570  ;;  %2181 = vmatprep.subr.mxu1 %v13214_v53  ;;  %2252 = vmatprep.subr.mxu0 %v13215_v28  ;;  %13226 = vst [vmem:[#allocation11_spill] sm:$0xff] %v9240_v52  ;;  %v9246_v53 = vld [vmem:[#allocation6 + $0x2b8] sm:$0xff]  ;;  %v9249_v28 = vld [vmem:[#allocation6 + $0x2a0] sm:$0xff] }
 0x527   :  { %2182 = vmatpush1.msra.mxu1 %v13216_v58  ;;  %2253 = vmatpush1.msra.mxu0 %v13217_v24  ;;  %v6573_v32 = vpop.eup %6572  ;;  %v1782_v55 = vmul.f32 %v6571_v46, %v8826_v27  ;;  %v9243_v46 = vld [vmem:[#allocation6 + $0x2a8] sm:$0xff]  ;;  %13228 = vst [vmem:[#allocation13_spill] sm:$0xff] %v9246_v53  ;;  %13229 = vst [vmem:[#allocation12_spill] sm:$0xff] %v9249_v28  ;;  %v9252_v58 = vld [vmem:[#allocation6 + $0x2b0] sm:$0xff] }
 0x528   :  { %2183 = vmatprep.subr.mxu1 %v13218_v23  ;;  %2254 = vmatprep.subr.mxu0 %v13219_v36  ;;  %v6575_v18 = vpop.eup %6574  ;;  %13227 = vst [vmem:[#allocation10_spill] sm:$0xff] %v9243_v46  ;;  %13230 = vst [vmem:[#allocation15_spill] sm:$0xff] %v9252_v58  ;;  %v9255_v24 = vld [vmem:[#allocation6 + $0x288] sm:$0xff]  ;;  %v9261_v23 = vld [vmem:[#allocation6 + $0x280] sm:$0xff] }
 0x529   :  { %2184 = vmatpush1.msra.mxu1 %v13220_v42  ;;  %2255 = vmatpush1.msra.mxu0 %v13221_v14  ;;  %v1783_v38 = vmul.f32 %v6575_v18, %v6573_v32  ;;  %v6577_v50 = vpop.eup %6576  ;;  %13231 = vst [vmem:[#allocation14_spill] sm:$0xff] %v9255_v24  ;;  %v9258_v32 = vld [vmem:[#allocation6 + $0x298] sm:$0xff]  ;;  %13233 = vst [vmem:[#allocation16_spill] sm:$0xff] %v9261_v23  ;;  %v9264_v36 = vld [vmem:[#allocation6 + $0x290] sm:$0xff] }
 0x52a   :  { %2185 = vmatprep.subr.mxu1 %v13222_v37  ;;  %2256 = vmatprep.subr.mxu0 %v8811_v21  ;;  %v1779_v21 = vadd.f32 1.0, %v6577_v50  ;;  %13232 = vst [vmem:[#allocation17_spill] sm:$0xff] %v9258_v32  ;;  %13234 = vst [vmem:[#allocation19_spill] sm:$0xff] %v9264_v36  ;;  %v9270_v42 = vld [vmem:[#allocation6 + $0x278] sm:$0xff]  ;;  %v9273_v14 = vld [vmem:[#allocation6 + $0x260] sm:$0xff] }
 0x52b   :  { %2186 = vmatpush1.msra.mxu1 %v13223_v39  ;;  %2257 = vmatpush1.msra.mxu0 %v13224_v40  ;;  %v9198_v27 = vadd.f32 %v1783_v38, %v1782_v55  ;;  %v9267_v55 = vld [vmem:[#allocation6 + $0x268] sm:$0xff]  ;;  %13236 = vst [vmem:[#allocation21_spill] sm:$0xff] %v9270_v42  ;;  %13237 = vst [vmem:[#allocation20_spill] sm:$0xff] %v9273_v14  ;;  %v9276_v18 = vld [vmem:[#allocation6 + $0x270] sm:$0xff] }
 0x52c   :  { %2187 = vmatprep.subr.mxu1 %v13225_v1  ;;  %2258 = vmatprep.subr.mxu0 %v8823_v22  ;;  %v9209_v22 = vld [vmem:[#allocation6 + $0x318] sm:$0xff]  ;;  %13235 = vst [vmem:[#allocation18_spill] sm:$0xff] %v9267_v55  ;;  %13238 = vst [vmem:[#allocation23_spill] sm:$0xff] %v9276_v18  ;;  %v9279_v37 = vld [vmem:[#allocation6 + $0x248] sm:$0xff] }
 0x52d   :  { %2188 = vmatpush1.msra.mxu1 %v8828_v26  ;;  %2259 = vmatpush1.msra.mxu0 %v8831_v30  ;;  %v9212_v26 = vld [vmem:[#allocation6 + $0x300] sm:$0xff]  ;;  %6578 = vtanh.f32 %v9198_v27  ;;  %v9222_v30 = vld [vmem:[#allocation6 + $0x2f8] sm:$0xff]  ;;  %13239 = vst [vmem:[#allocation22_spill] sm:$0xff] %v9279_v37  ;;  %v9288_v40 = vld [vmem:[#allocation6 + $0x250] sm:$0xff] }
 0x52e   :  { %2189 = vmatprep.subr.mxu1 %v8834_v15  ;;  %2260 = vmatprep.subr.mxu0 %v9201_v16  ;;  %v9215_v15 = vld [vmem:[#allocation6 + $0x310] sm:$0xff]  ;;  %6580 = vrcp.f32 %v1779_v21  ;;  %v9282_v38 = vld [vmem:[#allocation6 + $0x258] sm:$0xff]  ;;  %v9285_v39 = vld [vmem:[#allocation6 + $0x240] sm:$0xff]  ;;  %13242 = vst [vmem:[#allocation26_spill] sm:$0xff] %v9288_v40 }
 0x52f   :  { %2190 = vmatpush1.msra.mxu1 %v8838_v12  ;;  %2261 = vmatpush1.msra.mxu0 %v9205_v34  ;;  %v9219_v12 = vld [vmem:[#allocation6 + $0x2e8] sm:$0xff]  ;;  %13240 = vst [vmem:[#allocation24_spill] sm:$0xff] %v9282_v38  ;;  %13241 = vst [vmem:[#allocation25_spill] sm:$0xff] %v9285_v39  ;;  %v9294_v21 = vld [vmem:[#allocation6 + $0x238] sm:$0xff] }
 0x530   :  { %2191 = vmatprep.subr.mxu1 %v8842_v11  ;;  %2262 = vmatprep.subr.mxu0 %v9209_v22  ;;  %v9225_v11 = vld [vmem:[#allocation6 + $0x2e0] sm:$0xff]  ;;  %v9291_v1 = vld [vmem:[#allocation6 + $0x228] sm:$0xff]  ;;  %13244 = vst [vmem:[#allocation28_spill] sm:$0xff] %v9294_v21 }
 0x531   :  { %2192 = vmatpush1.msra.mxu1 %v9212_v26  ;;  %2263 = vmatpush1.msra.mxu0 %v9215_v15  ;;  %13243 = vst [vmem:[#allocation27_spill] sm:$0xff] %v9291_v1 }
 0x532   :  { %2193 = vmatprep.subr.mxu1 %v9219_v12  ;;  %2264 = vmatprep.subr.mxu0 %v9222_v30 }
 0x533   :  { %2194 = vmatpush1.msra.mxu1 %v9225_v11  ;;  %2265 = vmatpush1.msra.mxu0 %v9228_v56 }
 0x534   :  { %2195 = vmatprep.subr.mxu1 %v9231_v35  ;;  %2266 = vmatprep.subr.mxu0 %v9234_v45 }
 0x535   :  { %2196 = vmatpush1.msra.mxu1 %v9237_v43  ;;  %2267 = vmatpush1.msra.mxu0 %v9240_v52 }
 0x536   :  { %2197 = vmatprep.subr.mxu1 %v9243_v46  ;;  %2268 = vmatprep.subr.mxu0 %v9246_v53 }
 0x537   :  { %2198 = vmatpush1.msra.mxu1 %v9249_v28  ;;  %2269 = vmatpush1.msra.mxu0 %v9252_v58 }
 0x538   :  { %2199 = vmatprep.subr.mxu1 %v9255_v24  ;;  %2270 = vmatprep.subr.mxu0 %v9258_v32 }
 0x539   :  { %2200 = vmatpush1.msra.mxu1 %v9261_v23  ;;  %2271 = vmatpush1.msra.mxu0 %v9264_v36 }
 0x53a   :  { %2201 = vmatprep.subr.mxu1 %v9267_v55  ;;  %2272 = vmatprep.subr.mxu0 %v9270_v42  ;;  %v6579_v50 = vpop.eup %6578 }
 0x53b   :  { %2202 = vmatpush1.msra.mxu1 %v9273_v14  ;;  %2273 = vmatpush1.msra.mxu0 %v9276_v18  ;;  %v9303_v18 = vld [vmem:[#allocation6 + $0x208] sm:$0xff] }
 0x53c   :  { %2203 = vmatprep.subr.mxu1 %v9279_v37  ;;  %2274 = vmatprep.subr.mxu0 %v9282_v38  ;;  %v9297_v37 = vld [vmem:[#allocation6 + $0x220] sm:$0xff]  ;;  %v9300_v38 = vld [vmem:[#allocation6 + $0x230] sm:$0xff]  ;;  %13247 = vst [vmem:[#allocation31_spill] sm:$0xff] %v9303_v18 }
 0x53d   :  { %2204 = vmatpush1.msra.mxu1 %v9285_v39  ;;  %2275 = vmatpush1.msra.mxu0 %v9288_v40  ;;  %13245 = vst [vmem:[#allocation29_spill] sm:$0xff] %v9297_v37  ;;  %13246 = vst [vmem:[#allocation30_spill] sm:$0xff] %v9300_v38  ;;  %v6581_v39 = vpop.eup %6580  ;;  %v9306_v40 = vld [vmem:[#allocation6 + $0x218] sm:$0xff] }
 0x53e   :  { %2205 = vmatprep.subr.mxu1 %v9291_v1  ;;  %2276 = vmatprep.subr.mxu0 %v9294_v21  ;;  %13248 = vst [vmem:[#allocation32_spill] sm:$0xff] %v9306_v40  ;;  %v9309_v1 = vld [vmem:[#allocation6 + $0x200] sm:$0xff]  ;;  %v9313_v21 = vld [vmem:[#allocation6 + $0x210] sm:$0xff] }
 0x53f   :  { %2206 = vmatpush1.msra.mxu1 %v9297_v37  ;;  %2277 = vmatpush1.msra.mxu0 %v9300_v38  ;;  %13249 = vst [vmem:[#allocation33_spill] sm:$0xff] %v9309_v1  ;;  %v1786_v37 = vmul.f32 %v6581_v39, %v6579_v50  ;;  %13250 = vst [vmem:[#allocation34_spill] sm:$0xff] %v9313_v21  ;;  %v9326_v39 = vld [vmem:[#allocation4 + $0x3f0] sm:$0xff]  ;;  %v9329_v50 = vld [vmem:[#allocation4 + $0x3c8] sm:$0xff] }
 0x540   :  { %2207 = vmatprep.subr.mxu1 %v9303_v18  ;;  %2278 = vmatprep.subr.mxu0 %v9306_v40  ;;  %v9317_v18 = vld [vmem:[#allocation4 + $0x3e8] sm:$0xff]  ;;  %v9320_v40 = vld [vmem:[#allocation4 + $0x3f8] sm:$0xff]  ;;  %13254 = vst [vmem:[#allocation38_spill] sm:$0xff] %v9326_v39  ;;  %13255 = vst [vmem:[#allocation39_spill] sm:$0xff] %v9329_v50 }
 0x541   :  { %2208 = vmatpush1.msra.mxu1 %v9309_v1  ;;  %2241 = vmatprep.mubr.f32.mxu1 %v12890_v60  ;;  %13251 = vst [vmem:[#allocation35_spill] sm:$0xff] %v9317_v18  ;;  %13252 = vst [vmem:[#allocation36_spill] sm:$0xff] %v9320_v40  ;;  %v9323_v1 = vld [vmem:[#allocation4 + $0x3e0] sm:$0xff] }
 0x542   :  { %2279 = vmatpush1.msra.mxu0 %v9313_v21  ;;  %2312 = vmatprep.mubr.f32.mxu0 %v12890_v60  ;;  %13253 = vst [vmem:[#allocation37_spill] sm:$0xff] %v9323_v1 }
 0x543   :  { %2242 = vmatmul.mubr.f32.vlgmr.msra.gmra.mxu1 %v1786_v37  ;;  %2313 = vmatmul.mubr.f32.vlgmr.msra.gmra.mxu0 %v1786_v37  ;;  %v9332_v37 = vld [vmem:[#allocation4 + $0x3d8] sm:$0xff] }
 0x544   :  { %2319 = vmatprep.subr.mxu1 %v9317_v18  ;;  %2390 = vmatprep.subr.mxu0 %v9320_v40  ;;  %13256 = vst [vmem:[#allocation40_spill] sm:$0xff] %v9332_v37  ;;  %v9335_v18 = vld [vmem:[#allocation4 + $0x3c0] sm:$0xff]  ;;  %v9338_v40 = vld [vmem:[#allocation4 + $0x3d0] sm:$0xff] }
 0x545   :  { %2320 = vmatpush1.msra.mxu1 %v9323_v1  ;;  %2391 = vmatpush1.msra.mxu0 %v9326_v39  ;;  %13257 = vst [vmem:[#allocation41_spill] sm:$0xff] %v9335_v18  ;;  %13258 = vst [vmem:[#allocation42_spill] sm:$0xff] %v9338_v40  ;;  %v9341_v1 = vld [vmem:[#allocation4 + $0x3a8] sm:$0xff]  ;;  %v9344_v39 = vld [vmem:[#allocation4 + $0x3b8] sm:$0xff] }
 0x546   :  { %2321 = vmatprep.subr.mxu1 %v9329_v50  ;;  %2392 = vmatprep.subr.mxu0 %v9332_v37  ;;  %13259 = vst [vmem:[#allocation43_spill] sm:$0xff] %v9341_v1  ;;  %13260 = vst [vmem:[#allocation44_spill] sm:$0xff] %v9344_v39  ;;  %v9347_v50 = vld [vmem:[#allocation4 + $0x3a0] sm:$0xff]  ;;  %v9350_v37 = vld [vmem:[#allocation4 + $0x3b0] sm:$0xff] }
 0x547   :  { %2322 = vmatpush1.msra.mxu1 %v9335_v18  ;;  %2393 = vmatpush1.msra.mxu0 %v9338_v40  ;;  %13261 = vst [vmem:[#allocation45_spill] sm:$0xff] %v9347_v50  ;;  %13262 = vst [vmem:[#allocation46_spill] sm:$0xff] %v9350_v37  ;;  %v9353_v18 = vld [vmem:[#allocation4 + $0x388] sm:$0xff]  ;;  %v9356_v40 = vld [vmem:[#allocation4 + $0x398] sm:$0xff] }
 0x548   :  { %2323 = vmatprep.subr.mxu1 %v9341_v1  ;;  %2394 = vmatprep.subr.mxu0 %v9344_v39  ;;  %13263 = vst [vmem:[#allocation47_spill] sm:$0xff] %v9353_v18  ;;  %13264 = vst [vmem:[#allocation48_spill] sm:$0xff] %v9356_v40  ;;  %v9359_v1 = vld [vmem:[#allocation4 + $0x380] sm:$0xff]  ;;  %v9362_v39 = vld [vmem:[#allocation4 + $0x390] sm:$0xff] }
 0x549   :  { %2324 = vmatpush1.msra.mxu1 %v9347_v50  ;;  %2395 = vmatpush1.msra.mxu0 %v9350_v37  ;;  %13265 = vst [vmem:[#allocation49_spill] sm:$0xff] %v9359_v1  ;;  %13266 = vst [vmem:[#allocation50_spill] sm:$0xff] %v9362_v39  ;;  %v9365_v50 = vld [vmem:[#allocation4 + $0x368] sm:$0xff]  ;;  %v9368_v37 = vld [vmem:[#allocation4 + $0x378] sm:$0xff] }
 0x54a   :  { %2325 = vmatprep.subr.mxu1 %v9353_v18  ;;  %2396 = vmatprep.subr.mxu0 %v9356_v40  ;;  %13267 = vst [vmem:[#allocation51_spill] sm:$0xff] %v9365_v50  ;;  %13268 = vst [vmem:[#allocation52_spill] sm:$0xff] %v9368_v37  ;;  %v9371_v18 = vld [vmem:[#allocation4 + $0x360] sm:$0xff]  ;;  %v9374_v40 = vld [vmem:[#allocation4 + $0x370] sm:$0xff] }
 0x54b   :  { %2326 = vmatpush1.msra.mxu1 %v9359_v1  ;;  %2397 = vmatpush1.msra.mxu0 %v9362_v39  ;;  %13269 = vst [vmem:[#allocation53_spill] sm:$0xff] %v9371_v18  ;;  %13270 = vst [vmem:[#allocation54_spill] sm:$0xff] %v9374_v40  ;;  %v9377_v1 = vld [vmem:[#allocation4 + $0x348] sm:$0xff]  ;;  %v9380_v39 = vld [vmem:[#allocation4 + $0x358] sm:$0xff] }
 0x54c   :  { %2327 = vmatprep.subr.mxu1 %v9365_v50  ;;  %2398 = vmatprep.subr.mxu0 %v9368_v37  ;;  %13271 = vst [vmem:[#allocation55_spill] sm:$0xff] %v9377_v1  ;;  %13272 = vst [vmem:[#allocation56_spill] sm:$0xff] %v9380_v39  ;;  %v9383_v50 = vld [vmem:[#allocation4 + $0x340] sm:$0xff]  ;;  %v9386_v37 = vld [vmem:[#allocation4 + $0x350] sm:$0xff] }
 0x54d   :  { %2328 = vmatpush1.msra.mxu1 %v9371_v18  ;;  %2399 = vmatpush1.msra.mxu0 %v9374_v40  ;;  %13273 = vst [vmem:[#allocation57_spill] sm:$0xff] %v9383_v50  ;;  %13274 = vst [vmem:[#allocation58_spill] sm:$0xff] %v9386_v37  ;;  %v9389_v18 = vld [vmem:[#allocation4 + $0x328] sm:$0xff]  ;;  %v9392_v40 = vld [vmem:[#allocation4 + $0x338] sm:$0xff] }
 0x54e   :  { %2329 = vmatprep.subr.mxu1 %v9377_v1  ;;  %2400 = vmatprep.subr.mxu0 %v9380_v39  ;;  %13275 = vst [vmem:[#allocation59_spill] sm:$0xff] %v9389_v18  ;;  %13276 = vst [vmem:[#allocation60_spill] sm:$0xff] %v9392_v40  ;;  %v9395_v1 = vld [vmem:[#allocation4 + $0x320] sm:$0xff]  ;;  %v9398_v39 = vld [vmem:[#allocation4 + $0x330] sm:$0xff] }
 0x54f   :  { %2330 = vmatpush1.msra.mxu1 %v9383_v50  ;;  %2401 = vmatpush1.msra.mxu0 %v9386_v37  ;;  %13277 = vst [vmem:[#allocation61_spill] sm:$0xff] %v9395_v1  ;;  %13278 = vst [vmem:[#allocation62_spill] sm:$0xff] %v9398_v39  ;;  %v9401_v50 = vld [vmem:[#allocation4 + $0x308] sm:$0xff]  ;;  %v9404_v37 = vld [vmem:[#allocation4 + $0x318] sm:$0xff] }
 0x550   :  { %2331 = vmatprep.subr.mxu1 %v9389_v18  ;;  %2402 = vmatprep.subr.mxu0 %v9392_v40  ;;  %13279 = vst [vmem:[#allocation63_spill] sm:$0xff] %v9401_v50  ;;  %13280 = vst [vmem:[#allocation64_spill] sm:$0xff] %v9404_v37  ;;  %v9407_v18 = vld [vmem:[#allocation4 + $0x300] sm:$0xff]  ;;  %v9410_v40 = vld [vmem:[#allocation4 + $0x310] sm:$0xff] }
 0x551   :  { %2332 = vmatpush1.msra.mxu1 %v9395_v1  ;;  %2403 = vmatpush1.msra.mxu0 %v9398_v39  ;;  %13281 = vst [vmem:[#allocation65_spill] sm:$0xff] %v9407_v18  ;;  %13282 = vst [vmem:[#allocation66_spill] sm:$0xff] %v9410_v40  ;;  %v9413_v1 = vld [vmem:[#allocation4 + $0x2e8] sm:$0xff]  ;;  %v9416_v39 = vld [vmem:[#allocation4 + $0x2f8] sm:$0xff] }
 0x552   :  { %2333 = vmatprep.subr.mxu1 %v9401_v50  ;;  %2404 = vmatprep.subr.mxu0 %v9404_v37  ;;  %13283 = vst [vmem:[#allocation67_spill] sm:$0xff] %v9413_v1  ;;  %13284 = vst [vmem:[#allocation68_spill] sm:$0xff] %v9416_v39  ;;  %v9419_v50 = vld [vmem:[#allocation4 + $0x2e0] sm:$0xff]  ;;  %v9422_v37 = vld [vmem:[#allocation4 + $0x2f0] sm:$0xff] }
 0x553   :  { %2334 = vmatpush1.msra.mxu1 %v9407_v18  ;;  %2405 = vmatpush1.msra.mxu0 %v9410_v40  ;;  %13285 = vst [vmem:[#allocation69_spill] sm:$0xff] %v9419_v50  ;;  %13286 = vst [vmem:[#allocation70_spill] sm:$0xff] %v9422_v37  ;;  %v9425_v18 = vld [vmem:[#allocation4 + $0x2c8] sm:$0xff]  ;;  %v9428_v40 = vld [vmem:[#allocation4 + $0x2d8] sm:$0xff] }
 0x554   :  { %2335 = vmatprep.subr.mxu1 %v9413_v1  ;;  %2406 = vmatprep.subr.mxu0 %v9416_v39  ;;  %13287 = vst [vmem:[#allocation71_spill] sm:$0xff] %v9425_v18  ;;  %13288 = vst [vmem:[#allocation72_spill] sm:$0xff] %v9428_v40  ;;  %v9431_v1 = vld [vmem:[#allocation4 + $0x2c0] sm:$0xff]  ;;  %v9434_v39 = vld [vmem:[#allocation4 + $0x2d0] sm:$0xff] }
 0x555   :  { %2336 = vmatpush1.msra.mxu1 %v9419_v50  ;;  %2407 = vmatpush1.msra.mxu0 %v9422_v37  ;;  %13289 = vst [vmem:[#allocation73_spill] sm:$0xff] %v9431_v1  ;;  %13290 = vst [vmem:[#allocation74_spill] sm:$0xff] %v9434_v39  ;;  %v9437_v50 = vld [vmem:[#allocation4 + $0x2a8] sm:$0xff]  ;;  %v9440_v37 = vld [vmem:[#allocation4 + $0x2b8] sm:$0xff] }
 0x556   :  { %2337 = vmatprep.subr.mxu1 %v9425_v18  ;;  %2408 = vmatprep.subr.mxu0 %v9428_v40  ;;  %13291 = vst [vmem:[#allocation75_spill] sm:$0xff] %v9437_v50  ;;  %13292 = vst [vmem:[#allocation76_spill] sm:$0xff] %v9440_v37  ;;  %v9443_v18 = vld [vmem:[#allocation4 + $0x2a0] sm:$0xff]  ;;  %v9446_v40 = vld [vmem:[#allocation4 + $0x2b0] sm:$0xff] }
 0x557   :  { %2338 = vmatpush1.msra.mxu1 %v9431_v1  ;;  %2409 = vmatpush1.msra.mxu0 %v9434_v39  ;;  %13293 = vst [vmem:[#allocation77_spill] sm:$0xff] %v9443_v18  ;;  %13294 = vst [vmem:[#allocation78_spill] sm:$0xff] %v9446_v40  ;;  %v9449_v1 = vld [vmem:[#allocation4 + $0x288] sm:$0xff]  ;;  %v9452_v39 = vld [vmem:[#allocation4 + $0x298] sm:$0xff] }
 0x558   :  { %2339 = vmatprep.subr.mxu1 %v9437_v50  ;;  %2410 = vmatprep.subr.mxu0 %v9440_v37  ;;  %13295 = vst [vmem:[#allocation79_spill] sm:$0xff] %v9449_v1  ;;  %13296 = vst [vmem:[#allocation80_spill] sm:$0xff] %v9452_v39  ;;  %v9455_v50 = vld [vmem:[#allocation4 + $0x280] sm:$0xff]  ;;  %v9458_v37 = vld [vmem:[#allocation4 + $0x290] sm:$0xff] }
 0x559   :  { %2340 = vmatpush1.msra.mxu1 %v9443_v18  ;;  %2411 = vmatpush1.msra.mxu0 %v9446_v40  ;;  %13297 = vst [vmem:[#allocation81_spill] sm:$0xff] %v9455_v50  ;;  %13298 = vst [vmem:[#allocation82_spill] sm:$0xff] %v9458_v37  ;;  %v9461_v18 = vld [vmem:[#allocation4 + $0x268] sm:$0xff]  ;;  %v9464_v40 = vld [vmem:[#allocation4 + $0x278] sm:$0xff] }
 0x55a   :  { %2341 = vmatprep.subr.mxu1 %v9449_v1  ;;  %2412 = vmatprep.subr.mxu0 %v9452_v39  ;;  %13299 = vst [vmem:[#allocation83_spill] sm:$0xff] %v9461_v18  ;;  %13300 = vst [vmem:[#allocation84_spill] sm:$0xff] %v9464_v40  ;;  %v9467_v1 = vld [vmem:[#allocation4 + $0x260] sm:$0xff]  ;;  %v9470_v39 = vld [vmem:[#allocation4 + $0x270] sm:$0xff] }
 0x55b   :  { %2342 = vmatpush1.msra.mxu1 %v9455_v50  ;;  %2413 = vmatpush1.msra.mxu0 %v9458_v37  ;;  %13301 = vst [vmem:[#allocation85_spill] sm:$0xff] %v9467_v1  ;;  %13302 = vst [vmem:[#allocation86_spill] sm:$0xff] %v9470_v39  ;;  %v9473_v50 = vld [vmem:[#allocation4 + $0x248] sm:$0xff]  ;;  %v9476_v37 = vld [vmem:[#allocation4 + $0x258] sm:$0xff] }
 0x55c   :  { %2343 = vmatprep.subr.mxu1 %v9461_v18  ;;  %2414 = vmatprep.subr.mxu0 %v9464_v40  ;;  %13303 = vst [vmem:[#allocation87_spill] sm:$0xff] %v9473_v50  ;;  %13304 = vst [vmem:[#allocation88_spill] sm:$0xff] %v9476_v37  ;;  %v9479_v18 = vld [vmem:[#allocation4 + $0x240] sm:$0xff]  ;;  %v9482_v40 = vld [vmem:[#allocation4 + $0x250] sm:$0xff] }
 0x55d   :  { %2344 = vmatpush1.msra.mxu1 %v9467_v1  ;;  %2415 = vmatpush1.msra.mxu0 %v9470_v39  ;;  %13305 = vst [vmem:[#allocation89_spill] sm:$0xff] %v9479_v18  ;;  %13306 = vst [vmem:[#allocation90_spill] sm:$0xff] %v9482_v40  ;;  %v9485_v1 = vld [vmem:[#allocation4 + $0x228] sm:$0xff]  ;;  %v9488_v39 = vld [vmem:[#allocation4 + $0x238] sm:$0xff] }
 0x55e   :  { %2345 = vmatprep.subr.mxu1 %v9473_v50  ;;  %2416 = vmatprep.subr.mxu0 %v9476_v37  ;;  %13307 = vst [vmem:[#allocation91_spill] sm:$0xff] %v9485_v1  ;;  %13308 = vst [vmem:[#allocation92_spill] sm:$0xff] %v9488_v39  ;;  %v9491_v50 = vld [vmem:[#allocation4 + $0x220] sm:$0xff]  ;;  %v9494_v37 = vld [vmem:[#allocation4 + $0x230] sm:$0xff] }
 0x55f   :  { %2346 = vmatpush1.msra.mxu1 %v9479_v18  ;;  %2417 = vmatpush1.msra.mxu0 %v9482_v40  ;;  %13309 = vst [vmem:[#allocation93_spill] sm:$0xff] %v9491_v50  ;;  %13310 = vst [vmem:[#allocation94_spill] sm:$0xff] %v9494_v37  ;;  %v9497_v18 = vld [vmem:[#allocation4 + $0x208] sm:$0xff]  ;;  %v9500_v40 = vld [vmem:[#allocation4 + $0x218] sm:$0xff] }
 0x560   :  { %2347 = vmatprep.subr.mxu1 %v9485_v1  ;;  %2418 = vmatprep.subr.mxu0 %v9488_v39  ;;  %13311 = vst [vmem:[#allocation95_spill] sm:$0xff] %v9497_v18  ;;  %13312 = vst [vmem:[#allocation96_spill] sm:$0xff] %v9500_v40  ;;  %v9503_v1 = vld [vmem:[#allocation4 + $0x200] sm:$0xff]  ;;  %v9506_v39 = vld [vmem:[#allocation4 + $0x210] sm:$0xff] }
 0x561   :  { %2348 = vmatpush1.msra.mxu1 %v9491_v50  ;;  %2419 = vmatpush1.msra.mxu0 %v9494_v37  ;;  %13313 = vst [vmem:[#allocation97_spill] sm:$0xff] %v9503_v1  ;;  %13314 = vst [vmem:[#allocation98_spill] sm:$0xff] %v9506_v39  ;;  %v9512_v37 = vld [vmem:[#allocation6 + $0x1e8] sm:$0xff] }
 0x562   :  { %2349 = vmatprep.subr.mxu1 %v9497_v18  ;;  %2420 = vmatprep.subr.mxu0 %v9500_v40  ;;  %13315 = vst [vmem:[#allocation99_spill] sm:$0xff] %v9512_v37  ;;  %v1931_v18 = vpop.f32.mrf.mxu1  ;;  %v2002_v40 = vpop.f32.mrf.mxu0 }
 0x563   :  { %2350 = vmatpush1.msra.mxu1 %v9503_v1  ;;  %2421 = vmatpush1.msra.mxu0 %v9506_v39 }
 0x564   :  { %2383 = vmatprep.mubr.f32.mxu1 %v12890_v60  ;;  %2454 = vmatprep.mubr.f32.mxu0 %v12890_v60  ;;  %v1933_v50 = vpop.f32.mrf.mxu1  ;;  %v2004_v38 = vpop.f32.mrf.mxu0 }
 0x565   :  { %6330 = vmatprep.subr.mxu1 %v12890_v60  ;;  %2567 = vmatprep.subr.mxu0 %v9512_v37 }
 0x5e2   :  { %v2073_v21 = vpop.f32.mrf.mxu1  ;;  %v2144_v39 = vpop.f32.mrf.mxu0 }
 0x5e3   :  { %v2074_v1 = vadd.f32 %v2073_v21, %v1931_v18  ;;  %v2145_v28 = vadd.f32 %v2144_v39, %v2002_v40  ;;  %v9530_v40 = vld [vmem:[#allocation6 + $0x1e0] sm:$0xff] }
 0x5e4   :  { %v2075_v14 = vpop.f32.mrf.mxu1  ;;  %v2146_v24 = vpop.f32.mrf.mxu0  ;;  %v9540_v39 = vld [vmem:[#allocation6 + $0x1c0] sm:$0xff] }
 0x5e5   :  { %v2149_v42 = vadd.f32 %v2074_v1, %v8282_v54  ;;  %v2076_v55 = vadd.f32 %v2075_v14, %v1933_v50  ;;  %v2147_v58 = vadd.f32 %v2146_v24, %v2004_v38  ;;  %v2151_v18 = vadd.f32 %v2145_v28, %v8299_v47  ;;  %v9537_v1 = vld [vmem:[#allocation2 + $0x70] sm:$0xff]  ;;  %v9544_v50 = vld [vmem:[#allocation6 + $0x1a8] sm:$0xff] }
 0x5e7   :  { %v6036_v36 = vmul.f32 -1.442695, %v2149_v42  ;;  %v2150_v23 = vadd.f32 %v2076_v55, %v8286_v51  ;;  %v2152_v37 = vadd.f32 %v2147_v58, %v13101_v13 }
 0x5e9   :  { %6582 = vpow2.f32 %v6036_v36  ;;  %v6037_v32 = vmul.f32 -1.442695, %v2150_v23  ;;  %v6038_v53 = vmul.f32 -1.442695, %v2152_v37  ;;  %v9547_v37 = vld [vmem:[#allocation2 + $0x68] sm:$0xff] }
 0x5eb   :  { %6584 = vpow2.f32 %v6037_v32 }
 0x5ec   :  { %6586 = vpow2.f32 %v6038_v53 }
 0x5f6   :  { %v6583_v46 = vpop.eup %6582 }
 0x5f7   :  { %v2156_v21 = vadd.f32 1.0, %v6583_v46 }
 0x5f8   :  { %v6585_v52 = vpop.eup %6584 }
 0x5f9   :  { %6588 = vrcp.f32 %v2156_v21  ;;  %v2162_v14 = vadd.f32 1.0, %v6585_v52  ;;  %v6587_v55 = vpop.eup %6586  ;;  %v9527_v52 = vld [vmem:[#allocation2 + $0x78] sm:$0xff]  ;;  %v9554_v21 = vld [vmem:[#allocation6 + $0x188] sm:$0xff] }
 0x5fa   :  { %6590 = vtanh.f32 %v2151_v18  ;;  %v2169_v32 = vadd.f32 1.0, %v6587_v55  ;;  %v9550_v18 = vld [vmem:[#allocation6 + $0x1a0] sm:$0xff] }
 0x5fb   :  { %6592 = vrcp.f32 %v2162_v14  ;;  %v9557_v14 = vld [vmem:[#allocation2 + $0x60] sm:$0xff] }
 0x5fc   :  { %6594 = vrcp.f32 %v2169_v32  ;;  %v9560_v55 = vld [vmem:[#allocation6 + $0x180] sm:$0xff]  ;;  %v9574_v32 = vld [vmem:[#allocation6 + $0x148] sm:$0xff] }
 0x5fd   :  { %13317 = vst [vmem:[#allocation101_spill] sm:$0xff] %v9574_v32 }
 0x606   :  { %v6589_v36 = vpop.eup %6588 }
 0x607   :  { %v6591_v23 = vpop.eup %6590 }
 0x608   :  { %v6593_v42 = vpop.eup %6592  ;;  %v2173_v24 = vmul.f32 %v6591_v23, %v6589_v36  ;;  %v9564_v36 = vld [vmem:[#allocation6 + $0x168] sm:$0xff]  ;;  %v9567_v23 = vld [vmem:[#allocation2 + $0x58] sm:$0xff] }
 0x609   :  { %v2172_v58 = vmul.f32 %v6593_v42, %v8956_v6  ;;  %v6595_v46 = vpop.eup %6594  ;;  %v9534_v6 = vld [vmem:[#allocation6 + $0x1c8] sm:$0xff]  ;;  %v9570_v42 = vld [vmem:[#allocation6 + $0x160] sm:$0xff] }
 0x60a   :  { %13316 = vst [vmem:[#allocation100_spill] sm:$0xff] %v9570_v42 }
 0x60b   :  { %v9520_v38 = vadd.f32 %v2173_v24, %v2172_v58  ;;  %v9577_v24 = vld [vmem:[#allocation2 + $0x50] sm:$0xff]  ;;  %v9580_v58 = vld [vmem:[#allocation6 + $0x140] sm:$0xff] }
 0x60c   :  { %13318 = vst [vmem:[#allocation102_spill] sm:$0xff] %v9577_v24  ;;  %13319 = vst [vmem:[#allocation103_spill] sm:$0xff] %v9580_v58 }
 0x60d   :  { %6596 = vtanh.f32 %v9520_v38 }
 0x61a   :  { %v6597_v28 = vpop.eup %6596 }
 0x61b   :  { %v9523_v53 = vmul.f32 %v6597_v28, %v6595_v46  ;;  %v9584_v46 = vld [vmem:[#allocation6 + $0x128] sm:$0xff] }
 0x61c   :  { %13320 = vst [vmem:[#allocation104_spill] sm:$0xff] %v9584_v46  ;;  %v9587_v28 = vld [vmem:[#allocation2 + $0x48] sm:$0xff] }
 0x61d   :  { %2384 = vmatmul.mubr.f32.vlgmr.msra.gmra.mxu1 %v9523_v53  ;;  %2455 = vmatmul.mubr.f32.vlgmr.msra.gmra.mxu0 %v9523_v53  ;;  %13321 = vst [vmem:[#allocation105_spill] sm:$0xff] %v9587_v28 }
 0x61e   :  { %6331 = vmatpush3.msra.mxu1 %v9527_v52  ;;  %2568 = vmatpush1.msra.mxu0 %v9530_v40 }
 0x61f   :  { %6332 = vmatprep.subr.mxu1 %v12890_v60  ;;  %2569 = vmatprep.subr.mxu0 %v9534_v6 }
 0x620   :  { %6333 = vmatpush3.msra.mxu1 %v9537_v1  ;;  %2570 = vmatpush1.msra.mxu0 %v9540_v39 }
 0x621   :  { %6334 = vmatprep.subr.mxu1 %v12890_v60  ;;  %2571 = vmatprep.subr.mxu0 %v9544_v50 }
 0x622   :  { %6335 = vmatpush3.msra.mxu1 %v9547_v37  ;;  %2572 = vmatpush1.msra.mxu0 %v9550_v18 }
 0x623   :  { %6336 = vmatprep.subr.mxu1 %v12890_v60  ;;  %2573 = vmatprep.subr.mxu0 %v9554_v21 }
 0x624   :  { %6337 = vmatpush3.msra.mxu1 %v9557_v14  ;;  %2574 = vmatpush1.msra.mxu0 %v9560_v55 }
 0x625   :  { %6338 = vmatprep.subr.mxu1 %v12890_v60  ;;  %2575 = vmatprep.subr.mxu0 %v9564_v36 }
 0x626   :  { %6339 = vmatpush3.msra.mxu1 %v9567_v23  ;;  %2576 = vmatpush1.msra.mxu0 %v9570_v42  ;;  %v9590_v42 = vld [vmem:[#allocation6 + $0x120] sm:$0xff] }
 0x627   :  { %6340 = vmatprep.subr.mxu1 %v12890_v60  ;;  %2577 = vmatprep.subr.mxu0 %v9574_v32  ;;  %13322 = vst [vmem:[#allocation106_spill] sm:$0xff] %v9590_v42  ;;  %v9600_v32 = vld [vmem:[#allocation6 + $0x100] sm:$0xff] }
 0x628   :  { %6341 = vmatpush3.msra.mxu1 %v9577_v24  ;;  %2578 = vmatpush1.msra.mxu0 %v9580_v58  ;;  %v9594_v24 = vld [vmem:[#allocation6 + $0x108] sm:$0xff]  ;;  %v9597_v58 = vld [vmem:[#allocation2 + $0x40] sm:$0xff]  ;;  %13325 = vst [vmem:[#allocation109_spill] sm:$0xff] %v9600_v32 }
 0x629   :  { %6342 = vmatprep.subr.mxu1 %v12890_v60  ;;  %2579 = vmatprep.subr.mxu0 %v9584_v46  ;;  %13323 = vst [vmem:[#allocation107_spill] sm:$0xff] %v9594_v24  ;;  %13324 = vst [vmem:[#allocation108_spill] sm:$0xff] %v9597_v58  ;;  %v9610_v46 = vld [vmem:[#allocation6 + $0xe0] sm:$0xff] }
 0x62a   :  { %6343 = vmatpush3.msra.mxu1 %v9587_v28  ;;  %2580 = vmatpush1.msra.mxu0 %v9590_v42  ;;  %v9604_v28 = vld [vmem:[#allocation6 + $0xe8] sm:$0xff]  ;;  %v9607_v42 = vld [vmem:[#allocation2 + $0x38] sm:$0xff]  ;;  %13328 = vst [vmem:[#allocation112_spill] sm:$0xff] %v9610_v46 }
 0x62b   :  { %6344 = vmatprep.subr.mxu1 %v12890_v60  ;;  %2581 = vmatprep.subr.mxu0 %v9594_v24  ;;  %13326 = vst [vmem:[#allocation110_spill] sm:$0xff] %v9604_v28  ;;  %13327 = vst [vmem:[#allocation111_spill] sm:$0xff] %v9607_v42  ;;  %v9620_v24 = vld [vmem:[#allocation6 + $0xc0] sm:$0xff] }
 0x62c   :  { %6345 = vmatpush3.msra.mxu1 %v9597_v58  ;;  %2582 = vmatpush1.msra.mxu0 %v9600_v32  ;;  %v9614_v58 = vld [vmem:[#allocation6 + $0xc8] sm:$0xff]  ;;  %v9617_v32 = vld [vmem:[#allocation2 + $0x30] sm:$0xff]  ;;  %13331 = vst [vmem:[#allocation115_spill] sm:$0xff] %v9620_v24 }
 0x62d   :  { %6346 = vmatprep.subr.mxu1 %v12890_v60  ;;  %2583 = vmatprep.subr.mxu0 %v9604_v28  ;;  %13329 = vst [vmem:[#allocation113_spill] sm:$0xff] %v9614_v58  ;;  %13330 = vst [vmem:[#allocation114_spill] sm:$0xff] %v9617_v32  ;;  %v9630_v28 = vld [vmem:[#allocation6 + $0xa0] sm:$0xff] }
 0x62e   :  { %6347 = vmatpush3.msra.mxu1 %v9607_v42  ;;  %2584 = vmatpush1.msra.mxu0 %v9610_v46  ;;  %v9624_v42 = vld [vmem:[#allocation6 + $0xa8] sm:$0xff]  ;;  %13334 = vst [vmem:[#allocation118_spill] sm:$0xff] %v9630_v28 }
 0x62f   :  { %6348 = vmatprep.subr.mxu1 %v12890_v60  ;;  %2585 = vmatprep.subr.mxu0 %v9614_v58  ;;  %13332 = vst [vmem:[#allocation116_spill] sm:$0xff] %v9624_v42  ;;  %v9627_v46 = vld [vmem:[#allocation2 + $0x28] sm:$0xff]  ;;  %v9640_v58 = vld [vmem:[#allocation6 + $0x80] sm:$0xff] }
 0x630   :  { %6349 = vmatpush3.msra.mxu1 %v9617_v32  ;;  %2586 = vmatpush1.msra.mxu0 %v9620_v24  ;;  %13333 = vst [vmem:[#allocation117_spill] sm:$0xff] %v9627_v46  ;;  %v9634_v32 = vld [vmem:[#allocation6 + $0x88] sm:$0xff]  ;;  %v9637_v24 = vld [vmem:[#allocation2 + $0x20] sm:$0xff]  ;;  %13337 = vst [vmem:[#allocation121_spill] sm:$0xff] %v9640_v58 }
 0x631   :  { %6350 = vmatprep.subr.mxu1 %v12890_v60  ;;  %2587 = vmatprep.subr.mxu0 %v9624_v42  ;;  %13335 = vst [vmem:[#allocation119_spill] sm:$0xff] %v9634_v32  ;;  %13336 = vst [vmem:[#allocation120_spill] sm:$0xff] %v9637_v24  ;;  %v9650_v42 = vld [vmem:[#allocation6 + $0x60] sm:$0xff] }
 0x632   :  { %6351 = vmatpush3.msra.mxu1 %v9627_v46  ;;  %2588 = vmatpush1.msra.mxu0 %v9630_v28  ;;  %v9644_v46 = vld [vmem:[#allocation6 + $0x68] sm:$0xff]  ;;  %v9647_v28 = vld [vmem:[#allocation2 + $0x18] sm:$0xff]  ;;  %13340 = vst [vmem:[#allocation124_spill] sm:$0xff] %v9650_v42 }
 0x633   :  { %6352 = vmatprep.subr.mxu1 %v12890_v60  ;;  %2589 = vmatprep.subr.mxu0 %v9634_v32  ;;  %13338 = vst [vmem:[#allocation122_spill] sm:$0xff] %v9644_v46  ;;  %13339 = vst [vmem:[#allocation123_spill] sm:$0xff] %v9647_v28  ;;  %v9660_v32 = vld [vmem:[#allocation6 + $0x40] sm:$0xff] }
 0x634   :  { %6353 = vmatpush3.msra.mxu1 %v9637_v24  ;;  %2590 = vmatpush1.msra.mxu0 %v9640_v58  ;;  %v9654_v24 = vld [vmem:[#allocation6 + $0x48] sm:$0xff]  ;;  %v9657_v58 = vld [vmem:[#allocation2 + $0x10] sm:$0xff]  ;;  %13343 = vst [vmem:[#allocation127_spill] sm:$0xff] %v9660_v32 }
 0x635   :  { %6354 = vmatprep.subr.mxu1 %v12890_v60  ;;  %2591 = vmatprep.subr.mxu0 %v9644_v46  ;;  %13341 = vst [vmem:[#allocation125_spill] sm:$0xff] %v9654_v24  ;;  %13342 = vst [vmem:[#allocation126_spill] sm:$0xff] %v9657_v58  ;;  %v9670_v46 = vld [vmem:[#allocation6 + $0x20] sm:$0xff] }
 0x636   :  { %6355 = vmatpush3.msra.mxu1 %v9647_v28  ;;  %2592 = vmatpush1.msra.mxu0 %v9650_v42  ;;  %v9664_v28 = vld [vmem:[#allocation6 + $0x28] sm:$0xff] }
 0x637   :  { %6356 = vmatprep.subr.mxu1 %v12890_v60  ;;  %2593 = vmatprep.subr.mxu0 %v9654_v24  ;;  %v9667_v42 = vld [vmem:[#allocation2 + $0x8] sm:$0xff]  ;;  %v9677_v24 = vld [vmem:[#allocation2] sm:$0xff] }
 0x638   :  { %6357 = vmatpush3.msra.mxu1 %v9657_v58  ;;  %2594 = vmatpush1.msra.mxu0 %v9660_v32  ;;  %13344 = vst [vmem:[#allocation128_spill] sm:$0xff] %v9667_v42  ;;  %v9674_v58 = vld [vmem:[#allocation6 + $0x8] sm:$0xff]  ;;  %v2493_v32 = vpop.permute.xlu1 %2492  ;;  %13346 = vst [vmem:[#allocation130_spill] sm:$0xff] %v9677_v24 }
 0x639   :  { %6358 = vmatprep.subr.mxu1 %v12890_v60  ;;  %2595 = vmatprep.subr.mxu0 %v9664_v28  ;;  %13345 = vst [vmem:[#allocation129_spill] sm:$0xff] %v9674_v58  ;;  %vm2494_vm4 = vcmp.eq.s32.totalorder %v13136_v44, %v2493_v32  ;;  %v9696_v32 = vld [vmem:[#allocation4 + $0x1e8] sm:$0xff]  ;;  %v9705_v44 = vld [vmem:[#allocation6 + $0x1d0] sm:$0xff] }
 0x63a   :  { %6359 = vmatpush3.msra.mxu1 %v9667_v42  ;;  %2596 = vmatpush1.msra.mxu0 %v9670_v46  ;;  %v9683_v42 = vld [vmem:[#allocation6] sm:$0xff]  ;;  %13350 = vst [vmem:[#allocation134_spill] sm:$0xff] %v9696_v32  ;;  %13353 = vst [vmem:[#allocation137_spill] sm:$0xff] %v9705_v44 }
 0x63b   :  { %6360 = vmatprep.subr.mxu1 %v12890_v60  ;;  %2597 = vmatprep.subr.mxu0 %v9674_v58  ;;  %13347 = vst [vmem:[#allocation131_spill] sm:$0xff] %v9683_v42  ;;  %v9689_v58 = vld [vmem:[#allocation6 + $0x1f8] sm:$0xff] }
 0x63c   :  { %6361 = vmatpush3.msra.mxu1 %v9677_v24  ;;  %6362 = vmatprep.mubr.msk.f32.mxu1 %vm7815_vm0, %v12890_v60  ;;  %13348 = vst [vmem:[#allocation132_spill] sm:$0xff] %v9689_v58  ;;  %v9693_v24 = vld [vmem:[#allocation6 + $0x1f0] sm:$0xff] }
 0x63d   :  { %2598 = vmatpush1.msra.mxu0 %v9683_v42  ;;  %2631 = vmatprep.mubr.f32.mxu0 %v12890_v60  ;;  %13349 = vst [vmem:[#allocation133_spill] sm:$0xff] %v9693_v24  ;;  %v9699_v42 = vld [vmem:[#allocation6 + $0x1d8] sm:$0xff] }
 0x63e   :  { %6363 = vmatmul.mubr.msk.f32.vlgmr.msra.gmra.mxu1 %vm2494_vm4, %v13140_v49  ;;  %2632 = vmatmul.mubr.f32.vlgmr.msra.gmra.mxu0 %v9523_v53  ;;  %13351 = vst [vmem:[#allocation135_spill] sm:$0xff] %v9699_v42  ;;  %v9702_v49 = vld [vmem:[#allocation4 + $0x1e0] sm:$0xff] }
 0x63f   :  { %2638 = vmatprep.subr.mxu1 %v9689_v58  ;;  %2702 = vmatprep.mubr.f32.mxu1 %v12890_v60  ;;  %13352 = vst [vmem:[#allocation136_spill] sm:$0xff] %v9702_v49  ;;  %v9708_v58 = vld [vmem:[#allocation4 + $0x1c8] sm:$0xff] }
 0x640   :  { %2639 = vmatpush1.msra.mxu1 %v9693_v24  ;;  %2709 = vmatprep.subr.mxu0 %v9696_v32  ;;  %13354 = vst [vmem:[#allocation138_spill] sm:$0xff] %v9708_v58  ;;  %v9711_v24 = vld [vmem:[#allocation6 + $0x1b8] sm:$0xff]  ;;  %v9714_v32 = vld [vmem:[#allocation4 + $0x1c0] sm:$0xff] }
 0x641   :  { %2640 = vmatprep.subr.mxu1 %v9699_v42  ;;  %2710 = vmatpush1.msra.mxu0 %v9702_v49  ;;  %13355 = vst [vmem:[#allocation139_spill] sm:$0xff] %v9711_v24  ;;  %13356 = vst [vmem:[#allocation140_spill] sm:$0xff] %v9714_v32  ;;  %v9717_v42 = vld [vmem:[#allocation6 + $0x1b0] sm:$0xff]  ;;  %v9720_v49 = vld [vmem:[#allocation4 + $0x1a8] sm:$0xff] }
 0x642   :  { %2641 = vmatpush1.msra.mxu1 %v9705_v44  ;;  %2711 = vmatprep.subr.mxu0 %v9708_v58  ;;  %13357 = vst [vmem:[#allocation141_spill] sm:$0xff] %v9717_v42  ;;  %13358 = vst [vmem:[#allocation142_spill] sm:$0xff] %v9720_v49  ;;  %v9723_v44 = vld [vmem:[#allocation6 + $0x198] sm:$0xff]  ;;  %v9726_v58 = vld [vmem:[#allocation4 + $0x1a0] sm:$0xff] }
 0x643   :  { %2642 = vmatprep.subr.mxu1 %v9711_v24  ;;  %2712 = vmatpush1.msra.mxu0 %v9714_v32  ;;  %13359 = vst [vmem:[#allocation143_spill] sm:$0xff] %v9723_v44  ;;  %13360 = vst [vmem:[#allocation144_spill] sm:$0xff] %v9726_v58  ;;  %v9729_v24 = vld [vmem:[#allocation6 + $0x190] sm:$0xff]  ;;  %v9732_v32 = vld [vmem:[#allocation4 + $0x188] sm:$0xff] }
 0x644   :  { %2643 = vmatpush1.msra.mxu1 %v9717_v42  ;;  %2713 = vmatprep.subr.mxu0 %v9720_v49  ;;  %13361 = vst [vmem:[#allocation145_spill] sm:$0xff] %v9729_v24  ;;  %13362 = vst [vmem:[#allocation146_spill] sm:$0xff] %v9732_v32  ;;  %v9735_v42 = vld [vmem:[#allocation6 + $0x178] sm:$0xff]  ;;  %v9738_v49 = vld [vmem:[#allocation4 + $0x180] sm:$0xff] }
 0x645   :  { %2644 = vmatprep.subr.mxu1 %v9723_v44  ;;  %2714 = vmatpush1.msra.mxu0 %v9726_v58  ;;  %13363 = vst [vmem:[#allocation147_spill] sm:$0xff] %v9735_v42  ;;  %13364 = vst [vmem:[#allocation148_spill] sm:$0xff] %v9738_v49  ;;  %v9741_v44 = vld [vmem:[#allocation6 + $0x170] sm:$0xff]  ;;  %v9744_v58 = vld [vmem:[#allocation4 + $0x168] sm:$0xff] }
 0x646   :  { %2645 = vmatpush1.msra.mxu1 %v9729_v24  ;;  %2715 = vmatprep.subr.mxu0 %v9732_v32  ;;  %13365 = vst [vmem:[#allocation149_spill] sm:$0xff] %v9741_v44  ;;  %13366 = vst [vmem:[#allocation150_spill] sm:$0xff] %v9744_v58  ;;  %v9747_v24 = vld [vmem:[#allocation6 + $0x158] sm:$0xff]  ;;  %v9750_v32 = vld [vmem:[#allocation4 + $0x160] sm:$0xff] }
 0x647   :  { %2646 = vmatprep.subr.mxu1 %v9735_v42  ;;  %2716 = vmatpush1.msra.mxu0 %v9738_v49  ;;  %13367 = vst [vmem:[#allocation151_spill] sm:$0xff] %v9747_v24  ;;  %13368 = vst [vmem:[#allocation152_spill] sm:$0xff] %v9750_v32  ;;  %v9753_v42 = vld [vmem:[#allocation6 + $0x150] sm:$0xff]  ;;  %v9756_v49 = vld [vmem:[#allocation4 + $0x148] sm:$0xff] }
 0x648   :  { %2647 = vmatpush1.msra.mxu1 %v9741_v44  ;;  %2717 = vmatprep.subr.mxu0 %v9744_v58  ;;  %13369 = vst [vmem:[#allocation153_spill] sm:$0xff] %v9753_v42  ;;  %13370 = vst [vmem:[#allocation154_spill] sm:$0xff] %v9756_v49  ;;  %v9759_v44 = vld [vmem:[#allocation6 + $0x138] sm:$0xff]  ;;  %v9762_v58 = vld [vmem:[#allocation4 + $0x140] sm:$0xff] }
 0x649   :  { %2648 = vmatprep.subr.mxu1 %v9747_v24  ;;  %2718 = vmatpush1.msra.mxu0 %v9750_v32  ;;  %13371 = vst [vmem:[#allocation155_spill] sm:$0xff] %v9759_v44  ;;  %13372 = vst [vmem:[#allocation156_spill] sm:$0xff] %v9762_v58  ;;  %v9765_v24 = vld [vmem:[#allocation6 + $0x130] sm:$0xff]  ;;  %v9768_v32 = vld [vmem:[#allocation4 + $0x128] sm:$0xff] }
 0x64a   :  { %2649 = vmatpush1.msra.mxu1 %v9753_v42  ;;  %2719 = vmatprep.subr.mxu0 %v9756_v49  ;;  %13373 = vst [vmem:[#allocation157_spill] sm:$0xff] %v9765_v24  ;;  %13374 = vst [vmem:[#allocation158_spill] sm:$0xff] %v9768_v32  ;;  %v9771_v42 = vld [vmem:[#allocation6 + $0x118] sm:$0xff]  ;;  %v9774_v49 = vld [vmem:[#allocation4 + $0x120] sm:$0xff] }
 0x64b   :  { %2650 = vmatprep.subr.mxu1 %v9759_v44  ;;  %2720 = vmatpush1.msra.mxu0 %v9762_v58  ;;  %13375 = vst [vmem:[#allocation159_spill] sm:$0xff] %v9771_v42  ;;  %13376 = vst [vmem:[#allocation160_spill] sm:$0xff] %v9774_v49  ;;  %v9777_v44 = vld [vmem:[#allocation6 + $0x110] sm:$0xff]  ;;  %v9780_v58 = vld [vmem:[#allocation4 + $0x108] sm:$0xff] }
 0x64c   :  { %2651 = vmatpush1.msra.mxu1 %v9765_v24  ;;  %2721 = vmatprep.subr.mxu0 %v9768_v32  ;;  %13377 = vst [vmem:[#allocation161_spill] sm:$0xff] %v9777_v44  ;;  %13378 = vst [vmem:[#allocation162_spill] sm:$0xff] %v9780_v58  ;;  %v9783_v24 = vld [vmem:[#allocation6 + $0xf8] sm:$0xff]  ;;  %v9786_v32 = vld [vmem:[#allocation4 + $0x100] sm:$0xff] }
 0x64d   :  { %2652 = vmatprep.subr.mxu1 %v9771_v42  ;;  %2722 = vmatpush1.msra.mxu0 %v9774_v49  ;;  %13379 = vst [vmem:[#allocation163_spill] sm:$0xff] %v9783_v24  ;;  %13380 = vst [vmem:[#allocation164_spill] sm:$0xff] %v9786_v32  ;;  %v9789_v42 = vld [vmem:[#allocation6 + $0xf0] sm:$0xff]  ;;  %v9792_v49 = vld [vmem:[#allocation4 + $0xe8] sm:$0xff] }
 0x64e   :  { %2653 = vmatpush1.msra.mxu1 %v9777_v44  ;;  %2723 = vmatprep.subr.mxu0 %v9780_v58  ;;  %13381 = vst [vmem:[#allocation165_spill] sm:$0xff] %v9789_v42  ;;  %13382 = vst [vmem:[#allocation166_spill] sm:$0xff] %v9792_v49  ;;  %v9795_v44 = vld [vmem:[#allocation6 + $0xd8] sm:$0xff]  ;;  %v9798_v58 = vld [vmem:[#allocation4 + $0xe0] sm:$0xff] }
 0x64f   :  { %2654 = vmatprep.subr.mxu1 %v9783_v24  ;;  %2724 = vmatpush1.msra.mxu0 %v9786_v32  ;;  %13383 = vst [vmem:[#allocation167_spill] sm:$0xff] %v9795_v44  ;;  %13384 = vst [vmem:[#allocation168_spill] sm:$0xff] %v9798_v58  ;;  %v9801_v24 = vld [vmem:[#allocation6 + $0xd0] sm:$0xff]  ;;  %v9804_v32 = vld [vmem:[#allocation4 + $0xc8] sm:$0xff] }
 0x650   :  { %2655 = vmatpush1.msra.mxu1 %v9789_v42  ;;  %2725 = vmatprep.subr.mxu0 %v9792_v49  ;;  %13385 = vst [vmem:[#allocation169_spill] sm:$0xff] %v9801_v24  ;;  %13386 = vst [vmem:[#allocation170_spill] sm:$0xff] %v9804_v32  ;;  %v9807_v42 = vld [vmem:[#allocation6 + $0xb8] sm:$0xff]  ;;  %v9810_v49 = vld [vmem:[#allocation4 + $0xc0] sm:$0xff] }
 0x651   :  { %2656 = vmatprep.subr.mxu1 %v9795_v44  ;;  %2726 = vmatpush1.msra.mxu0 %v9798_v58  ;;  %13387 = vst [vmem:[#allocation171_spill] sm:$0xff] %v9807_v42  ;;  %13388 = vst [vmem:[#allocation172_spill] sm:$0xff] %v9810_v49  ;;  %v9813_v44 = vld [vmem:[#allocation6 + $0xb0] sm:$0xff]  ;;  %v9816_v58 = vld [vmem:[#allocation4 + $0xa8] sm:$0xff] }
 0x652   :  { %2657 = vmatpush1.msra.mxu1 %v9801_v24  ;;  %2727 = vmatprep.subr.mxu0 %v9804_v32  ;;  %13389 = vst [vmem:[#allocation173_spill] sm:$0xff] %v9813_v44  ;;  %13390 = vst [vmem:[#allocation174_spill] sm:$0xff] %v9816_v58  ;;  %v9819_v24 = vld [vmem:[#allocation6 + $0x98] sm:$0xff]  ;;  %v9822_v32 = vld [vmem:[#allocation4 + $0xa0] sm:$0xff] }
 0x653   :  { %2658 = vmatprep.subr.mxu1 %v9807_v42  ;;  %2728 = vmatpush1.msra.mxu0 %v9810_v49  ;;  %13391 = vst [vmem:[#allocation175_spill] sm:$0xff] %v9819_v24  ;;  %13392 = vst [vmem:[#allocation176_spill] sm:$0xff] %v9822_v32  ;;  %v9825_v42 = vld [vmem:[#allocation6 + $0x90] sm:$0xff]  ;;  %v9828_v49 = vld [vmem:[#allocation4 + $0x88] sm:$0xff] }
 0x654   :  { %2659 = vmatpush1.msra.mxu1 %v9813_v44  ;;  %2729 = vmatprep.subr.mxu0 %v9816_v58  ;;  %13393 = vst [vmem:[#allocation177_spill] sm:$0xff] %v9825_v42  ;;  %13394 = vst [vmem:[#allocation178_spill] sm:$0xff] %v9828_v49  ;;  %v9831_v44 = vld [vmem:[#allocation6 + $0x78] sm:$0xff]  ;;  %v9834_v58 = vld [vmem:[#allocation4 + $0x80] sm:$0xff] }
 0x655   :  { %2660 = vmatprep.subr.mxu1 %v9819_v24  ;;  %2730 = vmatpush1.msra.mxu0 %v9822_v32  ;;  %13395 = vst [vmem:[#allocation179_spill] sm:$0xff] %v9831_v44  ;;  %13396 = vst [vmem:[#allocation180_spill] sm:$0xff] %v9834_v58  ;;  %v9837_v24 = vld [vmem:[#allocation6 + $0x70] sm:$0xff]  ;;  %v9840_v32 = vld [vmem:[#allocation4 + $0x68] sm:$0xff] }
 0x656   :  { %2661 = vmatpush1.msra.mxu1 %v9825_v42  ;;  %2731 = vmatprep.subr.mxu0 %v9828_v49  ;;  %13397 = vst [vmem:[#allocation181_spill] sm:$0xff] %v9837_v24  ;;  %13398 = vst [vmem:[#allocation182_spill] sm:$0xff] %v9840_v32  ;;  %v9843_v42 = vld [vmem:[#allocation6 + $0x58] sm:$0xff]  ;;  %v9846_v49 = vld [vmem:[#allocation4 + $0x60] sm:$0xff] }
 0x657   :  { %2662 = vmatprep.subr.mxu1 %v9831_v44  ;;  %2732 = vmatpush1.msra.mxu0 %v9834_v58  ;;  %13399 = vst [vmem:[#allocation183_spill] sm:$0xff] %v9843_v42  ;;  %13400 = vst [vmem:[#allocation184_spill] sm:$0xff] %v9846_v49  ;;  %v9849_v44 = vld [vmem:[#allocation6 + $0x50] sm:$0xff]  ;;  %v9852_v58 = vld [vmem:[#allocation4 + $0x48] sm:$0xff] }
 0x658   :  { %2663 = vmatpush1.msra.mxu1 %v9837_v24  ;;  %2733 = vmatprep.subr.mxu0 %v9840_v32  ;;  %13401 = vst [vmem:[#allocation185_spill] sm:$0xff] %v9849_v44  ;;  %13402 = vst [vmem:[#allocation186_spill] sm:$0xff] %v9852_v58  ;;  %v9855_v24 = vld [vmem:[#allocation6 + $0x38] sm:$0xff]  ;;  %v9858_v32 = vld [vmem:[#allocation4 + $0x40] sm:$0xff] }
 0x659   :  { %2664 = vmatprep.subr.mxu1 %v9843_v42  ;;  %2734 = vmatpush1.msra.mxu0 %v9846_v49  ;;  %13403 = vst [vmem:[#allocation187_spill] sm:$0xff] %v9855_v24  ;;  %13404 = vst [vmem:[#allocation188_spill] sm:$0xff] %v9858_v32  ;;  %v9861_v42 = vld [vmem:[#allocation6 + $0x30] sm:$0xff]  ;;  %v9864_v49 = vld [vmem:[#allocation4 + $0x28] sm:$0xff] }
 0x65a   :  { %2665 = vmatpush1.msra.mxu1 %v9849_v44  ;;  %2735 = vmatprep.subr.mxu0 %v9852_v58  ;;  %13405 = vst [vmem:[#allocation189_spill] sm:$0xff] %v9861_v42  ;;  %13406 = vst [vmem:[#allocation190_spill] sm:$0xff] %v9864_v49  ;;  %v9867_v44 = vld [vmem:[#allocation6 + $0x18] sm:$0xff]  ;;  %v9870_v58 = vld [vmem:[#allocation4 + $0x20] sm:$0xff] }
 0x65b   :  { %2666 = vmatprep.subr.mxu1 %v9855_v24  ;;  %2736 = vmatpush1.msra.mxu0 %v9858_v32  ;;  %13407 = vst [vmem:[#allocation191_spill] sm:$0xff] %v9870_v58  ;;  %v9873_v24 = vld [vmem:[#allocation6 + $0x10] sm:$0xff]  ;;  %v9876_v32 = vld [vmem:[#allocation4 + $0x8] sm:$0xff] }
 0x65c   :  { %2667 = vmatpush1.msra.mxu1 %v9861_v42  ;;  %2737 = vmatprep.subr.mxu0 %v9864_v49  ;;  %13408 = vst [vmem:[#allocation192_spill] sm:$0xff] %v9873_v24  ;;  %v9880_v42 = vld [vmem:[#allocation4 + $0x1f8] sm:$0xff]  ;;  %v9883_v49 = vld [vmem:[#allocation4 + $0x1f0] sm:$0xff] }
 0x65d   :  { %2668 = vmatprep.subr.mxu1 %v9867_v44  ;;  %2738 = vmatpush1.msra.mxu0 %v9870_v58  ;;  %13409 = vst [vmem:[#allocation193_spill] sm:$0xff] %v9880_v42  ;;  %13410 = vst [vmem:[#allocation194_spill] sm:$0xff] %v9883_v49  ;;  %v9887_v58 = vld [vmem:[#allocation4 + $0x1d8] sm:$0xff] }
 0x65e   :  { %2669 = vmatpush1.msra.mxu1 %v9873_v24  ;;  %2739 = vmatprep.subr.mxu0 %v9876_v32  ;;  %13411 = vst [vmem:[#allocation195_spill] sm:$0xff] %v9887_v58  ;;  %v9891_v24 = vld [vmem:[#allocation4 + $0x1d0] sm:$0xff] }
 0x65f   :  { %2703 = vmatmul.mubr.f32.vlgmr.msra.gmra.mxu1 %v9523_v53  ;;  %2780 = vmatprep.subr.mxu1 %v9880_v42  ;;  %13412 = vst [vmem:[#allocation196_spill] sm:$0xff] %v9891_v24  ;;  %v9895_v53 = vld [vmem:[#allocation4 + $0x1b8] sm:$0xff]  ;;  %v9911_v42 = vld [vmem:[#allocation4 + $0x170] sm:$0xff] }
 0x660   :  { %2781 = vmatpush1.msra.mxu1 %v9883_v49  ;;  %2740 = vmatpush1.msra.mxu0 %v9098_v41  ;;  %v9899_v49 = vld [vmem:[#allocation4 + $0x1b0] sm:$0xff]  ;;  %v9902_v41 = vld [vmem:[#allocation4 + $0x198] sm:$0xff]  ;;  %13417 = vst [vmem:[#allocation201_spill] sm:$0xff] %v9911_v42 }
 0x661   :  { %2782 = vmatprep.subr.mxu1 %v9887_v58  ;;  %2773 = vmatprep.mubr.f32.mxu0 %v12890_v60  ;;  %13413 = vst [vmem:[#allocation197_spill] sm:$0xff] %v9899_v49  ;;  %13414 = vst [vmem:[#allocation198_spill] sm:$0xff] %v9902_v41  ;;  %v9905_v58 = vld [vmem:[#allocation4 + $0x190] sm:$0xff] }
 0x662   :  { %2783 = vmatpush1.msra.mxu1 %v9891_v24  ;;  %2844 = vmatprep.mubr.f32.mxu1 %v12890_v60  ;;  %13415 = vst [vmem:[#allocation199_spill] sm:$0xff] %v9905_v58  ;;  %v9908_v24 = vld [vmem:[#allocation4 + $0x178] sm:$0xff] }
 0x663   :  { %2784 = vmatprep.subr.mxu1 %v9895_v53  ;;  %2879 = vmatprep.subr.mxu0 %v9106_v57  ;;  %13416 = vst [vmem:[#allocation200_spill] sm:$0xff] %v9908_v24  ;;  %v9914_v57 = vld [vmem:[#allocation4 + $0x158] sm:$0xff] }
 0x664   :  { %2785 = vmatpush1.msra.mxu1 %v9899_v49  ;;  %v9917_v49 = vld [vmem:[#allocation4 + $0x150] sm:$0xff] }
 0x665   :  { %2786 = vmatprep.subr.mxu1 %v9902_v41  ;;  %v9920_v41 = vld [vmem:[#allocation4 + $0x138] sm:$0xff] }
 0x666   :  { %2787 = vmatpush1.msra.mxu1 %v9905_v58  ;;  %v9923_v58 = vld [vmem:[#allocation4 + $0x130] sm:$0xff] }
 0x667   :  { %2788 = vmatprep.subr.mxu1 %v9908_v24  ;;  %v9926_v24 = vld [vmem:[#allocation4 + $0x118] sm:$0xff] }
 0x668   :  { %2789 = vmatpush1.msra.mxu1 %v9911_v42  ;;  %13418 = vst [vmem:[#allocation202_spill] sm:$0xff] %v9926_v24  ;;  %v9929_v42 = vld [vmem:[#allocation4 + $0x110] sm:$0xff] }
 0x669   :  { %2790 = vmatprep.subr.mxu1 %v9914_v57  ;;  %13419 = vst [vmem:[#allocation203_spill] sm:$0xff] %v9929_v42 }
 0x66a   :  { %2791 = vmatpush1.msra.mxu1 %v9917_v49 }
 0x66b   :  { %2792 = vmatprep.subr.mxu1 %v9920_v41 }
 0x66c   :  { %2793 = vmatpush1.msra.mxu1 %v9923_v58 }
 0x66d   :  { %2794 = vmatprep.subr.mxu1 %v9926_v24 }
 0x66e   :  { %2795 = vmatpush1.msra.mxu1 %v9929_v42 }
 0x66f   :  { %2796 = vmatprep.subr.mxu1 %v9120_v59  ;;  %v2243_v59 = vpop.f32.mrf.mxu1 }
 0x670   :  { %2797 = vmatpush1.msra.mxu1 %v9123_v61 }
 0x671   :  { %2798 = vmatprep.subr.mxu1 %v9126_v62  ;;  %v2245_v61 = vpop.f32.mrf.mxu1 }
 0x672   :  { %2799 = vmatpush1.msra.mxu1 %v9129_v48 }
 0x673   :  { %2800 = vmatprep.subr.mxu1 %v9132_v29 }
 0x674   :  { %2801 = vmatpush1.msra.mxu1 %v9135_v31 }
 0x675   :  { %2802 = vmatprep.subr.mxu1 %v9138_v63 }
 0x676   :  { %2803 = vmatpush1.msra.mxu1 %v9141_v0 }
 0x677   :  { %2804 = vmatprep.subr.mxu1 %v9144_v2 }
 0x678   :  { %2805 = vmatpush1.msra.mxu1 %v9147_v3  ;;  %v2314_v3 = vpop.f32.mrf.mxu0 }
 0x679   :  { %2806 = vmatprep.subr.mxu1 %v9150_v4 }
 0x67a   :  { %2807 = vmatpush1.msra.mxu1 %v9153_v5  ;;  %v2316_v5 = vpop.f32.mrf.mxu0 }
 0x67b   :  { %2808 = vmatprep.subr.mxu1 %v9156_v7 }
 0x67c   :  { %2809 = vmatpush1.msra.mxu1 %v9159_v8 }
 0x67d   :  { %2810 = vmatprep.subr.mxu1 %v9162_v10 }
 0x67e   :  { %2811 = vmatpush1.msra.mxu1 %v9165_v9 }
 0x67f   :  { %2950 = vmatprep.subr.mxu1 %v9168_v33 }
 0x6dd   :  { %v2385_v62 = vpop.f32.mrf.mxu1  ;;  %v2456_v7 = vpop.f32.mrf.mxu0 }
 0x6de   :  { %v2386_v48 = vadd.f32 %v2385_v62, %v2243_v59  ;;  %v2457_v33 = vadd.f32 %v2456_v7, %v2314_v3  ;;  %v9968_v3 = vld [vmem:[#allocation6 + $0x3d0] sm:$0xff]  ;;  %v9974_v7 = vld [vmem:[#allocation6 + $0x3b8] sm:$0xff] }
 0x6df   :  { %v2387_v29 = vpop.f32.mrf.mxu1  ;;  %v2458_v8 = vpop.f32.mrf.mxu0 }
 0x6e0   :  { %v2461_v31 = vadd.f32 %v2386_v48, %v8748_v19  ;;  %v2388_v63 = vadd.f32 %v2387_v29, %v2245_v61  ;;  %v2459_v10 = vadd.f32 %v2458_v8, %v2316_v5  ;;  %v2463_v61 = vadd.f32 %v2457_v33, %v8762_v17  ;;  %v9971_v5 = vld [vmem:[#allocation6 + $0x3a8] sm:$0xff]  ;;  %v9977_v8 = vld [vmem:[#allocation6 + $0x3a0] sm:$0xff] }
 0x6e1   :  { %v9983_v33 = vld [vmem:[#allocation6 + $0x388] sm:$0xff] }
 0x6e2   :  { %v6039_v0 = vmul.f32 -1.442695, %v2461_v31  ;;  %v2462_v2 = vadd.f32 %v2388_v63, %v8752_v25  ;;  %v2464_v62 = vadd.f32 %v2459_v10, %v8758_v20  ;;  %v9953_v31 = vld [vmem:[#allocation6 + $0x3e0] sm:$0xff]  ;;  %v9956_v63 = vld [vmem:[#allocation6 + $0x3f0] sm:$0xff]  ;;  %13421 = vst [vmem:[#allocation205_spill] sm:$0xff] %v9983_v33 }
 0x6e3   :  { %v9980_v10 = vld [vmem:[#allocation6 + $0x3b0] sm:$0xff] }
 0x6e4   :  { %6598 = vpow2.f32 %v6039_v0  ;;  %v6040_v4 = vmul.f32 -1.442695, %v2462_v2  ;;  %v6041_v48 = vmul.f32 -1.442695, %v2464_v62  ;;  %v9959_v0 = vld [vmem:[#allocation6 + $0x3c8] sm:$0xff]  ;;  %v9965_v2 = vld [vmem:[#allocation6 + $0x3c0] sm:$0xff] }
 0x6e5   :  { %13420 = vst [vmem:[#allocation204_spill] sm:$0xff] %v9980_v10 }
 0x6e6   :  { %6600 = vpow2.f32 %v6040_v4 }
 0x6f1   :  { %v6599_v9 = vpop.eup %6598 }
 0x6f2   :  { %v2468_v24 = vadd.f32 1.0, %v6599_v9 }
 0x6f3   :  { %v6601_v42 = vpop.eup %6600 }
 0x6f4   :  { %v2474_v59 = vadd.f32 1.0, %v6601_v42 }
 0x6f6   :  { %6602 = vrcp.f32 %v2474_v59  ;;  %v9986_v59 = vld [vmem:[#allocation6 + $0x398] sm:$0xff] }
 0x6f7   :  { %6604 = vrcp.f32 %v2468_v24  ;;  %v9962_v24 = vld [vmem:[#allocation6 + $0x3d8] sm:$0xff]  ;;  %13422 = vst [vmem:[#allocation206_spill] sm:$0xff] %v9986_v59 }
 0x6f8   :  { %6606 = vtanh.f32 %v2463_v61  ;;  %v9990_v61 = vld [vmem:[#allocation6 + $0x380] sm:$0xff] }
 0x6f9   :  { %6608 = vpow2.f32 %v6041_v48  ;;  %13423 = vst [vmem:[#allocation207_spill] sm:$0xff] %v9990_v61  ;;  %v9993_v48 = vld [vmem:[#allocation6 + $0x390] sm:$0xff] }
 0x6fa   :  { %13424 = vst [vmem:[#allocation208_spill] sm:$0xff] %v9993_v48 }
 0x6fe   :  { %v2563_v29 = vpop.f32.mrf.mxu1 }
 0x6ff   :  { %2774 = vmatmul.mubr.f32.vlgmr.msra.gmra.mxu0 %v2563_v29  ;;  %2845 = vmatmul.mubr.f32.vlgmr.msra.gmra.mxu1 %v2563_v29 }
 0x700   :  { %2880 = vmatpush1.msra.mxu0 %v9953_v31  ;;  %2951 = vmatpush1.msra.mxu1 %v9956_v63  ;;  %v6364_v42 = vpop.f32.mrf.mxu1 }
 0x701   :  { %2881 = vmatprep.subr.mxu0 %v9959_v0  ;;  %2952 = vmatprep.subr.mxu1 %v9962_v24  ;;  %v9996_v42 = vld [vmem:[#allocation6 + $0x368] sm:$0xff] }
 0x702   :  { %2882 = vmatpush1.msra.mxu0 %v9965_v2  ;;  %2953 = vmatpush1.msra.mxu1 %v9968_v3  ;;  %13425 = vst [vmem:[#allocation209_spill] sm:$0xff] %v9996_v42 }
 0x703   :  { %v6603_v4 = vpop.eup %6602  ;;  %2883 = vmatprep.subr.mxu0 %v9971_v5  ;;  %2954 = vmatprep.subr.mxu1 %v9974_v7 }
 0x704   :  { %2884 = vmatpush1.msra.mxu0 %v9977_v8  ;;  %2955 = vmatpush1.msra.mxu1 %v9980_v10  ;;  %v6605_v9 = vpop.eup %6604  ;;  %v2484_v62 = vmul.f32 %v6603_v4, %v9198_v27  ;;  %v10002_v10 = vld [vmem:[#allocation6 + $0x360] sm:$0xff]  ;;  %v10005_v27 = vld [vmem:[#allocation6 + $0x370] sm:$0xff] }
 0x705   :  { %2885 = vmatprep.subr.mxu0 %v9983_v33  ;;  %2956 = vmatprep.subr.mxu1 %v9986_v59  ;;  %v6607_v29 = vpop.eup %6606  ;;  %v9999_v33 = vld [vmem:[#allocation6 + $0x378] sm:$0xff]  ;;  %13426 = vst [vmem:[#allocation210_spill] sm:$0xff] %v10002_v10  ;;  %13427 = vst [vmem:[#allocation211_spill] sm:$0xff] %v10005_v27 }
 0x706   :  { %2886 = vmatpush1.msra.mxu0 %v9990_v61  ;;  %2957 = vmatpush1.msra.mxu1 %v9993_v48  ;;  %v2485_v59 = vmul.f32 %v6607_v29, %v6605_v9  ;;  %v6609_v4 = vpop.eup %6608  ;;  %v10008_v48 = vld [vmem:[#allocation6 + $0x348] sm:$0xff]  ;;  %v10011_v61 = vld [vmem:[#allocation6 + $0x358] sm:$0xff]  ;;  %v10017_v9 = vld [vmem:[#allocation6 + $0x350] sm:$0xff] }
 0x707   :  { %2887 = vmatprep.subr.mxu0 %v9996_v42  ;;  %2958 = vmatprep.subr.mxu1 %v9999_v33  ;;  %13428 = vst [vmem:[#allocation212_spill] sm:$0xff] %v10008_v48  ;;  %v10014_v42 = vld [vmem:[#allocation6 + $0x340] sm:$0xff]  ;;  %13430 = vst [vmem:[#allocation214_spill] sm:$0xff] %v10017_v9 }
 0x708   :  { %2888 = vmatpush1.msra.mxu0 %v10002_v10  ;;  %2959 = vmatpush1.msra.mxu1 %v10005_v27  ;;  %13429 = vst [vmem:[#allocation213_spill] sm:$0xff] %v10014_v42  ;;  %v10020_v29 = vadd.f32 %v2485_v59, %v2484_v62  ;;  %v10022_v27 = vld [vmem:[#allocation6 + $0x328] sm:$0xff]  ;;  %v10026_v10 = vld [vmem:[#allocation6 + $0x320] sm:$0xff]  ;;  %v13446_v59 = vld [vmem:[#allocation23_spill] sm:$0xff] }
 0x709   :  { %2889 = vmatprep.subr.mxu0 %v10008_v48  ;;  %2960 = vmatprep.subr.mxu1 %v10011_v61  ;;  %13431 = vst [vmem:[#allocation215_spill] sm:$0xff] %v10022_v27  ;;  %v2481_v48 = vadd.f32 1.0, %v6609_v4  ;;  %13432 = vst [vmem:[#allocation216_spill] sm:$0xff] %v10026_v10  ;;  %v13447_v62 = vld [vmem:[#allocation22_spill] sm:$0xff]  ;;  %v13449_v4 = vld [vmem:[#allocation25_spill] sm:$0xff] }
 0x70a   :  { %2890 = vmatpush1.msra.mxu0 %v10014_v42  ;;  %2961 = vmatpush1.msra.mxu1 %v10017_v9  ;;  %v10030_v42 = vld [vmem:[#allocation6 + $0x308] sm:$0xff]  ;;  %6610 = vtanh.f32 %v10020_v29 }
 0x70b   :  { %2891 = vmatprep.subr.mxu0 %v10022_v27  ;;  %2962 = vmatprep.subr.mxu1 %v9201_v16  ;;  %13433 = vst [vmem:[#allocation217_spill] sm:$0xff] %v10030_v42  ;;  %6612 = vrcp.f32 %v2481_v48  ;;  %v13434_v16 = vld [vmem:[#allocation11_spill] sm:$0xff]  ;;  %v13448_v48 = vld [vmem:[#allocation24_spill] sm:$0xff] }
 0x70c   :  { %2892 = vmatpush1.msra.mxu0 %v10026_v10  ;;  %2963 = vmatpush1.msra.mxu1 %v9205_v34  ;;  %v13435_v34 = vld [vmem:[#allocation10_spill] sm:$0xff] }
 0x70d   :  { %2893 = vmatprep.subr.mxu0 %v10030_v42  ;;  %2964 = vmatprep.subr.mxu1 %v9209_v22  ;;  %v13436_v22 = vld [vmem:[#allocation13_spill] sm:$0xff] }
 0x70e   :  { %2894 = vmatpush1.msra.mxu0 %v9212_v26  ;;  %2965 = vmatpush1.msra.mxu1 %v9215_v15  ;;  %v13437_v26 = vld [vmem:[#allocation12_spill] sm:$0xff]  ;;  %v13438_v15 = vld [vmem:[#allocation15_spill] sm:$0xff] }
 0x70f   :  { %2895 = vmatprep.subr.mxu0 %v9219_v12  ;;  %2966 = vmatprep.subr.mxu1 %v9222_v30  ;;  %v13439_v12 = vld [vmem:[#allocation14_spill] sm:$0xff]  ;;  %v13440_v30 = vld [vmem:[#allocation17_spill] sm:$0xff] }
 0x710   :  { %2896 = vmatpush1.msra.mxu0 %v9225_v11  ;;  %2967 = vmatpush1.msra.mxu1 %v9228_v56  ;;  %v13441_v11 = vld [vmem:[#allocation16_spill] sm:$0xff]  ;;  %v13442_v56 = vld [vmem:[#allocation19_spill] sm:$0xff] }
 0x711   :  { %2897 = vmatprep.subr.mxu0 %v9231_v35  ;;  %2968 = vmatprep.subr.mxu1 %v9234_v45  ;;  %v13443_v35 = vld [vmem:[#allocation18_spill] sm:$0xff]  ;;  %v13444_v45 = vld [vmem:[#allocation21_spill] sm:$0xff] }
 0x712   :  { %2898 = vmatpush1.msra.mxu0 %v9237_v43  ;;  %2969 = vmatpush1.msra.mxu1 %v13434_v16  ;;  %v13445_v43 = vld [vmem:[#allocation20_spill] sm:$0xff]  ;;  %v13450_v16 = vld [vmem:[#allocation26_spill] sm:$0xff] }
 0x713   :  { %2899 = vmatprep.subr.mxu0 %v13435_v34  ;;  %2970 = vmatprep.subr.mxu1 %v13436_v22  ;;  %v13451_v22 = vld [vmem:[#allocation27_spill] sm:$0xff] }
 0x714   :  { %2900 = vmatpush1.msra.mxu0 %v13437_v26  ;;  %2971 = vmatpush1.msra.mxu1 %v13438_v15  ;;  %v13452_v26 = vld [vmem:[#allocation28_spill] sm:$0xff]  ;;  %v13453_v15 = vld [vmem:[#allocation29_spill] sm:$0xff] }
 0x715   :  { %2901 = vmatprep.subr.mxu0 %v13439_v12  ;;  %2972 = vmatprep.subr.mxu1 %v13440_v30  ;;  %v13454_v12 = vld [vmem:[#allocation30_spill] sm:$0xff] }
 0x716   :  { %2902 = vmatpush1.msra.mxu0 %v13441_v11  ;;  %2973 = vmatpush1.msra.mxu1 %v13442_v56  ;;  %v13455_v11 = vld [vmem:[#allocation31_spill] sm:$0xff]  ;;  %v13456_v56 = vld [vmem:[#allocation32_spill] sm:$0xff] }
 0x717   :  { %2903 = vmatprep.subr.mxu0 %v13443_v35  ;;  %2974 = vmatprep.subr.mxu1 %v13444_v45  ;;  %v6611_v34 = vpop.eup %6610  ;;  %v13457_v35 = vld [vmem:[#allocation33_spill] sm:$0xff] }
 0x718   :  { %2904 = vmatpush1.msra.mxu0 %v13445_v43  ;;  %2975 = vmatpush1.msra.mxu1 %v13446_v59  ;;  %v6613_v30 = vpop.eup %6612  ;;  %v13458_v43 = vld [vmem:[#allocation34_spill] sm:$0xff]  ;;  %v13459_v59 = vld [vmem:[#allocation35_spill] sm:$0xff] }
 0x719   :  { %2905 = vmatprep.subr.mxu0 %v13447_v62  ;;  %2976 = vmatprep.subr.mxu1 %v13448_v48  ;;  %v2488_v45 = vmul.f32 %v6613_v30, %v6611_v34  ;;  %v13460_v62 = vld [vmem:[#allocation36_spill] sm:$0xff]  ;;  %v13461_v48 = vld [vmem:[#allocation37_spill] sm:$0xff]  ;;  %v13466_v34 = vld [vmem:[#allocation42_spill] sm:$0xff] }
 0x71a   :  { %2906 = vmatpush1.msra.mxu0 %v13449_v4  ;;  %2977 = vmatpush1.msra.mxu1 %v13450_v16  ;;  %v13462_v4 = vld [vmem:[#allocation38_spill] sm:$0xff]  ;;  %v13463_v16 = vld [vmem:[#allocation39_spill] sm:$0xff]  ;;  %v13469_v30 = vld [vmem:[#allocation45_spill] sm:$0xff] }
 0x71b   :  { %2907 = vmatprep.subr.mxu0 %v13451_v22  ;;  %2978 = vmatprep.subr.mxu1 %v13452_v26  ;;  %v13464_v22 = vld [vmem:[#allocation40_spill] sm:$0xff]  ;;  %v13465_v26 = vld [vmem:[#allocation41_spill] sm:$0xff] }
 0x71c   :  { %2908 = vmatpush1.msra.mxu0 %v13453_v15  ;;  %2979 = vmatpush1.msra.mxu1 %v13454_v12  ;;  %v13467_v15 = vld [vmem:[#allocation43_spill] sm:$0xff]  ;;  %v13468_v12 = vld [vmem:[#allocation44_spill] sm:$0xff] }
 0x71d   :  { %2909 = vmatprep.subr.mxu0 %v13455_v11  ;;  %2980 = vmatprep.subr.mxu1 %v13456_v56  ;;  %v13470_v11 = vld [vmem:[#allocation46_spill] sm:$0xff]  ;;  %v13471_v56 = vld [vmem:[#allocation47_spill] sm:$0xff] }
 0x71e   :  { %2910 = vmatpush1.msra.mxu0 %v13457_v35  ;;  %2943 = vmatprep.mubr.f32.mxu0 %v12890_v60  ;;  %v13472_v35 = vld [vmem:[#allocation48_spill] sm:$0xff] }
 0x71f   :  { %2981 = vmatpush1.msra.mxu1 %v13458_v43  ;;  %3014 = vmatprep.mubr.f32.mxu1 %v12890_v60  ;;  %v13474_v43 = vld [vmem:[#allocation50_spill] sm:$0xff] }
 0x720   :  { %2944 = vmatmul.mubr.f32.vlgmr.msra.gmra.mxu0 %v2488_v45  ;;  %3015 = vmatmul.mubr.f32.vlgmr.msra.gmra.mxu1 %v2488_v45  ;;  %v13473_v45 = vld [vmem:[#allocation49_spill] sm:$0xff] }
 0x721   :  { %3021 = vmatprep.subr.mxu0 %v13459_v59  ;;  %3092 = vmatprep.subr.mxu1 %v13460_v62  ;;  %v13475_v59 = vld [vmem:[#allocation51_spill] sm:$0xff]  ;;  %v13476_v62 = vld [vmem:[#allocation52_spill] sm:$0xff] }
 0x722   :  { %3022 = vmatpush1.msra.mxu0 %v13461_v48  ;;  %3093 = vmatpush1.msra.mxu1 %v13462_v4  ;;  %v13477_v48 = vld [vmem:[#allocation53_spill] sm:$0xff]  ;;  %v13478_v4 = vld [vmem:[#allocation54_spill] sm:$0xff] }
 0x723   :  { %3023 = vmatprep.subr.mxu0 %v13463_v16  ;;  %3094 = vmatprep.subr.mxu1 %v13464_v22  ;;  %v13479_v16 = vld [vmem:[#allocation55_spill] sm:$0xff]  ;;  %v13480_v22 = vld [vmem:[#allocation56_spill] sm:$0xff] }
 0x724   :  { %3024 = vmatpush1.msra.mxu0 %v13465_v26  ;;  %3095 = vmatpush1.msra.mxu1 %v13466_v34  ;;  %v13481_v26 = vld [vmem:[#allocation57_spill] sm:$0xff]  ;;  %v13482_v34 = vld [vmem:[#allocation58_spill] sm:$0xff] }
 0x725   :  { %3025 = vmatprep.subr.mxu0 %v13467_v15  ;;  %3096 = vmatprep.subr.mxu1 %v13468_v12  ;;  %v13483_v15 = vld [vmem:[#allocation59_spill] sm:$0xff]  ;;  %v13484_v12 = vld [vmem:[#allocation60_spill] sm:$0xff] }
 0x726   :  { %3026 = vmatpush1.msra.mxu0 %v13469_v30  ;;  %3097 = vmatpush1.msra.mxu1 %v13470_v11  ;;  %v13485_v30 = vld [vmem:[#allocation61_spill] sm:$0xff]  ;;  %v13486_v11 = vld [vmem:[#allocation62_spill] sm:$0xff] }
 0x727   :  { %3027 = vmatprep.subr.mxu0 %v13471_v56  ;;  %3098 = vmatprep.subr.mxu1 %v13472_v35  ;;  %v13487_v56 = vld [vmem:[#allocation63_spill] sm:$0xff]  ;;  %v13488_v35 = vld [vmem:[#allocation64_spill] sm:$0xff] }
 0x728   :  { %3028 = vmatpush1.msra.mxu0 %v13473_v45  ;;  %3099 = vmatpush1.msra.mxu1 %v13474_v43  ;;  %v13489_v45 = vld [vmem:[#allocation65_spill] sm:$0xff]  ;;  %v13490_v43 = vld [vmem:[#allocation66_spill] sm:$0xff] }
 0x729   :  { %3029 = vmatprep.subr.mxu0 %v13475_v59  ;;  %3100 = vmatprep.subr.mxu1 %v13476_v62  ;;  %v13491_v59 = vld [vmem:[#allocation67_spill] sm:$0xff]  ;;  %v13492_v62 = vld [vmem:[#allocation68_spill] sm:$0xff] }
 0x72a   :  { %3030 = vmatpush1.msra.mxu0 %v13477_v48  ;;  %3101 = vmatpush1.msra.mxu1 %v13478_v4  ;;  %v13493_v48 = vld [vmem:[#allocation69_spill] sm:$0xff]  ;;  %v13494_v4 = vld [vmem:[#allocation70_spill] sm:$0xff] }
 0x72b   :  { %3031 = vmatprep.subr.mxu0 %v13479_v16  ;;  %3102 = vmatprep.subr.mxu1 %v13480_v22  ;;  %v13495_v16 = vld [vmem:[#allocation71_spill] sm:$0xff]  ;;  %v13496_v22 = vld [vmem:[#allocation72_spill] sm:$0xff] }
 0x72c   :  { %3032 = vmatpush1.msra.mxu0 %v13481_v26  ;;  %3103 = vmatpush1.msra.mxu1 %v13482_v34  ;;  %v13497_v26 = vld [vmem:[#allocation73_spill] sm:$0xff]  ;;  %v13498_v34 = vld [vmem:[#allocation74_spill] sm:$0xff] }
 0x72d   :  { %3033 = vmatprep.subr.mxu0 %v13483_v15  ;;  %3104 = vmatprep.subr.mxu1 %v13484_v12  ;;  %v13499_v15 = vld [vmem:[#allocation75_spill] sm:$0xff]  ;;  %v13500_v12 = vld [vmem:[#allocation76_spill] sm:$0xff] }
 0x72e   :  { %3034 = vmatpush1.msra.mxu0 %v13485_v30  ;;  %3105 = vmatpush1.msra.mxu1 %v13486_v11  ;;  %v13501_v30 = vld [vmem:[#allocation77_spill] sm:$0xff]  ;;  %v13502_v11 = vld [vmem:[#allocation78_spill] sm:$0xff] }
 0x72f   :  { %3035 = vmatprep.subr.mxu0 %v13487_v56  ;;  %3106 = vmatprep.subr.mxu1 %v13488_v35  ;;  %v13503_v56 = vld [vmem:[#allocation79_spill] sm:$0xff]  ;;  %v13504_v35 = vld [vmem:[#allocation80_spill] sm:$0xff] }
 0x730   :  { %3036 = vmatpush1.msra.mxu0 %v13489_v45  ;;  %3107 = vmatpush1.msra.mxu1 %v13490_v43  ;;  %v13505_v45 = vld [vmem:[#allocation81_spill] sm:$0xff]  ;;  %v13506_v43 = vld [vmem:[#allocation82_spill] sm:$0xff] }
 0x731   :  { %3037 = vmatprep.subr.mxu0 %v13491_v59  ;;  %3108 = vmatprep.subr.mxu1 %v13492_v62  ;;  %v13507_v59 = vld [vmem:[#allocation83_spill] sm:$0xff]  ;;  %v13508_v62 = vld [vmem:[#allocation84_spill] sm:$0xff] }
 0x732   :  { %3038 = vmatpush1.msra.mxu0 %v13493_v48  ;;  %3109 = vmatpush1.msra.mxu1 %v13494_v4  ;;  %v13509_v48 = vld [vmem:[#allocation85_spill] sm:$0xff]  ;;  %v13510_v4 = vld [vmem:[#allocation86_spill] sm:$0xff] }
 0x733   :  { %3039 = vmatprep.subr.mxu0 %v13495_v16  ;;  %3110 = vmatprep.subr.mxu1 %v13496_v22  ;;  %v13511_v16 = vld [vmem:[#allocation87_spill] sm:$0xff]  ;;  %v13512_v22 = vld [vmem:[#allocation88_spill] sm:$0xff] }
 0x734   :  { %3040 = vmatpush1.msra.mxu0 %v13497_v26  ;;  %3111 = vmatpush1.msra.mxu1 %v13498_v34  ;;  %v13513_v26 = vld [vmem:[#allocation89_spill] sm:$0xff]  ;;  %v13514_v34 = vld [vmem:[#allocation90_spill] sm:$0xff] }
 0x735   :  { %3041 = vmatprep.subr.mxu0 %v13499_v15  ;;  %3112 = vmatprep.subr.mxu1 %v13500_v12  ;;  %v13515_v15 = vld [vmem:[#allocation91_spill] sm:$0xff]  ;;  %v13516_v12 = vld [vmem:[#allocation92_spill] sm:$0xff] }
 0x736   :  { %3042 = vmatpush1.msra.mxu0 %v13501_v30  ;;  %3113 = vmatpush1.msra.mxu1 %v13502_v11  ;;  %v13517_v30 = vld [vmem:[#allocation93_spill] sm:$0xff]  ;;  %v13518_v11 = vld [vmem:[#allocation94_spill] sm:$0xff] }
 0x737   :  { %3043 = vmatprep.subr.mxu0 %v13503_v56  ;;  %3114 = vmatprep.subr.mxu1 %v13504_v35  ;;  %v13519_v56 = vld [vmem:[#allocation95_spill] sm:$0xff]  ;;  %v13520_v35 = vld [vmem:[#allocation96_spill] sm:$0xff] }
 0x738   :  { %3044 = vmatpush1.msra.mxu0 %v13505_v45  ;;  %3115 = vmatpush1.msra.mxu1 %v13506_v43  ;;  %v13521_v45 = vld [vmem:[#allocation97_spill] sm:$0xff]  ;;  %v13522_v43 = vld [vmem:[#allocation98_spill] sm:$0xff] }
 0x739   :  { %3045 = vmatprep.subr.mxu0 %v13507_v59  ;;  %3116 = vmatprep.subr.mxu1 %v13508_v62  ;;  %v13523_v59 = vld [vmem:[#allocation99_spill] sm:$0xff]  ;;  %v2633_v62 = vpop.f32.mrf.mxu0 }
 0x73a   :  { %3046 = vmatpush1.msra.mxu0 %v13509_v48  ;;  %3117 = vmatpush1.msra.mxu1 %v13510_v4  ;;  %v2704_v48 = vpop.f32.mrf.mxu1 }
 0x73b   :  { %3047 = vmatprep.subr.mxu0 %v13511_v16  ;;  %3118 = vmatprep.subr.mxu1 %v13512_v22  ;;  %v2635_v4 = vpop.f32.mrf.mxu0 }
 0x73c   :  { %3048 = vmatpush1.msra.mxu0 %v13513_v26  ;;  %3119 = vmatpush1.msra.mxu1 %v13514_v34  ;;  %v2706_v22 = vpop.f32.mrf.mxu1 }
 0x73d   :  { %3049 = vmatprep.subr.mxu0 %v13515_v15  ;;  %3120 = vmatprep.subr.mxu1 %v13516_v12 }
 0x73e   :  { %3050 = vmatpush1.msra.mxu0 %v13517_v30  ;;  %3121 = vmatpush1.msra.mxu1 %v13518_v11 }
 0x73f   :  { %3051 = vmatprep.subr.mxu0 %v13519_v56  ;;  %3122 = vmatprep.subr.mxu1 %v13520_v35 }
 0x740   :  { %3052 = vmatpush1.msra.mxu0 %v13521_v45  ;;  %3123 = vmatpush1.msra.mxu1 %v13522_v43 }
 0x741   :  { %3085 = vmatprep.mubr.f32.mxu0 %v12890_v60  ;;  %3156 = vmatprep.mubr.f32.mxu1 %v12890_v60 }
 0x742   :  { %6365 = vmatprep.subr.mxu0 %v12890_v60  ;;  %3269 = vmatprep.subr.mxu1 %v13523_v59 }
 0x7bf   :  { %v2775_v16 = vpop.f32.mrf.mxu0  ;;  %v2846_v12 = vpop.f32.mrf.mxu1 }
 0x7c0   :  { %v2776_v26 = vadd.f32 %v2775_v16, %v2633_v62  ;;  %v2847_v42 = vadd.f32 %v2846_v12, %v2704_v48  ;;  %v13539_v12 = vld [vmem:[#allocation115_spill] sm:$0xff] }
 0x7c1   :  { %v2777_v34 = vpop.f32.mrf.mxu0  ;;  %v2848_v45 = vpop.f32.mrf.mxu1 }
 0x7c2   :  { %v2851_v15 = vadd.f32 %v2776_v26, %v8282_v54  ;;  %v2778_v30 = vadd.f32 %v2777_v34, %v2635_v4  ;;  %v2849_v43 = vadd.f32 %v2848_v45, %v2706_v22  ;;  %v2853_v62 = vadd.f32 %v2847_v42, %v8299_v47  ;;  %v13541_v45 = vld [vmem:[#allocation117_spill] sm:$0xff] }
 0x7c4   :  { %v6045_v11 = vmul.f32 -1.442695, %v2851_v15  ;;  %v2852_v56 = vadd.f32 %v2778_v30, %v8286_v51  ;;  %v2854_v59 = vadd.f32 %v2849_v43, %v13101_v13  ;;  %v13542_v43 = vld [vmem:[#allocation118_spill] sm:$0xff] }
 0x7c6   :  { %6614 = vpow2.f32 %v6045_v11  ;;  %v6046_v35 = vmul.f32 -1.442695, %v2852_v56  ;;  %v6047_v10 = vmul.f32 -1.442695, %v2854_v59  ;;  %v13543_v59 = vld [vmem:[#allocation119_spill] sm:$0xff] }
 0x7c8   :  { %6616 = vpow2.f32 %v6046_v35  ;;  %v13540_v35 = vld [vmem:[#allocation116_spill] sm:$0xff] }
 0x7c9   :  { %6618 = vpow2.f32 %v6047_v10 }
 0x7d3   :  { %v6615_v27 = vpop.eup %6614 }
 0x7d4   :  { %v2858_v16 = vadd.f32 1.0, %v6615_v27 }
 0x7d5   :  { %v6617_v9 = vpop.eup %6616 }
 0x7d6   :  { %6620 = vrcp.f32 %v2858_v16  ;;  %v2864_v4 = vadd.f32 1.0, %v6617_v9  ;;  %v6619_v26 = vpop.eup %6618  ;;  %v13538_v9 = vld [vmem:[#allocation114_spill] sm:$0xff]  ;;  %v13545_v16 = vld [vmem:[#allocation121_spill] sm:$0xff] }
 0x7d7   :  { %6622 = vtanh.f32 %v2853_v62  ;;  %v2871_v11 = vadd.f32 1.0, %v6619_v26  ;;  %v13544_v62 = vld [vmem:[#allocation120_spill] sm:$0xff]  ;;  %v13547_v26 = vld [vmem:[#allocation123_spill] sm:$0xff] }
 0x7d8   :  { %6624 = vrcp.f32 %v2864_v4  ;;  %v13546_v4 = vld [vmem:[#allocation122_spill] sm:$0xff] }
 0x7d9   :  { %6626 = vrcp.f32 %v2871_v11  ;;  %v13551_v11 = vld [vmem:[#allocation127_spill] sm:$0xff] }
 0x7e3   :  { %v6621_v34 = vpop.eup %6620 }
 0x7e4   :  { %v6623_v15 = vpop.eup %6622 }
 0x7e5   :  { %v6625_v30 = vpop.eup %6624  ;;  %v2875_v22 = vmul.f32 %v6623_v15, %v6621_v34  ;;  %v13548_v34 = vld [vmem:[#allocation124_spill] sm:$0xff]  ;;  %v13549_v15 = vld [vmem:[#allocation125_spill] sm:$0xff] }
 0x7e6   :  { %v2874_v56 = vmul.f32 %v6625_v30, %v9520_v38  ;;  %v6627_v42 = vpop.eup %6626  ;;  %v13524_v38 = vld [vmem:[#allocation100_spill] sm:$0xff]  ;;  %v13550_v30 = vld [vmem:[#allocation126_spill] sm:$0xff] }
 0x7e8   :  { %v10144_v48 = vadd.f32 %v2875_v22, %v2874_v56  ;;  %v3195_v22 = vpop.permute.xlu0 %3194  ;;  %v13552_v56 = vld [vmem:[#allocation128_spill] sm:$0xff] }
 0x7ea   :  { %6628 = vtanh.f32 %v10144_v48 }
 0x7f7   :  { %v6629_v27 = vpop.eup %6628 }
 0x7f8   :  { %v10147_v10 = vmul.f32 %v6629_v27, %v6627_v42  ;;  %v13553_v42 = vld [vmem:[#allocation129_spill] sm:$0xff]  ;;  %v13554_v27 = vld [vmem:[#allocation130_spill] sm:$0xff] }
 0x7fa   :  { %3086 = vmatmul.mubr.f32.vlgmr.msra.gmra.mxu0 %v10147_v10  ;;  %3157 = vmatmul.mubr.f32.vlgmr.msra.gmra.mxu1 %v10147_v10 }
 0x7fb   :  { %6366 = vmatpush3.msra.mxu0 %v9527_v52  ;;  %3270 = vmatpush1.msra.mxu1 %v9530_v40  ;;  %v13525_v52 = vld [vmem:[#allocation101_spill] sm:$0xff]  ;;  %v13526_v40 = vld [vmem:[#allocation102_spill] sm:$0xff] }
 0x7fc   :  { %6367 = vmatprep.subr.mxu0 %v12890_v60  ;;  %3271 = vmatprep.subr.mxu1 %v9534_v6  ;;  %v13527_v6 = vld [vmem:[#allocation103_spill] sm:$0xff] }
 0x7fd   :  { %6368 = vmatpush3.msra.mxu0 %v9537_v1  ;;  %3272 = vmatpush1.msra.mxu1 %v9540_v39  ;;  %v13528_v1 = vld [vmem:[#allocation104_spill] sm:$0xff]  ;;  %v13529_v39 = vld [vmem:[#allocation105_spill] sm:$0xff] }
 0x7fe   :  { %6369 = vmatprep.subr.mxu0 %v12890_v60  ;;  %3273 = vmatprep.subr.mxu1 %v9544_v50  ;;  %v13530_v50 = vld [vmem:[#allocation106_spill] sm:$0xff] }
 0x7ff   :  { %6370 = vmatpush3.msra.mxu0 %v9547_v37  ;;  %3274 = vmatpush1.msra.mxu1 %v9550_v18  ;;  %v13531_v37 = vld [vmem:[#allocation107_spill] sm:$0xff]  ;;  %v13532_v18 = vld [vmem:[#allocation108_spill] sm:$0xff] }
 0x800   :  { %6371 = vmatprep.subr.mxu0 %v12890_v60  ;;  %3275 = vmatprep.subr.mxu1 %v9554_v21  ;;  %v13533_v21 = vld [vmem:[#allocation109_spill] sm:$0xff] }
 0x801   :  { %6372 = vmatpush3.msra.mxu0 %v9557_v14  ;;  %3276 = vmatpush1.msra.mxu1 %v9560_v55  ;;  %v13534_v14 = vld [vmem:[#allocation110_spill] sm:$0xff]  ;;  %v13535_v55 = vld [vmem:[#allocation111_spill] sm:$0xff] }
 0x802   :  { %6373 = vmatprep.subr.mxu0 %v12890_v60  ;;  %3277 = vmatprep.subr.mxu1 %v9564_v36  ;;  %v13536_v36 = vld [vmem:[#allocation112_spill] sm:$0xff] }
 0x803   :  { %6374 = vmatpush3.msra.mxu0 %v9567_v23  ;;  %3278 = vmatpush1.msra.mxu1 %v13524_v38  ;;  %v13537_v23 = vld [vmem:[#allocation113_spill] sm:$0xff] }
 0x804   :  { %6375 = vmatprep.subr.mxu0 %v12890_v60  ;;  %3279 = vmatprep.subr.mxu1 %v13525_v52  ;;  %v13555_v38 = vld [vmem:[#allocation9_spill] sm:$0xff]  ;;  %v13556_v52 = vld [vmem:[#allocation131_spill] sm:$0xff] }
 0x805   :  { %6376 = vmatpush3.msra.mxu0 %v13526_v40  ;;  %3280 = vmatpush1.msra.mxu1 %v13527_v6  ;;  %vm3196_vm5 = vcmp.eq.s32.totalorder %v13555_v38, %v3195_v22  ;;  %v13559_v40 = vld [vmem:[#allocation133_spill] sm:$0xff]  ;;  %v13560_v6 = vld [vmem:[#allocation134_spill] sm:$0xff]  ;;  %v13585_v22 = vld [vmem:[#allocation159_spill] sm:$0xff] }
 0x806   :  { %6377 = vmatprep.subr.mxu0 %v12890_v60  ;;  %3281 = vmatprep.subr.mxu1 %v13528_v1  ;;  %v13561_v1 = vld [vmem:[#allocation135_spill] sm:$0xff] }
 0x807   :  { %6378 = vmatpush3.msra.mxu0 %v13529_v39  ;;  %3282 = vmatpush1.msra.mxu1 %v13530_v50  ;;  %v13562_v39 = vld [vmem:[#allocation136_spill] sm:$0xff]  ;;  %v13563_v50 = vld [vmem:[#allocation137_spill] sm:$0xff] }
 0x808   :  { %6379 = vmatprep.subr.mxu0 %v12890_v60  ;;  %3283 = vmatprep.subr.mxu1 %v13531_v37  ;;  %v13564_v37 = vld [vmem:[#allocation138_spill] sm:$0xff] }
 0x809   :  { %6380 = vmatpush3.msra.mxu0 %v13532_v18  ;;  %3284 = vmatpush1.msra.mxu1 %v13533_v21  ;;  %v13565_v18 = vld [vmem:[#allocation139_spill] sm:$0xff]  ;;  %v13566_v21 = vld [vmem:[#allocation140_spill] sm:$0xff] }
 0x80a   :  { %6381 = vmatprep.subr.mxu0 %v12890_v60  ;;  %3285 = vmatprep.subr.mxu1 %v13534_v14  ;;  %v13567_v14 = vld [vmem:[#allocation141_spill] sm:$0xff] }
 0x80b   :  { %6382 = vmatpush3.msra.mxu0 %v13535_v55  ;;  %3286 = vmatpush1.msra.mxu1 %v13536_v36  ;;  %v13568_v55 = vld [vmem:[#allocation142_spill] sm:$0xff]  ;;  %v13569_v36 = vld [vmem:[#allocation143_spill] sm:$0xff] }
 0x80c   :  { %6383 = vmatprep.subr.mxu0 %v12890_v60  ;;  %3287 = vmatprep.subr.mxu1 %v13537_v23  ;;  %v13570_v23 = vld [vmem:[#allocation144_spill] sm:$0xff] }
 0x80d   :  { %6384 = vmatpush3.msra.mxu0 %v13538_v9  ;;  %3288 = vmatpush1.msra.mxu1 %v13539_v12  ;;  %v13571_v9 = vld [vmem:[#allocation145_spill] sm:$0xff]  ;;  %v13572_v12 = vld [vmem:[#allocation146_spill] sm:$0xff] }
 0x80e   :  { %6385 = vmatprep.subr.mxu0 %v12890_v60  ;;  %3289 = vmatprep.subr.mxu1 %v13540_v35  ;;  %v13573_v35 = vld [vmem:[#allocation147_spill] sm:$0xff] }
 0x80f   :  { %6386 = vmatpush3.msra.mxu0 %v13541_v45  ;;  %3290 = vmatpush1.msra.mxu1 %v13542_v43  ;;  %v13574_v45 = vld [vmem:[#allocation148_spill] sm:$0xff]  ;;  %v13575_v43 = vld [vmem:[#allocation149_spill] sm:$0xff] }
 0x810   :  { %6387 = vmatprep.subr.mxu0 %v12890_v60  ;;  %3291 = vmatprep.subr.mxu1 %v13543_v59  ;;  %v13576_v59 = vld [vmem:[#allocation150_spill] sm:$0xff] }
 0x811   :  { %6388 = vmatpush3.msra.mxu0 %v13544_v62  ;;  %3292 = vmatpush1.msra.mxu1 %v13545_v16  ;;  %v13577_v62 = vld [vmem:[#allocation151_spill] sm:$0xff]  ;;  %v13578_v16 = vld [vmem:[#allocation152_spill] sm:$0xff] }
 0x812   :  { %6389 = vmatprep.subr.mxu0 %v12890_v60  ;;  %3293 = vmatprep.subr.mxu1 %v13546_v4  ;;  %v13579_v4 = vld [vmem:[#allocation153_spill] sm:$0xff] }
 0x813   :  { %6390 = vmatpush3.msra.mxu0 %v13547_v26  ;;  %3294 = vmatpush1.msra.mxu1 %v13548_v34  ;;  %v13580_v26 = vld [vmem:[#allocation154_spill] sm:$0xff]  ;;  %v13581_v34 = vld [vmem:[#allocation155_spill] sm:$0xff] }
 0x814   :  { %6391 = vmatprep.subr.mxu0 %v12890_v60  ;;  %3295 = vmatprep.subr.mxu1 %v13549_v15  ;;  %v13582_v15 = vld [vmem:[#allocation156_spill] sm:$0xff] }
 0x815   :  { %6392 = vmatpush3.msra.mxu0 %v13550_v30  ;;  %3296 = vmatpush1.msra.mxu1 %v13551_v11  ;;  %v13583_v30 = vld [vmem:[#allocation157_spill] sm:$0xff]  ;;  %v13584_v11 = vld [vmem:[#allocation158_spill] sm:$0xff] }
 0x816   :  { %6393 = vmatprep.subr.mxu0 %v12890_v60  ;;  %3297 = vmatprep.subr.mxu1 %v9664_v28  ;;  %v13557_v28 = vmov 1.0  }
 0x817   :  { %6394 = vmatpush3.msra.mxu0 %v13552_v56  ;;  %3298 = vmatpush1.msra.mxu1 %v9670_v46  ;;  %v13558_v46 = vld [vmem:[#allocation132_spill] sm:$0xff] }
 0x818   :  { %6395 = vmatprep.subr.mxu0 %v12890_v60  ;;  %3299 = vmatprep.subr.mxu1 %v13553_v42  ;;  %v13586_v56 = vld [vmem:[#allocation160_spill] sm:$0xff]  ;;  %v13587_v42 = vld [vmem:[#allocation161_spill] sm:$0xff] }
 0x819   :  { %6396 = vmatpush3.msra.mxu0 %v13554_v27  ;;  %6397 = vmatprep.mubr.msk.f32.mxu0 %vm7815_vm0, %v12890_v60  ;;  %v13588_v27 = vld [vmem:[#allocation162_spill] sm:$0xff] }
 0x81a   :  { %3300 = vmatpush1.msra.mxu1 %v13556_v52  ;;  %3333 = vmatprep.mubr.f32.mxu1 %v12890_v60  ;;  %v13589_v52 = vld [vmem:[#allocation163_spill] sm:$0xff] }
 0x81b   :  { %6398 = vmatmul.mubr.msk.f32.vlgmr.msra.gmra.mxu0 %vm3196_vm5, %v13557_v28  ;;  %3334 = vmatmul.mubr.f32.vlgmr.msra.gmra.mxu1 %v10147_v10 }
 0x81c   :  { %3340 = vmatprep.subr.mxu0 %v13558_v46  ;;  %3404 = vmatprep.mubr.f32.mxu0 %v12890_v60  ;;  %v13590_v46 = vld [vmem:[#allocation164_spill] sm:$0xff] }
 0x81d   :  { %3341 = vmatpush1.msra.mxu0 %v13559_v40  ;;  %3411 = vmatprep.subr.mxu1 %v13560_v6  ;;  %v13591_v40 = vld [vmem:[#allocation165_spill] sm:$0xff]  ;;  %v13592_v6 = vld [vmem:[#allocation166_spill] sm:$0xff] }
 0x81e   :  { %3342 = vmatprep.subr.mxu0 %v13561_v1  ;;  %3412 = vmatpush1.msra.mxu1 %v13562_v39  ;;  %v13593_v1 = vld [vmem:[#allocation167_spill] sm:$0xff]  ;;  %v13594_v39 = vld [vmem:[#allocation168_spill] sm:$0xff] }
 0x81f   :  { %3343 = vmatpush1.msra.mxu0 %v13563_v50  ;;  %3413 = vmatprep.subr.mxu1 %v13564_v37  ;;  %v13595_v50 = vld [vmem:[#allocation169_spill] sm:$0xff]  ;;  %v13596_v37 = vld [vmem:[#allocation170_spill] sm:$0xff] }
 0x820   :  { %3344 = vmatprep.subr.mxu0 %v13565_v18  ;;  %3414 = vmatpush1.msra.mxu1 %v13566_v21  ;;  %v13597_v18 = vld [vmem:[#allocation171_spill] sm:$0xff]  ;;  %v13598_v21 = vld [vmem:[#allocation172_spill] sm:$0xff] }
 0x821   :  { %3345 = vmatpush1.msra.mxu0 %v13567_v14  ;;  %3415 = vmatprep.subr.mxu1 %v13568_v55  ;;  %v13599_v14 = vld [vmem:[#allocation173_spill] sm:$0xff]  ;;  %v13600_v55 = vld [vmem:[#allocation174_spill] sm:$0xff] }
 0x822   :  { %3346 = vmatprep.subr.mxu0 %v13569_v36  ;;  %3416 = vmatpush1.msra.mxu1 %v13570_v23  ;;  %v13601_v36 = vld [vmem:[#allocation175_spill] sm:$0xff]  ;;  %v13602_v23 = vld [vmem:[#allocation176_spill] sm:$0xff] }
 0x823   :  { %3347 = vmatpush1.msra.mxu0 %v13571_v9  ;;  %3417 = vmatprep.subr.mxu1 %v13572_v12  ;;  %v13603_v9 = vld [vmem:[#allocation177_spill] sm:$0xff]  ;;  %v13604_v12 = vld [vmem:[#allocation178_spill] sm:$0xff] }
 0x824   :  { %3348 = vmatprep.subr.mxu0 %v13573_v35  ;;  %3418 = vmatpush1.msra.mxu1 %v13574_v45  ;;  %v13605_v35 = vld [vmem:[#allocation179_spill] sm:$0xff]  ;;  %v13606_v45 = vld [vmem:[#allocation180_spill] sm:$0xff] }
 0x825   :  { %3349 = vmatpush1.msra.mxu0 %v13575_v43  ;;  %3419 = vmatprep.subr.mxu1 %v13576_v59  ;;  %v13607_v43 = vld [vmem:[#allocation181_spill] sm:$0xff]  ;;  %v13608_v59 = vld [vmem:[#allocation182_spill] sm:$0xff] }
 0x826   :  { %3350 = vmatprep.subr.mxu0 %v13577_v62  ;;  %3420 = vmatpush1.msra.mxu1 %v13578_v16  ;;  %v13609_v62 = vld [vmem:[#allocation183_spill] sm:$0xff]  ;;  %v13610_v16 = vld [vmem:[#allocation184_spill] sm:$0xff] }
 0x827   :  { %3351 = vmatpush1.msra.mxu0 %v13579_v4  ;;  %3421 = vmatprep.subr.mxu1 %v13580_v26  ;;  %v13611_v4 = vld [vmem:[#allocation185_spill] sm:$0xff]  ;;  %v13612_v26 = vld [vmem:[#allocation186_spill] sm:$0xff] }
 0x828   :  { %3352 = vmatprep.subr.mxu0 %v13581_v34  ;;  %3422 = vmatpush1.msra.mxu1 %v13582_v15  ;;  %v13613_v34 = vld [vmem:[#allocation187_spill] sm:$0xff]  ;;  %v13614_v15 = vld [vmem:[#allocation188_spill] sm:$0xff] }
 0x829   :  { %3353 = vmatpush1.msra.mxu0 %v13583_v30  ;;  %3423 = vmatprep.subr.mxu1 %v13584_v11  ;;  %v13615_v30 = vld [vmem:[#allocation189_spill] sm:$0xff]  ;;  %v13616_v11 = vld [vmem:[#allocation190_spill] sm:$0xff] }
 0x82a   :  { %3354 = vmatprep.subr.mxu0 %v13585_v22  ;;  %3424 = vmatpush1.msra.mxu1 %v13586_v56  ;;  %v13617_v22 = vld [vmem:[#allocation191_spill] sm:$0xff]  ;;  %v13618_v56 = vld [vmem:[#allocation192_spill] sm:$0xff] }
 0x82b   :  { %3355 = vmatpush1.msra.mxu0 %v13587_v42  ;;  %3425 = vmatprep.subr.mxu1 %v13588_v27  ;;  %v13619_v42 = vld [vmem:[#allocation193_spill] sm:$0xff]  ;;  %v13620_v27 = vld [vmem:[#allocation194_spill] sm:$0xff] }
 0x82c   :  { %3356 = vmatprep.subr.mxu0 %v13589_v52  ;;  %3426 = vmatpush1.msra.mxu1 %v13590_v46  ;;  %v10286_v52 = vld [vmem:[#allocation4] sm:$0xff]  ;;  %v13621_v46 = vld [vmem:[#allocation195_spill] sm:$0xff] }
 0x82d   :  { %3357 = vmatpush1.msra.mxu0 %v13591_v40  ;;  %3427 = vmatprep.subr.mxu1 %v13592_v6  ;;  %v13624_v40 = vld [vmem:[#allocation198_spill] sm:$0xff]  ;;  %v13625_v6 = vld [vmem:[#allocation199_spill] sm:$0xff] }
 0x82e   :  { %3358 = vmatprep.subr.mxu0 %v13593_v1  ;;  %3428 = vmatpush1.msra.mxu1 %v13594_v39  ;;  %v13626_v1 = vld [vmem:[#allocation200_spill] sm:$0xff]  ;;  %v13627_v39 = vld [vmem:[#allocation201_spill] sm:$0xff] }
 0x82f   :  { %3359 = vmatpush1.msra.mxu0 %v13595_v50  ;;  %3429 = vmatprep.subr.mxu1 %v13596_v37  ;;  %v13629_v50 = vld [vmem:[#allocation203_spill] sm:$0xff]  ;;  %v10308_v37 = vld [vmem:[#allocation4 + $0xf8] sm:$0xff] }
 0x830   :  { %3360 = vmatprep.subr.mxu0 %v13597_v18  ;;  %3430 = vmatpush1.msra.mxu1 %v13598_v21  ;;  %v10311_v18 = vld [vmem:[#allocation4 + $0xf0] sm:$0xff]  ;;  %v10314_v21 = vld [vmem:[#allocation4 + $0xd8] sm:$0xff] }
 0x831   :  { %3361 = vmatpush1.msra.mxu0 %v13599_v14  ;;  %3431 = vmatprep.subr.mxu1 %v13600_v55  ;;  %v10329_v14 = vld [vmem:[#allocation4 + $0x90] sm:$0xff]  ;;  %v10332_v55 = vld [vmem:[#allocation4 + $0x78] sm:$0xff] }
 0x832   :  { %3362 = vmatprep.subr.mxu0 %v13601_v36  ;;  %3432 = vmatpush1.msra.mxu1 %v13602_v23  ;;  %v10335_v36 = vld [vmem:[#allocation4 + $0x70] sm:$0xff]  ;;  %v10338_v23 = vld [vmem:[#allocation4 + $0x58] sm:$0xff] }
 0x833   :  { %3363 = vmatpush1.msra.mxu0 %v13603_v9  ;;  %3433 = vmatprep.subr.mxu1 %v13604_v12  ;;  %v10341_v9 = vld [vmem:[#allocation4 + $0x50] sm:$0xff]  ;;  %v10344_v12 = vld [vmem:[#allocation4 + $0x38] sm:$0xff] }
 0x834   :  { %3364 = vmatprep.subr.mxu0 %v13605_v35  ;;  %3434 = vmatpush1.msra.mxu1 %v13606_v45  ;;  %v10347_v35 = vld [vmem:[#allocation4 + $0x30] sm:$0xff]  ;;  %v10350_v45 = vld [vmem:[#allocation4 + $0x18] sm:$0xff] }
 0x835   :  { %3365 = vmatpush1.msra.mxu0 %v13607_v43  ;;  %3435 = vmatprep.subr.mxu1 %v13608_v59  ;;  %v10353_v43 = vld [vmem:[#allocation4 + $0x10] sm:$0xff]  ;;  %v10356_v59 = vld [vmem:[#allocation6 + $0x3f8] sm:$0xff] }
 0x836   :  { %3366 = vmatprep.subr.mxu0 %v13609_v62  ;;  %3436 = vmatpush1.msra.mxu1 %v13610_v16  ;;  %v2945_v62 = vpop.f32.mrf.mxu0 }
 0x837   :  { %3367 = vmatpush1.msra.mxu0 %v13611_v4  ;;  %3437 = vmatprep.subr.mxu1 %v13612_v26 }
 0x838   :  { %3368 = vmatprep.subr.mxu0 %v13613_v34  ;;  %3438 = vmatpush1.msra.mxu1 %v13614_v15  ;;  %v2947_v16 = vpop.f32.mrf.mxu0 }
 0x839   :  { %3369 = vmatpush1.msra.mxu0 %v13615_v30  ;;  %3439 = vmatprep.subr.mxu1 %v13616_v11 }
 0x83a   :  { %3370 = vmatprep.subr.mxu0 %v9867_v44  ;;  %3440 = vmatpush1.msra.mxu1 %v13617_v22  ;;  %v13622_v44 = vld [vmem:[#allocation196_spill] sm:$0xff] }
 0x83b   :  { %3371 = vmatpush1.msra.mxu0 %v13618_v56  ;;  %3441 = vmatprep.subr.mxu1 %v9876_v32  ;;  %v10294_v32 = vld [vmem:[#allocation6 + $0x3e8] sm:$0xff]  ;;  %v3016_v56 = vpop.f32.mrf.mxu1 }
 0x83c   :  { %3405 = vmatmul.mubr.f32.vlgmr.msra.gmra.mxu0 %v10147_v10  ;;  %3482 = vmatprep.subr.mxu0 %v13619_v42  ;;  %v13623_v10 = vld [vmem:[#allocation197_spill] sm:$0xff] }
 0x83d   :  { %3483 = vmatpush1.msra.mxu0 %v13620_v27  ;;  %3442 = vmatpush1.msra.mxu1 %v10286_v52  ;;  %v3018_v27 = vpop.f32.mrf.mxu1 }
 0x83e   :  { %3484 = vmatprep.subr.mxu0 %v13621_v46  ;;  %3475 = vmatprep.mubr.f32.mxu1 %v12890_v60 }
 0x83f   :  { %3485 = vmatpush1.msra.mxu0 %v13622_v44  ;;  %3546 = vmatprep.mubr.f32.mxu0 %v12890_v60 }
 0x840   :  { %3486 = vmatprep.subr.mxu0 %v9895_v53  ;;  %3581 = vmatprep.subr.mxu1 %v10294_v32  ;;  %v13628_v53 = vld [vmem:[#allocation202_spill] sm:$0xff] }
 0x841   :  { %3487 = vmatpush1.msra.mxu0 %v13623_v10 }
 0x842   :  { %3488 = vmatprep.subr.mxu0 %v13624_v40 }
 0x843   :  { %3489 = vmatpush1.msra.mxu0 %v13625_v6 }
 0x844   :  { %3490 = vmatprep.subr.mxu0 %v13626_v1 }
 0x845   :  { %3491 = vmatpush1.msra.mxu0 %v13627_v39 }
 0x846   :  { %3492 = vmatprep.subr.mxu0 %v9914_v57  ;;  %v10326_v57 = vld [vmem:[#allocation4 + $0x98] sm:$0xff] }
 0x847   :  { %3493 = vmatpush1.msra.mxu0 %v9917_v49  ;;  %v10317_v49 = vld [vmem:[#allocation4 + $0xd0] sm:$0xff] }
 0x848   :  { %3494 = vmatprep.subr.mxu0 %v9920_v41  ;;  %v10323_v41 = vld [vmem:[#allocation4 + $0xb0] sm:$0xff] }
 0x849   :  { %3495 = vmatpush1.msra.mxu0 %v9923_v58  ;;  %v10320_v58 = vld [vmem:[#allocation4 + $0xb8] sm:$0xff] }
 0x84a   :  { %3496 = vmatprep.subr.mxu0 %v13628_v53 }
 0x84b   :  { %3497 = vmatpush1.msra.mxu0 %v13629_v50 }
 0x84c   :  { %3498 = vmatprep.subr.mxu0 %v10308_v37 }
 0x84d   :  { %3499 = vmatpush1.msra.mxu0 %v10311_v18 }
 0x84e   :  { %3500 = vmatprep.subr.mxu0 %v10314_v21 }
 0x84f   :  { %3501 = vmatpush1.msra.mxu0 %v10317_v49 }
 0x850   :  { %3502 = vmatprep.subr.mxu0 %v10320_v58 }
 0x851   :  { %3503 = vmatpush1.msra.mxu0 %v10323_v41 }
 0x852   :  { %3504 = vmatprep.subr.mxu0 %v10326_v57 }
 0x853   :  { %3505 = vmatpush1.msra.mxu0 %v10329_v14 }
 0x854   :  { %3506 = vmatprep.subr.mxu0 %v10332_v55 }
 0x855   :  { %3507 = vmatpush1.msra.mxu0 %v10335_v36 }
 0x856   :  { %3508 = vmatprep.subr.mxu0 %v10338_v23 }
 0x857   :  { %3509 = vmatpush1.msra.mxu0 %v10341_v9 }
 0x858   :  { %3510 = vmatprep.subr.mxu0 %v10344_v12 }
 0x859   :  { %3511 = vmatpush1.msra.mxu0 %v10347_v35 }
 0x85a   :  { %3512 = vmatprep.subr.mxu0 %v10350_v45 }
 0x85b   :  { %3513 = vmatpush1.msra.mxu0 %v10353_v43 }
 0x85c   :  { %3652 = vmatprep.subr.mxu0 %v10356_v59 }
 0x8ba   :  { %v3087_v4 = vpop.f32.mrf.mxu0  ;;  %v3158_v46 = vpop.f32.mrf.mxu1 }
 0x8bb   :  { %v3088_v26 = vadd.f32 %v3087_v4, %v2945_v62  ;;  %v3159_v6 = vadd.f32 %v3158_v46, %v3016_v56  ;;  %v13638_v56 = vld [vmem:[#allocation212_spill] sm:$0xff]  ;;  %v13641_v46 = vld [vmem:[#allocation215_spill] sm:$0xff] }
 0x8bc   :  { %v3089_v34 = vpop.f32.mrf.mxu0  ;;  %v3160_v44 = vpop.f32.mrf.mxu1 }
 0x8bd   :  { %v3163_v15 = vadd.f32 %v3088_v26, %v8748_v19  ;;  %v3090_v30 = vadd.f32 %v3089_v34, %v2947_v16  ;;  %v3161_v10 = vadd.f32 %v3160_v44, %v3018_v27  ;;  %v3165_v62 = vadd.f32 %v3159_v6, %v8762_v17  ;;  %v10389_v44 = vld [vmem:[#allocation6 + $0x338] sm:$0xff] }
 0x8be   :  { %v10397_v6 = vld [vmem:[#allocation6 + $0x318] sm:$0xff] }
 0x8bf   :  { %v6048_v11 = vmul.f32 -1.442695, %v3163_v15  ;;  %v3164_v22 = vadd.f32 %v3090_v30, %v8752_v25  ;;  %v3166_v50 = vadd.f32 %v3161_v10, %v8758_v20  ;;  %v13630_v15 = vld [vmem:[#allocation204_spill] sm:$0xff]  ;;  %v13632_v30 = vld [vmem:[#allocation206_spill] sm:$0xff] }
 0x8c0   :  { %v13642_v10 = vld [vmem:[#allocation216_spill] sm:$0xff] }
 0x8c1   :  { %6630 = vpow2.f32 %v6048_v11  ;;  %v6049_v42 = vmul.f32 -1.442695, %v3164_v22  ;;  %v6050_v16 = vmul.f32 -1.442695, %v3166_v50  ;;  %v13635_v11 = vld [vmem:[#allocation209_spill] sm:$0xff]  ;;  %v10410_v50 = vld [vmem:[#allocation6 + $0x2f8] sm:$0xff] }
 0x8c3   :  { %6632 = vpow2.f32 %v6049_v42  ;;  %v13640_v42 = vld [vmem:[#allocation214_spill] sm:$0xff] }
 0x8ce   :  { %v6631_v40 = vpop.eup %6630 }
 0x8cf   :  { %v3170_v39 = vadd.f32 1.0, %v6631_v40  ;;  %v10393_v40 = vld [vmem:[#allocation6 + $0x330] sm:$0xff] }
 0x8d0   :  { %v6633_v1 = vpop.eup %6632 }
 0x8d1   :  { %v3176_v53 = vadd.f32 1.0, %v6633_v1  ;;  %v10400_v1 = vld [vmem:[#allocation6 + $0x300] sm:$0xff] }
 0x8d3   :  { %6634 = vrcp.f32 %v3176_v53  ;;  %v10407_v53 = vld [vmem:[#allocation6 + $0x2e8] sm:$0xff] }
 0x8d4   :  { %6636 = vrcp.f32 %v3170_v39  ;;  %v10403_v39 = vld [vmem:[#allocation6 + $0x310] sm:$0xff] }
 0x8d5   :  { %6638 = vtanh.f32 %v3165_v62  ;;  %v10413_v62 = vld [vmem:[#allocation6 + $0x2e0] sm:$0xff] }
 0x8d6   :  { %6640 = vpow2.f32 %v6050_v16  ;;  %v10416_v16 = vld [vmem:[#allocation6 + $0x2f0] sm:$0xff] }
 0x8db   :  { %v3265_v4 = vpop.f32.mrf.mxu0 }
 0x8dc   :  { %3476 = vmatmul.mubr.f32.vlgmr.msra.gmra.mxu1 %v3265_v4  ;;  %3547 = vmatmul.mubr.f32.vlgmr.msra.gmra.mxu0 %v3265_v4  ;;  %v10419_v4 = vld [vmem:[#allocation6 + $0x2c8] sm:$0xff] }
 0x8dd   :  { %3582 = vmatpush1.msra.mxu1 %v9953_v31  ;;  %3653 = vmatpush1.msra.mxu0 %v9956_v63  ;;  %v6399_v26 = vpop.f32.mrf.mxu0  ;;  %v13631_v63 = vld [vmem:[#allocation205_spill] sm:$0xff] }
 0x8de   :  { %3583 = vmatprep.subr.mxu1 %v9959_v0  ;;  %3654 = vmatprep.subr.mxu0 %v9962_v24  ;;  %v13633_v24 = vld [vmem:[#allocation207_spill] sm:$0xff]  ;;  %v10422_v26 = vld [vmem:[#allocation6 + $0x2d8] sm:$0xff] }
 0x8df   :  { %3584 = vmatpush1.msra.mxu1 %v9965_v2  ;;  %3655 = vmatpush1.msra.mxu0 %v9968_v3  ;;  %v13634_v2 = vld [vmem:[#allocation208_spill] sm:$0xff] }
 0x8e0   :  { %v6635_v34 = vpop.eup %6634  ;;  %3585 = vmatprep.subr.mxu1 %v9971_v5  ;;  %3656 = vmatprep.subr.mxu0 %v9974_v7  ;;  %v13636_v7 = vld [vmem:[#allocation210_spill] sm:$0xff] }
 0x8e1   :  { %3586 = vmatpush1.msra.mxu1 %v9977_v8  ;;  %3657 = vmatpush1.msra.mxu0 %v13630_v15  ;;  %v6637_v31 = vpop.eup %6636  ;;  %v3186_v0 = vmul.f32 %v6635_v34, %v10020_v29  ;;  %v13637_v8 = vld [vmem:[#allocation211_spill] sm:$0xff]  ;;  %v13639_v29 = vld [vmem:[#allocation213_spill] sm:$0xff] }
 0x8e2   :  { %3587 = vmatprep.subr.mxu1 %v13631_v63  ;;  %3658 = vmatprep.subr.mxu0 %v13632_v30  ;;  %v6639_v3 = vpop.eup %6638  ;;  %v10425_v34 = vld [vmem:[#allocation6 + $0x2c0] sm:$0xff]  ;;  %v10428_v15 = vld [vmem:[#allocation6 + $0x2d0] sm:$0xff]  ;;  %v10434_v63 = vld [vmem:[#allocation6 + $0x2b8] sm:$0xff] }
 0x8e3   :  { %3588 = vmatpush1.msra.mxu1 %v13633_v24  ;;  %3659 = vmatpush1.msra.mxu0 %v13634_v2  ;;  %v3187_v5 = vmul.f32 %v6639_v3, %v6637_v31  ;;  %v6641_v22 = vpop.eup %6640  ;;  %13644 = vst [vmem:[#allocation11_spill] sm:$0xff] %v10428_v15  ;;  %v10431_v31 = vld [vmem:[#allocation6 + $0x2a8] sm:$0xff]  ;;  %13646 = vst [vmem:[#allocation13_spill] sm:$0xff] %v10434_v63  ;;  %v10437_v30 = vld [vmem:[#allocation6 + $0x2a0] sm:$0xff] }
 0x8e4   :  { %3589 = vmatprep.subr.mxu1 %v13635_v11  ;;  %3660 = vmatprep.subr.mxu0 %v9999_v33  ;;  %v3183_v33 = vadd.f32 1.0, %v6641_v22  ;;  %13645 = vst [vmem:[#allocation10_spill] sm:$0xff] %v10431_v31  ;;  %13647 = vst [vmem:[#allocation12_spill] sm:$0xff] %v10437_v30  ;;  %v10443_v24 = vld [vmem:[#allocation6 + $0x288] sm:$0xff]  ;;  %v10446_v2 = vld [vmem:[#allocation6 + $0x298] sm:$0xff] }
 0x8e5   :  { %3590 = vmatpush1.msra.mxu1 %v13636_v7  ;;  %3661 = vmatpush1.msra.mxu0 %v13637_v8  ;;  %v10386_v27 = vadd.f32 %v3187_v5, %v3186_v0  ;;  %v10440_v0 = vld [vmem:[#allocation6 + $0x2b0] sm:$0xff]  ;;  %13649 = vst [vmem:[#allocation14_spill] sm:$0xff] %v10443_v24  ;;  %13650 = vst [vmem:[#allocation17_spill] sm:$0xff] %v10446_v2  ;;  %v10449_v3 = vld [vmem:[#allocation6 + $0x280] sm:$0xff] }
 0x8e6   :  { %3591 = vmatprep.subr.mxu1 %v13638_v56  ;;  %3662 = vmatprep.subr.mxu0 %v10011_v61  ;;  %v13643_v61 = vld [vmem:[#allocation217_spill] sm:$0xff]  ;;  %13648 = vst [vmem:[#allocation15_spill] sm:$0xff] %v10440_v0  ;;  %13651 = vst [vmem:[#allocation16_spill] sm:$0xff] %v10449_v3  ;;  %v10452_v11 = vld [vmem:[#allocation6 + $0x290] sm:$0xff] }
 0x8e7   :  { %3592 = vmatpush1.msra.mxu1 %v13639_v29  ;;  %3663 = vmatpush1.msra.mxu0 %v13640_v42  ;;  %6642 = vtanh.f32 %v10386_v27  ;;  %13652 = vst [vmem:[#allocation19_spill] sm:$0xff] %v10452_v11  ;;  %v10455_v5 = vld [vmem:[#allocation6 + $0x268] sm:$0xff]  ;;  %v10458_v7 = vld [vmem:[#allocation6 + $0x278] sm:$0xff]  ;;  %v10461_v8 = vld [vmem:[#allocation6 + $0x260] sm:$0xff] }
 0x8e8   :  { %3593 = vmatprep.subr.mxu1 %v13641_v46  ;;  %3664 = vmatprep.subr.mxu0 %v10389_v44  ;;  %6644 = vrcp.f32 %v3183_v33  ;;  %13653 = vst [vmem:[#allocation18_spill] sm:$0xff] %v10455_v5  ;;  %13654 = vst [vmem:[#allocation21_spill] sm:$0xff] %v10458_v7  ;;  %v10464_v22 = vld [vmem:[#allocation6 + $0x270] sm:$0xff]  ;;  %v10467_v56 = vld [vmem:[#allocation6 + $0x248] sm:$0xff] }
 0x8e9   :  { %3594 = vmatpush1.msra.mxu1 %v13642_v10  ;;  %3665 = vmatpush1.msra.mxu0 %v10393_v40  ;;  %13655 = vst [vmem:[#allocation20_spill] sm:$0xff] %v10461_v8  ;;  %13656 = vst [vmem:[#allocation23_spill] sm:$0xff] %v10464_v22  ;;  %v10470_v29 = vld [vmem:[#allocation6 + $0x258] sm:$0xff]  ;;  %v10473_v42 = vld [vmem:[#allocation6 + $0x240] sm:$0xff] }
 0x8ea   :  { %3595 = vmatprep.subr.mxu1 %v13643_v61  ;;  %3666 = vmatprep.subr.mxu0 %v10397_v6  ;;  %13657 = vst [vmem:[#allocation22_spill] sm:$0xff] %v10467_v56  ;;  %13658 = vst [vmem:[#allocation24_spill] sm:$0xff] %v10470_v29  ;;  %v10476_v46 = vld [vmem:[#allocation6 + $0x250] sm:$0xff]  ;;  %v10479_v10 = vld [vmem:[#allocation6 + $0x228] sm:$0xff] }
 0x8eb   :  { %3596 = vmatpush1.msra.mxu1 %v10400_v1  ;;  %3667 = vmatpush1.msra.mxu0 %v10403_v39  ;;  %13659 = vst [vmem:[#allocation25_spill] sm:$0xff] %v10473_v42  ;;  %13660 = vst [vmem:[#allocation26_spill] sm:$0xff] %v10476_v46  ;;  %v10482_v61 = vld [vmem:[#allocation6 + $0x238] sm:$0xff] }
 0x8ec   :  { %3597 = vmatprep.subr.mxu1 %v10407_v53  ;;  %3668 = vmatprep.subr.mxu0 %v10410_v50  ;;  %13661 = vst [vmem:[#allocation27_spill] sm:$0xff] %v10479_v10  ;;  %13662 = vst [vmem:[#allocation28_spill] sm:$0xff] %v10482_v61 }
 0x8ed   :  { %3598 = vmatpush1.msra.mxu1 %v10413_v62  ;;  %3669 = vmatpush1.msra.mxu0 %v10416_v16 }
 0x8ee   :  { %3599 = vmatprep.subr.mxu1 %v10419_v4  ;;  %3670 = vmatprep.subr.mxu0 %v10422_v26 }
 0x8ef   :  { %3600 = vmatpush1.msra.mxu1 %v10425_v34  ;;  %3671 = vmatpush1.msra.mxu0 %v10428_v15 }
 0x8f0   :  { %3601 = vmatprep.subr.mxu1 %v10431_v31  ;;  %3672 = vmatprep.subr.mxu0 %v10434_v63 }
 0x8f1   :  { %3602 = vmatpush1.msra.mxu1 %v10437_v30  ;;  %3673 = vmatpush1.msra.mxu0 %v10440_v0 }
 0x8f2   :  { %3603 = vmatprep.subr.mxu1 %v10443_v24  ;;  %3674 = vmatprep.subr.mxu0 %v10446_v2 }
 0x8f3   :  { %3604 = vmatpush1.msra.mxu1 %v10449_v3  ;;  %3675 = vmatpush1.msra.mxu0 %v10452_v11 }
 0x8f4   :  { %3605 = vmatprep.subr.mxu1 %v10455_v5  ;;  %3676 = vmatprep.subr.mxu0 %v10458_v7  ;;  %v6643_v33 = vpop.eup %6642 }
 0x8f5   :  { %3606 = vmatpush1.msra.mxu1 %v10461_v8  ;;  %3677 = vmatpush1.msra.mxu0 %v10464_v22  ;;  %v10491_v22 = vld [vmem:[#allocation6 + $0x208] sm:$0xff] }
 0x8f6   :  { %3607 = vmatprep.subr.mxu1 %v10467_v56  ;;  %3678 = vmatprep.subr.mxu0 %v10470_v29  ;;  %v10485_v56 = vld [vmem:[#allocation6 + $0x220] sm:$0xff]  ;;  %v10488_v29 = vld [vmem:[#allocation6 + $0x230] sm:$0xff]  ;;  %13665 = vst [vmem:[#allocation31_spill] sm:$0xff] %v10491_v22 }
 0x8f7   :  { %3608 = vmatpush1.msra.mxu1 %v10473_v42  ;;  %3679 = vmatpush1.msra.mxu0 %v10476_v46  ;;  %13663 = vst [vmem:[#allocation29_spill] sm:$0xff] %v10485_v56  ;;  %13664 = vst [vmem:[#allocation30_spill] sm:$0xff] %v10488_v29  ;;  %v6645_v42 = vpop.eup %6644  ;;  %v10494_v46 = vld [vmem:[#allocation6 + $0x218] sm:$0xff] }
 0x8f8   :  { %3609 = vmatprep.subr.mxu1 %v10479_v10  ;;  %3680 = vmatprep.subr.mxu0 %v10482_v61  ;;  %13666 = vst [vmem:[#allocation32_spill] sm:$0xff] %v10494_v46  ;;  %v10497_v10 = vld [vmem:[#allocation6 + $0x200] sm:$0xff]  ;;  %v10501_v61 = vld [vmem:[#allocation6 + $0x210] sm:$0xff] }
 0x8f9   :  { %3610 = vmatpush1.msra.mxu1 %v10485_v56  ;;  %3681 = vmatpush1.msra.mxu0 %v10488_v29  ;;  %13667 = vst [vmem:[#allocation33_spill] sm:$0xff] %v10497_v10  ;;  %v3190_v56 = vmul.f32 %v6645_v42, %v6643_v33  ;;  %13668 = vst [vmem:[#allocation34_spill] sm:$0xff] %v10501_v61  ;;  %v10514_v42 = vld [vmem:[#allocation4 + $0x3f0] sm:$0xff]  ;;  %v10517_v33 = vld [vmem:[#allocation4 + $0x3c8] sm:$0xff] }
 0x8fa   :  { %3611 = vmatprep.subr.mxu1 %v10491_v22  ;;  %3682 = vmatprep.subr.mxu0 %v10494_v46  ;;  %v10505_v22 = vld [vmem:[#allocation4 + $0x3e8] sm:$0xff]  ;;  %v10508_v46 = vld [vmem:[#allocation4 + $0x3f8] sm:$0xff]  ;;  %13672 = vst [vmem:[#allocation38_spill] sm:$0xff] %v10514_v42  ;;  %13673 = vst [vmem:[#allocation39_spill] sm:$0xff] %v10517_v33 }
 0x8fb   :  { %3612 = vmatpush1.msra.mxu1 %v10497_v10  ;;  %3645 = vmatprep.mubr.f32.mxu1 %v12890_v60  ;;  %13669 = vst [vmem:[#allocation35_spill] sm:$0xff] %v10505_v22  ;;  %13670 = vst [vmem:[#allocation36_spill] sm:$0xff] %v10508_v46  ;;  %v10511_v10 = vld [vmem:[#allocation4 + $0x3e0] sm:$0xff] }
 0x8fc   :  { %3683 = vmatpush1.msra.mxu0 %v10501_v61  ;;  %3716 = vmatprep.mubr.f32.mxu0 %v12890_v60  ;;  %13671 = vst [vmem:[#allocation37_spill] sm:$0xff] %v10511_v10 }
 0x8fd   :  { %3646 = vmatmul.mubr.f32.vlgmr.msra.gmra.mxu1 %v3190_v56  ;;  %3717 = vmatmul.mubr.f32.vlgmr.msra.gmra.mxu0 %v3190_v56  ;;  %v10520_v56 = vld [vmem:[#allocation4 + $0x3d8] sm:$0xff] }
 0x8fe   :  { %3723 = vmatprep.subr.mxu1 %v10505_v22  ;;  %3794 = vmatprep.subr.mxu0 %v10508_v46  ;;  %13674 = vst [vmem:[#allocation40_spill] sm:$0xff] %v10520_v56  ;;  %v10523_v22 = vld [vmem:[#allocation4 + $0x3c0] sm:$0xff]  ;;  %v10526_v46 = vld [vmem:[#allocation4 + $0x3d0] sm:$0xff] }
 0x8ff   :  { %3724 = vmatpush1.msra.mxu1 %v10511_v10  ;;  %3795 = vmatpush1.msra.mxu0 %v10514_v42  ;;  %13675 = vst [vmem:[#allocation41_spill] sm:$0xff] %v10523_v22  ;;  %13676 = vst [vmem:[#allocation42_spill] sm:$0xff] %v10526_v46  ;;  %v10529_v10 = vld [vmem:[#allocation4 + $0x3a8] sm:$0xff]  ;;  %v10532_v42 = vld [vmem:[#allocation4 + $0x3b8] sm:$0xff] }
 0x900   :  { %3725 = vmatprep.subr.mxu1 %v10517_v33  ;;  %3796 = vmatprep.subr.mxu0 %v10520_v56  ;;  %13677 = vst [vmem:[#allocation43_spill] sm:$0xff] %v10529_v10  ;;  %13678 = vst [vmem:[#allocation44_spill] sm:$0xff] %v10532_v42  ;;  %v10535_v33 = vld [vmem:[#allocation4 + $0x3a0] sm:$0xff]  ;;  %v10538_v56 = vld [vmem:[#allocation4 + $0x3b0] sm:$0xff] }
 0x901   :  { %3726 = vmatpush1.msra.mxu1 %v10523_v22  ;;  %3797 = vmatpush1.msra.mxu0 %v10526_v46  ;;  %13679 = vst [vmem:[#allocation45_spill] sm:$0xff] %v10535_v33  ;;  %13680 = vst [vmem:[#allocation46_spill] sm:$0xff] %v10538_v56  ;;  %v10541_v22 = vld [vmem:[#allocation4 + $0x388] sm:$0xff]  ;;  %v10544_v46 = vld [vmem:[#allocation4 + $0x398] sm:$0xff] }
 0x902   :  { %3727 = vmatprep.subr.mxu1 %v10529_v10  ;;  %3798 = vmatprep.subr.mxu0 %v10532_v42  ;;  %13681 = vst [vmem:[#allocation47_spill] sm:$0xff] %v10541_v22  ;;  %13682 = vst [vmem:[#allocation48_spill] sm:$0xff] %v10544_v46  ;;  %v10547_v10 = vld [vmem:[#allocation4 + $0x380] sm:$0xff]  ;;  %v10550_v42 = vld [vmem:[#allocation4 + $0x390] sm:$0xff] }
 0x903   :  { %3728 = vmatpush1.msra.mxu1 %v10535_v33  ;;  %3799 = vmatpush1.msra.mxu0 %v10538_v56  ;;  %13683 = vst [vmem:[#allocation49_spill] sm:$0xff] %v10547_v10  ;;  %13684 = vst [vmem:[#allocation50_spill] sm:$0xff] %v10550_v42  ;;  %v10553_v33 = vld [vmem:[#allocation4 + $0x368] sm:$0xff]  ;;  %v10556_v56 = vld [vmem:[#allocation4 + $0x378] sm:$0xff] }
 0x904   :  { %3729 = vmatprep.subr.mxu1 %v10541_v22  ;;  %3800 = vmatprep.subr.mxu0 %v10544_v46  ;;  %13685 = vst [vmem:[#allocation51_spill] sm:$0xff] %v10553_v33  ;;  %13686 = vst [vmem:[#allocation52_spill] sm:$0xff] %v10556_v56  ;;  %v10559_v22 = vld [vmem:[#allocation4 + $0x360] sm:$0xff]  ;;  %v10562_v46 = vld [vmem:[#allocation4 + $0x370] sm:$0xff] }
 0x905   :  { %3730 = vmatpush1.msra.mxu1 %v10547_v10  ;;  %3801 = vmatpush1.msra.mxu0 %v10550_v42  ;;  %13687 = vst [vmem:[#allocation53_spill] sm:$0xff] %v10559_v22  ;;  %13688 = vst [vmem:[#allocation54_spill] sm:$0xff] %v10562_v46  ;;  %v10565_v10 = vld [vmem:[#allocation4 + $0x348] sm:$0xff]  ;;  %v10568_v42 = vld [vmem:[#allocation4 + $0x358] sm:$0xff] }
 0x906   :  { %3731 = vmatprep.subr.mxu1 %v10553_v33  ;;  %3802 = vmatprep.subr.mxu0 %v10556_v56  ;;  %13689 = vst [vmem:[#allocation55_spill] sm:$0xff] %v10565_v10  ;;  %13690 = vst [vmem:[#allocation56_spill] sm:$0xff] %v10568_v42  ;;  %v10571_v33 = vld [vmem:[#allocation4 + $0x340] sm:$0xff]  ;;  %v10574_v56 = vld [vmem:[#allocation4 + $0x350] sm:$0xff] }
 0x907   :  { %3732 = vmatpush1.msra.mxu1 %v10559_v22  ;;  %3803 = vmatpush1.msra.mxu0 %v10562_v46  ;;  %13691 = vst [vmem:[#allocation57_spill] sm:$0xff] %v10571_v33  ;;  %13692 = vst [vmem:[#allocation58_spill] sm:$0xff] %v10574_v56  ;;  %v10577_v22 = vld [vmem:[#allocation4 + $0x328] sm:$0xff]  ;;  %v10580_v46 = vld [vmem:[#allocation4 + $0x338] sm:$0xff] }
 0x908   :  { %3733 = vmatprep.subr.mxu1 %v10565_v10  ;;  %3804 = vmatprep.subr.mxu0 %v10568_v42  ;;  %13693 = vst [vmem:[#allocation59_spill] sm:$0xff] %v10577_v22  ;;  %13694 = vst [vmem:[#allocation60_spill] sm:$0xff] %v10580_v46  ;;  %v10583_v10 = vld [vmem:[#allocation4 + $0x320] sm:$0xff]  ;;  %v10586_v42 = vld [vmem:[#allocation4 + $0x330] sm:$0xff] }
 0x909   :  { %3734 = vmatpush1.msra.mxu1 %v10571_v33  ;;  %3805 = vmatpush1.msra.mxu0 %v10574_v56  ;;  %13695 = vst [vmem:[#allocation61_spill] sm:$0xff] %v10583_v10  ;;  %13696 = vst [vmem:[#allocation62_spill] sm:$0xff] %v10586_v42  ;;  %v10589_v33 = vld [vmem:[#allocation4 + $0x308] sm:$0xff]  ;;  %v10592_v56 = vld [vmem:[#allocation4 + $0x318] sm:$0xff] }
 0x90a   :  { %3735 = vmatprep.subr.mxu1 %v10577_v22  ;;  %3806 = vmatprep.subr.mxu0 %v10580_v46  ;;  %13697 = vst [vmem:[#allocation63_spill] sm:$0xff] %v10589_v33  ;;  %13698 = vst [vmem:[#allocation64_spill] sm:$0xff] %v10592_v56  ;;  %v10595_v22 = vld [vmem:[#allocation4 + $0x300] sm:$0xff]  ;;  %v10598_v46 = vld [vmem:[#allocation4 + $0x310] sm:$0xff] }
 0x90b   :  { %3736 = vmatpush1.msra.mxu1 %v10583_v10  ;;  %3807 = vmatpush1.msra.mxu0 %v10586_v42  ;;  %13699 = vst [vmem:[#allocation65_spill] sm:$0xff] %v10595_v22  ;;  %13700 = vst [vmem:[#allocation66_spill] sm:$0xff] %v10598_v46  ;;  %v10601_v10 = vld [vmem:[#allocation4 + $0x2e8] sm:$0xff]  ;;  %v10604_v42 = vld [vmem:[#allocation4 + $0x2f8] sm:$0xff] }
 0x90c   :  { %3737 = vmatprep.subr.mxu1 %v10589_v33  ;;  %3808 = vmatprep.subr.mxu0 %v10592_v56  ;;  %13701 = vst [vmem:[#allocation67_spill] sm:$0xff] %v10601_v10  ;;  %13702 = vst [vmem:[#allocation68_spill] sm:$0xff] %v10604_v42  ;;  %v10607_v33 = vld [vmem:[#allocation4 + $0x2e0] sm:$0xff]  ;;  %v10610_v56 = vld [vmem:[#allocation4 + $0x2f0] sm:$0xff] }
 0x90d   :  { %3738 = vmatpush1.msra.mxu1 %v10595_v22  ;;  %3809 = vmatpush1.msra.mxu0 %v10598_v46  ;;  %13703 = vst [vmem:[#allocation69_spill] sm:$0xff] %v10607_v33  ;;  %13704 = vst [vmem:[#allocation70_spill] sm:$0xff] %v10610_v56  ;;  %v10613_v22 = vld [vmem:[#allocation4 + $0x2c8] sm:$0xff]  ;;  %v10616_v46 = vld [vmem:[#allocation4 + $0x2d8] sm:$0xff] }
 0x90e   :  { %3739 = vmatprep.subr.mxu1 %v10601_v10  ;;  %3810 = vmatprep.subr.mxu0 %v10604_v42  ;;  %13705 = vst [vmem:[#allocation71_spill] sm:$0xff] %v10613_v22  ;;  %13706 = vst [vmem:[#allocation72_spill] sm:$0xff] %v10616_v46  ;;  %v10619_v10 = vld [vmem:[#allocation4 + $0x2c0] sm:$0xff]  ;;  %v10622_v42 = vld [vmem:[#allocation4 + $0x2d0] sm:$0xff] }
 0x90f   :  { %3740 = vmatpush1.msra.mxu1 %v10607_v33  ;;  %3811 = vmatpush1.msra.mxu0 %v10610_v56  ;;  %13707 = vst [vmem:[#allocation73_spill] sm:$0xff] %v10619_v10  ;;  %13708 = vst [vmem:[#allocation74_spill] sm:$0xff] %v10622_v42  ;;  %v10625_v33 = vld [vmem:[#allocation4 + $0x2a8] sm:$0xff]  ;;  %v10628_v56 = vld [vmem:[#allocation4 + $0x2b8] sm:$0xff] }
 0x910   :  { %3741 = vmatprep.subr.mxu1 %v10613_v22  ;;  %3812 = vmatprep.subr.mxu0 %v10616_v46  ;;  %13709 = vst [vmem:[#allocation75_spill] sm:$0xff] %v10625_v33  ;;  %13710 = vst [vmem:[#allocation76_spill] sm:$0xff] %v10628_v56  ;;  %v10631_v22 = vld [vmem:[#allocation4 + $0x2a0] sm:$0xff]  ;;  %v10634_v46 = vld [vmem:[#allocation4 + $0x2b0] sm:$0xff] }
 0x911   :  { %3742 = vmatpush1.msra.mxu1 %v10619_v10  ;;  %3813 = vmatpush1.msra.mxu0 %v10622_v42  ;;  %13711 = vst [vmem:[#allocation77_spill] sm:$0xff] %v10631_v22  ;;  %13712 = vst [vmem:[#allocation78_spill] sm:$0xff] %v10634_v46  ;;  %v10637_v10 = vld [vmem:[#allocation4 + $0x288] sm:$0xff]  ;;  %v10640_v42 = vld [vmem:[#allocation4 + $0x298] sm:$0xff] }
 0x912   :  { %3743 = vmatprep.subr.mxu1 %v10625_v33  ;;  %3814 = vmatprep.subr.mxu0 %v10628_v56  ;;  %13713 = vst [vmem:[#allocation79_spill] sm:$0xff] %v10637_v10  ;;  %13714 = vst [vmem:[#allocation80_spill] sm:$0xff] %v10640_v42  ;;  %v10643_v33 = vld [vmem:[#allocation4 + $0x280] sm:$0xff]  ;;  %v10646_v56 = vld [vmem:[#allocation4 + $0x290] sm:$0xff] }
 0x913   :  { %3744 = vmatpush1.msra.mxu1 %v10631_v22  ;;  %3815 = vmatpush1.msra.mxu0 %v10634_v46  ;;  %13715 = vst [vmem:[#allocation81_spill] sm:$0xff] %v10643_v33  ;;  %13716 = vst [vmem:[#allocation82_spill] sm:$0xff] %v10646_v56  ;;  %v10649_v22 = vld [vmem:[#allocation4 + $0x268] sm:$0xff]  ;;  %v10652_v46 = vld [vmem:[#allocation4 + $0x278] sm:$0xff] }
 0x914   :  { %3745 = vmatprep.subr.mxu1 %v10637_v10  ;;  %3816 = vmatprep.subr.mxu0 %v10640_v42  ;;  %13717 = vst [vmem:[#allocation83_spill] sm:$0xff] %v10649_v22  ;;  %13718 = vst [vmem:[#allocation84_spill] sm:$0xff] %v10652_v46  ;;  %v10655_v10 = vld [vmem:[#allocation4 + $0x260] sm:$0xff]  ;;  %v10658_v42 = vld [vmem:[#allocation4 + $0x270] sm:$0xff] }
 0x915   :  { %3746 = vmatpush1.msra.mxu1 %v10643_v33  ;;  %3817 = vmatpush1.msra.mxu0 %v10646_v56  ;;  %13719 = vst [vmem:[#allocation85_spill] sm:$0xff] %v10655_v10  ;;  %13720 = vst [vmem:[#allocation86_spill] sm:$0xff] %v10658_v42  ;;  %v10661_v33 = vld [vmem:[#allocation4 + $0x248] sm:$0xff]  ;;  %v10664_v56 = vld [vmem:[#allocation4 + $0x258] sm:$0xff] }
 0x916   :  { %3747 = vmatprep.subr.mxu1 %v10649_v22  ;;  %3818 = vmatprep.subr.mxu0 %v10652_v46  ;;  %13721 = vst [vmem:[#allocation87_spill] sm:$0xff] %v10661_v33  ;;  %13722 = vst [vmem:[#allocation88_spill] sm:$0xff] %v10664_v56  ;;  %v10667_v22 = vld [vmem:[#allocation4 + $0x240] sm:$0xff]  ;;  %v10670_v46 = vld [vmem:[#allocation4 + $0x250] sm:$0xff] }
 0x917   :  { %3748 = vmatpush1.msra.mxu1 %v10655_v10  ;;  %3819 = vmatpush1.msra.mxu0 %v10658_v42  ;;  %13723 = vst [vmem:[#allocation89_spill] sm:$0xff] %v10667_v22  ;;  %13724 = vst [vmem:[#allocation90_spill] sm:$0xff] %v10670_v46  ;;  %v10673_v10 = vld [vmem:[#allocation4 + $0x228] sm:$0xff]  ;;  %v10676_v42 = vld [vmem:[#allocation4 + $0x238] sm:$0xff] }
 0x918   :  { %3749 = vmatprep.subr.mxu1 %v10661_v33  ;;  %3820 = vmatprep.subr.mxu0 %v10664_v56  ;;  %13725 = vst [vmem:[#allocation91_spill] sm:$0xff] %v10673_v10  ;;  %13726 = vst [vmem:[#allocation92_spill] sm:$0xff] %v10676_v42  ;;  %v10679_v33 = vld [vmem:[#allocation4 + $0x220] sm:$0xff]  ;;  %v10682_v56 = vld [vmem:[#allocation4 + $0x230] sm:$0xff] }
 0x919   :  { %3750 = vmatpush1.msra.mxu1 %v10667_v22  ;;  %3821 = vmatpush1.msra.mxu0 %v10670_v46  ;;  %13727 = vst [vmem:[#allocation93_spill] sm:$0xff] %v10679_v33  ;;  %13728 = vst [vmem:[#allocation94_spill] sm:$0xff] %v10682_v56  ;;  %v10685_v22 = vld [vmem:[#allocation4 + $0x208] sm:$0xff]  ;;  %v10688_v46 = vld [vmem:[#allocation4 + $0x218] sm:$0xff] }
 0x91a   :  { %3751 = vmatprep.subr.mxu1 %v10673_v10  ;;  %3822 = vmatprep.subr.mxu0 %v10676_v42  ;;  %13729 = vst [vmem:[#allocation95_spill] sm:$0xff] %v10685_v22  ;;  %13730 = vst [vmem:[#allocation96_spill] sm:$0xff] %v10688_v46  ;;  %v10691_v10 = vld [vmem:[#allocation4 + $0x200] sm:$0xff]  ;;  %v10694_v42 = vld [vmem:[#allocation4 + $0x210] sm:$0xff] }
 0x91b   :  { %3752 = vmatpush1.msra.mxu1 %v10679_v33  ;;  %3823 = vmatpush1.msra.mxu0 %v10682_v56  ;;  %13731 = vst [vmem:[#allocation97_spill] sm:$0xff] %v10691_v10  ;;  %13732 = vst [vmem:[#allocation98_spill] sm:$0xff] %v10694_v42  ;;  %v10700_v56 = vld [vmem:[#allocation6 + $0x1e8] sm:$0xff] }
 0x91c   :  { %3753 = vmatprep.subr.mxu1 %v10685_v22  ;;  %3824 = vmatprep.subr.mxu0 %v10688_v46  ;;  %13733 = vst [vmem:[#allocation99_spill] sm:$0xff] %v10700_v56  ;;  %v3335_v22 = vpop.f32.mrf.mxu1  ;;  %v3406_v46 = vpop.f32.mrf.mxu0 }
 0x91d   :  { %3754 = vmatpush1.msra.mxu1 %v10691_v10  ;;  %3825 = vmatpush1.msra.mxu0 %v10694_v42 }
 0x91e   :  { %3787 = vmatprep.mubr.f32.mxu1 %v12890_v60  ;;  %3858 = vmatprep.mubr.f32.mxu0 %v12890_v60  ;;  %v3337_v33 = vpop.f32.mrf.mxu1  ;;  %v3408_v29 = vpop.f32.mrf.mxu0 }
 0x91f   :  { %6400 = vmatprep.subr.mxu1 %v12890_v60  ;;  %3971 = vmatprep.subr.mxu0 %v10700_v56 }
 0x99c   :  { %v3477_v61 = vpop.f32.mrf.mxu1  ;;  %v3548_v42 = vpop.f32.mrf.mxu0 }
 0x99d   :  { %v3478_v10 = vadd.f32 %v3477_v61, %v3335_v22  ;;  %v3549_v30 = vadd.f32 %v3548_v42, %v3406_v46  ;;  %v10718_v46 = vld [vmem:[#allocation6 + $0x1e0] sm:$0xff] }
 0x99e   :  { %v3479_v8 = vpop.f32.mrf.mxu1  ;;  %v3550_v24 = vpop.f32.mrf.mxu0  ;;  %v10728_v42 = vld [vmem:[#allocation6 + $0x1c0] sm:$0xff] }
 0x99f   :  { %v3553_v7 = vadd.f32 %v3478_v10, %v8282_v54  ;;  %v3480_v5 = vadd.f32 %v3479_v8, %v3337_v33  ;;  %v3551_v0 = vadd.f32 %v3550_v24, %v3408_v29  ;;  %v3555_v22 = vadd.f32 %v3549_v30, %v8299_v47  ;;  %v10725_v10 = vld [vmem:[#allocation2 + $0x70] sm:$0xff]  ;;  %v10732_v33 = vld [vmem:[#allocation6 + $0x1a8] sm:$0xff] }
 0x9a1   :  { %v6054_v11 = vmul.f32 -1.442695, %v3553_v7  ;;  %v3554_v3 = vadd.f32 %v3480_v5, %v8286_v51  ;;  %v3556_v56 = vadd.f32 %v3551_v0, %v13101_v13 }
 0x9a3   :  { %6646 = vpow2.f32 %v6054_v11  ;;  %v6055_v2 = vmul.f32 -1.442695, %v3554_v3  ;;  %v6056_v63 = vmul.f32 -1.442695, %v3556_v56  ;;  %v10735_v56 = vld [vmem:[#allocation2 + $0x68] sm:$0xff] }
 0x9a5   :  { %6648 = vpow2.f32 %v6055_v2 }
 0x9a6   :  { %6650 = vpow2.f32 %v6056_v63 }
 0x9b0   :  { %v6647_v31 = vpop.eup %6646 }
 0x9b1   :  { %v3560_v61 = vadd.f32 1.0, %v6647_v31 }
 0x9b2   :  { %v6649_v15 = vpop.eup %6648 }
 0x9b3   :  { %6652 = vrcp.f32 %v3560_v61  ;;  %v3566_v8 = vadd.f32 1.0, %v6649_v15  ;;  %v6651_v5 = vpop.eup %6650  ;;  %v10715_v15 = vld [vmem:[#allocation2 + $0x78] sm:$0xff]  ;;  %v10742_v61 = vld [vmem:[#allocation6 + $0x188] sm:$0xff] }
 0x9b4   :  { %6654 = vtanh.f32 %v3555_v22  ;;  %v3573_v2 = vadd.f32 1.0, %v6651_v5  ;;  %v10738_v22 = vld [vmem:[#allocation6 + $0x1a0] sm:$0xff] }
 0x9b5   :  { %6656 = vrcp.f32 %v3566_v8  ;;  %v10745_v8 = vld [vmem:[#allocation2 + $0x60] sm:$0xff] }
 0x9b6   :  { %6658 = vrcp.f32 %v3573_v2  ;;  %v10748_v5 = vld [vmem:[#allocation6 + $0x180] sm:$0xff]  ;;  %v10762_v2 = vld [vmem:[#allocation6 + $0x148] sm:$0xff] }
 0x9b7   :  { %13735 = vst [vmem:[#allocation101_spill] sm:$0xff] %v10762_v2 }
 0x9c0   :  { %v6653_v11 = vpop.eup %6652 }
 0x9c1   :  { %v6655_v3 = vpop.eup %6654 }
 0x9c2   :  { %v6657_v7 = vpop.eup %6656  ;;  %v3577_v24 = vmul.f32 %v6655_v3, %v6653_v11  ;;  %v10752_v11 = vld [vmem:[#allocation6 + $0x168] sm:$0xff]  ;;  %v10755_v3 = vld [vmem:[#allocation2 + $0x58] sm:$0xff] }
 0x9c3   :  { %v3576_v0 = vmul.f32 %v6657_v7, %v10144_v48  ;;  %v6659_v31 = vpop.eup %6658  ;;  %v10722_v48 = vld [vmem:[#allocation6 + $0x1c8] sm:$0xff]  ;;  %v10758_v7 = vld [vmem:[#allocation6 + $0x160] sm:$0xff] }
 0x9c4   :  { %13734 = vst [vmem:[#allocation100_spill] sm:$0xff] %v10758_v7 }
 0x9c5   :  { %v10708_v29 = vadd.f32 %v3577_v24, %v3576_v0  ;;  %v10765_v24 = vld [vmem:[#allocation2 + $0x50] sm:$0xff]  ;;  %v10768_v0 = vld [vmem:[#allocation6 + $0x140] sm:$0xff] }
 0x9c6   :  { %13736 = vst [vmem:[#allocation102_spill] sm:$0xff] %v10765_v24  ;;  %13737 = vst [vmem:[#allocation103_spill] sm:$0xff] %v10768_v0 }
 0x9c7   :  { %6660 = vtanh.f32 %v10708_v29 }
 0x9d4   :  { %v6661_v30 = vpop.eup %6660 }
 0x9d5   :  { %v10711_v63 = vmul.f32 %v6661_v30, %v6659_v31  ;;  %v10772_v31 = vld [vmem:[#allocation6 + $0x128] sm:$0xff] }
 0x9d6   :  { %13738 = vst [vmem:[#allocation104_spill] sm:$0xff] %v10772_v31  ;;  %v10775_v30 = vld [vmem:[#allocation2 + $0x48] sm:$0xff] }
 0x9d7   :  { %3788 = vmatmul.mubr.f32.vlgmr.msra.gmra.mxu1 %v10711_v63  ;;  %3859 = vmatmul.mubr.f32.vlgmr.msra.gmra.mxu0 %v10711_v63  ;;  %13739 = vst [vmem:[#allocation105_spill] sm:$0xff] %v10775_v30 }
 0x9d8   :  { %6401 = vmatpush3.msra.mxu1 %v10715_v15  ;;  %3972 = vmatpush1.msra.mxu0 %v10718_v46 }
 0x9d9   :  { %6402 = vmatprep.subr.mxu1 %v12890_v60  ;;  %3973 = vmatprep.subr.mxu0 %v10722_v48 }
 0x9da   :  { %6403 = vmatpush3.msra.mxu1 %v10725_v10  ;;  %3974 = vmatpush1.msra.mxu0 %v10728_v42 }
 0x9db   :  { %6404 = vmatprep.subr.mxu1 %v12890_v60  ;;  %3975 = vmatprep.subr.mxu0 %v10732_v33 }
 0x9dc   :  { %6405 = vmatpush3.msra.mxu1 %v10735_v56  ;;  %3976 = vmatpush1.msra.mxu0 %v10738_v22 }
 0x9dd   :  { %6406 = vmatprep.subr.mxu1 %v12890_v60  ;;  %3977 = vmatprep.subr.mxu0 %v10742_v61 }
 0x9de   :  { %6407 = vmatpush3.msra.mxu1 %v10745_v8  ;;  %3978 = vmatpush1.msra.mxu0 %v10748_v5 }
 0x9df   :  { %6408 = vmatprep.subr.mxu1 %v12890_v60  ;;  %3979 = vmatprep.subr.mxu0 %v10752_v11 }
 0x9e0   :  { %6409 = vmatpush3.msra.mxu1 %v10755_v3  ;;  %3980 = vmatpush1.msra.mxu0 %v10758_v7  ;;  %v10778_v7 = vld [vmem:[#allocation6 + $0x120] sm:$0xff] }
 0x9e1   :  { %6410 = vmatprep.subr.mxu1 %v12890_v60  ;;  %3981 = vmatprep.subr.mxu0 %v10762_v2  ;;  %13740 = vst [vmem:[#allocation106_spill] sm:$0xff] %v10778_v7  ;;  %v10788_v2 = vld [vmem:[#allocation6 + $0x100] sm:$0xff] }
 0x9e2   :  { %6411 = vmatpush3.msra.mxu1 %v10765_v24  ;;  %3982 = vmatpush1.msra.mxu0 %v10768_v0  ;;  %v10782_v24 = vld [vmem:[#allocation6 + $0x108] sm:$0xff]  ;;  %v10785_v0 = vld [vmem:[#allocation2 + $0x40] sm:$0xff]  ;;  %13743 = vst [vmem:[#allocation109_spill] sm:$0xff] %v10788_v2 }
 0x9e3   :  { %6412 = vmatprep.subr.mxu1 %v12890_v60  ;;  %3983 = vmatprep.subr.mxu0 %v10772_v31  ;;  %13741 = vst [vmem:[#allocation107_spill] sm:$0xff] %v10782_v24  ;;  %13742 = vst [vmem:[#allocation108_spill] sm:$0xff] %v10785_v0  ;;  %v10798_v31 = vld [vmem:[#allocation6 + $0xe0] sm:$0xff] }
 0x9e4   :  { %6413 = vmatpush3.msra.mxu1 %v10775_v30  ;;  %3984 = vmatpush1.msra.mxu0 %v10778_v7  ;;  %v10792_v30 = vld [vmem:[#allocation6 + $0xe8] sm:$0xff]  ;;  %v10795_v7 = vld [vmem:[#allocation2 + $0x38] sm:$0xff]  ;;  %13746 = vst [vmem:[#allocation112_spill] sm:$0xff] %v10798_v31 }
 0x9e5   :  { %6414 = vmatprep.subr.mxu1 %v12890_v60  ;;  %3985 = vmatprep.subr.mxu0 %v10782_v24  ;;  %13744 = vst [vmem:[#allocation110_spill] sm:$0xff] %v10792_v30  ;;  %13745 = vst [vmem:[#allocation111_spill] sm:$0xff] %v10795_v7  ;;  %v10808_v24 = vld [vmem:[#allocation6 + $0xc0] sm:$0xff] }
 0x9e6   :  { %6415 = vmatpush3.msra.mxu1 %v10785_v0  ;;  %3986 = vmatpush1.msra.mxu0 %v10788_v2  ;;  %v10802_v0 = vld [vmem:[#allocation6 + $0xc8] sm:$0xff]  ;;  %v10805_v2 = vld [vmem:[#allocation2 + $0x30] sm:$0xff]  ;;  %13749 = vst [vmem:[#allocation115_spill] sm:$0xff] %v10808_v24 }
 0x9e7   :  { %6416 = vmatprep.subr.mxu1 %v12890_v60  ;;  %3987 = vmatprep.subr.mxu0 %v10792_v30  ;;  %13747 = vst [vmem:[#allocation113_spill] sm:$0xff] %v10802_v0  ;;  %13748 = vst [vmem:[#allocation114_spill] sm:$0xff] %v10805_v2  ;;  %v10818_v30 = vld [vmem:[#allocation6 + $0xa0] sm:$0xff] }
 0x9e8   :  { %6417 = vmatpush3.msra.mxu1 %v10795_v7  ;;  %3988 = vmatpush1.msra.mxu0 %v10798_v31  ;;  %v10812_v7 = vld [vmem:[#allocation6 + $0xa8] sm:$0xff]  ;;  %13752 = vst [vmem:[#allocation118_spill] sm:$0xff] %v10818_v30 }
 0x9e9   :  { %6418 = vmatprep.subr.mxu1 %v12890_v60  ;;  %3989 = vmatprep.subr.mxu0 %v10802_v0  ;;  %13750 = vst [vmem:[#allocation116_spill] sm:$0xff] %v10812_v7  ;;  %v10815_v31 = vld [vmem:[#allocation2 + $0x28] sm:$0xff]  ;;  %v10828_v0 = vld [vmem:[#allocation6 + $0x80] sm:$0xff] }
 0x9ea   :  { %6419 = vmatpush3.msra.mxu1 %v10805_v2  ;;  %3990 = vmatpush1.msra.mxu0 %v10808_v24  ;;  %13751 = vst [vmem:[#allocation117_spill] sm:$0xff] %v10815_v31  ;;  %v10822_v2 = vld [vmem:[#allocation6 + $0x88] sm:$0xff]  ;;  %v10825_v24 = vld [vmem:[#allocation2 + $0x20] sm:$0xff]  ;;  %13755 = vst [vmem:[#allocation121_spill] sm:$0xff] %v10828_v0 }
 0x9eb   :  { %6420 = vmatprep.subr.mxu1 %v12890_v60  ;;  %3991 = vmatprep.subr.mxu0 %v10812_v7  ;;  %13753 = vst [vmem:[#allocation119_spill] sm:$0xff] %v10822_v2  ;;  %13754 = vst [vmem:[#allocation120_spill] sm:$0xff] %v10825_v24  ;;  %v10838_v7 = vld [vmem:[#allocation6 + $0x60] sm:$0xff] }
 0x9ec   :  { %6421 = vmatpush3.msra.mxu1 %v10815_v31  ;;  %3992 = vmatpush1.msra.mxu0 %v10818_v30  ;;  %v10832_v31 = vld [vmem:[#allocation6 + $0x68] sm:$0xff]  ;;  %v10835_v30 = vld [vmem:[#allocation2 + $0x18] sm:$0xff]  ;;  %13758 = vst [vmem:[#allocation124_spill] sm:$0xff] %v10838_v7 }
 0x9ed   :  { %6422 = vmatprep.subr.mxu1 %v12890_v60  ;;  %3993 = vmatprep.subr.mxu0 %v10822_v2  ;;  %13756 = vst [vmem:[#allocation122_spill] sm:$0xff] %v10832_v31  ;;  %13757 = vst [vmem:[#allocation123_spill] sm:$0xff] %v10835_v30  ;;  %v10848_v2 = vld [vmem:[#allocation6 + $0x40] sm:$0xff] }
 0x9ee   :  { %6423 = vmatpush3.msra.mxu1 %v10825_v24  ;;  %3994 = vmatpush1.msra.mxu0 %v10828_v0  ;;  %v10842_v24 = vld [vmem:[#allocation6 + $0x48] sm:$0xff]  ;;  %v10845_v0 = vld [vmem:[#allocation2 + $0x10] sm:$0xff]  ;;  %13761 = vst [vmem:[#allocation127_spill] sm:$0xff] %v10848_v2 }
 0x9ef   :  { %6424 = vmatprep.subr.mxu1 %v12890_v60  ;;  %3995 = vmatprep.subr.mxu0 %v10832_v31  ;;  %13759 = vst [vmem:[#allocation125_spill] sm:$0xff] %v10842_v24  ;;  %13760 = vst [vmem:[#allocation126_spill] sm:$0xff] %v10845_v0  ;;  %v10858_v31 = vld [vmem:[#allocation6 + $0x20] sm:$0xff] }
 0x9f0   :  { %6425 = vmatpush3.msra.mxu1 %v10835_v30  ;;  %3996 = vmatpush1.msra.mxu0 %v10838_v7  ;;  %v10852_v30 = vld [vmem:[#allocation6 + $0x28] sm:$0xff] }
 0x9f1   :  { %6426 = vmatprep.subr.mxu1 %v12890_v60  ;;  %3997 = vmatprep.subr.mxu0 %v10842_v24  ;;  %v10855_v7 = vld [vmem:[#allocation2 + $0x8] sm:$0xff]  ;;  %v10865_v24 = vld [vmem:[#allocation2] sm:$0xff] }
 0x9f2   :  { %6427 = vmatpush3.msra.mxu1 %v10845_v0  ;;  %3998 = vmatpush1.msra.mxu0 %v10848_v2  ;;  %13762 = vst [vmem:[#allocation128_spill] sm:$0xff] %v10855_v7  ;;  %v10862_v0 = vld [vmem:[#allocation6 + $0x8] sm:$0xff]  ;;  %v3897_v2 = vpop.permute.xlu1 %3896  ;;  %13764 = vst [vmem:[#allocation130_spill] sm:$0xff] %v10865_v24 }
 0x9f3   :  { %6428 = vmatprep.subr.mxu1 %v12890_v60  ;;  %3999 = vmatprep.subr.mxu0 %v10852_v30  ;;  %13763 = vst [vmem:[#allocation129_spill] sm:$0xff] %v10862_v0  ;;  %vm3898_vm6 = vcmp.eq.s32.totalorder %v13555_v38, %v3897_v2  ;;  %v10884_v2 = vld [vmem:[#allocation4 + $0x1e8] sm:$0xff]  ;;  %v10893_v38 = vld [vmem:[#allocation6 + $0x1d0] sm:$0xff] }
 0x9f4   :  { %6429 = vmatpush3.msra.mxu1 %v10855_v7  ;;  %4000 = vmatpush1.msra.mxu0 %v10858_v31  ;;  %v10871_v7 = vld [vmem:[#allocation6] sm:$0xff]  ;;  %13768 = vst [vmem:[#allocation134_spill] sm:$0xff] %v10884_v2  ;;  %13771 = vst [vmem:[#allocation137_spill] sm:$0xff] %v10893_v38 }
 0x9f5   :  { %6430 = vmatprep.subr.mxu1 %v12890_v60  ;;  %4001 = vmatprep.subr.mxu0 %v10862_v0  ;;  %13765 = vst [vmem:[#allocation131_spill] sm:$0xff] %v10871_v7  ;;  %v10877_v0 = vld [vmem:[#allocation6 + $0x1f8] sm:$0xff] }
 0x9f6   :  { %6431 = vmatpush3.msra.mxu1 %v10865_v24  ;;  %6432 = vmatprep.mubr.msk.f32.mxu1 %vm7815_vm0, %v12890_v60  ;;  %13766 = vst [vmem:[#allocation132_spill] sm:$0xff] %v10877_v0  ;;  %v10881_v24 = vld [vmem:[#allocation6 + $0x1f0] sm:$0xff] }
 0x9f7   :  { %4002 = vmatpush1.msra.mxu0 %v10871_v7  ;;  %4035 = vmatprep.mubr.f32.mxu0 %v12890_v60  ;;  %13767 = vst [vmem:[#allocation133_spill] sm:$0xff] %v10881_v24  ;;  %v10887_v7 = vld [vmem:[#allocation6 + $0x1d8] sm:$0xff] }
 0x9f8   :  { %6433 = vmatmul.mubr.msk.f32.vlgmr.msra.gmra.mxu1 %vm3898_vm6, %v13557_v28  ;;  %4036 = vmatmul.mubr.f32.vlgmr.msra.gmra.mxu0 %v10711_v63  ;;  %13769 = vst [vmem:[#allocation135_spill] sm:$0xff] %v10887_v7  ;;  %v10890_v28 = vld [vmem:[#allocation4 + $0x1e0] sm:$0xff] }
 0x9f9   :  { %4042 = vmatprep.subr.mxu1 %v10877_v0  ;;  %4106 = vmatprep.mubr.f32.mxu1 %v12890_v60  ;;  %13770 = vst [vmem:[#allocation136_spill] sm:$0xff] %v10890_v28  ;;  %v10896_v0 = vld [vmem:[#allocation4 + $0x1c8] sm:$0xff] }
 0x9fa   :  { %4043 = vmatpush1.msra.mxu1 %v10881_v24  ;;  %4113 = vmatprep.subr.mxu0 %v10884_v2  ;;  %13772 = vst [vmem:[#allocation138_spill] sm:$0xff] %v10896_v0  ;;  %v10899_v24 = vld [vmem:[#allocation6 + $0x1b8] sm:$0xff]  ;;  %v10902_v2 = vld [vmem:[#allocation4 + $0x1c0] sm:$0xff] }
 0x9fb   :  { %4044 = vmatprep.subr.mxu1 %v10887_v7  ;;  %4114 = vmatpush1.msra.mxu0 %v10890_v28  ;;  %13773 = vst [vmem:[#allocation139_spill] sm:$0xff] %v10899_v24  ;;  %13774 = vst [vmem:[#allocation140_spill] sm:$0xff] %v10902_v2  ;;  %v10905_v7 = vld [vmem:[#allocation6 + $0x1b0] sm:$0xff]  ;;  %v10908_v28 = vld [vmem:[#allocation4 + $0x1a8] sm:$0xff] }
 0x9fc   :  { %4045 = vmatpush1.msra.mxu1 %v10893_v38  ;;  %4115 = vmatprep.subr.mxu0 %v10896_v0  ;;  %13775 = vst [vmem:[#allocation141_spill] sm:$0xff] %v10905_v7  ;;  %13776 = vst [vmem:[#allocation142_spill] sm:$0xff] %v10908_v28  ;;  %v10911_v38 = vld [vmem:[#allocation6 + $0x198] sm:$0xff]  ;;  %v10914_v0 = vld [vmem:[#allocation4 + $0x1a0] sm:$0xff] }
 0x9fd   :  { %4046 = vmatprep.subr.mxu1 %v10899_v24  ;;  %4116 = vmatpush1.msra.mxu0 %v10902_v2  ;;  %13777 = vst [vmem:[#allocation143_spill] sm:$0xff] %v10911_v38  ;;  %13778 = vst [vmem:[#allocation144_spill] sm:$0xff] %v10914_v0  ;;  %v10917_v24 = vld [vmem:[#allocation6 + $0x190] sm:$0xff]  ;;  %v10920_v2 = vld [vmem:[#allocation4 + $0x188] sm:$0xff] }
 0x9fe   :  { %4047 = vmatpush1.msra.mxu1 %v10905_v7  ;;  %4117 = vmatprep.subr.mxu0 %v10908_v28  ;;  %13779 = vst [vmem:[#allocation145_spill] sm:$0xff] %v10917_v24  ;;  %13780 = vst [vmem:[#allocation146_spill] sm:$0xff] %v10920_v2  ;;  %v10923_v7 = vld [vmem:[#allocation6 + $0x178] sm:$0xff]  ;;  %v10926_v28 = vld [vmem:[#allocation4 + $0x180] sm:$0xff] }
 0x9ff   :  { %4048 = vmatprep.subr.mxu1 %v10911_v38  ;;  %4118 = vmatpush1.msra.mxu0 %v10914_v0  ;;  %13781 = vst [vmem:[#allocation147_spill] sm:$0xff] %v10923_v7  ;;  %13782 = vst [vmem:[#allocation148_spill] sm:$0xff] %v10926_v28  ;;  %v10929_v38 = vld [vmem:[#allocation6 + $0x170] sm:$0xff]  ;;  %v10932_v0 = vld [vmem:[#allocation4 + $0x168] sm:$0xff] }
 0xa00   :  { %4049 = vmatpush1.msra.mxu1 %v10917_v24  ;;  %4119 = vmatprep.subr.mxu0 %v10920_v2  ;;  %13783 = vst [vmem:[#allocation149_spill] sm:$0xff] %v10929_v38  ;;  %13784 = vst [vmem:[#allocation150_spill] sm:$0xff] %v10932_v0  ;;  %v10935_v24 = vld [vmem:[#allocation6 + $0x158] sm:$0xff]  ;;  %v10938_v2 = vld [vmem:[#allocation4 + $0x160] sm:$0xff] }
 0xa01   :  { %4050 = vmatprep.subr.mxu1 %v10923_v7  ;;  %4120 = vmatpush1.msra.mxu0 %v10926_v28  ;;  %13785 = vst [vmem:[#allocation151_spill] sm:$0xff] %v10935_v24  ;;  %13786 = vst [vmem:[#allocation152_spill] sm:$0xff] %v10938_v2  ;;  %v10941_v7 = vld [vmem:[#allocation6 + $0x150] sm:$0xff]  ;;  %v10944_v28 = vld [vmem:[#allocation4 + $0x148] sm:$0xff] }
 0xa02   :  { %4051 = vmatpush1.msra.mxu1 %v10929_v38  ;;  %4121 = vmatprep.subr.mxu0 %v10932_v0  ;;  %13787 = vst [vmem:[#allocation153_spill] sm:$0xff] %v10941_v7  ;;  %13788 = vst [vmem:[#allocation154_spill] sm:$0xff] %v10944_v28  ;;  %v10947_v38 = vld [vmem:[#allocation6 + $0x138] sm:$0xff]  ;;  %v10950_v0 = vld [vmem:[#allocation4 + $0x140] sm:$0xff] }
 0xa03   :  { %4052 = vmatprep.subr.mxu1 %v10935_v24  ;;  %4122 = vmatpush1.msra.mxu0 %v10938_v2  ;;  %13789 = vst [vmem:[#allocation155_spill] sm:$0xff] %v10947_v38  ;;  %13790 = vst [vmem:[#allocation156_spill] sm:$0xff] %v10950_v0  ;;  %v10953_v24 = vld [vmem:[#allocation6 + $0x130] sm:$0xff]  ;;  %v10956_v2 = vld [vmem:[#allocation4 + $0x128] sm:$0xff] }
 0xa04   :  { %4053 = vmatpush1.msra.mxu1 %v10941_v7  ;;  %4123 = vmatprep.subr.mxu0 %v10944_v28  ;;  %13791 = vst [vmem:[#allocation157_spill] sm:$0xff] %v10953_v24  ;;  %13792 = vst [vmem:[#allocation158_spill] sm:$0xff] %v10956_v2  ;;  %v10959_v7 = vld [vmem:[#allocation6 + $0x118] sm:$0xff]  ;;  %v10962_v28 = vld [vmem:[#allocation4 + $0x120] sm:$0xff] }
 0xa05   :  { %4054 = vmatprep.subr.mxu1 %v10947_v38  ;;  %4124 = vmatpush1.msra.mxu0 %v10950_v0  ;;  %13793 = vst [vmem:[#allocation159_spill] sm:$0xff] %v10959_v7  ;;  %13794 = vst [vmem:[#allocation160_spill] sm:$0xff] %v10962_v28  ;;  %v10965_v38 = vld [vmem:[#allocation6 + $0x110] sm:$0xff]  ;;  %v10968_v0 = vld [vmem:[#allocation4 + $0x108] sm:$0xff] }
 0xa06   :  { %4055 = vmatpush1.msra.mxu1 %v10953_v24  ;;  %4125 = vmatprep.subr.mxu0 %v10956_v2  ;;  %13795 = vst [vmem:[#allocation161_spill] sm:$0xff] %v10965_v38  ;;  %13796 = vst [vmem:[#allocation162_spill] sm:$0xff] %v10968_v0  ;;  %v10971_v24 = vld [vmem:[#allocation6 + $0xf8] sm:$0xff]  ;;  %v10974_v2 = vld [vmem:[#allocation4 + $0x100] sm:$0xff] }
 0xa07   :  { %4056 = vmatprep.subr.mxu1 %v10959_v7  ;;  %4126 = vmatpush1.msra.mxu0 %v10962_v28  ;;  %13797 = vst [vmem:[#allocation163_spill] sm:$0xff] %v10971_v24  ;;  %13798 = vst [vmem:[#allocation164_spill] sm:$0xff] %v10974_v2  ;;  %v10977_v7 = vld [vmem:[#allocation6 + $0xf0] sm:$0xff]  ;;  %v10980_v28 = vld [vmem:[#allocation4 + $0xe8] sm:$0xff] }
 0xa08   :  { %4057 = vmatpush1.msra.mxu1 %v10965_v38  ;;  %4127 = vmatprep.subr.mxu0 %v10968_v0  ;;  %13799 = vst [vmem:[#allocation165_spill] sm:$0xff] %v10977_v7  ;;  %13800 = vst [vmem:[#allocation166_spill] sm:$0xff] %v10980_v28  ;;  %v10983_v38 = vld [vmem:[#allocation6 + $0xd8] sm:$0xff]  ;;  %v10986_v0 = vld [vmem:[#allocation4 + $0xe0] sm:$0xff] }
 0xa09   :  { %4058 = vmatprep.subr.mxu1 %v10971_v24  ;;  %4128 = vmatpush1.msra.mxu0 %v10974_v2  ;;  %13801 = vst [vmem:[#allocation167_spill] sm:$0xff] %v10983_v38  ;;  %13802 = vst [vmem:[#allocation168_spill] sm:$0xff] %v10986_v0  ;;  %v10989_v24 = vld [vmem:[#allocation6 + $0xd0] sm:$0xff]  ;;  %v10992_v2 = vld [vmem:[#allocation4 + $0xc8] sm:$0xff] }
 0xa0a   :  { %4059 = vmatpush1.msra.mxu1 %v10977_v7  ;;  %4129 = vmatprep.subr.mxu0 %v10980_v28  ;;  %13803 = vst [vmem:[#allocation169_spill] sm:$0xff] %v10989_v24  ;;  %13804 = vst [vmem:[#allocation170_spill] sm:$0xff] %v10992_v2  ;;  %v10995_v7 = vld [vmem:[#allocation6 + $0xb8] sm:$0xff]  ;;  %v10998_v28 = vld [vmem:[#allocation4 + $0xc0] sm:$0xff] }
 0xa0b   :  { %4060 = vmatprep.subr.mxu1 %v10983_v38  ;;  %4130 = vmatpush1.msra.mxu0 %v10986_v0  ;;  %13805 = vst [vmem:[#allocation171_spill] sm:$0xff] %v10995_v7  ;;  %13806 = vst [vmem:[#allocation172_spill] sm:$0xff] %v10998_v28  ;;  %v11001_v38 = vld [vmem:[#allocation6 + $0xb0] sm:$0xff]  ;;  %v11004_v0 = vld [vmem:[#allocation4 + $0xa8] sm:$0xff] }
 0xa0c   :  { %4061 = vmatpush1.msra.mxu1 %v10989_v24  ;;  %4131 = vmatprep.subr.mxu0 %v10992_v2  ;;  %13807 = vst [vmem:[#allocation173_spill] sm:$0xff] %v11001_v38  ;;  %13808 = vst [vmem:[#allocation174_spill] sm:$0xff] %v11004_v0  ;;  %v11007_v24 = vld [vmem:[#allocation6 + $0x98] sm:$0xff]  ;;  %v11010_v2 = vld [vmem:[#allocation4 + $0xa0] sm:$0xff] }
 0xa0d   :  { %4062 = vmatprep.subr.mxu1 %v10995_v7  ;;  %4132 = vmatpush1.msra.mxu0 %v10998_v28  ;;  %13809 = vst [vmem:[#allocation175_spill] sm:$0xff] %v11007_v24  ;;  %13810 = vst [vmem:[#allocation176_spill] sm:$0xff] %v11010_v2  ;;  %v11013_v7 = vld [vmem:[#allocation6 + $0x90] sm:$0xff]  ;;  %v11016_v28 = vld [vmem:[#allocation4 + $0x88] sm:$0xff] }
 0xa0e   :  { %4063 = vmatpush1.msra.mxu1 %v11001_v38  ;;  %4133 = vmatprep.subr.mxu0 %v11004_v0  ;;  %13811 = vst [vmem:[#allocation177_spill] sm:$0xff] %v11013_v7  ;;  %13812 = vst [vmem:[#allocation178_spill] sm:$0xff] %v11016_v28  ;;  %v11019_v38 = vld [vmem:[#allocation6 + $0x78] sm:$0xff]  ;;  %v11022_v0 = vld [vmem:[#allocation4 + $0x80] sm:$0xff] }
 0xa0f   :  { %4064 = vmatprep.subr.mxu1 %v11007_v24  ;;  %4134 = vmatpush1.msra.mxu0 %v11010_v2  ;;  %13813 = vst [vmem:[#allocation179_spill] sm:$0xff] %v11019_v38  ;;  %13814 = vst [vmem:[#allocation180_spill] sm:$0xff] %v11022_v0  ;;  %v11025_v24 = vld [vmem:[#allocation6 + $0x70] sm:$0xff]  ;;  %v11028_v2 = vld [vmem:[#allocation4 + $0x68] sm:$0xff] }
 0xa10   :  { %4065 = vmatpush1.msra.mxu1 %v11013_v7  ;;  %4135 = vmatprep.subr.mxu0 %v11016_v28  ;;  %13815 = vst [vmem:[#allocation181_spill] sm:$0xff] %v11025_v24  ;;  %13816 = vst [vmem:[#allocation182_spill] sm:$0xff] %v11028_v2  ;;  %v11031_v7 = vld [vmem:[#allocation6 + $0x58] sm:$0xff]  ;;  %v11034_v28 = vld [vmem:[#allocation4 + $0x60] sm:$0xff] }
 0xa11   :  { %4066 = vmatprep.subr.mxu1 %v11019_v38  ;;  %4136 = vmatpush1.msra.mxu0 %v11022_v0  ;;  %13817 = vst [vmem:[#allocation183_spill] sm:$0xff] %v11031_v7  ;;  %13818 = vst [vmem:[#allocation184_spill] sm:$0xff] %v11034_v28  ;;  %v11037_v38 = vld [vmem:[#allocation6 + $0x50] sm:$0xff]  ;;  %v11040_v0 = vld [vmem:[#allocation4 + $0x48] sm:$0xff] }
 0xa12   :  { %4067 = vmatpush1.msra.mxu1 %v11025_v24  ;;  %4137 = vmatprep.subr.mxu0 %v11028_v2  ;;  %13819 = vst [vmem:[#allocation185_spill] sm:$0xff] %v11037_v38  ;;  %13820 = vst [vmem:[#allocation186_spill] sm:$0xff] %v11040_v0  ;;  %v11043_v24 = vld [vmem:[#allocation6 + $0x38] sm:$0xff]  ;;  %v11046_v2 = vld [vmem:[#allocation4 + $0x40] sm:$0xff] }
 0xa13   :  { %4068 = vmatprep.subr.mxu1 %v11031_v7  ;;  %4138 = vmatpush1.msra.mxu0 %v11034_v28  ;;  %13821 = vst [vmem:[#allocation187_spill] sm:$0xff] %v11043_v24  ;;  %13822 = vst [vmem:[#allocation188_spill] sm:$0xff] %v11046_v2  ;;  %v11049_v7 = vld [vmem:[#allocation6 + $0x30] sm:$0xff]  ;;  %v11052_v28 = vld [vmem:[#allocation4 + $0x28] sm:$0xff] }
 0xa14   :  { %4069 = vmatpush1.msra.mxu1 %v11037_v38  ;;  %4139 = vmatprep.subr.mxu0 %v11040_v0  ;;  %13823 = vst [vmem:[#allocation189_spill] sm:$0xff] %v11049_v7  ;;  %13824 = vst [vmem:[#allocation190_spill] sm:$0xff] %v11052_v28  ;;  %v11055_v38 = vld [vmem:[#allocation6 + $0x18] sm:$0xff]  ;;  %v11058_v0 = vld [vmem:[#allocation4 + $0x20] sm:$0xff] }
 0xa15   :  { %4070 = vmatprep.subr.mxu1 %v11043_v24  ;;  %4140 = vmatpush1.msra.mxu0 %v11046_v2  ;;  %13825 = vst [vmem:[#allocation191_spill] sm:$0xff] %v11058_v0  ;;  %v11061_v24 = vld [vmem:[#allocation6 + $0x10] sm:$0xff]  ;;  %v11064_v2 = vld [vmem:[#allocation4 + $0x8] sm:$0xff] }
 0xa16   :  { %4071 = vmatpush1.msra.mxu1 %v11049_v7  ;;  %4141 = vmatprep.subr.mxu0 %v11052_v28  ;;  %13826 = vst [vmem:[#allocation192_spill] sm:$0xff] %v11061_v24  ;;  %v11068_v7 = vld [vmem:[#allocation4 + $0x1f8] sm:$0xff]  ;;  %v11071_v28 = vld [vmem:[#allocation4 + $0x1f0] sm:$0xff] }
 0xa17   :  { %4072 = vmatprep.subr.mxu1 %v11055_v38  ;;  %4142 = vmatpush1.msra.mxu0 %v11058_v0  ;;  %13827 = vst [vmem:[#allocation193_spill] sm:$0xff] %v11068_v7  ;;  %13828 = vst [vmem:[#allocation194_spill] sm:$0xff] %v11071_v28  ;;  %v11075_v0 = vld [vmem:[#allocation4 + $0x1d8] sm:$0xff] }
 0xa18   :  { %4073 = vmatpush1.msra.mxu1 %v11061_v24  ;;  %4143 = vmatprep.subr.mxu0 %v11064_v2  ;;  %13829 = vst [vmem:[#allocation195_spill] sm:$0xff] %v11075_v0  ;;  %v11079_v24 = vld [vmem:[#allocation4 + $0x1d0] sm:$0xff] }
 0xa19   :  { %4107 = vmatmul.mubr.f32.vlgmr.msra.gmra.mxu1 %v10711_v63  ;;  %4184 = vmatprep.subr.mxu1 %v11068_v7  ;;  %13830 = vst [vmem:[#allocation196_spill] sm:$0xff] %v11079_v24  ;;  %v11083_v63 = vld [vmem:[#allocation4 + $0x1b8] sm:$0xff]  ;;  %v11099_v7 = vld [vmem:[#allocation4 + $0x170] sm:$0xff] }
 0xa1a   :  { %4185 = vmatpush1.msra.mxu1 %v11071_v28  ;;  %4144 = vmatpush1.msra.mxu0 %v10286_v52  ;;  %v11087_v28 = vld [vmem:[#allocation4 + $0x1b0] sm:$0xff]  ;;  %v11090_v52 = vld [vmem:[#allocation4 + $0x198] sm:$0xff]  ;;  %13835 = vst [vmem:[#allocation201_spill] sm:$0xff] %v11099_v7 }
 0xa1b   :  { %4186 = vmatprep.subr.mxu1 %v11075_v0  ;;  %4177 = vmatprep.mubr.f32.mxu0 %v12890_v60  ;;  %13831 = vst [vmem:[#allocation197_spill] sm:$0xff] %v11087_v28  ;;  %13832 = vst [vmem:[#allocation198_spill] sm:$0xff] %v11090_v52  ;;  %v11093_v0 = vld [vmem:[#allocation4 + $0x190] sm:$0xff] }
 0xa1c   :  { %4187 = vmatpush1.msra.mxu1 %v11079_v24  ;;  %4248 = vmatprep.mubr.f32.mxu1 %v12890_v60  ;;  %13833 = vst [vmem:[#allocation199_spill] sm:$0xff] %v11093_v0  ;;  %v11096_v24 = vld [vmem:[#allocation4 + $0x178] sm:$0xff] }
 0xa1d   :  { %4188 = vmatprep.subr.mxu1 %v11083_v63  ;;  %4283 = vmatprep.subr.mxu0 %v10294_v32  ;;  %13834 = vst [vmem:[#allocation200_spill] sm:$0xff] %v11096_v24  ;;  %v11102_v32 = vld [vmem:[#allocation4 + $0x158] sm:$0xff] }
 0xa1e   :  { %4189 = vmatpush1.msra.mxu1 %v11087_v28  ;;  %v11105_v28 = vld [vmem:[#allocation4 + $0x150] sm:$0xff] }
 0xa1f   :  { %4190 = vmatprep.subr.mxu1 %v11090_v52  ;;  %v11108_v52 = vld [vmem:[#allocation4 + $0x138] sm:$0xff] }
 0xa20   :  { %4191 = vmatpush1.msra.mxu1 %v11093_v0  ;;  %v11111_v0 = vld [vmem:[#allocation4 + $0x130] sm:$0xff] }
 0xa21   :  { %4192 = vmatprep.subr.mxu1 %v11096_v24  ;;  %v11114_v24 = vld [vmem:[#allocation4 + $0x118] sm:$0xff] }
 0xa22   :  { %4193 = vmatpush1.msra.mxu1 %v11099_v7  ;;  %13836 = vst [vmem:[#allocation202_spill] sm:$0xff] %v11114_v24  ;;  %v11117_v7 = vld [vmem:[#allocation4 + $0x110] sm:$0xff] }
 0xa23   :  { %4194 = vmatprep.subr.mxu1 %v11102_v32  ;;  %13837 = vst [vmem:[#allocation203_spill] sm:$0xff] %v11117_v7 }
 0xa24   :  { %4195 = vmatpush1.msra.mxu1 %v11105_v28 }
 0xa25   :  { %4196 = vmatprep.subr.mxu1 %v11108_v52 }
 0xa26   :  { %4197 = vmatpush1.msra.mxu1 %v11111_v0 }
 0xa27   :  { %4198 = vmatprep.subr.mxu1 %v11114_v24 }
 0xa28   :  { %4199 = vmatpush1.msra.mxu1 %v11117_v7 }
 0xa29   :  { %4200 = vmatprep.subr.mxu1 %v10308_v37  ;;  %v3647_v37 = vpop.f32.mrf.mxu1 }
 0xa2a   :  { %4201 = vmatpush1.msra.mxu1 %v10311_v18 }
 0xa2b   :  { %4202 = vmatprep.subr.mxu1 %v10314_v21  ;;  %v3649_v18 = vpop.f32.mrf.mxu1 }
 0xa2c   :  { %4203 = vmatpush1.msra.mxu1 %v10317_v49 }
 0xa2d   :  { %4204 = vmatprep.subr.mxu1 %v10320_v58 }
 0xa2e   :  { %4205 = vmatpush1.msra.mxu1 %v10323_v41 }
 0xa2f   :  { %4206 = vmatprep.subr.mxu1 %v10326_v57 }
 0xa30   :  { %4207 = vmatpush1.msra.mxu1 %v10329_v14 }
 0xa31   :  { %4208 = vmatprep.subr.mxu1 %v10332_v55 }
 0xa32   :  { %4209 = vmatpush1.msra.mxu1 %v10335_v36  ;;  %v3718_v36 = vpop.f32.mrf.mxu0 }
 0xa33   :  { %4210 = vmatprep.subr.mxu1 %v10338_v23 }
 0xa34   :  { %4211 = vmatpush1.msra.mxu1 %v10341_v9  ;;  %v3720_v9 = vpop.f32.mrf.mxu0 }
 0xa35   :  { %4212 = vmatprep.subr.mxu1 %v10344_v12 }
 0xa36   :  { %4213 = vmatpush1.msra.mxu1 %v10347_v35 }
 0xa37   :  { %4214 = vmatprep.subr.mxu1 %v10350_v45 }
 0xa38   :  { %4215 = vmatpush1.msra.mxu1 %v10353_v43 }
 0xa39   :  { %4354 = vmatprep.subr.mxu1 %v10356_v59 }
 0xa97   :  { %v3789_v21 = vpop.f32.mrf.mxu1  ;;  %v3860_v12 = vpop.f32.mrf.mxu0 }
 0xa98   :  { %v3790_v49 = vadd.f32 %v3789_v21, %v3647_v37  ;;  %v3861_v59 = vadd.f32 %v3860_v12, %v3718_v36  ;;  %v11156_v36 = vld [vmem:[#allocation6 + $0x3d0] sm:$0xff]  ;;  %v11162_v12 = vld [vmem:[#allocation6 + $0x3b8] sm:$0xff] }
 0xa99   :  { %v3791_v58 = vpop.f32.mrf.mxu1  ;;  %v3862_v35 = vpop.f32.mrf.mxu0 }
 0xa9a   :  { %v3865_v41 = vadd.f32 %v3790_v49, %v8748_v19  ;;  %v3792_v57 = vadd.f32 %v3791_v58, %v3649_v18  ;;  %v3863_v45 = vadd.f32 %v3862_v35, %v3720_v9  ;;  %v3867_v18 = vadd.f32 %v3861_v59, %v8762_v17  ;;  %v11159_v9 = vld [vmem:[#allocation6 + $0x3a8] sm:$0xff]  ;;  %v11165_v35 = vld [vmem:[#allocation6 + $0x3a0] sm:$0xff] }
 0xa9b   :  { %v11171_v59 = vld [vmem:[#allocation6 + $0x388] sm:$0xff] }
 0xa9c   :  { %v6057_v14 = vmul.f32 -1.442695, %v3865_v41  ;;  %v3866_v55 = vadd.f32 %v3792_v57, %v8752_v25  ;;  %v3868_v21 = vadd.f32 %v3863_v45, %v8758_v20  ;;  %v11141_v41 = vld [vmem:[#allocation6 + $0x3e0] sm:$0xff]  ;;  %v11144_v57 = vld [vmem:[#allocation6 + $0x3f0] sm:$0xff]  ;;  %13839 = vst [vmem:[#allocation205_spill] sm:$0xff] %v11171_v59 }
 0xa9d   :  { %v11168_v45 = vld [vmem:[#allocation6 + $0x3b0] sm:$0xff] }
 0xa9e   :  { %6662 = vpow2.f32 %v6057_v14  ;;  %v6058_v23 = vmul.f32 -1.442695, %v3866_v55  ;;  %v6059_v49 = vmul.f32 -1.442695, %v3868_v21  ;;  %v11147_v14 = vld [vmem:[#allocation6 + $0x3c8] sm:$0xff]  ;;  %v11153_v55 = vld [vmem:[#allocation6 + $0x3c0] sm:$0xff] }
 0xa9f   :  { %13838 = vst [vmem:[#allocation204_spill] sm:$0xff] %v11168_v45 }
 0xaa0   :  { %6664 = vpow2.f32 %v6058_v23 }
 0xaab   :  { %v6663_v43 = vpop.eup %6662 }
 0xaac   :  { %v3872_v24 = vadd.f32 1.0, %v6663_v43 }
 0xaad   :  { %v6665_v7 = vpop.eup %6664 }
 0xaae   :  { %v3878_v37 = vadd.f32 1.0, %v6665_v7 }
 0xab0   :  { %6666 = vrcp.f32 %v3878_v37  ;;  %v11174_v37 = vld [vmem:[#allocation6 + $0x398] sm:$0xff] }
 0xab1   :  { %6668 = vrcp.f32 %v3872_v24  ;;  %v11150_v24 = vld [vmem:[#allocation6 + $0x3d8] sm:$0xff]  ;;  %13840 = vst [vmem:[#allocation206_spill] sm:$0xff] %v11174_v37 }
 0xab2   :  { %6670 = vtanh.f32 %v3867_v18  ;;  %v11178_v18 = vld [vmem:[#allocation6 + $0x380] sm:$0xff] }
 0xab3   :  { %6672 = vpow2.f32 %v6059_v49  ;;  %13841 = vst [vmem:[#allocation207_spill] sm:$0xff] %v11178_v18  ;;  %v11181_v49 = vld [vmem:[#allocation6 + $0x390] sm:$0xff] }
 0xab4   :  { %13842 = vst [vmem:[#allocation208_spill] sm:$0xff] %v11181_v49 }
 0xab8   :  { %v3967_v58 = vpop.f32.mrf.mxu1 }
 0xab9   :  { %4178 = vmatmul.mubr.f32.vlgmr.msra.gmra.mxu0 %v3967_v58  ;;  %4249 = vmatmul.mubr.f32.vlgmr.msra.gmra.mxu1 %v3967_v58 }
 0xaba   :  { %4284 = vmatpush1.msra.mxu0 %v11141_v41  ;;  %4355 = vmatpush1.msra.mxu1 %v11144_v57  ;;  %v6434_v7 = vpop.f32.mrf.mxu1 }
 0xabb   :  { %4285 = vmatprep.subr.mxu0 %v11147_v14  ;;  %4356 = vmatprep.subr.mxu1 %v11150_v24  ;;  %v11184_v7 = vld [vmem:[#allocation6 + $0x368] sm:$0xff] }
 0xabc   :  { %4286 = vmatpush1.msra.mxu0 %v11153_v55  ;;  %4357 = vmatpush1.msra.mxu1 %v11156_v36  ;;  %13843 = vst [vmem:[#allocation209_spill] sm:$0xff] %v11184_v7 }
 0xabd   :  { %v6667_v23 = vpop.eup %6666  ;;  %4287 = vmatprep.subr.mxu0 %v11159_v9  ;;  %4358 = vmatprep.subr.mxu1 %v11162_v12 }
 0xabe   :  { %4288 = vmatpush1.msra.mxu0 %v11165_v35  ;;  %4359 = vmatpush1.msra.mxu1 %v11168_v45  ;;  %v6669_v43 = vpop.eup %6668  ;;  %v3888_v21 = vmul.f32 %v6667_v23, %v10386_v27  ;;  %v11190_v45 = vld [vmem:[#allocation6 + $0x360] sm:$0xff]  ;;  %v11193_v27 = vld [vmem:[#allocation6 + $0x370] sm:$0xff] }
 0xabf   :  { %4289 = vmatprep.subr.mxu0 %v11171_v59  ;;  %4360 = vmatprep.subr.mxu1 %v11174_v37  ;;  %v6671_v58 = vpop.eup %6670  ;;  %v11187_v59 = vld [vmem:[#allocation6 + $0x378] sm:$0xff]  ;;  %13844 = vst [vmem:[#allocation210_spill] sm:$0xff] %v11190_v45  ;;  %13845 = vst [vmem:[#allocation211_spill] sm:$0xff] %v11193_v27 }
 0xac0   :  { %4290 = vmatpush1.msra.mxu0 %v11178_v18  ;;  %4361 = vmatpush1.msra.mxu1 %v11181_v49  ;;  %v3889_v37 = vmul.f32 %v6671_v58, %v6669_v43  ;;  %v6673_v23 = vpop.eup %6672  ;;  %v11196_v49 = vld [vmem:[#allocation6 + $0x348] sm:$0xff]  ;;  %v11199_v18 = vld [vmem:[#allocation6 + $0x358] sm:$0xff]  ;;  %v11205_v43 = vld [vmem:[#allocation6 + $0x350] sm:$0xff] }
 0xac1   :  { %4291 = vmatprep.subr.mxu0 %v11184_v7  ;;  %4362 = vmatprep.subr.mxu1 %v11187_v59  ;;  %13846 = vst [vmem:[#allocation212_spill] sm:$0xff] %v11196_v49  ;;  %v11202_v7 = vld [vmem:[#allocation6 + $0x340] sm:$0xff]  ;;  %13848 = vst [vmem:[#allocation214_spill] sm:$0xff] %v11205_v43 }
 0xac2   :  { %4292 = vmatpush1.msra.mxu0 %v11190_v45  ;;  %4363 = vmatpush1.msra.mxu1 %v11193_v27  ;;  %13847 = vst [vmem:[#allocation213_spill] sm:$0xff] %v11202_v7  ;;  %v11208_v58 = vadd.f32 %v3889_v37, %v3888_v21  ;;  %v11210_v27 = vld [vmem:[#allocation6 + $0x328] sm:$0xff]  ;;  %v11214_v45 = vld [vmem:[#allocation6 + $0x320] sm:$0xff]  ;;  %v13864_v37 = vld [vmem:[#allocation23_spill] sm:$0xff] }
 0xac3   :  { %4293 = vmatprep.subr.mxu0 %v11196_v49  ;;  %4364 = vmatprep.subr.mxu1 %v11199_v18  ;;  %13849 = vst [vmem:[#allocation215_spill] sm:$0xff] %v11210_v27  ;;  %v3885_v49 = vadd.f32 1.0, %v6673_v23  ;;  %13850 = vst [vmem:[#allocation216_spill] sm:$0xff] %v11214_v45  ;;  %v13865_v21 = vld [vmem:[#allocation22_spill] sm:$0xff]  ;;  %v13867_v23 = vld [vmem:[#allocation25_spill] sm:$0xff] }
 0xac4   :  { %4294 = vmatpush1.msra.mxu0 %v11202_v7  ;;  %4365 = vmatpush1.msra.mxu1 %v11205_v43  ;;  %v11218_v7 = vld [vmem:[#allocation6 + $0x308] sm:$0xff]  ;;  %6674 = vtanh.f32 %v11208_v58 }
 0xac5   :  { %4295 = vmatprep.subr.mxu0 %v11210_v27  ;;  %4366 = vmatprep.subr.mxu1 %v10389_v44  ;;  %13851 = vst [vmem:[#allocation217_spill] sm:$0xff] %v11218_v7  ;;  %6676 = vrcp.f32 %v3885_v49  ;;  %v13852_v44 = vld [vmem:[#allocation11_spill] sm:$0xff]  ;;  %v13866_v49 = vld [vmem:[#allocation24_spill] sm:$0xff] }
 0xac6   :  { %4296 = vmatpush1.msra.mxu0 %v11214_v45  ;;  %4367 = vmatpush1.msra.mxu1 %v10393_v40  ;;  %v13853_v40 = vld [vmem:[#allocation10_spill] sm:$0xff] }
 0xac7   :  { %4297 = vmatprep.subr.mxu0 %v11218_v7  ;;  %4368 = vmatprep.subr.mxu1 %v10397_v6  ;;  %v13854_v6 = vld [vmem:[#allocation13_spill] sm:$0xff] }
 0xac8   :  { %4298 = vmatpush1.msra.mxu0 %v10400_v1  ;;  %4369 = vmatpush1.msra.mxu1 %v10403_v39  ;;  %v13855_v1 = vld [vmem:[#allocation12_spill] sm:$0xff]  ;;  %v13856_v39 = vld [vmem:[#allocation15_spill] sm:$0xff] }
 0xac9   :  { %4299 = vmatprep.subr.mxu0 %v10407_v53  ;;  %4370 = vmatprep.subr.mxu1 %v10410_v50  ;;  %v13857_v53 = vld [vmem:[#allocation14_spill] sm:$0xff]  ;;  %v13858_v50 = vld [vmem:[#allocation17_spill] sm:$0xff] }
 0xaca   :  { %4300 = vmatpush1.msra.mxu0 %v10413_v62  ;;  %4371 = vmatpush1.msra.mxu1 %v10416_v16  ;;  %v13859_v62 = vld [vmem:[#allocation16_spill] sm:$0xff]  ;;  %v13860_v16 = vld [vmem:[#allocation19_spill] sm:$0xff] }
 0xacb   :  { %4301 = vmatprep.subr.mxu0 %v10419_v4  ;;  %4372 = vmatprep.subr.mxu1 %v10422_v26  ;;  %v13861_v4 = vld [vmem:[#allocation18_spill] sm:$0xff]  ;;  %v13862_v26 = vld [vmem:[#allocation21_spill] sm:$0xff] }
 0xacc   :  { %4302 = vmatpush1.msra.mxu0 %v10425_v34  ;;  %4373 = vmatpush1.msra.mxu1 %v13852_v44  ;;  %v13863_v34 = vld [vmem:[#allocation20_spill] sm:$0xff]  ;;  %v13868_v44 = vld [vmem:[#allocation26_spill] sm:$0xff] }
 0xacd   :  { %4303 = vmatprep.subr.mxu0 %v13853_v40  ;;  %4374 = vmatprep.subr.mxu1 %v13854_v6  ;;  %v13869_v6 = vld [vmem:[#allocation27_spill] sm:$0xff] }
 0xace   :  { %4304 = vmatpush1.msra.mxu0 %v13855_v1  ;;  %4375 = vmatpush1.msra.mxu1 %v13856_v39  ;;  %v13870_v1 = vld [vmem:[#allocation28_spill] sm:$0xff]  ;;  %v13871_v39 = vld [vmem:[#allocation29_spill] sm:$0xff] }
 0xacf   :  { %4305 = vmatprep.subr.mxu0 %v13857_v53  ;;  %4376 = vmatprep.subr.mxu1 %v13858_v50  ;;  %v13872_v53 = vld [vmem:[#allocation30_spill] sm:$0xff] }
 0xad0   :  { %4306 = vmatpush1.msra.mxu0 %v13859_v62  ;;  %4377 = vmatpush1.msra.mxu1 %v13860_v16  ;;  %v13873_v62 = vld [vmem:[#allocation31_spill] sm:$0xff]  ;;  %v13874_v16 = vld [vmem:[#allocation32_spill] sm:$0xff] }
 0xad1   :  { %4307 = vmatprep.subr.mxu0 %v13861_v4  ;;  %4378 = vmatprep.subr.mxu1 %v13862_v26  ;;  %v6675_v40 = vpop.eup %6674  ;;  %v13875_v4 = vld [vmem:[#allocation33_spill] sm:$0xff] }
 0xad2   :  { %4308 = vmatpush1.msra.mxu0 %v13863_v34  ;;  %4379 = vmatpush1.msra.mxu1 %v13864_v37  ;;  %v6677_v50 = vpop.eup %6676  ;;  %v13876_v34 = vld [vmem:[#allocation34_spill] sm:$0xff]  ;;  %v13877_v37 = vld [vmem:[#allocation35_spill] sm:$0xff] }
 0xad3   :  { %4309 = vmatprep.subr.mxu0 %v13865_v21  ;;  %4380 = vmatprep.subr.mxu1 %v13866_v49  ;;  %v3892_v26 = vmul.f32 %v6677_v50, %v6675_v40  ;;  %v13878_v21 = vld [vmem:[#allocation36_spill] sm:$0xff]  ;;  %v13879_v49 = vld [vmem:[#allocation37_spill] sm:$0xff]  ;;  %v13884_v40 = vld [vmem:[#allocation42_spill] sm:$0xff] }
 0xad4   :  { %4310 = vmatpush1.msra.mxu0 %v13867_v23  ;;  %4381 = vmatpush1.msra.mxu1 %v13868_v44  ;;  %v13880_v23 = vld [vmem:[#allocation38_spill] sm:$0xff]  ;;  %v13881_v44 = vld [vmem:[#allocation39_spill] sm:$0xff]  ;;  %v13887_v50 = vld [vmem:[#allocation45_spill] sm:$0xff] }
 0xad5   :  { %4311 = vmatprep.subr.mxu0 %v13869_v6  ;;  %4382 = vmatprep.subr.mxu1 %v13870_v1  ;;  %v13882_v6 = vld [vmem:[#allocation40_spill] sm:$0xff]  ;;  %v13883_v1 = vld [vmem:[#allocation41_spill] sm:$0xff] }
 0xad6   :  { %4312 = vmatpush1.msra.mxu0 %v13871_v39  ;;  %4383 = vmatpush1.msra.mxu1 %v13872_v53  ;;  %v13885_v39 = vld [vmem:[#allocation43_spill] sm:$0xff]  ;;  %v13886_v53 = vld [vmem:[#allocation44_spill] sm:$0xff] }
 0xad7   :  { %4313 = vmatprep.subr.mxu0 %v13873_v62  ;;  %4384 = vmatprep.subr.mxu1 %v13874_v16  ;;  %v13888_v62 = vld [vmem:[#allocation46_spill] sm:$0xff]  ;;  %v13889_v16 = vld [vmem:[#allocation47_spill] sm:$0xff] }
 0xad8   :  { %4314 = vmatpush1.msra.mxu0 %v13875_v4  ;;  %4347 = vmatprep.mubr.f32.mxu0 %v12890_v60  ;;  %v13890_v4 = vld [vmem:[#allocation48_spill] sm:$0xff] }
 0xad9   :  { %4385 = vmatpush1.msra.mxu1 %v13876_v34  ;;  %4418 = vmatprep.mubr.f32.mxu1 %v12890_v60  ;;  %v13892_v34 = vld [vmem:[#allocation50_spill] sm:$0xff] }
 0xada   :  { %4348 = vmatmul.mubr.f32.vlgmr.msra.gmra.mxu0 %v3892_v26  ;;  %4419 = vmatmul.mubr.f32.vlgmr.msra.gmra.mxu1 %v3892_v26  ;;  %v13891_v26 = vld [vmem:[#allocation49_spill] sm:$0xff] }
 0xadb   :  { %4425 = vmatprep.subr.mxu0 %v13877_v37  ;;  %4496 = vmatprep.subr.mxu1 %v13878_v21  ;;  %v13893_v37 = vld [vmem:[#allocation51_spill] sm:$0xff]  ;;  %v13894_v21 = vld [vmem:[#allocation52_spill] sm:$0xff] }
 0xadc   :  { %4426 = vmatpush1.msra.mxu0 %v13879_v49  ;;  %4497 = vmatpush1.msra.mxu1 %v13880_v23  ;;  %v13895_v49 = vld [vmem:[#allocation53_spill] sm:$0xff]  ;;  %v13896_v23 = vld [vmem:[#allocation54_spill] sm:$0xff] }
 0xadd   :  { %4427 = vmatprep.subr.mxu0 %v13881_v44  ;;  %4498 = vmatprep.subr.mxu1 %v13882_v6  ;;  %v13897_v44 = vld [vmem:[#allocation55_spill] sm:$0xff]  ;;  %v13898_v6 = vld [vmem:[#allocation56_spill] sm:$0xff] }
 0xade   :  { %4428 = vmatpush1.msra.mxu0 %v13883_v1  ;;  %4499 = vmatpush1.msra.mxu1 %v13884_v40  ;;  %v13899_v1 = vld [vmem:[#allocation57_spill] sm:$0xff]  ;;  %v13900_v40 = vld [vmem:[#allocation58_spill] sm:$0xff] }
 0xadf   :  { %4429 = vmatprep.subr.mxu0 %v13885_v39  ;;  %4500 = vmatprep.subr.mxu1 %v13886_v53  ;;  %v13901_v39 = vld [vmem:[#allocation59_spill] sm:$0xff]  ;;  %v13902_v53 = vld [vmem:[#allocation60_spill] sm:$0xff] }
 0xae0   :  { %4430 = vmatpush1.msra.mxu0 %v13887_v50  ;;  %4501 = vmatpush1.msra.mxu1 %v13888_v62  ;;  %v13903_v50 = vld [vmem:[#allocation61_spill] sm:$0xff]  ;;  %v13904_v62 = vld [vmem:[#allocation62_spill] sm:$0xff] }
 0xae1   :  { %4431 = vmatprep.subr.mxu0 %v13889_v16  ;;  %4502 = vmatprep.subr.mxu1 %v13890_v4  ;;  %v13905_v16 = vld [vmem:[#allocation63_spill] sm:$0xff]  ;;  %v13906_v4 = vld [vmem:[#allocation64_spill] sm:$0xff] }
 0xae2   :  { %4432 = vmatpush1.msra.mxu0 %v13891_v26  ;;  %4503 = vmatpush1.msra.mxu1 %v13892_v34  ;;  %v13907_v26 = vld [vmem:[#allocation65_spill] sm:$0xff]  ;;  %v13908_v34 = vld [vmem:[#allocation66_spill] sm:$0xff] }
 0xae3   :  { %4433 = vmatprep.subr.mxu0 %v13893_v37  ;;  %4504 = vmatprep.subr.mxu1 %v13894_v21  ;;  %v13909_v37 = vld [vmem:[#allocation67_spill] sm:$0xff]  ;;  %v13910_v21 = vld [vmem:[#allocation68_spill] sm:$0xff] }
 0xae4   :  { %4434 = vmatpush1.msra.mxu0 %v13895_v49  ;;  %4505 = vmatpush1.msra.mxu1 %v13896_v23  ;;  %v13911_v49 = vld [vmem:[#allocation69_spill] sm:$0xff]  ;;  %v13912_v23 = vld [vmem:[#allocation70_spill] sm:$0xff] }
 0xae5   :  { %4435 = vmatprep.subr.mxu0 %v13897_v44  ;;  %4506 = vmatprep.subr.mxu1 %v13898_v6  ;;  %v13913_v44 = vld [vmem:[#allocation71_spill] sm:$0xff]  ;;  %v13914_v6 = vld [vmem:[#allocation72_spill] sm:$0xff] }
 0xae6   :  { %4436 = vmatpush1.msra.mxu0 %v13899_v1  ;;  %4507 = vmatpush1.msra.mxu1 %v13900_v40  ;;  %v13915_v1 = vld [vmem:[#allocation73_spill] sm:$0xff]  ;;  %v13916_v40 = vld [vmem:[#allocation74_spill] sm:$0xff] }
 0xae7   :  { %4437 = vmatprep.subr.mxu0 %v13901_v39  ;;  %4508 = vmatprep.subr.mxu1 %v13902_v53  ;;  %v13917_v39 = vld [vmem:[#allocation75_spill] sm:$0xff]  ;;  %v13918_v53 = vld [vmem:[#allocation76_spill] sm:$0xff] }
 0xae8   :  { %4438 = vmatpush1.msra.mxu0 %v13903_v50  ;;  %4509 = vmatpush1.msra.mxu1 %v13904_v62  ;;  %v13919_v50 = vld [vmem:[#allocation77_spill] sm:$0xff]  ;;  %v13920_v62 = vld [vmem:[#allocation78_spill] sm:$0xff] }
 0xae9   :  { %4439 = vmatprep.subr.mxu0 %v13905_v16  ;;  %4510 = vmatprep.subr.mxu1 %v13906_v4  ;;  %v13921_v16 = vld [vmem:[#allocation79_spill] sm:$0xff]  ;;  %v13922_v4 = vld [vmem:[#allocation80_spill] sm:$0xff] }
 0xaea   :  { %4440 = vmatpush1.msra.mxu0 %v13907_v26  ;;  %4511 = vmatpush1.msra.mxu1 %v13908_v34  ;;  %v13923_v26 = vld [vmem:[#allocation81_spill] sm:$0xff]  ;;  %v13924_v34 = vld [vmem:[#allocation82_spill] sm:$0xff] }
 0xaeb   :  { %4441 = vmatprep.subr.mxu0 %v13909_v37  ;;  %4512 = vmatprep.subr.mxu1 %v13910_v21  ;;  %v13925_v37 = vld [vmem:[#allocation83_spill] sm:$0xff]  ;;  %v13926_v21 = vld [vmem:[#allocation84_spill] sm:$0xff] }
 0xaec   :  { %4442 = vmatpush1.msra.mxu0 %v13911_v49  ;;  %4513 = vmatpush1.msra.mxu1 %v13912_v23  ;;  %v13927_v49 = vld [vmem:[#allocation85_spill] sm:$0xff]  ;;  %v13928_v23 = vld [vmem:[#allocation86_spill] sm:$0xff] }
 0xaed   :  { %4443 = vmatprep.subr.mxu0 %v13913_v44  ;;  %4514 = vmatprep.subr.mxu1 %v13914_v6  ;;  %v13929_v44 = vld [vmem:[#allocation87_spill] sm:$0xff]  ;;  %v13930_v6 = vld [vmem:[#allocation88_spill] sm:$0xff] }
 0xaee   :  { %4444 = vmatpush1.msra.mxu0 %v13915_v1  ;;  %4515 = vmatpush1.msra.mxu1 %v13916_v40  ;;  %v13931_v1 = vld [vmem:[#allocation89_spill] sm:$0xff]  ;;  %v13932_v40 = vld [vmem:[#allocation90_spill] sm:$0xff] }
 0xaef   :  { %4445 = vmatprep.subr.mxu0 %v13917_v39  ;;  %4516 = vmatprep.subr.mxu1 %v13918_v53  ;;  %v13933_v39 = vld [vmem:[#allocation91_spill] sm:$0xff]  ;;  %v13934_v53 = vld [vmem:[#allocation92_spill] sm:$0xff] }
 0xaf0   :  { %4446 = vmatpush1.msra.mxu0 %v13919_v50  ;;  %4517 = vmatpush1.msra.mxu1 %v13920_v62  ;;  %v13935_v50 = vld [vmem:[#allocation93_spill] sm:$0xff]  ;;  %v13936_v62 = vld [vmem:[#allocation94_spill] sm:$0xff] }
 0xaf1   :  { %4447 = vmatprep.subr.mxu0 %v13921_v16  ;;  %4518 = vmatprep.subr.mxu1 %v13922_v4  ;;  %v13937_v16 = vld [vmem:[#allocation95_spill] sm:$0xff]  ;;  %v13938_v4 = vld [vmem:[#allocation96_spill] sm:$0xff] }
 0xaf2   :  { %4448 = vmatpush1.msra.mxu0 %v13923_v26  ;;  %4519 = vmatpush1.msra.mxu1 %v13924_v34  ;;  %v13939_v26 = vld [vmem:[#allocation97_spill] sm:$0xff]  ;;  %v13940_v34 = vld [vmem:[#allocation98_spill] sm:$0xff] }
 0xaf3   :  { %4449 = vmatprep.subr.mxu0 %v13925_v37  ;;  %4520 = vmatprep.subr.mxu1 %v13926_v21  ;;  %v13941_v37 = vld [vmem:[#allocation99_spill] sm:$0xff]  ;;  %v4037_v21 = vpop.f32.mrf.mxu0 }
 0xaf4   :  { %4450 = vmatpush1.msra.mxu0 %v13927_v49  ;;  %4521 = vmatpush1.msra.mxu1 %v13928_v23  ;;  %v4108_v49 = vpop.f32.mrf.mxu1 }
 0xaf5   :  { %4451 = vmatprep.subr.mxu0 %v13929_v44  ;;  %4522 = vmatprep.subr.mxu1 %v13930_v6  ;;  %v4039_v23 = vpop.f32.mrf.mxu0 }
 0xaf6   :  { %4452 = vmatpush1.msra.mxu0 %v13931_v1  ;;  %4523 = vmatpush1.msra.mxu1 %v13932_v40  ;;  %v4110_v6 = vpop.f32.mrf.mxu1 }
 0xaf7   :  { %4453 = vmatprep.subr.mxu0 %v13933_v39  ;;  %4524 = vmatprep.subr.mxu1 %v13934_v53 }
 0xaf8   :  { %4454 = vmatpush1.msra.mxu0 %v13935_v50  ;;  %4525 = vmatpush1.msra.mxu1 %v13936_v62 }
 0xaf9   :  { %4455 = vmatprep.subr.mxu0 %v13937_v16  ;;  %4526 = vmatprep.subr.mxu1 %v13938_v4 }
 0xafa   :  { %4456 = vmatpush1.msra.mxu0 %v13939_v26  ;;  %4527 = vmatpush1.msra.mxu1 %v13940_v34 }
 0xafb   :  { %4489 = vmatprep.mubr.f32.mxu0 %v12890_v60  ;;  %4560 = vmatprep.mubr.f32.mxu1 %v12890_v60 }
 0xafc   :  { %6435 = vmatprep.subr.mxu0 %v12890_v60  ;;  %4673 = vmatprep.subr.mxu1 %v13941_v37 }
 0xb79   :  { %v4179_v44 = vpop.f32.mrf.mxu0  ;;  %v4250_v53 = vpop.f32.mrf.mxu1 }
 0xb7a   :  { %v4180_v1 = vadd.f32 %v4179_v44, %v4037_v21  ;;  %v4251_v7 = vadd.f32 %v4250_v53, %v4108_v49  ;;  %v13957_v53 = vld [vmem:[#allocation115_spill] sm:$0xff] }
 0xb7b   :  { %v4181_v40 = vpop.f32.mrf.mxu0  ;;  %v4252_v26 = vpop.f32.mrf.mxu1 }
 0xb7c   :  { %v4255_v39 = vadd.f32 %v4180_v1, %v8282_v54  ;;  %v4182_v50 = vadd.f32 %v4181_v40, %v4039_v23  ;;  %v4253_v34 = vadd.f32 %v4252_v26, %v4110_v6  ;;  %v4257_v21 = vadd.f32 %v4251_v7, %v8299_v47  ;;  %v13959_v26 = vld [vmem:[#allocation117_spill] sm:$0xff] }
 0xb7e   :  { %v6063_v62 = vmul.f32 -1.442695, %v4255_v39  ;;  %v4256_v16 = vadd.f32 %v4182_v50, %v8286_v51  ;;  %v4258_v37 = vadd.f32 %v4253_v34, %v13101_v13  ;;  %v13960_v34 = vld [vmem:[#allocation118_spill] sm:$0xff] }
 0xb80   :  { %6678 = vpow2.f32 %v6063_v62  ;;  %v6064_v4 = vmul.f32 -1.442695, %v4256_v16  ;;  %v6065_v45 = vmul.f32 -1.442695, %v4258_v37  ;;  %v13961_v37 = vld [vmem:[#allocation119_spill] sm:$0xff] }
 0xb82   :  { %6680 = vpow2.f32 %v6064_v4  ;;  %v13958_v4 = vld [vmem:[#allocation116_spill] sm:$0xff] }
 0xb83   :  { %6682 = vpow2.f32 %v6065_v45 }
 0xb8d   :  { %v6679_v27 = vpop.eup %6678 }
 0xb8e   :  { %v4262_v44 = vadd.f32 1.0, %v6679_v27 }
 0xb8f   :  { %v6681_v43 = vpop.eup %6680 }
 0xb90   :  { %6684 = vrcp.f32 %v4262_v44  ;;  %v4268_v23 = vadd.f32 1.0, %v6681_v43  ;;  %v6683_v1 = vpop.eup %6682  ;;  %v13956_v43 = vld [vmem:[#allocation114_spill] sm:$0xff]  ;;  %v13963_v44 = vld [vmem:[#allocation121_spill] sm:$0xff] }
 0xb91   :  { %6686 = vtanh.f32 %v4257_v21  ;;  %v4275_v62 = vadd.f32 1.0, %v6683_v1  ;;  %v13962_v21 = vld [vmem:[#allocation120_spill] sm:$0xff]  ;;  %v13965_v1 = vld [vmem:[#allocation123_spill] sm:$0xff] }
 0xb92   :  { %6688 = vrcp.f32 %v4268_v23  ;;  %v13964_v23 = vld [vmem:[#allocation122_spill] sm:$0xff] }
 0xb93   :  { %6690 = vrcp.f32 %v4275_v62  ;;  %v13969_v62 = vld [vmem:[#allocation127_spill] sm:$0xff] }
 0xb9d   :  { %v6685_v40 = vpop.eup %6684 }
 0xb9e   :  { %v6687_v39 = vpop.eup %6686 }
 0xb9f   :  { %v6689_v50 = vpop.eup %6688  ;;  %v4279_v6 = vmul.f32 %v6687_v39, %v6685_v40  ;;  %v13966_v40 = vld [vmem:[#allocation124_spill] sm:$0xff]  ;;  %v13967_v39 = vld [vmem:[#allocation125_spill] sm:$0xff] }
 0xba0   :  { %v4278_v16 = vmul.f32 %v6689_v50, %v10708_v29  ;;  %v6691_v7 = vpop.eup %6690  ;;  %v13942_v29 = vld [vmem:[#allocation100_spill] sm:$0xff]  ;;  %v13968_v50 = vld [vmem:[#allocation126_spill] sm:$0xff] }
 0xba2   :  { %v11332_v49 = vadd.f32 %v4279_v6, %v4278_v16  ;;  %v4599_v6 = vpop.permute.xlu0 %4598  ;;  %v13970_v16 = vld [vmem:[#allocation128_spill] sm:$0xff] }
 0xba4   :  { %6692 = vtanh.f32 %v11332_v49 }
 0xbb1   :  { %v6693_v27 = vpop.eup %6692 }
 0xbb2   :  { %v11335_v45 = vmul.f32 %v6693_v27, %v6691_v7  ;;  %v13971_v7 = vld [vmem:[#allocation129_spill] sm:$0xff]  ;;  %v13972_v27 = vld [vmem:[#allocation130_spill] sm:$0xff] }
 0xbb4   :  { %4490 = vmatmul.mubr.f32.vlgmr.msra.gmra.mxu0 %v11335_v45  ;;  %4561 = vmatmul.mubr.f32.vlgmr.msra.gmra.mxu1 %v11335_v45 }
 0xbb5   :  { %6436 = vmatpush3.msra.mxu0 %v10715_v15  ;;  %4674 = vmatpush1.msra.mxu1 %v10718_v46  ;;  %v13943_v15 = vld [vmem:[#allocation101_spill] sm:$0xff]  ;;  %v13944_v46 = vld [vmem:[#allocation102_spill] sm:$0xff] }
 0xbb6   :  { %6437 = vmatprep.subr.mxu0 %v12890_v60  ;;  %4675 = vmatprep.subr.mxu1 %v10722_v48  ;;  %v13945_v48 = vld [vmem:[#allocation103_spill] sm:$0xff] }
 0xbb7   :  { %6438 = vmatpush3.msra.mxu0 %v10725_v10  ;;  %4676 = vmatpush1.msra.mxu1 %v10728_v42  ;;  %v13946_v10 = vld [vmem:[#allocation104_spill] sm:$0xff]  ;;  %v13947_v42 = vld [vmem:[#allocation105_spill] sm:$0xff] }
 0xbb8   :  { %6439 = vmatprep.subr.mxu0 %v12890_v60  ;;  %4677 = vmatprep.subr.mxu1 %v10732_v33  ;;  %v13948_v33 = vld [vmem:[#allocation106_spill] sm:$0xff] }
 0xbb9   :  { %6440 = vmatpush3.msra.mxu0 %v10735_v56  ;;  %4678 = vmatpush1.msra.mxu1 %v10738_v22  ;;  %v13949_v56 = vld [vmem:[#allocation107_spill] sm:$0xff]  ;;  %v13950_v22 = vld [vmem:[#allocation108_spill] sm:$0xff] }
 0xbba   :  { %6441 = vmatprep.subr.mxu0 %v12890_v60  ;;  %4679 = vmatprep.subr.mxu1 %v10742_v61  ;;  %v13951_v61 = vld [vmem:[#allocation109_spill] sm:$0xff] }
 0xbbb   :  { %6442 = vmatpush3.msra.mxu0 %v10745_v8  ;;  %4680 = vmatpush1.msra.mxu1 %v10748_v5  ;;  %v13952_v8 = vld [vmem:[#allocation110_spill] sm:$0xff]  ;;  %v13953_v5 = vld [vmem:[#allocation111_spill] sm:$0xff] }
 0xbbc   :  { %6443 = vmatprep.subr.mxu0 %v12890_v60  ;;  %4681 = vmatprep.subr.mxu1 %v10752_v11  ;;  %v13954_v11 = vld [vmem:[#allocation112_spill] sm:$0xff] }
 0xbbd   :  { %6444 = vmatpush3.msra.mxu0 %v10755_v3  ;;  %4682 = vmatpush1.msra.mxu1 %v13942_v29  ;;  %v13955_v3 = vld [vmem:[#allocation113_spill] sm:$0xff] }
 0xbbe   :  { %6445 = vmatprep.subr.mxu0 %v12890_v60  ;;  %4683 = vmatprep.subr.mxu1 %v13943_v15  ;;  %v13973_v29 = vld [vmem:[#allocation9_spill] sm:$0xff]  ;;  %v13974_v15 = vld [vmem:[#allocation131_spill] sm:$0xff] }
 0xbbf   :  { %6446 = vmatpush3.msra.mxu0 %v13944_v46  ;;  %4684 = vmatpush1.msra.mxu1 %v13945_v48  ;;  %vm4600_vm7 = vcmp.eq.s32.totalorder %v13973_v29, %v4599_v6  ;;  %v13977_v46 = vld [vmem:[#allocation133_spill] sm:$0xff]  ;;  %v13978_v48 = vld [vmem:[#allocation134_spill] sm:$0xff]  ;;  %v14003_v6 = vld [vmem:[#allocation159_spill] sm:$0xff] }
 0xbc0   :  { %6447 = vmatprep.subr.mxu0 %v12890_v60  ;;  %4685 = vmatprep.subr.mxu1 %v13946_v10  ;;  %v13979_v10 = vld [vmem:[#allocation135_spill] sm:$0xff] }
 0xbc1   :  { %6448 = vmatpush3.msra.mxu0 %v13947_v42  ;;  %4686 = vmatpush1.msra.mxu1 %v13948_v33  ;;  %v13980_v42 = vld [vmem:[#allocation136_spill] sm:$0xff]  ;;  %v13981_v33 = vld [vmem:[#allocation137_spill] sm:$0xff] }
 0xbc2   :  { %6449 = vmatprep.subr.mxu0 %v12890_v60  ;;  %4687 = vmatprep.subr.mxu1 %v13949_v56  ;;  %v13982_v56 = vld [vmem:[#allocation138_spill] sm:$0xff] }
 0xbc3   :  { %6450 = vmatpush3.msra.mxu0 %v13950_v22  ;;  %4688 = vmatpush1.msra.mxu1 %v13951_v61  ;;  %v13983_v22 = vld [vmem:[#allocation139_spill] sm:$0xff]  ;;  %v13984_v61 = vld [vmem:[#allocation140_spill] sm:$0xff] }
 0xbc4   :  { %6451 = vmatprep.subr.mxu0 %v12890_v60  ;;  %4689 = vmatprep.subr.mxu1 %v13952_v8  ;;  %v13985_v8 = vld [vmem:[#allocation141_spill] sm:$0xff] }
 0xbc5   :  { %6452 = vmatpush3.msra.mxu0 %v13953_v5  ;;  %4690 = vmatpush1.msra.mxu1 %v13954_v11  ;;  %v13986_v5 = vld [vmem:[#allocation142_spill] sm:$0xff]  ;;  %v13987_v11 = vld [vmem:[#allocation143_spill] sm:$0xff] }
 0xbc6   :  { %6453 = vmatprep.subr.mxu0 %v12890_v60  ;;  %4691 = vmatprep.subr.mxu1 %v13955_v3  ;;  %v13988_v3 = vld [vmem:[#allocation144_spill] sm:$0xff] }
 0xbc7   :  { %6454 = vmatpush3.msra.mxu0 %v13956_v43  ;;  %4692 = vmatpush1.msra.mxu1 %v13957_v53  ;;  %v13989_v43 = vld [vmem:[#allocation145_spill] sm:$0xff]  ;;  %v13990_v53 = vld [vmem:[#allocation146_spill] sm:$0xff] }
 0xbc8   :  { %6455 = vmatprep.subr.mxu0 %v12890_v60  ;;  %4693 = vmatprep.subr.mxu1 %v13958_v4  ;;  %v13991_v4 = vld [vmem:[#allocation147_spill] sm:$0xff] }
 0xbc9   :  { %6456 = vmatpush3.msra.mxu0 %v13959_v26  ;;  %4694 = vmatpush1.msra.mxu1 %v13960_v34  ;;  %v13992_v26 = vld [vmem:[#allocation148_spill] sm:$0xff]  ;;  %v13993_v34 = vld [vmem:[#allocation149_spill] sm:$0xff] }
 0xbca   :  { %6457 = vmatprep.subr.mxu0 %v12890_v60  ;;  %4695 = vmatprep.subr.mxu1 %v13961_v37  ;;  %v13994_v37 = vld [vmem:[#allocation150_spill] sm:$0xff] }
 0xbcb   :  { %6458 = vmatpush3.msra.mxu0 %v13962_v21  ;;  %4696 = vmatpush1.msra.mxu1 %v13963_v44  ;;  %v13995_v21 = vld [vmem:[#allocation151_spill] sm:$0xff]  ;;  %v13996_v44 = vld [vmem:[#allocation152_spill] sm:$0xff] }
 0xbcc   :  { %6459 = vmatprep.subr.mxu0 %v12890_v60  ;;  %4697 = vmatprep.subr.mxu1 %v13964_v23  ;;  %v13997_v23 = vld [vmem:[#allocation153_spill] sm:$0xff] }
 0xbcd   :  { %6460 = vmatpush3.msra.mxu0 %v13965_v1  ;;  %4698 = vmatpush1.msra.mxu1 %v13966_v40  ;;  %v13998_v1 = vld [vmem:[#allocation154_spill] sm:$0xff]  ;;  %v13999_v40 = vld [vmem:[#allocation155_spill] sm:$0xff] }
 0xbce   :  { %6461 = vmatprep.subr.mxu0 %v12890_v60  ;;  %4699 = vmatprep.subr.mxu1 %v13967_v39  ;;  %v14000_v39 = vld [vmem:[#allocation156_spill] sm:$0xff] }
 0xbcf   :  { %6462 = vmatpush3.msra.mxu0 %v13968_v50  ;;  %4700 = vmatpush1.msra.mxu1 %v13969_v62  ;;  %v14001_v50 = vld [vmem:[#allocation157_spill] sm:$0xff]  ;;  %v14002_v62 = vld [vmem:[#allocation158_spill] sm:$0xff] }
 0xbd0   :  { %6463 = vmatprep.subr.mxu0 %v12890_v60  ;;  %4701 = vmatprep.subr.mxu1 %v10852_v30  ;;  %v13975_v30 = vmov 1.0  }
 0xbd1   :  { %6464 = vmatpush3.msra.mxu0 %v13970_v16  ;;  %4702 = vmatpush1.msra.mxu1 %v10858_v31  ;;  %v13976_v31 = vld [vmem:[#allocation132_spill] sm:$0xff] }
 0xbd2   :  { %6465 = vmatprep.subr.mxu0 %v12890_v60  ;;  %4703 = vmatprep.subr.mxu1 %v13971_v7  ;;  %v14004_v16 = vld [vmem:[#allocation160_spill] sm:$0xff]  ;;  %v14005_v7 = vld [vmem:[#allocation161_spill] sm:$0xff] }
 0xbd3   :  { %6466 = vmatpush3.msra.mxu0 %v13972_v27  ;;  %6467 = vmatprep.mubr.msk.f32.mxu0 %vm7815_vm0, %v12890_v60  ;;  %v14006_v27 = vld [vmem:[#allocation162_spill] sm:$0xff] }
 0xbd4   :  { %4704 = vmatpush1.msra.mxu1 %v13974_v15  ;;  %4737 = vmatprep.mubr.f32.mxu1 %v12890_v60  ;;  %v14007_v15 = vld [vmem:[#allocation163_spill] sm:$0xff] }
 0xbd5   :  { %6468 = vmatmul.mubr.msk.f32.vlgmr.msra.gmra.mxu0 %vm4600_vm7, %v13975_v30  ;;  %4738 = vmatmul.mubr.f32.vlgmr.msra.gmra.mxu1 %v11335_v45 }
 0xbd6   :  { %4744 = vmatprep.subr.mxu0 %v13976_v31  ;;  %4808 = vmatprep.mubr.f32.mxu0 %v12890_v60  ;;  %v14008_v31 = vld [vmem:[#allocation164_spill] sm:$0xff] }
 0xbd7   :  { %4745 = vmatpush1.msra.mxu0 %v13977_v46  ;;  %4815 = vmatprep.subr.mxu1 %v13978_v48  ;;  %v14009_v46 = vld [vmem:[#allocation165_spill] sm:$0xff]  ;;  %v14010_v48 = vld [vmem:[#allocation166_spill] sm:$0xff] }
 0xbd8   :  { %4746 = vmatprep.subr.mxu0 %v13979_v10  ;;  %4816 = vmatpush1.msra.mxu1 %v13980_v42  ;;  %v14011_v10 = vld [vmem:[#allocation167_spill] sm:$0xff]  ;;  %v14012_v42 = vld [vmem:[#allocation168_spill] sm:$0xff] }
 0xbd9   :  { %4747 = vmatpush1.msra.mxu0 %v13981_v33  ;;  %4817 = vmatprep.subr.mxu1 %v13982_v56  ;;  %v14013_v33 = vld [vmem:[#allocation169_spill] sm:$0xff]  ;;  %v14014_v56 = vld [vmem:[#allocation170_spill] sm:$0xff] }
 0xbda   :  { %4748 = vmatprep.subr.mxu0 %v13983_v22  ;;  %4818 = vmatpush1.msra.mxu1 %v13984_v61  ;;  %v14015_v22 = vld [vmem:[#allocation171_spill] sm:$0xff]  ;;  %v14016_v61 = vld [vmem:[#allocation172_spill] sm:$0xff] }
 0xbdb   :  { %4749 = vmatpush1.msra.mxu0 %v13985_v8  ;;  %4819 = vmatprep.subr.mxu1 %v13986_v5  ;;  %v14017_v8 = vld [vmem:[#allocation173_spill] sm:$0xff]  ;;  %v14018_v5 = vld [vmem:[#allocation174_spill] sm:$0xff] }
 0xbdc   :  { %4750 = vmatprep.subr.mxu0 %v13987_v11  ;;  %4820 = vmatpush1.msra.mxu1 %v13988_v3  ;;  %v14019_v11 = vld [vmem:[#allocation175_spill] sm:$0xff]  ;;  %v14020_v3 = vld [vmem:[#allocation176_spill] sm:$0xff] }
 0xbdd   :  { %4751 = vmatpush1.msra.mxu0 %v13989_v43  ;;  %4821 = vmatprep.subr.mxu1 %v13990_v53  ;;  %v14021_v43 = vld [vmem:[#allocation177_spill] sm:$0xff]  ;;  %v14022_v53 = vld [vmem:[#allocation178_spill] sm:$0xff] }
 0xbde   :  { %4752 = vmatprep.subr.mxu0 %v13991_v4  ;;  %4822 = vmatpush1.msra.mxu1 %v13992_v26  ;;  %v14023_v4 = vld [vmem:[#allocation179_spill] sm:$0xff]  ;;  %v14024_v26 = vld [vmem:[#allocation180_spill] sm:$0xff] }
 0xbdf   :  { %4753 = vmatpush1.msra.mxu0 %v13993_v34  ;;  %4823 = vmatprep.subr.mxu1 %v13994_v37  ;;  %v14025_v34 = vld [vmem:[#allocation181_spill] sm:$0xff]  ;;  %v14026_v37 = vld [vmem:[#allocation182_spill] sm:$0xff] }
 0xbe0   :  { %4754 = vmatprep.subr.mxu0 %v13995_v21  ;;  %4824 = vmatpush1.msra.mxu1 %v13996_v44  ;;  %v14027_v21 = vld [vmem:[#allocation183_spill] sm:$0xff]  ;;  %v14028_v44 = vld [vmem:[#allocation184_spill] sm:$0xff] }
 0xbe1   :  { %4755 = vmatpush1.msra.mxu0 %v13997_v23  ;;  %4825 = vmatprep.subr.mxu1 %v13998_v1  ;;  %v14029_v23 = vld [vmem:[#allocation185_spill] sm:$0xff]  ;;  %v14030_v1 = vld [vmem:[#allocation186_spill] sm:$0xff] }
 0xbe2   :  { %4756 = vmatprep.subr.mxu0 %v13999_v40  ;;  %4826 = vmatpush1.msra.mxu1 %v14000_v39  ;;  %v14031_v40 = vld [vmem:[#allocation187_spill] sm:$0xff]  ;;  %v14032_v39 = vld [vmem:[#allocation188_spill] sm:$0xff] }
 0xbe3   :  { %4757 = vmatpush1.msra.mxu0 %v14001_v50  ;;  %4827 = vmatprep.subr.mxu1 %v14002_v62  ;;  %v14033_v50 = vld [vmem:[#allocation189_spill] sm:$0xff]  ;;  %v14034_v62 = vld [vmem:[#allocation190_spill] sm:$0xff] }
 0xbe4   :  { %4758 = vmatprep.subr.mxu0 %v14003_v6  ;;  %4828 = vmatpush1.msra.mxu1 %v14004_v16  ;;  %v14035_v6 = vld [vmem:[#allocation191_spill] sm:$0xff]  ;;  %v14036_v16 = vld [vmem:[#allocation192_spill] sm:$0xff] }
 0xbe5   :  { %4759 = vmatpush1.msra.mxu0 %v14005_v7  ;;  %4829 = vmatprep.subr.mxu1 %v14006_v27  ;;  %v14037_v7 = vld [vmem:[#allocation193_spill] sm:$0xff]  ;;  %v14038_v27 = vld [vmem:[#allocation194_spill] sm:$0xff] }
 0xbe6   :  { %4760 = vmatprep.subr.mxu0 %v14007_v15  ;;  %4830 = vmatpush1.msra.mxu1 %v14008_v31  ;;  %v11474_v15 = vld [vmem:[#allocation4] sm:$0xff]  ;;  %v14039_v31 = vld [vmem:[#allocation195_spill] sm:$0xff] }
 0xbe7   :  { %4761 = vmatpush1.msra.mxu0 %v14009_v46  ;;  %4831 = vmatprep.subr.mxu1 %v14010_v48  ;;  %v14042_v46 = vld [vmem:[#allocation198_spill] sm:$0xff]  ;;  %v14043_v48 = vld [vmem:[#allocation199_spill] sm:$0xff] }
 0xbe8   :  { %4762 = vmatprep.subr.mxu0 %v14011_v10  ;;  %4832 = vmatpush1.msra.mxu1 %v14012_v42  ;;  %v14044_v10 = vld [vmem:[#allocation200_spill] sm:$0xff]  ;;  %v14045_v42 = vld [vmem:[#allocation201_spill] sm:$0xff] }
 0xbe9   :  { %4763 = vmatpush1.msra.mxu0 %v14013_v33  ;;  %4833 = vmatprep.subr.mxu1 %v14014_v56  ;;  %v14047_v33 = vld [vmem:[#allocation203_spill] sm:$0xff]  ;;  %v11496_v56 = vld [vmem:[#allocation4 + $0xf8] sm:$0xff] }
 0xbea   :  { %4764 = vmatprep.subr.mxu0 %v14015_v22  ;;  %4834 = vmatpush1.msra.mxu1 %v14016_v61  ;;  %v11499_v22 = vld [vmem:[#allocation4 + $0xf0] sm:$0xff]  ;;  %v11502_v61 = vld [vmem:[#allocation4 + $0xd8] sm:$0xff] }
 0xbeb   :  { %4765 = vmatpush1.msra.mxu0 %v14017_v8  ;;  %4835 = vmatprep.subr.mxu1 %v14018_v5  ;;  %v11517_v8 = vld [vmem:[#allocation4 + $0x90] sm:$0xff]  ;;  %v11520_v5 = vld [vmem:[#allocation4 + $0x78] sm:$0xff] }
 0xbec   :  { %4766 = vmatprep.subr.mxu0 %v14019_v11  ;;  %4836 = vmatpush1.msra.mxu1 %v14020_v3  ;;  %v11523_v11 = vld [vmem:[#allocation4 + $0x70] sm:$0xff]  ;;  %v11526_v3 = vld [vmem:[#allocation4 + $0x58] sm:$0xff] }
 0xbed   :  { %4767 = vmatpush1.msra.mxu0 %v14021_v43  ;;  %4837 = vmatprep.subr.mxu1 %v14022_v53  ;;  %v11529_v43 = vld [vmem:[#allocation4 + $0x50] sm:$0xff]  ;;  %v11532_v53 = vld [vmem:[#allocation4 + $0x38] sm:$0xff] }
 0xbee   :  { %4768 = vmatprep.subr.mxu0 %v14023_v4  ;;  %4838 = vmatpush1.msra.mxu1 %v14024_v26  ;;  %v11535_v4 = vld [vmem:[#allocation4 + $0x30] sm:$0xff]  ;;  %v11538_v26 = vld [vmem:[#allocation4 + $0x18] sm:$0xff] }
 0xbef   :  { %4769 = vmatpush1.msra.mxu0 %v14025_v34  ;;  %4839 = vmatprep.subr.mxu1 %v14026_v37  ;;  %v11541_v34 = vld [vmem:[#allocation4 + $0x10] sm:$0xff]  ;;  %v11544_v37 = vld [vmem:[#allocation6 + $0x3f8] sm:$0xff] }
 0xbf0   :  { %4770 = vmatprep.subr.mxu0 %v14027_v21  ;;  %4840 = vmatpush1.msra.mxu1 %v14028_v44  ;;  %v4349_v21 = vpop.f32.mrf.mxu0 }
 0xbf1   :  { %4771 = vmatpush1.msra.mxu0 %v14029_v23  ;;  %4841 = vmatprep.subr.mxu1 %v14030_v1 }
 0xbf2   :  { %4772 = vmatprep.subr.mxu0 %v14031_v40  ;;  %4842 = vmatpush1.msra.mxu1 %v14032_v39  ;;  %v4351_v44 = vpop.f32.mrf.mxu0 }
 0xbf3   :  { %4773 = vmatpush1.msra.mxu0 %v14033_v50  ;;  %4843 = vmatprep.subr.mxu1 %v14034_v62 }
 0xbf4   :  { %4774 = vmatprep.subr.mxu0 %v11055_v38  ;;  %4844 = vmatpush1.msra.mxu1 %v14035_v6  ;;  %v14040_v38 = vld [vmem:[#allocation196_spill] sm:$0xff] }
 0xbf5   :  { %4775 = vmatpush1.msra.mxu0 %v14036_v16  ;;  %4845 = vmatprep.subr.mxu1 %v11064_v2  ;;  %v11482_v2 = vld [vmem:[#allocation6 + $0x3e8] sm:$0xff]  ;;  %v4420_v16 = vpop.f32.mrf.mxu1 }
 0xbf6   :  { %4809 = vmatmul.mubr.f32.vlgmr.msra.gmra.mxu0 %v11335_v45  ;;  %4886 = vmatprep.subr.mxu0 %v14037_v7  ;;  %v14041_v45 = vld [vmem:[#allocation197_spill] sm:$0xff] }
 0xbf7   :  { %4887 = vmatpush1.msra.mxu0 %v14038_v27  ;;  %4846 = vmatpush1.msra.mxu1 %v11474_v15  ;;  %v4422_v27 = vpop.f32.mrf.mxu1 }
 0xbf8   :  { %4888 = vmatprep.subr.mxu0 %v14039_v31  ;;  %4879 = vmatprep.mubr.f32.mxu1 %v12890_v60 }
 0xbf9   :  { %4889 = vmatpush1.msra.mxu0 %v14040_v38  ;;  %4950 = vmatprep.mubr.f32.mxu0 %v12890_v60 }
 0xbfa   :  { %4890 = vmatprep.subr.mxu0 %v11083_v63  ;;  %4985 = vmatprep.subr.mxu1 %v11482_v2  ;;  %v14046_v63 = vld [vmem:[#allocation202_spill] sm:$0xff] }
 0xbfb   :  { %4891 = vmatpush1.msra.mxu0 %v14041_v45 }
 0xbfc   :  { %4892 = vmatprep.subr.mxu0 %v14042_v46 }
 0xbfd   :  { %4893 = vmatpush1.msra.mxu0 %v14043_v48 }
 0xbfe   :  { %4894 = vmatprep.subr.mxu0 %v14044_v10 }
 0xbff   :  { %4895 = vmatpush1.msra.mxu0 %v14045_v42 }
 0xc00   :  { %4896 = vmatprep.subr.mxu0 %v11102_v32  ;;  %v11514_v32 = vld [vmem:[#allocation4 + $0x98] sm:$0xff] }
 0xc01   :  { %4897 = vmatpush1.msra.mxu0 %v11105_v28  ;;  %v11505_v28 = vld [vmem:[#allocation4 + $0xd0] sm:$0xff] }
 0xc02   :  { %4898 = vmatprep.subr.mxu0 %v11108_v52  ;;  %v11511_v52 = vld [vmem:[#allocation4 + $0xb0] sm:$0xff] }
 0xc03   :  { %4899 = vmatpush1.msra.mxu0 %v11111_v0  ;;  %v11508_v0 = vld [vmem:[#allocation4 + $0xb8] sm:$0xff] }
 0xc04   :  { %4900 = vmatprep.subr.mxu0 %v14046_v63 }
 0xc05   :  { %4901 = vmatpush1.msra.mxu0 %v14047_v33 }
 0xc06   :  { %4902 = vmatprep.subr.mxu0 %v11496_v56 }
 0xc07   :  { %4903 = vmatpush1.msra.mxu0 %v11499_v22 }
 0xc08   :  { %4904 = vmatprep.subr.mxu0 %v11502_v61 }
 0xc09   :  { %4905 = vmatpush1.msra.mxu0 %v11505_v28 }
 0xc0a   :  { %4906 = vmatprep.subr.mxu0 %v11508_v0 }
 0xc0b   :  { %4907 = vmatpush1.msra.mxu0 %v11511_v52 }
 0xc0c   :  { %4908 = vmatprep.subr.mxu0 %v11514_v32 }
 0xc0d   :  { %4909 = vmatpush1.msra.mxu0 %v11517_v8 }
 0xc0e   :  { %4910 = vmatprep.subr.mxu0 %v11520_v5 }
 0xc0f   :  { %4911 = vmatpush1.msra.mxu0 %v11523_v11 }
 0xc10   :  { %4912 = vmatprep.subr.mxu0 %v11526_v3 }
 0xc11   :  { %4913 = vmatpush1.msra.mxu0 %v11529_v43 }
 0xc12   :  { %4914 = vmatprep.subr.mxu0 %v11532_v53 }
 0xc13   :  { %4915 = vmatpush1.msra.mxu0 %v11535_v4 }
 0xc14   :  { %4916 = vmatprep.subr.mxu0 %v11538_v26 }
 0xc15   :  { %4917 = vmatpush1.msra.mxu0 %v11541_v34 }
 0xc16   :  { %5056 = vmatprep.subr.mxu0 %v11544_v37 }
 0xc74   :  { %v4491_v23 = vpop.f32.mrf.mxu0  ;;  %v4562_v31 = vpop.f32.mrf.mxu1 }
 0xc75   :  { %v4492_v1 = vadd.f32 %v4491_v23, %v4349_v21  ;;  %v4563_v48 = vadd.f32 %v4562_v31, %v4420_v16  ;;  %v14056_v16 = vld [vmem:[#allocation212_spill] sm:$0xff]  ;;  %v14059_v31 = vld [vmem:[#allocation215_spill] sm:$0xff] }
 0xc76   :  { %v4493_v40 = vpop.f32.mrf.mxu0  ;;  %v4564_v38 = vpop.f32.mrf.mxu1 }
 0xc77   :  { %v4567_v39 = vadd.f32 %v4492_v1, %v8748_v19  ;;  %v4494_v50 = vadd.f32 %v4493_v40, %v4351_v44  ;;  %v4565_v45 = vadd.f32 %v4564_v38, %v4422_v27  ;;  %v4569_v21 = vadd.f32 %v4563_v48, %v8762_v17  ;;  %v11577_v38 = vld [vmem:[#allocation6 + $0x338] sm:$0xff] }
 0xc78   :  { %v11585_v48 = vld [vmem:[#allocation6 + $0x318] sm:$0xff] }
 0xc79   :  { %v6066_v62 = vmul.f32 -1.442695, %v4567_v39  ;;  %v4568_v6 = vadd.f32 %v4494_v50, %v8752_v25  ;;  %v4570_v33 = vadd.f32 %v4565_v45, %v8758_v20  ;;  %v14048_v39 = vld [vmem:[#allocation204_spill] sm:$0xff]  ;;  %v14050_v50 = vld [vmem:[#allocation206_spill] sm:$0xff] }
 0xc7a   :  { %v14060_v45 = vld [vmem:[#allocation216_spill] sm:$0xff] }
 0xc7b   :  { %6694 = vpow2.f32 %v6066_v62  ;;  %v6067_v7 = vmul.f32 -1.442695, %v4568_v6  ;;  %v6068_v44 = vmul.f32 -1.442695, %v4570_v33  ;;  %v14053_v62 = vld [vmem:[#allocation209_spill] sm:$0xff]  ;;  %v11598_v33 = vld [vmem:[#allocation6 + $0x2f8] sm:$0xff] }
 0xc7d   :  { %6696 = vpow2.f32 %v6067_v7  ;;  %v14058_v7 = vld [vmem:[#allocation214_spill] sm:$0xff] }
 0xc88   :  { %v6695_v46 = vpop.eup %6694 }
 0xc89   :  { %v4574_v42 = vadd.f32 1.0, %v6695_v46  ;;  %v11581_v46 = vld [vmem:[#allocation6 + $0x330] sm:$0xff] }
 0xc8a   :  { %v6697_v10 = vpop.eup %6696 }
 0xc8b   :  { %v4580_v63 = vadd.f32 1.0, %v6697_v10  ;;  %v11588_v10 = vld [vmem:[#allocation6 + $0x300] sm:$0xff] }
 0xc8d   :  { %6698 = vrcp.f32 %v4580_v63  ;;  %v11595_v63 = vld [vmem:[#allocation6 + $0x2e8] sm:$0xff] }
 0xc8e   :  { %6700 = vrcp.f32 %v4574_v42  ;;  %v11591_v42 = vld [vmem:[#allocation6 + $0x310] sm:$0xff] }
 0xc8f   :  { %6702 = vtanh.f32 %v4569_v21  ;;  %v11601_v21 = vld [vmem:[#allocation6 + $0x2e0] sm:$0xff] }
 0xc90   :  { %6704 = vpow2.f32 %v6068_v44  ;;  %v11604_v44 = vld [vmem:[#allocation6 + $0x2f0] sm:$0xff] }
 0xc95   :  { %v4669_v23 = vpop.f32.mrf.mxu0 }
 0xc96   :  { %4880 = vmatmul.mubr.f32.vlgmr.msra.gmra.mxu1 %v4669_v23  ;;  %4951 = vmatmul.mubr.f32.vlgmr.msra.gmra.mxu0 %v4669_v23  ;;  %v11607_v23 = vld [vmem:[#allocation6 + $0x2c8] sm:$0xff] }
 0xc97   :  { %4986 = vmatpush1.msra.mxu1 %v11141_v41  ;;  %5057 = vmatpush1.msra.mxu0 %v11144_v57  ;;  %v6469_v1 = vpop.f32.mrf.mxu0  ;;  %v14049_v57 = vld [vmem:[#allocation205_spill] sm:$0xff] }
 0xc98   :  { %4987 = vmatprep.subr.mxu1 %v11147_v14  ;;  %5058 = vmatprep.subr.mxu0 %v11150_v24  ;;  %v14051_v24 = vld [vmem:[#allocation207_spill] sm:$0xff]  ;;  %v11610_v1 = vld [vmem:[#allocation6 + $0x2d8] sm:$0xff] }
 0xc99   :  { %4988 = vmatpush1.msra.mxu1 %v11153_v55  ;;  %5059 = vmatpush1.msra.mxu0 %v11156_v36  ;;  %v14052_v55 = vld [vmem:[#allocation208_spill] sm:$0xff] }
 0xc9a   :  { %v6699_v40 = vpop.eup %6698  ;;  %4989 = vmatprep.subr.mxu1 %v11159_v9  ;;  %5060 = vmatprep.subr.mxu0 %v11162_v12  ;;  %v14054_v12 = vld [vmem:[#allocation210_spill] sm:$0xff] }
 0xc9b   :  { %4990 = vmatpush1.msra.mxu1 %v11165_v35  ;;  %5061 = vmatpush1.msra.mxu0 %v14048_v39  ;;  %v6701_v41 = vpop.eup %6700  ;;  %v4590_v14 = vmul.f32 %v6699_v40, %v11208_v58  ;;  %v14055_v35 = vld [vmem:[#allocation211_spill] sm:$0xff]  ;;  %v14057_v58 = vld [vmem:[#allocation213_spill] sm:$0xff] }
 0xc9c   :  { %4991 = vmatprep.subr.mxu1 %v14049_v57  ;;  %5062 = vmatprep.subr.mxu0 %v14050_v50  ;;  %v6703_v36 = vpop.eup %6702  ;;  %v11613_v40 = vld [vmem:[#allocation6 + $0x2c0] sm:$0xff]  ;;  %v11616_v39 = vld [vmem:[#allocation6 + $0x2d0] sm:$0xff]  ;;  %v11622_v57 = vld [vmem:[#allocation6 + $0x2b8] sm:$0xff] }
 0xc9d   :  { %4992 = vmatpush1.msra.mxu1 %v14051_v24  ;;  %5063 = vmatpush1.msra.mxu0 %v14052_v55  ;;  %v4591_v9 = vmul.f32 %v6703_v36, %v6701_v41  ;;  %v6705_v6 = vpop.eup %6704  ;;  %14062 = vst [vmem:[#allocation11_spill] sm:$0xff] %v11616_v39  ;;  %v11619_v41 = vld [vmem:[#allocation6 + $0x2a8] sm:$0xff]  ;;  %14064 = vst [vmem:[#allocation13_spill] sm:$0xff] %v11622_v57  ;;  %v11625_v50 = vld [vmem:[#allocation6 + $0x2a0] sm:$0xff] }
 0xc9e   :  { %4993 = vmatprep.subr.mxu1 %v14053_v62  ;;  %5064 = vmatprep.subr.mxu0 %v11187_v59  ;;  %v4587_v59 = vadd.f32 1.0, %v6705_v6  ;;  %14063 = vst [vmem:[#allocation10_spill] sm:$0xff] %v11619_v41  ;;  %14065 = vst [vmem:[#allocation12_spill] sm:$0xff] %v11625_v50  ;;  %v11631_v24 = vld [vmem:[#allocation6 + $0x288] sm:$0xff]  ;;  %v11634_v55 = vld [vmem:[#allocation6 + $0x298] sm:$0xff] }
 0xc9f   :  { %4994 = vmatpush1.msra.mxu1 %v14054_v12  ;;  %5065 = vmatpush1.msra.mxu0 %v14055_v35  ;;  %v11574_v27 = vadd.f32 %v4591_v9, %v4590_v14  ;;  %v11628_v14 = vld [vmem:[#allocation6 + $0x2b0] sm:$0xff]  ;;  %14067 = vst [vmem:[#allocation14_spill] sm:$0xff] %v11631_v24  ;;  %14068 = vst [vmem:[#allocation17_spill] sm:$0xff] %v11634_v55  ;;  %v11637_v36 = vld [vmem:[#allocation6 + $0x280] sm:$0xff] }
 0xca0   :  { %4995 = vmatprep.subr.mxu1 %v14056_v16  ;;  %5066 = vmatprep.subr.mxu0 %v11199_v18  ;;  %v14061_v18 = vld [vmem:[#allocation217_spill] sm:$0xff]  ;;  %14066 = vst [vmem:[#allocation15_spill] sm:$0xff] %v11628_v14  ;;  %14069 = vst [vmem:[#allocation16_spill] sm:$0xff] %v11637_v36  ;;  %v11640_v62 = vld [vmem:[#allocation6 + $0x290] sm:$0xff] }
 0xca1   :  { %4996 = vmatpush1.msra.mxu1 %v14057_v58  ;;  %5067 = vmatpush1.msra.mxu0 %v14058_v7  ;;  %6706 = vtanh.f32 %v11574_v27  ;;  %14070 = vst [vmem:[#allocation19_spill] sm:$0xff] %v11640_v62  ;;  %v11643_v9 = vld [vmem:[#allocation6 + $0x268] sm:$0xff]  ;;  %v11646_v12 = vld [vmem:[#allocation6 + $0x278] sm:$0xff]  ;;  %v11649_v35 = vld [vmem:[#allocation6 + $0x260] sm:$0xff] }
 0xca2   :  { %4997 = vmatprep.subr.mxu1 %v14059_v31  ;;  %5068 = vmatprep.subr.mxu0 %v11577_v38  ;;  %6708 = vrcp.f32 %v4587_v59  ;;  %14071 = vst [vmem:[#allocation18_spill] sm:$0xff] %v11643_v9  ;;  %14072 = vst [vmem:[#allocation21_spill] sm:$0xff] %v11646_v12  ;;  %v11652_v6 = vld [vmem:[#allocation6 + $0x270] sm:$0xff]  ;;  %v11655_v16 = vld [vmem:[#allocation6 + $0x248] sm:$0xff] }
 0xca3   :  { %4998 = vmatpush1.msra.mxu1 %v14060_v45  ;;  %5069 = vmatpush1.msra.mxu0 %v11581_v46  ;;  %14073 = vst [vmem:[#allocation20_spill] sm:$0xff] %v11649_v35  ;;  %14074 = vst [vmem:[#allocation23_spill] sm:$0xff] %v11652_v6  ;;  %v11658_v58 = vld [vmem:[#allocation6 + $0x258] sm:$0xff]  ;;  %v11661_v7 = vld [vmem:[#allocation6 + $0x240] sm:$0xff] }
 0xca4   :  { %4999 = vmatprep.subr.mxu1 %v14061_v18  ;;  %5070 = vmatprep.subr.mxu0 %v11585_v48  ;;  %14075 = vst [vmem:[#allocation22_spill] sm:$0xff] %v11655_v16  ;;  %14076 = vst [vmem:[#allocation24_spill] sm:$0xff] %v11658_v58  ;;  %v11664_v31 = vld [vmem:[#allocation6 + $0x250] sm:$0xff]  ;;  %v11667_v45 = vld [vmem:[#allocation6 + $0x228] sm:$0xff] }
 0xca5   :  { %5000 = vmatpush1.msra.mxu1 %v11588_v10  ;;  %5071 = vmatpush1.msra.mxu0 %v11591_v42  ;;  %14077 = vst [vmem:[#allocation25_spill] sm:$0xff] %v11661_v7  ;;  %14078 = vst [vmem:[#allocation26_spill] sm:$0xff] %v11664_v31  ;;  %v11670_v18 = vld [vmem:[#allocation6 + $0x238] sm:$0xff] }
 0xca6   :  { %5001 = vmatprep.subr.mxu1 %v11595_v63  ;;  %5072 = vmatprep.subr.mxu0 %v11598_v33  ;;  %14079 = vst [vmem:[#allocation27_spill] sm:$0xff] %v11667_v45  ;;  %14080 = vst [vmem:[#allocation28_spill] sm:$0xff] %v11670_v18 }
 0xca7   :  { %5002 = vmatpush1.msra.mxu1 %v11601_v21  ;;  %5073 = vmatpush1.msra.mxu0 %v11604_v44 }
 0xca8   :  { %5003 = vmatprep.subr.mxu1 %v11607_v23  ;;  %5074 = vmatprep.subr.mxu0 %v11610_v1 }
 0xca9   :  { %5004 = vmatpush1.msra.mxu1 %v11613_v40  ;;  %5075 = vmatpush1.msra.mxu0 %v11616_v39 }
 0xcaa   :  { %5005 = vmatprep.subr.mxu1 %v11619_v41  ;;  %5076 = vmatprep.subr.mxu0 %v11622_v57 }
 0xcab   :  { %5006 = vmatpush1.msra.mxu1 %v11625_v50  ;;  %5077 = vmatpush1.msra.mxu0 %v11628_v14 }
 0xcac   :  { %5007 = vmatprep.subr.mxu1 %v11631_v24  ;;  %5078 = vmatprep.subr.mxu0 %v11634_v55 }
 0xcad   :  { %5008 = vmatpush1.msra.mxu1 %v11637_v36  ;;  %5079 = vmatpush1.msra.mxu0 %v11640_v62 }
 0xcae   :  { %5009 = vmatprep.subr.mxu1 %v11643_v9  ;;  %5080 = vmatprep.subr.mxu0 %v11646_v12  ;;  %v6707_v59 = vpop.eup %6706 }
 0xcaf   :  { %5010 = vmatpush1.msra.mxu1 %v11649_v35  ;;  %5081 = vmatpush1.msra.mxu0 %v11652_v6  ;;  %v11679_v6 = vld [vmem:[#allocation6 + $0x208] sm:$0xff] }
 0xcb0   :  { %5011 = vmatprep.subr.mxu1 %v11655_v16  ;;  %5082 = vmatprep.subr.mxu0 %v11658_v58  ;;  %v11673_v16 = vld [vmem:[#allocation6 + $0x220] sm:$0xff]  ;;  %v11676_v58 = vld [vmem:[#allocation6 + $0x230] sm:$0xff]  ;;  %14083 = vst [vmem:[#allocation31_spill] sm:$0xff] %v11679_v6 }
 0xcb1   :  { %5012 = vmatpush1.msra.mxu1 %v11661_v7  ;;  %5083 = vmatpush1.msra.mxu0 %v11664_v31  ;;  %14081 = vst [vmem:[#allocation29_spill] sm:$0xff] %v11673_v16  ;;  %14082 = vst [vmem:[#allocation30_spill] sm:$0xff] %v11676_v58  ;;  %v6709_v7 = vpop.eup %6708  ;;  %v11682_v31 = vld [vmem:[#allocation6 + $0x218] sm:$0xff] }
 0xcb2   :  { %5013 = vmatprep.subr.mxu1 %v11667_v45  ;;  %5084 = vmatprep.subr.mxu0 %v11670_v18  ;;  %14084 = vst [vmem:[#allocation32_spill] sm:$0xff] %v11682_v31  ;;  %v11685_v45 = vld [vmem:[#allocation6 + $0x200] sm:$0xff]  ;;  %v11689_v18 = vld [vmem:[#allocation6 + $0x210] sm:$0xff] }
 0xcb3   :  { %5014 = vmatpush1.msra.mxu1 %v11673_v16  ;;  %5085 = vmatpush1.msra.mxu0 %v11676_v58  ;;  %14085 = vst [vmem:[#allocation33_spill] sm:$0xff] %v11685_v45  ;;  %v4594_v16 = vmul.f32 %v6709_v7, %v6707_v59  ;;  %14086 = vst [vmem:[#allocation34_spill] sm:$0xff] %v11689_v18  ;;  %v11702_v7 = vld [vmem:[#allocation4 + $0x3f0] sm:$0xff]  ;;  %v11705_v59 = vld [vmem:[#allocation4 + $0x3c8] sm:$0xff] }
 0xcb4   :  { %5015 = vmatprep.subr.mxu1 %v11679_v6  ;;  %5086 = vmatprep.subr.mxu0 %v11682_v31  ;;  %v11693_v6 = vld [vmem:[#allocation4 + $0x3e8] sm:$0xff]  ;;  %v11696_v31 = vld [vmem:[#allocation4 + $0x3f8] sm:$0xff]  ;;  %14090 = vst [vmem:[#allocation38_spill] sm:$0xff] %v11702_v7  ;;  %14091 = vst [vmem:[#allocation39_spill] sm:$0xff] %v11705_v59 }
 0xcb5   :  { %5016 = vmatpush1.msra.mxu1 %v11685_v45  ;;  %5049 = vmatprep.mubr.f32.mxu1 %v12890_v60  ;;  %14087 = vst [vmem:[#allocation35_spill] sm:$0xff] %v11693_v6  ;;  %14088 = vst [vmem:[#allocation36_spill] sm:$0xff] %v11696_v31  ;;  %v11699_v45 = vld [vmem:[#allocation4 + $0x3e0] sm:$0xff] }
 0xcb6   :  { %5087 = vmatpush1.msra.mxu0 %v11689_v18  ;;  %5120 = vmatprep.mubr.f32.mxu0 %v12890_v60  ;;  %14089 = vst [vmem:[#allocation37_spill] sm:$0xff] %v11699_v45 }
 0xcb7   :  { %5050 = vmatmul.mubr.f32.vlgmr.msra.gmra.mxu1 %v4594_v16  ;;  %5121 = vmatmul.mubr.f32.vlgmr.msra.gmra.mxu0 %v4594_v16  ;;  %v11708_v16 = vld [vmem:[#allocation4 + $0x3d8] sm:$0xff] }
 0xcb8   :  { %5127 = vmatprep.subr.mxu1 %v11693_v6  ;;  %5198 = vmatprep.subr.mxu0 %v11696_v31  ;;  %14092 = vst [vmem:[#allocation40_spill] sm:$0xff] %v11708_v16  ;;  %v11711_v6 = vld [vmem:[#allocation4 + $0x3c0] sm:$0xff]  ;;  %v11714_v31 = vld [vmem:[#allocation4 + $0x3d0] sm:$0xff] }
 0xcb9   :  { %5128 = vmatpush1.msra.mxu1 %v11699_v45  ;;  %5199 = vmatpush1.msra.mxu0 %v11702_v7  ;;  %14093 = vst [vmem:[#allocation41_spill] sm:$0xff] %v11711_v6  ;;  %14094 = vst [vmem:[#allocation42_spill] sm:$0xff] %v11714_v31  ;;  %v11717_v45 = vld [vmem:[#allocation4 + $0x3a8] sm:$0xff]  ;;  %v11720_v7 = vld [vmem:[#allocation4 + $0x3b8] sm:$0xff] }
 0xcba   :  { %5129 = vmatprep.subr.mxu1 %v11705_v59  ;;  %5200 = vmatprep.subr.mxu0 %v11708_v16  ;;  %14095 = vst [vmem:[#allocation43_spill] sm:$0xff] %v11717_v45  ;;  %14096 = vst [vmem:[#allocation44_spill] sm:$0xff] %v11720_v7  ;;  %v11723_v59 = vld [vmem:[#allocation4 + $0x3a0] sm:$0xff]  ;;  %v11726_v16 = vld [vmem:[#allocation4 + $0x3b0] sm:$0xff] }
 0xcbb   :  { %5130 = vmatpush1.msra.mxu1 %v11711_v6  ;;  %5201 = vmatpush1.msra.mxu0 %v11714_v31  ;;  %14097 = vst [vmem:[#allocation45_spill] sm:$0xff] %v11723_v59  ;;  %14098 = vst [vmem:[#allocation46_spill] sm:$0xff] %v11726_v16  ;;  %v11729_v6 = vld [vmem:[#allocation4 + $0x388] sm:$0xff]  ;;  %v11732_v31 = vld [vmem:[#allocation4 + $0x398] sm:$0xff] }
 0xcbc   :  { %5131 = vmatprep.subr.mxu1 %v11717_v45  ;;  %5202 = vmatprep.subr.mxu0 %v11720_v7  ;;  %14099 = vst [vmem:[#allocation47_spill] sm:$0xff] %v11729_v6  ;;  %14100 = vst [vmem:[#allocation48_spill] sm:$0xff] %v11732_v31  ;;  %v11735_v45 = vld [vmem:[#allocation4 + $0x380] sm:$0xff]  ;;  %v11738_v7 = vld [vmem:[#allocation4 + $0x390] sm:$0xff] }
 0xcbd   :  { %5132 = vmatpush1.msra.mxu1 %v11723_v59  ;;  %5203 = vmatpush1.msra.mxu0 %v11726_v16  ;;  %14101 = vst [vmem:[#allocation49_spill] sm:$0xff] %v11735_v45  ;;  %14102 = vst [vmem:[#allocation50_spill] sm:$0xff] %v11738_v7  ;;  %v11741_v59 = vld [vmem:[#allocation4 + $0x368] sm:$0xff]  ;;  %v11744_v16 = vld [vmem:[#allocation4 + $0x378] sm:$0xff] }
 0xcbe   :  { %5133 = vmatprep.subr.mxu1 %v11729_v6  ;;  %5204 = vmatprep.subr.mxu0 %v11732_v31  ;;  %14103 = vst [vmem:[#allocation51_spill] sm:$0xff] %v11741_v59  ;;  %14104 = vst [vmem:[#allocation52_spill] sm:$0xff] %v11744_v16  ;;  %v11747_v6 = vld [vmem:[#allocation4 + $0x360] sm:$0xff]  ;;  %v11750_v31 = vld [vmem:[#allocation4 + $0x370] sm:$0xff] }
 0xcbf   :  { %5134 = vmatpush1.msra.mxu1 %v11735_v45  ;;  %5205 = vmatpush1.msra.mxu0 %v11738_v7  ;;  %14105 = vst [vmem:[#allocation53_spill] sm:$0xff] %v11747_v6  ;;  %14106 = vst [vmem:[#allocation54_spill] sm:$0xff] %v11750_v31  ;;  %v11753_v45 = vld [vmem:[#allocation4 + $0x348] sm:$0xff]  ;;  %v11756_v7 = vld [vmem:[#allocation4 + $0x358] sm:$0xff] }
 0xcc0   :  { %5135 = vmatprep.subr.mxu1 %v11741_v59  ;;  %5206 = vmatprep.subr.mxu0 %v11744_v16  ;;  %14107 = vst [vmem:[#allocation55_spill] sm:$0xff] %v11753_v45  ;;  %14108 = vst [vmem:[#allocation56_spill] sm:$0xff] %v11756_v7  ;;  %v11759_v59 = vld [vmem:[#allocation4 + $0x340] sm:$0xff]  ;;  %v11762_v16 = vld [vmem:[#allocation4 + $0x350] sm:$0xff] }
 0xcc1   :  { %5136 = vmatpush1.msra.mxu1 %v11747_v6  ;;  %5207 = vmatpush1.msra.mxu0 %v11750_v31  ;;  %14109 = vst [vmem:[#allocation57_spill] sm:$0xff] %v11759_v59  ;;  %14110 = vst [vmem:[#allocation58_spill] sm:$0xff] %v11762_v16  ;;  %v11765_v6 = vld [vmem:[#allocation4 + $0x328] sm:$0xff]  ;;  %v11768_v31 = vld [vmem:[#allocation4 + $0x338] sm:$0xff] }
 0xcc2   :  { %5137 = vmatprep.subr.mxu1 %v11753_v45  ;;  %5208 = vmatprep.subr.mxu0 %v11756_v7  ;;  %14111 = vst [vmem:[#allocation59_spill] sm:$0xff] %v11765_v6  ;;  %14112 = vst [vmem:[#allocation60_spill] sm:$0xff] %v11768_v31  ;;  %v11771_v45 = vld [vmem:[#allocation4 + $0x320] sm:$0xff]  ;;  %v11774_v7 = vld [vmem:[#allocation4 + $0x330] sm:$0xff] }
 0xcc3   :  { %5138 = vmatpush1.msra.mxu1 %v11759_v59  ;;  %5209 = vmatpush1.msra.mxu0 %v11762_v16  ;;  %14113 = vst [vmem:[#allocation61_spill] sm:$0xff] %v11771_v45  ;;  %14114 = vst [vmem:[#allocation62_spill] sm:$0xff] %v11774_v7  ;;  %v11777_v59 = vld [vmem:[#allocation4 + $0x308] sm:$0xff]  ;;  %v11780_v16 = vld [vmem:[#allocation4 + $0x318] sm:$0xff] }
 0xcc4   :  { %5139 = vmatprep.subr.mxu1 %v11765_v6  ;;  %5210 = vmatprep.subr.mxu0 %v11768_v31  ;;  %14115 = vst [vmem:[#allocation63_spill] sm:$0xff] %v11777_v59  ;;  %14116 = vst [vmem:[#allocation64_spill] sm:$0xff] %v11780_v16  ;;  %v11783_v6 = vld [vmem:[#allocation4 + $0x300] sm:$0xff]  ;;  %v11786_v31 = vld [vmem:[#allocation4 + $0x310] sm:$0xff] }
 0xcc5   :  { %5140 = vmatpush1.msra.mxu1 %v11771_v45  ;;  %5211 = vmatpush1.msra.mxu0 %v11774_v7  ;;  %14117 = vst [vmem:[#allocation65_spill] sm:$0xff] %v11783_v6  ;;  %14118 = vst [vmem:[#allocation66_spill] sm:$0xff] %v11786_v31  ;;  %v11789_v45 = vld [vmem:[#allocation4 + $0x2e8] sm:$0xff]  ;;  %v11792_v7 = vld [vmem:[#allocation4 + $0x2f8] sm:$0xff] }
 0xcc6   :  { %5141 = vmatprep.subr.mxu1 %v11777_v59  ;;  %5212 = vmatprep.subr.mxu0 %v11780_v16  ;;  %14119 = vst [vmem:[#allocation67_spill] sm:$0xff] %v11789_v45  ;;  %14120 = vst [vmem:[#allocation68_spill] sm:$0xff] %v11792_v7  ;;  %v11795_v59 = vld [vmem:[#allocation4 + $0x2e0] sm:$0xff]  ;;  %v11798_v16 = vld [vmem:[#allocation4 + $0x2f0] sm:$0xff] }
 0xcc7   :  { %5142 = vmatpush1.msra.mxu1 %v11783_v6  ;;  %5213 = vmatpush1.msra.mxu0 %v11786_v31  ;;  %14121 = vst [vmem:[#allocation69_spill] sm:$0xff] %v11795_v59  ;;  %14122 = vst [vmem:[#allocation70_spill] sm:$0xff] %v11798_v16  ;;  %v11801_v6 = vld [vmem:[#allocation4 + $0x2c8] sm:$0xff]  ;;  %v11804_v31 = vld [vmem:[#allocation4 + $0x2d8] sm:$0xff] }
 0xcc8   :  { %5143 = vmatprep.subr.mxu1 %v11789_v45  ;;  %5214 = vmatprep.subr.mxu0 %v11792_v7  ;;  %14123 = vst [vmem:[#allocation71_spill] sm:$0xff] %v11801_v6  ;;  %14124 = vst [vmem:[#allocation72_spill] sm:$0xff] %v11804_v31  ;;  %v11807_v45 = vld [vmem:[#allocation4 + $0x2c0] sm:$0xff]  ;;  %v11810_v7 = vld [vmem:[#allocation4 + $0x2d0] sm:$0xff] }
 0xcc9   :  { %5144 = vmatpush1.msra.mxu1 %v11795_v59  ;;  %5215 = vmatpush1.msra.mxu0 %v11798_v16  ;;  %14125 = vst [vmem:[#allocation73_spill] sm:$0xff] %v11807_v45  ;;  %14126 = vst [vmem:[#allocation74_spill] sm:$0xff] %v11810_v7  ;;  %v11813_v59 = vld [vmem:[#allocation4 + $0x2a8] sm:$0xff]  ;;  %v11816_v16 = vld [vmem:[#allocation4 + $0x2b8] sm:$0xff] }
 0xcca   :  { %5145 = vmatprep.subr.mxu1 %v11801_v6  ;;  %5216 = vmatprep.subr.mxu0 %v11804_v31  ;;  %14127 = vst [vmem:[#allocation75_spill] sm:$0xff] %v11813_v59  ;;  %14128 = vst [vmem:[#allocation76_spill] sm:$0xff] %v11816_v16  ;;  %v11819_v6 = vld [vmem:[#allocation4 + $0x2a0] sm:$0xff]  ;;  %v11822_v31 = vld [vmem:[#allocation4 + $0x2b0] sm:$0xff] }
 0xccb   :  { %5146 = vmatpush1.msra.mxu1 %v11807_v45  ;;  %5217 = vmatpush1.msra.mxu0 %v11810_v7  ;;  %14129 = vst [vmem:[#allocation77_spill] sm:$0xff] %v11819_v6  ;;  %14130 = vst [vmem:[#allocation78_spill] sm:$0xff] %v11822_v31  ;;  %v11825_v45 = vld [vmem:[#allocation4 + $0x288] sm:$0xff]  ;;  %v11828_v7 = vld [vmem:[#allocation4 + $0x298] sm:$0xff] }
 0xccc   :  { %5147 = vmatprep.subr.mxu1 %v11813_v59  ;;  %5218 = vmatprep.subr.mxu0 %v11816_v16  ;;  %14131 = vst [vmem:[#allocation79_spill] sm:$0xff] %v11825_v45  ;;  %14132 = vst [vmem:[#allocation80_spill] sm:$0xff] %v11828_v7  ;;  %v11831_v59 = vld [vmem:[#allocation4 + $0x280] sm:$0xff]  ;;  %v11834_v16 = vld [vmem:[#allocation4 + $0x290] sm:$0xff] }
 0xccd   :  { %5148 = vmatpush1.msra.mxu1 %v11819_v6  ;;  %5219 = vmatpush1.msra.mxu0 %v11822_v31  ;;  %14133 = vst [vmem:[#allocation81_spill] sm:$0xff] %v11831_v59  ;;  %14134 = vst [vmem:[#allocation82_spill] sm:$0xff] %v11834_v16  ;;  %v11837_v6 = vld [vmem:[#allocation4 + $0x268] sm:$0xff]  ;;  %v11840_v31 = vld [vmem:[#allocation4 + $0x278] sm:$0xff] }
 0xcce   :  { %5149 = vmatprep.subr.mxu1 %v11825_v45  ;;  %5220 = vmatprep.subr.mxu0 %v11828_v7  ;;  %14135 = vst [vmem:[#allocation83_spill] sm:$0xff] %v11837_v6  ;;  %14136 = vst [vmem:[#allocation84_spill] sm:$0xff] %v11840_v31  ;;  %v11843_v45 = vld [vmem:[#allocation4 + $0x260] sm:$0xff]  ;;  %v11846_v7 = vld [vmem:[#allocation4 + $0x270] sm:$0xff] }
 0xccf   :  { %5150 = vmatpush1.msra.mxu1 %v11831_v59  ;;  %5221 = vmatpush1.msra.mxu0 %v11834_v16  ;;  %14137 = vst [vmem:[#allocation85_spill] sm:$0xff] %v11843_v45  ;;  %14138 = vst [vmem:[#allocation86_spill] sm:$0xff] %v11846_v7  ;;  %v11849_v59 = vld [vmem:[#allocation4 + $0x248] sm:$0xff]  ;;  %v11852_v16 = vld [vmem:[#allocation4 + $0x258] sm:$0xff] }
 0xcd0   :  { %5151 = vmatprep.subr.mxu1 %v11837_v6  ;;  %5222 = vmatprep.subr.mxu0 %v11840_v31  ;;  %14139 = vst [vmem:[#allocation87_spill] sm:$0xff] %v11849_v59  ;;  %14140 = vst [vmem:[#allocation88_spill] sm:$0xff] %v11852_v16  ;;  %v11855_v6 = vld [vmem:[#allocation4 + $0x240] sm:$0xff]  ;;  %v11858_v31 = vld [vmem:[#allocation4 + $0x250] sm:$0xff] }
 0xcd1   :  { %5152 = vmatpush1.msra.mxu1 %v11843_v45  ;;  %5223 = vmatpush1.msra.mxu0 %v11846_v7  ;;  %14141 = vst [vmem:[#allocation89_spill] sm:$0xff] %v11855_v6  ;;  %14142 = vst [vmem:[#allocation90_spill] sm:$0xff] %v11858_v31  ;;  %v11861_v45 = vld [vmem:[#allocation4 + $0x228] sm:$0xff]  ;;  %v11864_v7 = vld [vmem:[#allocation4 + $0x238] sm:$0xff] }
 0xcd2   :  { %5153 = vmatprep.subr.mxu1 %v11849_v59  ;;  %5224 = vmatprep.subr.mxu0 %v11852_v16  ;;  %14143 = vst [vmem:[#allocation91_spill] sm:$0xff] %v11861_v45  ;;  %14144 = vst [vmem:[#allocation92_spill] sm:$0xff] %v11864_v7  ;;  %v11867_v59 = vld [vmem:[#allocation4 + $0x220] sm:$0xff]  ;;  %v11870_v16 = vld [vmem:[#allocation4 + $0x230] sm:$0xff] }
 0xcd3   :  { %5154 = vmatpush1.msra.mxu1 %v11855_v6  ;;  %5225 = vmatpush1.msra.mxu0 %v11858_v31  ;;  %14145 = vst [vmem:[#allocation93_spill] sm:$0xff] %v11867_v59  ;;  %14146 = vst [vmem:[#allocation94_spill] sm:$0xff] %v11870_v16  ;;  %v11873_v6 = vld [vmem:[#allocation4 + $0x208] sm:$0xff]  ;;  %v11876_v31 = vld [vmem:[#allocation4 + $0x218] sm:$0xff] }
 0xcd4   :  { %5155 = vmatprep.subr.mxu1 %v11861_v45  ;;  %5226 = vmatprep.subr.mxu0 %v11864_v7  ;;  %14147 = vst [vmem:[#allocation95_spill] sm:$0xff] %v11873_v6  ;;  %14148 = vst [vmem:[#allocation96_spill] sm:$0xff] %v11876_v31  ;;  %v11879_v45 = vld [vmem:[#allocation4 + $0x200] sm:$0xff]  ;;  %v11882_v7 = vld [vmem:[#allocation4 + $0x210] sm:$0xff] }
 0xcd5   :  { %5156 = vmatpush1.msra.mxu1 %v11867_v59  ;;  %5227 = vmatpush1.msra.mxu0 %v11870_v16  ;;  %14149 = vst [vmem:[#allocation97_spill] sm:$0xff] %v11879_v45  ;;  %14150 = vst [vmem:[#allocation98_spill] sm:$0xff] %v11882_v7  ;;  %v7590_v16 = vld [vmem:[#allocation6 + $0x1e8] sm:$0xff]  ;;  %v4810_v59 = vpop.f32.mrf.mxu0 }
 0xcd6   :  { %5157 = vmatprep.subr.mxu1 %v11873_v6  ;;  %5228 = vmatprep.subr.mxu0 %v11876_v31  ;;  %v4739_v6 = vpop.f32.mrf.mxu1 }
 0xcd7   :  { %5158 = vmatpush1.msra.mxu1 %v11879_v45  ;;  %5229 = vmatpush1.msra.mxu0 %v11882_v7  ;;  %v4812_v58 = vpop.f32.mrf.mxu0 }
 0xcd8   :  { %5191 = vmatprep.mubr.f32.mxu1 %v12890_v60  ;;  %5262 = vmatprep.mubr.f32.mxu0 %v12890_v60  ;;  %v4741_v18 = vpop.f32.mrf.mxu1 }
 0xcd9   :  { %6470 = vmatprep.subr.mxu1 %v12890_v60  ;;  %5375 = vmatprep.subr.mxu0 %v7590_v16 }
 0xd56   :  { %v4881_v31 = vpop.f32.mrf.mxu1  ;;  %v4952_v9 = vpop.f32.mrf.mxu0 }
 0xd57   :  { %v4882_v35 = vadd.f32 %v4881_v31, %v4739_v6  ;;  %v4953_v50 = vadd.f32 %v4952_v9, %v4810_v59  ;;  %v7596_v59 = vld [vmem:[#allocation6 + $0x1a8] sm:$0xff] }
 0xd58   :  { %v4883_v12 = vpop.f32.mrf.mxu1  ;;  %v4954_v24 = vpop.f32.mrf.mxu0 }
 0xd59   :  { %v4957_v45 = vadd.f32 %v4882_v35, %v8282_v54  ;;  %v4884_v62 = vadd.f32 %v4883_v12, %v4741_v18  ;;  %v4955_v14 = vadd.f32 %v4954_v24, %v4812_v58  ;;  %v4959_v6 = vadd.f32 %v4953_v50, %v8299_v47  ;;  %v7592_v58 = vld [vmem:[#allocation6 + $0x1e0] sm:$0xff]  ;;  %v7594_v18 = vld [vmem:[#allocation2 + $0x70] sm:$0xff] }
 0xd5b   :  { %v6072_v7 = vmul.f32 -1.442695, %v4957_v45  ;;  %v4958_v36 = vadd.f32 %v4884_v62, %v8286_v51  ;;  %v4960_v16 = vadd.f32 %v4955_v14, %v13101_v13 }
 0xd5d   :  { %6710 = vpow2.f32 %v6072_v7  ;;  %v6073_v55 = vmul.f32 -1.442695, %v4958_v36  ;;  %v6074_v57 = vmul.f32 -1.442695, %v4960_v16  ;;  %v7595_v7 = vld [vmem:[#allocation6 + $0x1c0] sm:$0xff]  ;;  %v7597_v16 = vld [vmem:[#allocation2 + $0x68] sm:$0xff] }
 0xd5f   :  { %6712 = vpow2.f32 %v6073_v55 }
 0xd60   :  { %6714 = vpow2.f32 %v6074_v57 }
 0xd6a   :  { %v6711_v41 = vpop.eup %6710 }
 0xd6b   :  { %v4964_v31 = vadd.f32 1.0, %v6711_v41 }
 0xd6c   :  { %v6713_v39 = vpop.eup %6712 }
 0xd6d   :  { %6716 = vrcp.f32 %v4964_v31  ;;  %v4970_v12 = vadd.f32 1.0, %v6713_v39  ;;  %v6715_v62 = vpop.eup %6714  ;;  %v7591_v39 = vld [vmem:[#allocation2 + $0x78] sm:$0xff]  ;;  %v7599_v31 = vld [vmem:[#allocation6 + $0x188] sm:$0xff] }
 0xd6e   :  { %6718 = vtanh.f32 %v4959_v6  ;;  %v4977_v55 = vadd.f32 1.0, %v6715_v62  ;;  %v7598_v6 = vld [vmem:[#allocation6 + $0x1a0] sm:$0xff] }
 0xd6f   :  { %6720 = vrcp.f32 %v4970_v12  ;;  %v7600_v12 = vld [vmem:[#allocation2 + $0x60] sm:$0xff] }
 0xd70   :  { %6722 = vrcp.f32 %v4977_v55  ;;  %v7601_v62 = vld [vmem:[#allocation6 + $0x180] sm:$0xff]  ;;  %v7605_v55 = vld [vmem:[#allocation6 + $0x148] sm:$0xff] }
 0xd7a   :  { %v6717_v35 = vpop.eup %6716 }
 0xd7b   :  { %v6719_v36 = vpop.eup %6718 }
 0xd7c   :  { %v6721_v45 = vpop.eup %6720  ;;  %v4981_v24 = vmul.f32 %v6719_v36, %v6717_v35  ;;  %v7602_v35 = vld [vmem:[#allocation6 + $0x168] sm:$0xff]  ;;  %v7603_v36 = vld [vmem:[#allocation2 + $0x58] sm:$0xff] }
 0xd7d   :  { %v4980_v14 = vmul.f32 %v6721_v45, %v11332_v49  ;;  %v6723_v41 = vpop.eup %6722  ;;  %v7593_v49 = vld [vmem:[#allocation6 + $0x1c8] sm:$0xff]  ;;  %v7604_v45 = vld [vmem:[#allocation6 + $0x160] sm:$0xff] }
 0xd7f   :  { %v11893_v9 = vadd.f32 %v4981_v24, %v4980_v14  ;;  %v7606_v24 = vld [vmem:[#allocation2 + $0x50] sm:$0xff]  ;;  %v7607_v14 = vld [vmem:[#allocation6 + $0x140] sm:$0xff] }
 0xd81   :  { %6724 = vtanh.f32 %v11893_v9 }
 0xd8e   :  { %v6725_v50 = vpop.eup %6724 }
 0xd8f   :  { %v11896_v57 = vmul.f32 %v6725_v50, %v6723_v41  ;;  %v7608_v41 = vld [vmem:[#allocation6 + $0x128] sm:$0xff] }
 0xd90   :  { %v7609_v50 = vld [vmem:[#allocation2 + $0x48] sm:$0xff] }
 0xd91   :  { %5192 = vmatmul.mubr.f32.vlgmr.msra.gmra.mxu1 %v11896_v57  ;;  %5263 = vmatmul.mubr.f32.vlgmr.msra.gmra.mxu0 %v11896_v57 }
 0xd92   :  { %6471 = vmatpush3.msra.mxu1 %v7591_v39  ;;  %5376 = vmatpush1.msra.mxu0 %v7592_v58  ;;  %v7610_v39 = vld [vmem:[#allocation6 + $0x120] sm:$0xff]  ;;  %v7611_v58 = vld [vmem:[#allocation6 + $0x108] sm:$0xff] }
 0xd93   :  { %6472 = vmatprep.subr.mxu1 %v12890_v60  ;;  %5377 = vmatprep.subr.mxu0 %v7593_v49  ;;  %v7612_v49 = vld [vmem:[#allocation2 + $0x40] sm:$0xff] }
 0xd94   :  { %6473 = vmatpush3.msra.mxu1 %v7594_v18  ;;  %5378 = vmatpush1.msra.mxu0 %v7595_v7  ;;  %v7613_v18 = vld [vmem:[#allocation6 + $0x100] sm:$0xff]  ;;  %v7614_v7 = vld [vmem:[#allocation6 + $0xe8] sm:$0xff] }
 0xd95   :  { %6474 = vmatprep.subr.mxu1 %v12890_v60  ;;  %5379 = vmatprep.subr.mxu0 %v7596_v59  ;;  %v7615_v59 = vld [vmem:[#allocation2 + $0x38] sm:$0xff] }
 0xd96   :  { %6475 = vmatpush3.msra.mxu1 %v7597_v16  ;;  %5380 = vmatpush1.msra.mxu0 %v7598_v6  ;;  %v7616_v16 = vld [vmem:[#allocation6 + $0xe0] sm:$0xff]  ;;  %v7617_v6 = vld [vmem:[#allocation6 + $0xc8] sm:$0xff] }
 0xd97   :  { %6476 = vmatprep.subr.mxu1 %v12890_v60  ;;  %5381 = vmatprep.subr.mxu0 %v7599_v31  ;;  %v7618_v31 = vld [vmem:[#allocation2 + $0x30] sm:$0xff] }
 0xd98   :  { %6477 = vmatpush3.msra.mxu1 %v7600_v12  ;;  %5382 = vmatpush1.msra.mxu0 %v7601_v62  ;;  %v7619_v12 = vld [vmem:[#allocation6 + $0xc0] sm:$0xff]  ;;  %v7620_v62 = vld [vmem:[#allocation6 + $0xa8] sm:$0xff] }
 0xd99   :  { %6478 = vmatprep.subr.mxu1 %v12890_v60  ;;  %5383 = vmatprep.subr.mxu0 %v7602_v35  ;;  %v7621_v35 = vld [vmem:[#allocation2 + $0x28] sm:$0xff] }
 0xd9a   :  { %6479 = vmatpush3.msra.mxu1 %v7603_v36  ;;  %5384 = vmatpush1.msra.mxu0 %v7604_v45  ;;  %v7622_v36 = vld [vmem:[#allocation6 + $0xa0] sm:$0xff]  ;;  %v7623_v45 = vld [vmem:[#allocation6 + $0x88] sm:$0xff] }
 0xd9b   :  { %6480 = vmatprep.subr.mxu1 %v12890_v60  ;;  %5385 = vmatprep.subr.mxu0 %v7605_v55  ;;  %v7624_v55 = vld [vmem:[#allocation2 + $0x20] sm:$0xff] }
 0xd9c   :  { %6481 = vmatpush3.msra.mxu1 %v7606_v24  ;;  %5386 = vmatpush1.msra.mxu0 %v7607_v14  ;;  %v7625_v24 = vld [vmem:[#allocation6 + $0x80] sm:$0xff]  ;;  %v7626_v14 = vld [vmem:[#allocation6 + $0x68] sm:$0xff] }
 0xd9d   :  { %6482 = vmatprep.subr.mxu1 %v12890_v60  ;;  %5387 = vmatprep.subr.mxu0 %v7608_v41  ;;  %v7627_v41 = vld [vmem:[#allocation2 + $0x18] sm:$0xff] }
 0xd9e   :  { %6483 = vmatpush3.msra.mxu1 %v7609_v50  ;;  %5388 = vmatpush1.msra.mxu0 %v7610_v39  ;;  %v7628_v50 = vld [vmem:[#allocation6 + $0x60] sm:$0xff]  ;;  %v7629_v39 = vld [vmem:[#allocation6 + $0x48] sm:$0xff] }
 0xd9f   :  { %6484 = vmatprep.subr.mxu1 %v12890_v60  ;;  %5389 = vmatprep.subr.mxu0 %v7611_v58  ;;  %v7630_v58 = vld [vmem:[#allocation2 + $0x10] sm:$0xff] }
 0xda0   :  { %6485 = vmatpush3.msra.mxu1 %v7612_v49  ;;  %5390 = vmatpush1.msra.mxu0 %v7613_v18  ;;  %v7631_v49 = vld [vmem:[#allocation6 + $0x40] sm:$0xff]  ;;  %v7632_v18 = vld [vmem:[#allocation6 + $0x28] sm:$0xff] }
 0xda1   :  { %6486 = vmatprep.subr.mxu1 %v12890_v60  ;;  %5391 = vmatprep.subr.mxu0 %v7614_v7  ;;  %v5301_v7 = vpop.permute.xlu1 %5300 }
 0xda2   :  { %6487 = vmatpush3.msra.mxu1 %v7615_v59  ;;  %5392 = vmatpush1.msra.mxu0 %v7616_v16  ;;  %v7633_v59 = vld [vmem:[#allocation2 + $0x8] sm:$0xff]  ;;  %v7634_v16 = vld [vmem:[#allocation6 + $0x20] sm:$0xff]  ;;  %vm5302_vm8 = vcmp.eq.s32.totalorder %v13973_v29, %v5301_v7  ;;  %v7643_v29 = vld [vmem:[#allocation6 + $0x1d0] sm:$0xff] }
 0xda3   :  { %6488 = vmatprep.subr.mxu1 %v12890_v60  ;;  %5393 = vmatprep.subr.mxu0 %v7617_v6  ;;  %v7635_v6 = vld [vmem:[#allocation6 + $0x8] sm:$0xff]  ;;  %v7653_v7 = vld [vmem:[#allocation6 + $0x178] sm:$0xff] }
 0xda4   :  { %6489 = vmatpush3.msra.mxu1 %v7618_v31  ;;  %5394 = vmatpush1.msra.mxu0 %v7619_v12  ;;  %v7636_v31 = vld [vmem:[#allocation2] sm:$0xff] }
 0xda5   :  { %6490 = vmatprep.subr.mxu1 %v12890_v60  ;;  %5395 = vmatprep.subr.mxu0 %v7620_v62  ;;  %v7637_v12 = vld [vmem:[#allocation6] sm:$0xff]  ;;  %v7638_v62 = vld [vmem:[#allocation6 + $0x1f8] sm:$0xff] }
 0xda6   :  { %6491 = vmatpush3.msra.mxu1 %v7621_v35  ;;  %5396 = vmatpush1.msra.mxu0 %v7622_v36  ;;  %v7639_v35 = vld [vmem:[#allocation6 + $0x1f0] sm:$0xff]  ;;  %v7640_v36 = vld [vmem:[#allocation4 + $0x1e8] sm:$0xff] }
 0xda7   :  { %6492 = vmatprep.subr.mxu1 %v12890_v60  ;;  %5397 = vmatprep.subr.mxu0 %v7623_v45  ;;  %v7641_v45 = vld [vmem:[#allocation6 + $0x1d8] sm:$0xff] }
 0xda8   :  { %6493 = vmatpush3.msra.mxu1 %v7624_v55  ;;  %5398 = vmatpush1.msra.mxu0 %v7625_v24  ;;  %v7642_v55 = vld [vmem:[#allocation4 + $0x1e0] sm:$0xff]  ;;  %v7644_v24 = vld [vmem:[#allocation4 + $0x1c8] sm:$0xff] }
 0xda9   :  { %6494 = vmatprep.subr.mxu1 %v12890_v60  ;;  %5399 = vmatprep.subr.mxu0 %v7626_v14  ;;  %v7645_v14 = vld [vmem:[#allocation6 + $0x1b8] sm:$0xff] }
 0xdaa   :  { %6495 = vmatpush3.msra.mxu1 %v7627_v41  ;;  %5400 = vmatpush1.msra.mxu0 %v7628_v50  ;;  %v7647_v41 = vld [vmem:[#allocation6 + $0x1b0] sm:$0xff]  ;;  %v7648_v50 = vld [vmem:[#allocation4 + $0x1a8] sm:$0xff] }
 0xdab   :  { %6496 = vmatprep.subr.mxu1 %v12890_v60  ;;  %5401 = vmatprep.subr.mxu0 %v7629_v39  ;;  %v7649_v39 = vld [vmem:[#allocation6 + $0x198] sm:$0xff] }
 0xdac   :  { %6497 = vmatpush3.msra.mxu1 %v7630_v58  ;;  %5402 = vmatpush1.msra.mxu0 %v7631_v49  ;;  %v7650_v58 = vld [vmem:[#allocation4 + $0x1a0] sm:$0xff]  ;;  %v7651_v49 = vld [vmem:[#allocation6 + $0x190] sm:$0xff] }
 0xdad   :  { %6498 = vmatprep.subr.mxu1 %v12890_v60  ;;  %5403 = vmatprep.subr.mxu0 %v7632_v18  ;;  %v7652_v18 = vld [vmem:[#allocation4 + $0x188] sm:$0xff] }
 0xdae   :  { %6499 = vmatpush3.msra.mxu1 %v7633_v59  ;;  %5404 = vmatpush1.msra.mxu0 %v7634_v16  ;;  %v7654_v59 = vld [vmem:[#allocation4 + $0x180] sm:$0xff]  ;;  %v7655_v16 = vld [vmem:[#allocation6 + $0x170] sm:$0xff] }
 0xdaf   :  { %6500 = vmatprep.subr.mxu1 %v12890_v60  ;;  %5405 = vmatprep.subr.mxu0 %v7635_v6  ;;  %v7656_v6 = vld [vmem:[#allocation4 + $0x168] sm:$0xff] }
 0xdb0   :  { %6501 = vmatpush3.msra.mxu1 %v7636_v31  ;;  %6502 = vmatprep.mubr.msk.f32.mxu1 %vm7815_vm0, %v12890_v60  ;;  %v7657_v31 = vld [vmem:[#allocation6 + $0x158] sm:$0xff] }
 0xdb1   :  { %5406 = vmatpush1.msra.mxu0 %v7637_v12  ;;  %5439 = vmatprep.mubr.f32.mxu0 %v12890_v60  ;;  %v7658_v12 = vld [vmem:[#allocation4 + $0x160] sm:$0xff] }
 0xdb2   :  { %6503 = vmatmul.mubr.msk.f32.vlgmr.msra.gmra.mxu1 %vm5302_vm8, %v13975_v30  ;;  %5440 = vmatmul.mubr.f32.vlgmr.msra.gmra.mxu0 %v11896_v57  ;;  %v7646_v30 = vld [vmem:[#allocation4 + $0x1c0] sm:$0xff] }
 0xdb3   :  { %5446 = vmatprep.subr.mxu1 %v7638_v62  ;;  %5510 = vmatprep.mubr.f32.mxu1 %v12890_v60  ;;  %v7659_v62 = vld [vmem:[#allocation6 + $0x150] sm:$0xff] }
 0xdb4   :  { %5447 = vmatpush1.msra.mxu1 %v7639_v35  ;;  %5517 = vmatprep.subr.mxu0 %v7640_v36  ;;  %v7660_v35 = vld [vmem:[#allocation4 + $0x148] sm:$0xff]  ;;  %v7661_v36 = vld [vmem:[#allocation6 + $0x138] sm:$0xff] }
 0xdb5   :  { %5448 = vmatprep.subr.mxu1 %v7641_v45  ;;  %5518 = vmatpush1.msra.mxu0 %v7642_v55  ;;  %v7662_v45 = vld [vmem:[#allocation4 + $0x140] sm:$0xff]  ;;  %v7663_v55 = vld [vmem:[#allocation6 + $0x130] sm:$0xff] }
 0xdb6   :  { %5449 = vmatpush1.msra.mxu1 %v7643_v29  ;;  %5519 = vmatprep.subr.mxu0 %v7644_v24  ;;  %v7664_v29 = vld [vmem:[#allocation4 + $0x128] sm:$0xff]  ;;  %v7665_v24 = vld [vmem:[#allocation6 + $0x118] sm:$0xff] }
 0xdb7   :  { %5450 = vmatprep.subr.mxu1 %v7645_v14  ;;  %5520 = vmatpush1.msra.mxu0 %v7646_v30  ;;  %v7666_v14 = vld [vmem:[#allocation4 + $0x120] sm:$0xff]  ;;  %v7667_v30 = vld [vmem:[#allocation6 + $0x110] sm:$0xff] }
 0xdb8   :  { %5451 = vmatpush1.msra.mxu1 %v7647_v41  ;;  %5521 = vmatprep.subr.mxu0 %v7648_v50  ;;  %v7668_v41 = vld [vmem:[#allocation4 + $0x108] sm:$0xff]  ;;  %v7669_v50 = vld [vmem:[#allocation6 + $0xf8] sm:$0xff] }
 0xdb9   :  { %5452 = vmatprep.subr.mxu1 %v7649_v39  ;;  %5522 = vmatpush1.msra.mxu0 %v7650_v58  ;;  %v7670_v39 = vld [vmem:[#allocation4 + $0x100] sm:$0xff]  ;;  %v7671_v58 = vld [vmem:[#allocation6 + $0xf0] sm:$0xff] }
 0xdba   :  { %5453 = vmatpush1.msra.mxu1 %v7651_v49  ;;  %5523 = vmatprep.subr.mxu0 %v7652_v18  ;;  %v7672_v49 = vld [vmem:[#allocation4 + $0xe8] sm:$0xff]  ;;  %v7673_v18 = vld [vmem:[#allocation6 + $0xd8] sm:$0xff] }
 0xdbb   :  { %5454 = vmatprep.subr.mxu1 %v7653_v7  ;;  %5524 = vmatpush1.msra.mxu0 %v7654_v59  ;;  %v7674_v7 = vld [vmem:[#allocation4 + $0xe0] sm:$0xff]  ;;  %v7675_v59 = vld [vmem:[#allocation6 + $0xd0] sm:$0xff] }
 0xdbc   :  { %5455 = vmatpush1.msra.mxu1 %v7655_v16  ;;  %5525 = vmatprep.subr.mxu0 %v7656_v6  ;;  %v7676_v16 = vld [vmem:[#allocation4 + $0xc8] sm:$0xff]  ;;  %v7677_v6 = vld [vmem:[#allocation6 + $0xb8] sm:$0xff] }
 0xdbd   :  { %5456 = vmatprep.subr.mxu1 %v7657_v31  ;;  %5526 = vmatpush1.msra.mxu0 %v7658_v12  ;;  %v7678_v31 = vld [vmem:[#allocation4 + $0xc0] sm:$0xff]  ;;  %v7679_v12 = vld [vmem:[#allocation6 + $0xb0] sm:$0xff] }
 0xdbe   :  { %5457 = vmatpush1.msra.mxu1 %v7659_v62  ;;  %5527 = vmatprep.subr.mxu0 %v7660_v35  ;;  %v7680_v62 = vld [vmem:[#allocation4 + $0xa8] sm:$0xff]  ;;  %v7681_v35 = vld [vmem:[#allocation6 + $0x98] sm:$0xff] }
 0xdbf   :  { %5458 = vmatprep.subr.mxu1 %v7661_v36  ;;  %5528 = vmatpush1.msra.mxu0 %v7662_v45  ;;  %v7682_v36 = vld [vmem:[#allocation4 + $0xa0] sm:$0xff]  ;;  %v7683_v45 = vld [vmem:[#allocation6 + $0x90] sm:$0xff] }
 0xdc0   :  { %5459 = vmatpush1.msra.mxu1 %v7663_v55  ;;  %5529 = vmatprep.subr.mxu0 %v7664_v29  ;;  %v7684_v55 = vld [vmem:[#allocation4 + $0x88] sm:$0xff]  ;;  %v7685_v29 = vld [vmem:[#allocation6 + $0x78] sm:$0xff] }
 0xdc1   :  { %5460 = vmatprep.subr.mxu1 %v7665_v24  ;;  %5530 = vmatpush1.msra.mxu0 %v7666_v14  ;;  %v7686_v24 = vld [vmem:[#allocation4 + $0x80] sm:$0xff]  ;;  %v7687_v14 = vld [vmem:[#allocation6 + $0x70] sm:$0xff] }
 0xdc2   :  { %5461 = vmatpush1.msra.mxu1 %v7667_v30  ;;  %5531 = vmatprep.subr.mxu0 %v7668_v41  ;;  %v7688_v30 = vld [vmem:[#allocation4 + $0x68] sm:$0xff]  ;;  %v7689_v41 = vld [vmem:[#allocation6 + $0x58] sm:$0xff] }
 0xdc3   :  { %5462 = vmatprep.subr.mxu1 %v7669_v50  ;;  %5532 = vmatpush1.msra.mxu0 %v7670_v39  ;;  %v7690_v50 = vld [vmem:[#allocation4 + $0x60] sm:$0xff]  ;;  %v7691_v39 = vld [vmem:[#allocation6 + $0x50] sm:$0xff] }
 0xdc4   :  { %5463 = vmatpush1.msra.mxu1 %v7671_v58  ;;  %5533 = vmatprep.subr.mxu0 %v7672_v49  ;;  %v7692_v58 = vld [vmem:[#allocation4 + $0x48] sm:$0xff]  ;;  %v7693_v49 = vld [vmem:[#allocation6 + $0x38] sm:$0xff] }
 0xdc5   :  { %5464 = vmatprep.subr.mxu1 %v7673_v18  ;;  %5534 = vmatpush1.msra.mxu0 %v7674_v7  ;;  %v7694_v18 = vld [vmem:[#allocation4 + $0x40] sm:$0xff]  ;;  %v7695_v7 = vld [vmem:[#allocation6 + $0x30] sm:$0xff] }
 0xdc6   :  { %5465 = vmatpush1.msra.mxu1 %v7675_v59  ;;  %5535 = vmatprep.subr.mxu0 %v7676_v16  ;;  %v7696_v59 = vld [vmem:[#allocation4 + $0x28] sm:$0xff]  ;;  %v7697_v16 = vld [vmem:[#allocation6 + $0x18] sm:$0xff] }
 0xdc7   :  { %5466 = vmatprep.subr.mxu1 %v7677_v6  ;;  %5536 = vmatpush1.msra.mxu0 %v7678_v31  ;;  %v7698_v6 = vld [vmem:[#allocation4 + $0x20] sm:$0xff]  ;;  %v7699_v31 = vld [vmem:[#allocation6 + $0x10] sm:$0xff] }
 0xdc8   :  { %5467 = vmatpush1.msra.mxu1 %v7679_v12  ;;  %5537 = vmatprep.subr.mxu0 %v7680_v62  ;;  %v7700_v12 = vld [vmem:[#allocation4 + $0x8] sm:$0xff]  ;;  %v7701_v62 = vld [vmem:[#allocation4 + $0x1f8] sm:$0xff] }
 0xdc9   :  { %5468 = vmatprep.subr.mxu1 %v7681_v35  ;;  %5538 = vmatpush1.msra.mxu0 %v7682_v36  ;;  %v7702_v35 = vld [vmem:[#allocation4 + $0x1f0] sm:$0xff]  ;;  %v7703_v36 = vld [vmem:[#allocation4 + $0x1d8] sm:$0xff] }
 0xdca   :  { %5469 = vmatpush1.msra.mxu1 %v7683_v45  ;;  %5539 = vmatprep.subr.mxu0 %v7684_v55  ;;  %v7704_v45 = vld [vmem:[#allocation4 + $0x1d0] sm:$0xff]  ;;  %v7705_v55 = vld [vmem:[#allocation4 + $0x1b8] sm:$0xff] }
 0xdcb   :  { %5470 = vmatprep.subr.mxu1 %v7685_v29  ;;  %5540 = vmatpush1.msra.mxu0 %v7686_v24  ;;  %v7706_v29 = vld [vmem:[#allocation4 + $0x1b0] sm:$0xff] }
 0xdcc   :  { %5471 = vmatpush1.msra.mxu1 %v7687_v14  ;;  %5541 = vmatprep.subr.mxu0 %v7688_v30  ;;  %v7708_v24 = vld [vmem:[#allocation4 + $0x190] sm:$0xff]  ;;  %v7709_v14 = vld [vmem:[#allocation4 + $0x178] sm:$0xff] }
 0xdcd   :  { %5472 = vmatprep.subr.mxu1 %v7689_v41  ;;  %5542 = vmatpush1.msra.mxu0 %v7690_v50  ;;  %v7711_v30 = vld [vmem:[#allocation4 + $0x158] sm:$0xff]  ;;  %v7712_v41 = vld [vmem:[#allocation4 + $0x150] sm:$0xff] }
 0xdce   :  { %5473 = vmatpush1.msra.mxu1 %v7691_v39  ;;  %5543 = vmatprep.subr.mxu0 %v7692_v58  ;;  %v7713_v50 = vld [vmem:[#allocation4 + $0x138] sm:$0xff]  ;;  %v7714_v39 = vld [vmem:[#allocation4 + $0x130] sm:$0xff] }
 0xdcf   :  { %5474 = vmatprep.subr.mxu1 %v7693_v49  ;;  %5544 = vmatpush1.msra.mxu0 %v7694_v18  ;;  %v7715_v58 = vld [vmem:[#allocation4 + $0x118] sm:$0xff] }
 0xdd0   :  { %5475 = vmatpush1.msra.mxu1 %v7695_v7  ;;  %5545 = vmatprep.subr.mxu0 %v7696_v59 }
 0xdd1   :  { %5476 = vmatprep.subr.mxu1 %v7697_v16  ;;  %5546 = vmatpush1.msra.mxu0 %v7698_v6 }
 0xdd2   :  { %5477 = vmatpush1.msra.mxu1 %v7699_v31  ;;  %5547 = vmatprep.subr.mxu0 %v7700_v12  ;;  %v7717_v12 = vld [vmem:[#allocation6 + $0x3e0] sm:$0xff] }
 0xdd3   :  { %5511 = vmatmul.mubr.f32.vlgmr.msra.gmra.mxu1 %v11896_v57  ;;  %5588 = vmatprep.subr.mxu1 %v7701_v62  ;;  %v7707_v57 = vld [vmem:[#allocation4 + $0x198] sm:$0xff]  ;;  %v7718_v62 = vld [vmem:[#allocation6 + $0x3f0] sm:$0xff] }
 0xdd4   :  { %5589 = vmatpush1.msra.mxu1 %v7702_v35  ;;  %5548 = vmatpush1.msra.mxu0 %v11474_v15  ;;  %v7710_v15 = vld [vmem:[#allocation4 + $0x170] sm:$0xff] }
 0xdd5   :  { %5590 = vmatprep.subr.mxu1 %v7703_v36  ;;  %5581 = vmatprep.mubr.f32.mxu0 %v12890_v60  ;;  %v7719_v36 = vld [vmem:[#allocation6 + $0x3c8] sm:$0xff] }
 0xdd6   :  { %5591 = vmatpush1.msra.mxu1 %v7704_v45  ;;  %5652 = vmatprep.mubr.f32.mxu1 %v12890_v60  ;;  %v7720_v45 = vld [vmem:[#allocation6 + $0x3d8] sm:$0xff] }
 0xdd7   :  { %5592 = vmatprep.subr.mxu1 %v7705_v55  ;;  %5687 = vmatprep.subr.mxu0 %v11482_v2  ;;  %v7716_v2 = vld [vmem:[#allocation4 + $0x110] sm:$0xff]  ;;  %v7721_v55 = vld [vmem:[#allocation6 + $0x3c0] sm:$0xff] }
 0xdd8   :  { %5593 = vmatpush1.msra.mxu1 %v7706_v29  ;;  %v7722_v29 = vld [vmem:[#allocation6 + $0x3d0] sm:$0xff] }
 0xdd9   :  { %5594 = vmatprep.subr.mxu1 %v7707_v57 }
 0xdda   :  { %5595 = vmatpush1.msra.mxu1 %v7708_v24  ;;  %v7723_v24 = vld [vmem:[#allocation6 + $0x3a8] sm:$0xff] }
 0xddb   :  { %5596 = vmatprep.subr.mxu1 %v7709_v14  ;;  %v7724_v14 = vld [vmem:[#allocation6 + $0x3b8] sm:$0xff] }
 0xddc   :  { %5597 = vmatpush1.msra.mxu1 %v7710_v15  ;;  %v7725_v15 = vld [vmem:[#allocation6 + $0x3a0] sm:$0xff] }
 0xddd   :  { %5598 = vmatprep.subr.mxu1 %v7711_v30  ;;  %v7726_v30 = vld [vmem:[#allocation6 + $0x3b0] sm:$0xff] }
 0xdde   :  { %5599 = vmatpush1.msra.mxu1 %v7712_v41 }
 0xddf   :  { %5600 = vmatprep.subr.mxu1 %v7713_v50  ;;  %v7727_v50 = vld [vmem:[#allocation6 + $0x388] sm:$0xff] }
 0xde0   :  { %5601 = vmatpush1.msra.mxu1 %v7714_v39  ;;  %v7728_v39 = vld [vmem:[#allocation6 + $0x398] sm:$0xff] }
 0xde1   :  { %5602 = vmatprep.subr.mxu1 %v7715_v58 }
 0xde2   :  { %5603 = vmatpush1.msra.mxu1 %v7716_v2  ;;  %v7729_v2 = vld [vmem:[#allocation6 + $0x380] sm:$0xff] }
 0xde3   :  { %5604 = vmatprep.subr.mxu1 %v11496_v56  ;;  %v5051_v56 = vpop.f32.mrf.mxu1 }
 0xde4   :  { %5605 = vmatpush1.msra.mxu1 %v11499_v22 }
 0xde5   :  { %5606 = vmatprep.subr.mxu1 %v11502_v61  ;;  %v5053_v22 = vpop.f32.mrf.mxu1 }
 0xde6   :  { %5607 = vmatpush1.msra.mxu1 %v11505_v28 }
 0xde7   :  { %5608 = vmatprep.subr.mxu1 %v11508_v0 }
 0xde8   :  { %5609 = vmatpush1.msra.mxu1 %v11511_v52 }
 0xde9   :  { %5610 = vmatprep.subr.mxu1 %v11514_v32 }
 0xdea   :  { %5611 = vmatpush1.msra.mxu1 %v11517_v8 }
 0xdeb   :  { %5612 = vmatprep.subr.mxu1 %v11520_v5 }
 0xdec   :  { %5613 = vmatpush1.msra.mxu1 %v11523_v11  ;;  %v5122_v11 = vpop.f32.mrf.mxu0 }
 0xded   :  { %5614 = vmatprep.subr.mxu1 %v11526_v3 }
 0xdee   :  { %5615 = vmatpush1.msra.mxu1 %v11529_v43  ;;  %v5124_v43 = vpop.f32.mrf.mxu0 }
 0xdef   :  { %5616 = vmatprep.subr.mxu1 %v11532_v53 }
 0xdf0   :  { %5617 = vmatpush1.msra.mxu1 %v11535_v4 }
 0xdf1   :  { %5618 = vmatprep.subr.mxu1 %v11538_v26 }
 0xdf2   :  { %5619 = vmatpush1.msra.mxu1 %v11541_v34 }
 0xdf3   :  { %5758 = vmatprep.subr.mxu1 %v11544_v37 }
 0xe51   :  { %v5193_v61 = vpop.f32.mrf.mxu1  ;;  %v5264_v53 = vpop.f32.mrf.mxu0 }
 0xe52   :  { %v5194_v28 = vadd.f32 %v5193_v61, %v5051_v56  ;;  %v5265_v37 = vadd.f32 %v5264_v53, %v5122_v11  ;;  %v7730_v56 = vld [vmem:[#allocation6 + $0x390] sm:$0xff]  ;;  %v7731_v61 = vld [vmem:[#allocation6 + $0x368] sm:$0xff]  ;;  %v7736_v11 = vld [vmem:[#allocation6 + $0x358] sm:$0xff] }
 0xe53   :  { %v5195_v0 = vpop.f32.mrf.mxu1  ;;  %v5266_v4 = vpop.f32.mrf.mxu0  ;;  %v7739_v53 = vld [vmem:[#allocation6 + $0x328] sm:$0xff] }
 0xe54   :  { %v5269_v52 = vadd.f32 %v5194_v28, %v8748_v19  ;;  %v5196_v32 = vadd.f32 %v5195_v0, %v5053_v22  ;;  %v5267_v26 = vadd.f32 %v5266_v4, %v5124_v43  ;;  %v5271_v16 = vadd.f32 %v5265_v37, %v8762_v17  ;;  %v7732_v28 = vld [vmem:[#allocation6 + $0x378] sm:$0xff]  ;;  %v14163_v37 = vld [vmem:[#allocation23_spill] sm:$0xff] }
 0xe56   :  { %v6075_v8 = vmul.f32 -1.442695, %v5269_v52  ;;  %v5270_v5 = vadd.f32 %v5196_v32, %v8752_v25  ;;  %v5272_v59 = vadd.f32 %v5267_v26, %v8758_v20  ;;  %v7733_v52 = vld [vmem:[#allocation6 + $0x360] sm:$0xff]  ;;  %v7734_v32 = vld [vmem:[#allocation6 + $0x370] sm:$0xff] }
 0xe57   :  { %v7740_v26 = vld [vmem:[#allocation6 + $0x320] sm:$0xff] }
 0xe58   :  { %6726 = vpow2.f32 %v6075_v8  ;;  %v6076_v3 = vmul.f32 -1.442695, %v5270_v5  ;;  %v6077_v6 = vmul.f32 -1.442695, %v5272_v59  ;;  %v7735_v5 = vld [vmem:[#allocation6 + $0x348] sm:$0xff] }
 0xe59   :  { %v14167_v59 = vld [vmem:[#allocation26_spill] sm:$0xff] }
 0xe5a   :  { %6728 = vpow2.f32 %v6076_v3  ;;  %v7738_v3 = vld [vmem:[#allocation6 + $0x350] sm:$0xff] }
 0xe65   :  { %v6727_v34 = vpop.eup %6726 }
 0xe66   :  { %v5276_v18 = vadd.f32 1.0, %v6727_v34  ;;  %v7741_v34 = vld [vmem:[#allocation6 + $0x308] sm:$0xff] }
 0xe67   :  { %v6729_v49 = vpop.eup %6728 }
 0xe68   :  { %v5282_v7 = vadd.f32 1.0, %v6729_v49  ;;  %v14164_v49 = vld [vmem:[#allocation22_spill] sm:$0xff] }
 0xe6a   :  { %6730 = vrcp.f32 %v5282_v7  ;;  %v14166_v7 = vld [vmem:[#allocation25_spill] sm:$0xff] }
 0xe6b   :  { %6732 = vrcp.f32 %v5276_v18  ;;  %v14165_v18 = vld [vmem:[#allocation24_spill] sm:$0xff] }
 0xe6c   :  { %6734 = vtanh.f32 %v5271_v16 }
 0xe6d   :  { %6736 = vpow2.f32 %v6077_v6  ;;  %v14168_v6 = vld [vmem:[#allocation27_spill] sm:$0xff] }
 0xe72   :  { %v5371_v31 = vpop.f32.mrf.mxu1 }
 0xe73   :  { %5582 = vmatmul.mubr.f32.vlgmr.msra.gmra.mxu0 %v5371_v31  ;;  %5653 = vmatmul.mubr.f32.vlgmr.msra.gmra.mxu1 %v5371_v31  ;;  %v14169_v31 = vld [vmem:[#allocation28_spill] sm:$0xff] }
 0xe74   :  { %5688 = vmatpush1.msra.mxu0 %v7717_v12  ;;  %5759 = vmatpush1.msra.mxu1 %v7718_v62  ;;  %v6504_v35 = vpop.f32.mrf.mxu1  ;;  %v14170_v12 = vld [vmem:[#allocation29_spill] sm:$0xff]  ;;  %v14171_v62 = vld [vmem:[#allocation30_spill] sm:$0xff] }
 0xe75   :  { %5689 = vmatprep.subr.mxu0 %v7719_v36  ;;  %5760 = vmatprep.subr.mxu1 %v7720_v45  ;;  %v14172_v36 = vld [vmem:[#allocation31_spill] sm:$0xff]  ;;  %v14173_v45 = vld [vmem:[#allocation32_spill] sm:$0xff] }
 0xe76   :  { %5690 = vmatpush1.msra.mxu0 %v7721_v55  ;;  %5761 = vmatpush1.msra.mxu1 %v7722_v29  ;;  %v14174_v55 = vld [vmem:[#allocation33_spill] sm:$0xff] }
 0xe77   :  { %v6731_v57 = vpop.eup %6730  ;;  %5691 = vmatprep.subr.mxu0 %v7723_v24  ;;  %5762 = vmatprep.subr.mxu1 %v7724_v14  ;;  %v14176_v24 = vld [vmem:[#allocation35_spill] sm:$0xff]  ;;  %v14177_v14 = vld [vmem:[#allocation36_spill] sm:$0xff] }
 0xe78   :  { %5692 = vmatpush1.msra.mxu0 %v7725_v15  ;;  %5763 = vmatpush1.msra.mxu1 %v7726_v30  ;;  %v6733_v41 = vpop.eup %6732  ;;  %v5292_v58 = vmul.f32 %v6731_v57, %v11574_v27  ;;  %v7737_v27 = vld [vmem:[#allocation6 + $0x340] sm:$0xff]  ;;  %v14175_v57 = vld [vmem:[#allocation34_spill] sm:$0xff] }
 0xe79   :  { %5693 = vmatprep.subr.mxu0 %v7727_v50  ;;  %5764 = vmatprep.subr.mxu1 %v7728_v39  ;;  %v6735_v22 = vpop.eup %6734  ;;  %v14178_v15 = vld [vmem:[#allocation37_spill] sm:$0xff]  ;;  %v14179_v30 = vld [vmem:[#allocation38_spill] sm:$0xff]  ;;  %v14181_v50 = vld [vmem:[#allocation40_spill] sm:$0xff] }
 0xe7a   :  { %5694 = vmatpush1.msra.mxu0 %v7729_v2  ;;  %5765 = vmatpush1.msra.mxu1 %v7730_v56  ;;  %v5293_v0 = vmul.f32 %v6735_v22, %v6733_v41  ;;  %v6737_v8 = vpop.eup %6736  ;;  %v14180_v41 = vld [vmem:[#allocation39_spill] sm:$0xff]  ;;  %v14182_v39 = vld [vmem:[#allocation41_spill] sm:$0xff]  ;;  %v14185_v56 = vld [vmem:[#allocation44_spill] sm:$0xff] }
 0xe7b   :  { %5695 = vmatprep.subr.mxu0 %v7731_v61  ;;  %5766 = vmatprep.subr.mxu1 %v7732_v28  ;;  %v5289_v4 = vadd.f32 1.0, %v6737_v8  ;;  %v14184_v2 = vld [vmem:[#allocation43_spill] sm:$0xff]  ;;  %v14186_v22 = vld [vmem:[#allocation45_spill] sm:$0xff]  ;;  %v14187_v61 = vld [vmem:[#allocation46_spill] sm:$0xff] }
 0xe7c   :  { %5696 = vmatpush1.msra.mxu0 %v7733_v52  ;;  %5767 = vmatpush1.msra.mxu1 %v7734_v32  ;;  %v11949_v43 = vadd.f32 %v5293_v0, %v5292_v58  ;;  %v14183_v58 = vld [vmem:[#allocation42_spill] sm:$0xff]  ;;  %v14188_v28 = vld [vmem:[#allocation47_spill] sm:$0xff]  ;;  %v14189_v0 = vld [vmem:[#allocation48_spill] sm:$0xff] }
 0xe7d   :  { %5697 = vmatprep.subr.mxu0 %v7735_v5  ;;  %5768 = vmatprep.subr.mxu1 %v7736_v11  ;;  %v14190_v52 = vld [vmem:[#allocation49_spill] sm:$0xff]  ;;  %v14191_v32 = vld [vmem:[#allocation50_spill] sm:$0xff]  ;;  %v14192_v8 = vld [vmem:[#allocation51_spill] sm:$0xff] }
 0xe7e   :  { %5698 = vmatpush1.msra.mxu0 %v7737_v27  ;;  %5769 = vmatpush1.msra.mxu1 %v7738_v3  ;;  %6738 = vtanh.f32 %v11949_v43  ;;  %v14193_v5 = vld [vmem:[#allocation52_spill] sm:$0xff]  ;;  %v14194_v11 = vld [vmem:[#allocation53_spill] sm:$0xff]  ;;  %v14195_v27 = vld [vmem:[#allocation54_spill] sm:$0xff] }
 0xe7f   :  { %5699 = vmatprep.subr.mxu0 %v7739_v53  ;;  %5770 = vmatprep.subr.mxu1 %v11577_v38  ;;  %6740 = vrcp.f32 %v5289_v4  ;;  %v14151_v38 = vld [vmem:[#allocation11_spill] sm:$0xff]  ;;  %v14197_v53 = vld [vmem:[#allocation56_spill] sm:$0xff]  ;;  %v14198_v4 = vld [vmem:[#allocation57_spill] sm:$0xff] }
 0xe80   :  { %5700 = vmatpush1.msra.mxu0 %v7740_v26  ;;  %5771 = vmatpush1.msra.mxu1 %v11581_v46  ;;  %v14152_v46 = vld [vmem:[#allocation10_spill] sm:$0xff]  ;;  %v14196_v3 = vld [vmem:[#allocation55_spill] sm:$0xff] }
 0xe81   :  { %5701 = vmatprep.subr.mxu0 %v7741_v34  ;;  %5772 = vmatprep.subr.mxu1 %v11585_v48  ;;  %v14153_v48 = vld [vmem:[#allocation13_spill] sm:$0xff]  ;;  %v14199_v26 = vld [vmem:[#allocation58_spill] sm:$0xff]  ;;  %v14200_v34 = vld [vmem:[#allocation59_spill] sm:$0xff] }
 0xe82   :  { %5702 = vmatpush1.msra.mxu0 %v11588_v10  ;;  %5773 = vmatpush1.msra.mxu1 %v11591_v42  ;;  %v14154_v10 = vld [vmem:[#allocation12_spill] sm:$0xff]  ;;  %v14155_v42 = vld [vmem:[#allocation15_spill] sm:$0xff] }
 0xe83   :  { %5703 = vmatprep.subr.mxu0 %v11595_v63  ;;  %5774 = vmatprep.subr.mxu1 %v11598_v33  ;;  %v14156_v63 = vld [vmem:[#allocation14_spill] sm:$0xff]  ;;  %v14157_v33 = vld [vmem:[#allocation17_spill] sm:$0xff] }
 0xe84   :  { %5704 = vmatpush1.msra.mxu0 %v11601_v21  ;;  %5775 = vmatpush1.msra.mxu1 %v11604_v44  ;;  %v14158_v21 = vld [vmem:[#allocation16_spill] sm:$0xff]  ;;  %v14159_v44 = vld [vmem:[#allocation19_spill] sm:$0xff] }
 0xe85   :  { %5705 = vmatprep.subr.mxu0 %v11607_v23  ;;  %5776 = vmatprep.subr.mxu1 %v11610_v1  ;;  %v14160_v23 = vld [vmem:[#allocation18_spill] sm:$0xff]  ;;  %v14161_v1 = vld [vmem:[#allocation21_spill] sm:$0xff] }
 0xe86   :  { %5706 = vmatpush1.msra.mxu0 %v11613_v40  ;;  %5777 = vmatpush1.msra.mxu1 %v14151_v38  ;;  %v14162_v40 = vld [vmem:[#allocation20_spill] sm:$0xff] }
 0xe87   :  { %5707 = vmatprep.subr.mxu0 %v14152_v46  ;;  %5778 = vmatprep.subr.mxu1 %v14153_v48  ;;  %v14201_v38 = vld [vmem:[#allocation60_spill] sm:$0xff]  ;;  %v14202_v46 = vld [vmem:[#allocation61_spill] sm:$0xff]  ;;  %v14203_v48 = vld [vmem:[#allocation62_spill] sm:$0xff] }
 0xe88   :  { %5708 = vmatpush1.msra.mxu0 %v14154_v10  ;;  %5779 = vmatpush1.msra.mxu1 %v14155_v42  ;;  %v14204_v10 = vld [vmem:[#allocation63_spill] sm:$0xff]  ;;  %v14205_v42 = vld [vmem:[#allocation64_spill] sm:$0xff] }
 0xe89   :  { %5709 = vmatprep.subr.mxu0 %v14156_v63  ;;  %5780 = vmatprep.subr.mxu1 %v14157_v33  ;;  %v14206_v63 = vld [vmem:[#allocation65_spill] sm:$0xff]  ;;  %v14207_v33 = vld [vmem:[#allocation66_spill] sm:$0xff] }
 0xe8a   :  { %5710 = vmatpush1.msra.mxu0 %v14158_v21  ;;  %5781 = vmatpush1.msra.mxu1 %v14159_v44  ;;  %v14208_v21 = vld [vmem:[#allocation67_spill] sm:$0xff]  ;;  %v14209_v44 = vld [vmem:[#allocation68_spill] sm:$0xff] }
 0xe8b   :  { %5711 = vmatprep.subr.mxu0 %v14160_v23  ;;  %5782 = vmatprep.subr.mxu1 %v14161_v1  ;;  %v6739_v16 = vpop.eup %6738  ;;  %v14210_v23 = vld [vmem:[#allocation69_spill] sm:$0xff]  ;;  %v14211_v1 = vld [vmem:[#allocation70_spill] sm:$0xff] }
 0xe8c   :  { %5712 = vmatpush1.msra.mxu0 %v14162_v40  ;;  %5783 = vmatpush1.msra.mxu1 %v14163_v37  ;;  %v6741_v35 = vpop.eup %6740  ;;  %v14212_v40 = vld [vmem:[#allocation71_spill] sm:$0xff]  ;;  %v14213_v37 = vld [vmem:[#allocation72_spill] sm:$0xff] }
 0xe8d   :  { %5713 = vmatprep.subr.mxu0 %v14164_v49  ;;  %5784 = vmatprep.subr.mxu1 %v14165_v18  ;;  %v5296_v29 = vmul.f32 %v6741_v35, %v6739_v16  ;;  %v14214_v49 = vld [vmem:[#allocation73_spill] sm:$0xff]  ;;  %v14215_v18 = vld [vmem:[#allocation74_spill] sm:$0xff] }
 0xe8e   :  { %5714 = vmatpush1.msra.mxu0 %v14166_v7  ;;  %5785 = vmatpush1.msra.mxu1 %v14167_v59  ;;  %v14216_v7 = vld [vmem:[#allocation75_spill] sm:$0xff]  ;;  %v14217_v59 = vld [vmem:[#allocation76_spill] sm:$0xff]  ;;  %v14218_v16 = vld [vmem:[#allocation77_spill] sm:$0xff] }
 0xe8f   :  { %5715 = vmatprep.subr.mxu0 %v14168_v6  ;;  %5786 = vmatprep.subr.mxu1 %v14169_v31  ;;  %v14219_v6 = vld [vmem:[#allocation78_spill] sm:$0xff]  ;;  %v14220_v31 = vld [vmem:[#allocation79_spill] sm:$0xff] }
 0xe90   :  { %5716 = vmatpush1.msra.mxu0 %v14170_v12  ;;  %5787 = vmatpush1.msra.mxu1 %v14171_v62  ;;  %v14221_v12 = vld [vmem:[#allocation80_spill] sm:$0xff]  ;;  %v14222_v62 = vld [vmem:[#allocation81_spill] sm:$0xff]  ;;  %v14223_v35 = vld [vmem:[#allocation82_spill] sm:$0xff] }
 0xe91   :  { %5717 = vmatprep.subr.mxu0 %v14172_v36  ;;  %5788 = vmatprep.subr.mxu1 %v14173_v45  ;;  %v14224_v36 = vld [vmem:[#allocation83_spill] sm:$0xff]  ;;  %v14225_v45 = vld [vmem:[#allocation84_spill] sm:$0xff] }
 0xe92   :  { %5718 = vmatpush1.msra.mxu0 %v14174_v55  ;;  %5751 = vmatprep.mubr.f32.mxu0 %v12890_v60  ;;  %v14226_v55 = vld [vmem:[#allocation85_spill] sm:$0xff] }
 0xe93   :  { %5789 = vmatpush1.msra.mxu1 %v14175_v57  ;;  %5822 = vmatprep.mubr.f32.mxu1 %v12890_v60  ;;  %v14228_v57 = vld [vmem:[#allocation87_spill] sm:$0xff] }
 0xe94   :  { %5752 = vmatmul.mubr.f32.vlgmr.msra.gmra.mxu0 %v5296_v29  ;;  %5823 = vmatmul.mubr.f32.vlgmr.msra.gmra.mxu1 %v5296_v29  ;;  %v14227_v29 = vld [vmem:[#allocation86_spill] sm:$0xff] }
 0xe95   :  { %5829 = vmatprep.subr.mxu0 %v14176_v24  ;;  %5900 = vmatprep.subr.mxu1 %v14177_v14  ;;  %v14229_v24 = vld [vmem:[#allocation88_spill] sm:$0xff]  ;;  %v14230_v14 = vld [vmem:[#allocation89_spill] sm:$0xff] }
 0xe96   :  { %5830 = vmatpush1.msra.mxu0 %v14178_v15  ;;  %5901 = vmatpush1.msra.mxu1 %v14179_v30  ;;  %v14231_v15 = vld [vmem:[#allocation90_spill] sm:$0xff]  ;;  %v14232_v30 = vld [vmem:[#allocation91_spill] sm:$0xff] }
 0xe97   :  { %5831 = vmatprep.subr.mxu0 %v14180_v41  ;;  %5902 = vmatprep.subr.mxu1 %v14181_v50  ;;  %v14233_v41 = vld [vmem:[#allocation92_spill] sm:$0xff]  ;;  %v14234_v50 = vld [vmem:[#allocation93_spill] sm:$0xff] }
 0xe98   :  { %5832 = vmatpush1.msra.mxu0 %v14182_v39  ;;  %5903 = vmatpush1.msra.mxu1 %v14183_v58  ;;  %v14235_v39 = vld [vmem:[#allocation94_spill] sm:$0xff]  ;;  %v14236_v58 = vld [vmem:[#allocation95_spill] sm:$0xff] }
 0xe99   :  { %5833 = vmatprep.subr.mxu0 %v14184_v2  ;;  %5904 = vmatprep.subr.mxu1 %v14185_v56  ;;  %v14237_v2 = vld [vmem:[#allocation96_spill] sm:$0xff]  ;;  %v14238_v56 = vld [vmem:[#allocation97_spill] sm:$0xff] }
 0xe9a   :  { %5834 = vmatpush1.msra.mxu0 %v14186_v22  ;;  %5905 = vmatpush1.msra.mxu1 %v14187_v61  ;;  %v14239_v22 = vld [vmem:[#allocation98_spill] sm:$0xff]  ;;  %v5441_v61 = vpop.f32.mrf.mxu0 }
 0xe9b   :  { %5835 = vmatprep.subr.mxu0 %v14188_v28  ;;  %5906 = vmatprep.subr.mxu1 %v14189_v0  ;;  %v5512_v28 = vpop.f32.mrf.mxu1 }
 0xe9c   :  { %5836 = vmatpush1.msra.mxu0 %v14190_v52  ;;  %5907 = vmatpush1.msra.mxu1 %v14191_v32  ;;  %v5443_v0 = vpop.f32.mrf.mxu0 }
 0xe9d   :  { %5837 = vmatprep.subr.mxu0 %v14192_v8  ;;  %5908 = vmatprep.subr.mxu1 %v14193_v5  ;;  %v5514_v32 = vpop.f32.mrf.mxu1 }
 0xe9e   :  { %5838 = vmatpush1.msra.mxu0 %v14194_v11  ;;  %5909 = vmatpush1.msra.mxu1 %v14195_v27 }
 0xe9f   :  { %5839 = vmatprep.subr.mxu0 %v14196_v3  ;;  %5910 = vmatprep.subr.mxu1 %v14197_v53 }
 0xea0   :  { %5840 = vmatpush1.msra.mxu0 %v14198_v4  ;;  %5911 = vmatpush1.msra.mxu1 %v14199_v26 }
 0xea1   :  { %5841 = vmatprep.subr.mxu0 %v14200_v34  ;;  %5912 = vmatprep.subr.mxu1 %v14201_v38 }
 0xea2   :  { %5842 = vmatpush1.msra.mxu0 %v14202_v46  ;;  %5913 = vmatpush1.msra.mxu1 %v14203_v48 }
 0xea3   :  { %5843 = vmatprep.subr.mxu0 %v14204_v10  ;;  %5914 = vmatprep.subr.mxu1 %v14205_v42 }
 0xea4   :  { %5844 = vmatpush1.msra.mxu0 %v14206_v63  ;;  %5915 = vmatpush1.msra.mxu1 %v14207_v33 }
 0xea5   :  { %5845 = vmatprep.subr.mxu0 %v14208_v21  ;;  %5916 = vmatprep.subr.mxu1 %v14209_v44 }
 0xea6   :  { %5846 = vmatpush1.msra.mxu0 %v14210_v23  ;;  %5917 = vmatpush1.msra.mxu1 %v14211_v1 }
 0xea7   :  { %5847 = vmatprep.subr.mxu0 %v14212_v40  ;;  %5918 = vmatprep.subr.mxu1 %v14213_v37 }
 0xea8   :  { %5848 = vmatpush1.msra.mxu0 %v14214_v49  ;;  %5919 = vmatpush1.msra.mxu1 %v14215_v18 }
 0xea9   :  { %5849 = vmatprep.subr.mxu0 %v14216_v7  ;;  %5920 = vmatprep.subr.mxu1 %v14217_v59 }
 0xeaa   :  { %5850 = vmatpush1.msra.mxu0 %v14218_v16  ;;  %5921 = vmatpush1.msra.mxu1 %v14219_v6 }
 0xeab   :  { %5851 = vmatprep.subr.mxu0 %v14220_v31  ;;  %5922 = vmatprep.subr.mxu1 %v14221_v12 }
 0xeac   :  { %5852 = vmatpush1.msra.mxu0 %v14222_v62  ;;  %5923 = vmatpush1.msra.mxu1 %v14223_v35 }
 0xead   :  { %5853 = vmatprep.subr.mxu0 %v14224_v36  ;;  %5924 = vmatprep.subr.mxu1 %v14225_v45 }
 0xeae   :  { %5854 = vmatpush1.msra.mxu0 %v14226_v55  ;;  %5925 = vmatpush1.msra.mxu1 %v14227_v29 }
 0xeaf   :  { %5855 = vmatprep.subr.mxu0 %v14228_v57  ;;  %5926 = vmatprep.subr.mxu1 %v14229_v24 }
 0xeb0   :  { %5856 = vmatpush1.msra.mxu0 %v14230_v14  ;;  %5927 = vmatpush1.msra.mxu1 %v14231_v15 }
 0xeb1   :  { %5857 = vmatprep.subr.mxu0 %v14232_v30  ;;  %5928 = vmatprep.subr.mxu1 %v14233_v41 }
 0xeb2   :  { %5858 = vmatpush1.msra.mxu0 %v14234_v50  ;;  %5929 = vmatpush1.msra.mxu1 %v14235_v39 }
 0xeb3   :  { %5859 = vmatprep.subr.mxu0 %v14236_v58  ;;  %5930 = vmatprep.subr.mxu1 %v14237_v2 }
 0xeb4   :  { %5860 = vmatpush1.msra.mxu0 %v14238_v56  ;;  %5893 = vmatprep.mubr.f32.mxu0 %v12890_v60 }
 0xeb5   :  { %5931 = vmatpush1.msra.mxu1 %v14239_v22  ;;  %5964 = vmatprep.mubr.f32.mxu1 %v12890_v60 }
 0xf33   :  { %v5583_v52 = vpop.f32.mrf.mxu0  ;;  %v5654_v27 = vpop.f32.mrf.mxu1 }
 0xf34   :  { %v5584_v8 = vadd.f32 %v5583_v52, %v5441_v61  ;;  %v5655_v46 = vadd.f32 %v5654_v27, %v5512_v28 }
 0xf35   :  { %v5585_v5 = vpop.f32.mrf.mxu0  ;;  %v5656_v34 = vpop.f32.mrf.mxu1 }
 0xf36   :  { %v5659_v11 = vadd.f32 %v5584_v8, %v8282_v54  ;;  %v5586_v3 = vadd.f32 %v5585_v5, %v5443_v0  ;;  %v5657_v38 = vadd.f32 %v5656_v34, %v5514_v32  ;;  %v5661_v42 = vadd.f32 %v5655_v46, %v8299_v47 }
 0xf38   :  { %v6081_v53 = vmul.f32 -1.442695, %v5659_v11  ;;  %v5660_v4 = vadd.f32 %v5586_v3, %v8286_v51  ;;  %v5662_v60 = vadd.f32 %v5657_v38, %v13101_v13 }
 0xf3a   :  { %6742 = vpow2.f32 %v6081_v53  ;;  %v6082_v26 = vmul.f32 -1.442695, %v5660_v4  ;;  %v6083_v48 = vmul.f32 -1.442695, %v5662_v60 }
 0xf3c   :  { %6744 = vpow2.f32 %v6082_v26 }
 0xf3d   :  { %6746 = vpow2.f32 %v6083_v48 }
 0xf47   :  { %v6743_v10 = vpop.eup %6742 }
 0xf48   :  { %v5666_v63 = vadd.f32 1.0, %v6743_v10 }
 0xf49   :  { %v6745_v33 = vpop.eup %6744 }
 0xf4a   :  { %6748 = vrcp.f32 %v5666_v63  ;;  %v5672_v54 = vadd.f32 1.0, %v6745_v33  ;;  %v6747_v51 = vpop.eup %6746 }
 0xf4b   :  { %6750 = vtanh.f32 %v5661_v42  ;;  %v5679_v1 = vadd.f32 1.0, %v6747_v51 }
 0xf4c   :  { %6752 = vrcp.f32 %v5672_v54 }
 0xf4d   :  { %6754 = vrcp.f32 %v5679_v1 }
 0xf54   :  { %v5753_v7 = vpop.f32.mrf.mxu0  ;;  %v5824_v59 = vpop.f32.mrf.mxu1 }
 0xf56   :  { %v5755_v16 = vpop.f32.mrf.mxu0  ;;  %v5826_v6 = vpop.f32.mrf.mxu1 }
 0xf57   :  { %v6749_v21 = vpop.eup %6748 }
 0xf58   :  { %v6751_v44 = vpop.eup %6750 }
 0xf59   :  { %v6753_v23 = vpop.eup %6752  ;;  %v5683_v40 = vmul.f32 %v6751_v44, %v6749_v21 }
 0xf5a   :  { %v5682_v13 = vmul.f32 %v6753_v23, %v11893_v9  ;;  %v6755_v47 = vpop.eup %6754 }
 0xf5c   :  { %v5684_v37 = vadd.f32 %v5683_v40, %v5682_v13 }
 0xf5e   :  { %6756 = vtanh.f32 %v5684_v37  ;;  %6000 = vst [vmem:[%s12085_s6] sm:$0xff] %v5684_v37 }
 0xf6b   :  { %v6757_v49 = vpop.eup %6756 }
 0xf6c   :  { %v5686_v18 = vmul.f32 %v6757_v49, %v6755_v47 }
 0xf6e   :  { %5894 = vmatmul.mubr.f32.vlgmr.msra.gmra.mxu0 %v5686_v18  ;;  %5999 = vst [vmem:[%s12084_s5] sm:$0xff] %v5686_v18  ;;  %5965 = vmatmul.mubr.f32.vlgmr.msra.gmra.mxu1 %v5686_v18 }
0x102e   :  { %v5895_v9 = vpop.f32.mrf.mxu0  ;;  %v5966_v35 = vpop.f32.mrf.mxu1 }
0x102f   :  { %v5896_v31 = vadd.f32 %v5895_v9, %v5753_v7  ;;  %v5967_v15 = vadd.f32 %v5966_v35, %v5824_v59 }
0x1030   :  { %v5897_v12 = vpop.f32.mrf.mxu0  ;;  %v5968_v57 = vpop.f32.mrf.mxu1 }
0x1031   :  { %v5971_v62 = vadd.f32 %v5896_v31, %v8748_v19  ;;  %v5898_v36 = vadd.f32 %v5897_v12, %v5755_v16  ;;  %v5969_v24 = vadd.f32 %v5968_v57, %v5826_v6  ;;  %v5973_v50 = vadd.f32 %v5967_v15, %v8762_v17 }
0x1033   :  { %v6084_v45 = vmul.f32 -1.442695, %v5971_v62  ;;  %v5972_v55 = vadd.f32 %v5898_v36, %v8752_v25  ;;  %v5974_v14 = vadd.f32 %v5969_v24, %v8758_v20 }
0x1035   :  { %6758 = vpow2.f32 %v6084_v45  ;;  %v6085_v29 = vmul.f32 -1.442695, %v5972_v55  ;;  %v6086_v30 = vmul.f32 -1.442695, %v5974_v14 }
0x1037   :  { %6760 = vpow2.f32 %v6085_v29 }
0x1038   :  { %6762 = vpow2.f32 %v6086_v30 }
0x1042   :  { %v6759_v41 = vpop.eup %6758 }
0x1043   :  { %v5978_v39 = vadd.f32 1.0, %v6759_v41 }
0x1044   :  { %v6761_v58 = vpop.eup %6760 }
0x1045   :  { %6764 = vrcp.f32 %v5978_v39  ;;  %v5984_v19 = vadd.f32 1.0, %v6761_v58  ;;  %v6763_v25 = vpop.eup %6762 }
0x1046   :  { %6766 = vtanh.f32 %v5973_v50  ;;  %v5991_v61 = vadd.f32 1.0, %v6763_v25 }
0x1047   :  { %6768 = vrcp.f32 %v5984_v19 }
0x1048   :  { %6770 = vrcp.f32 %v5991_v61 }
0x1052   :  { %v6765_v2 = vpop.eup %6764 }
0x1053   :  { %v6767_v56 = vpop.eup %6766 }
0x1054   :  { %v6769_v22 = vpop.eup %6768  ;;  %v5995_v28 = vmul.f32 %v6767_v56, %v6765_v2 }
0x1055   :  { %v5994_v20 = vmul.f32 %v6769_v22, %v11949_v43  ;;  %v6771_v17 = vpop.eup %6770 }
0x1057   :  { %v5996_v0 = vadd.f32 %v5995_v28, %v5994_v20 }
0x1059   :  { %6772 = vtanh.f32 %v5996_v0  ;;  %6088 = vst [vmem:[%s12085_s6 + $0x8] sm:$0xff] %v5996_v0 }
0x1066   :  { %v6773_v52 = vpop.eup %6772 }
0x1067   :  { %v5998_v32 = vmul.f32 %v6773_v52, %v6771_v17 }
0x1069   :  { %6087 = vst [vmem:[%s12084_s5 + $0x8] sm:$0xff] %v5998_v32 }
0x106a   :  { %6013 = vsyncpa [#allocation3], 1 }
0x106b   :  { %6014 = vsyncpa [#allocation5], 1 }

</bundles_post_ra>
